<compile_context>
chip_gen: v7x
topology: tpu7x:2x2x1
jax: 0.10.0
libtpu: 0.0.40
codegen_flags: <defaults>
</compile_context>

<pallas_src>
import jax
import jax.numpy as jnp
from jax import lax
from jax.experimental import pallas as pl
from jax.experimental.pallas import tpu as pltpu


def _lstm_gate_combine(g, h_prev, c_prev, valid):
    """One LSTM cell update with packed-sequence masking.

    g: (R, 4H) pre-activation gates in PyTorch (i, f, g, o) order.
    Two full-width EUP passes (sigmoid + tanh over all 4H lanes); the per-gate slices
    afterwards are cheap VPU/XLU work off the EUP/MXU critical path.
    """
    H = h_prev.shape[-1]
    s = jax.nn.sigmoid(g)                         # i, f, -, o
    t = jnp.tanh(g)                               # -, -, g, -
    c_new = s[:, H:2 * H] * c_prev + s[:, 0:H] * t[:, 2 * H:3 * H]
    h_new = s[:, 3 * H:4 * H] * jnp.tanh(c_new)
    h = jnp.where(valid, h_new, h_prev)           # freeze state past the sequence length
    c = jnp.where(valid, c_new, c_prev)
    return h, c


def make_recurrence_kernel(fuse_proj):
    def kernel(xenc_ref, menc2_ref, xdec_ref, mdec_ref,
               enc_wih0_ref, enc_b0_ref, enc_whh0_ref,
               enc_wih1f_ref, enc_wih1b_ref, enc_b1_ref, enc_whh1_ref,
               wh0_ref, bh0_ref,
               dec_wih0_ref, dec_b0_ref, dec_wih1_ref, dec_b1_ref, dec_whh_ref,
               *rest):
        if fuse_proj:
            (wout_ref, bout_ref, o_ref,
             xg0_buf, xg1_buf, e0f_buf, e0b_buf, ydec_buf) = rest
        else:
            (o_ref, xg0_buf, xg1_buf, e0f_buf, e0b_buf) = rest
            ydec_buf = o_ref                       # write decoder outputs straight to HBM block

        Lx, Bp, H = xenc_ref.shape
        Ly = xdec_ref.shape[0]
        G = 4 * H
        f32, bf16 = jnp.float32, jnp.bfloat16
        zeros_bh = jnp.zeros((Bp, H), f32)
        zeros_2bh = jnp.zeros((2 * Bp, H), f32)

        # ---------- Encoder layer 0: one fused input-gate matmul for both directions ----------
        g0 = (jnp.dot(xenc_ref[...].reshape(Lx * Bp, H).astype(bf16), enc_wih0_ref[...],
                      preferred_element_type=f32) + enc_b0_ref[...])          # (Lx*Bp, 8H)
        xg0_buf[...] = g0.reshape(Lx, Bp, 2 * G).astype(bf16)                 # bf16 staging

        # Fused fwd/bwd time loop: state rows [0:Bp] = forward (time i), rows [Bp:2Bp] =
        # backward (time Lx-1-i).  ONE row-stacked recurrent matmul per step.
        whh0 = enc_whh0_ref[...]                                              # (H, 8H) bf16

        def e0_step(i, carry):
            h, c = carry                                                      # (2Bp, H) f32
            rec = jnp.dot(h.astype(bf16), whh0, preferred_element_type=f32)   # (2Bp, 8H)
            rec_sel = jnp.concatenate([rec[0:Bp, 0:G], rec[Bp:2 * Bp, G:2 * G]], axis=0)
            gf = xg0_buf[i]                                                   # fwd gates @ t=i
            gb = xg0_buf[Lx - 1 - i]                                          # bwd gates @ t=Lx-1-i
            g_in = jnp.concatenate([gf[:, 0:G], gb[:, G:2 * G]], axis=0).astype(f32)
            valid = menc2_ref[i] > 0.5                                        # (2Bp, 1)
            h, c = _lstm_gate_combine(g_in + rec_sel, h, c, valid)
            e0f_buf[i] = h[0:Bp]
            e0b_buf[Lx - 1 - i] = h[Bp:2 * Bp]
            return h, c

        h_e0, _ = lax.fori_loop(0, Lx, e0_step, (zeros_2bh, zeros_2bh), unroll=True)

        # ---------- Encoder layer 1 (forward only; reverse hidden is discarded by Seq2Seq) ----------
        # Two matmuls summed instead of a lane-concat of the two direction outputs.
        g1 = (jnp.dot(e0f_buf[...].reshape(Lx * Bp, H).astype(bf16), enc_wih1f_ref[...],
                      preferred_element_type=f32)
              + jnp.dot(e0b_buf[...].reshape(Lx * Bp, H).astype(bf16), enc_wih1b_ref[...],
                        preferred_element_type=f32)
              + enc_b1_ref[...])
        xg1_buf[0:Lx] = g1.reshape(Lx, Bp, G).astype(bf16)

        whh1 = enc_whh1_ref[...]

        def e1_step(i, carry):
            h, c = carry
            rec = jnp.dot(h.astype(bf16), whh1, preferred_element_type=f32)
            valid = menc2_ref[i][0:Bp] > 0.5
            return _lstm_gate_combine(xg1_buf[i].astype(f32) + rec, h, c, valid)

        h_e1, _ = lax.fori_loop(0, Lx, e1_step, (zeros_bh, zeros_bh), unroll=True)

        # ---------- h0_proj: decoder initial hiddens from the two forward final hiddens ----------
        h_cat = jnp.concatenate([h_e0[0:Bp], h_e1], axis=0)                   # (2Bp, H)
        h_d = (jnp.dot(h_cat.astype(bf16), wh0_ref[...], preferred_element_type=f32)
               + bh0_ref[...])                                                # rows 0:Bp = layer0
        c_d = zeros_2bh

        # ---------- Decoder: layer-0 input gates precomputed, layers 0+1 fused per step ----------
        gd0 = (jnp.dot(xdec_ref[...].reshape(Ly * Bp, H).astype(bf16), dec_wih0_ref[...],
                       preferred_element_type=f32) + dec_b0_ref[...])
        xg1_buf[0:Ly] = gd0.reshape(Ly, Bp, G).astype(bf16)                   # reuse gate scratch

        dwhh = dec_whh_ref[...]                                               # (H, 8H) = [Whh0|Whh1]
        dwih1 = dec_wih1_ref[...]                                             # (H, 4H)
        db1 = jnp.broadcast_to(dec_b1_ref[...], (Bp, G))                      # hoisted broadcast

        def d_step(t, carry):
            h, c = carry                                                      # (2Bp, H)
            rec = jnp.dot(h.astype(bf16), dwhh, preferred_element_type=f32)   # (2Bp, 8H)
            valid = mdec_ref[t] > 0.5                                         # (Bp, 1)
            # layer 0
            g0d = xg1_buf[t].astype(f32) + rec[0:Bp, 0:G]
            h0n, c0n = _lstm_gate_combine(g0d, h[0:Bp], c[0:Bp], valid)
            # layer 1 consumes the fresh layer-0 hidden (direct fusion)
            g1d = (jnp.dot(h0n.astype(bf16), dwih1, preferred_element_type=f32)
                   + db1 + rec[Bp:2 * Bp, G:2 * G])
            h1n, c1n = _lstm_gate_combine(g1d, h[Bp:2 * Bp], c[Bp:2 * Bp], valid)
            # pad_packed_sequence(padding_value = pad_token = 0)
            ydec_buf[t] = jnp.where(valid, h1n, 0.0).astype(ydec_buf.dtype)
            return (jnp.concatenate([h0n, h1n], axis=0),
                    jnp.concatenate([c0n, c1n], axis=0))

        lax.fori_loop(0, Ly, d_step, (h_d, c_d), unroll=True)

        if fuse_proj:
            # ---------- Fused out_proj epilogue: lane-dense (Ly*Bp, Vp) logits ----------
            yd = ydec_buf[...].reshape(Ly * Bp, H).astype(bf16)
            o_ref[...] = (jnp.dot(yd, wout_ref[...], preferred_element_type=f32)
                          + bout_ref[...])

    return kernel


def outproj_kernel(y_ref, w_ref, b_ref, o_ref):
    # lane-dense (rows, V-tile) output block; bf16 MXU inputs, f32 accumulation
    o_ref[...] = (jnp.dot(y_ref[...].astype(jnp.bfloat16), w_ref[...],
                          preferred_element_type=jnp.float32) + b_ref[...])


def init_params(key, desc_vocab_size, abs_vocab_size, hidden_dim, num_layers=2):
    assert num_layers == 2  # as exercised by Seq2Seq(numLayers=2) here
    H = hidden_dim
    G = 4 * H
    Vx, Vy = desc_vocab_size, abs_vocab_size
    s = 0.1
    ks = iter(jax.random.split(key, 32))

    def rnd(shape):
        return jax.random.normal(next(ks), shape, jnp.float32) * s

    bf16 = jnp.bfloat16
    enc_emb = rnd((Vx, H)).at[0].set(0.0)                        # padding_idx = 0
    dec_emb = rnd((Vy, H)).at[0].set(0.0)

    def lstm_layer(in_dim):
        return (rnd((G, in_dim)), rnd((G, H)), rnd((G,)), rnd((G,)))

    e0f = lstm_layer(H)          # encoder layer 0 forward
    e0b = lstm_layer(H)          # encoder layer 0 reverse
    e1f = lstm_layer(2 * H)      # encoder layer 1 forward (input = concat of directions)
    # encoder layer-1 reverse weights exist in nn.LSTM but are unused by Seq2Seq.forward
    d0 = lstm_layer(H)           # decoder layer 0
    d1 = lstm_layer(H)           # decoder layer 1

    w_h0, b_h0 = rnd((H, H)), rnd((H,))
    w_out, b_out = rnd((Vy, H)), rnd((Vy,))

    Vp = ((Vy + 127) // 128) * 128
    w_out_t = jnp.zeros((H, Vp), jnp.float32).at[:, :Vy].set(w_out.T).astype(bf16)
    b_out_p = jnp.zeros((1, Vp), jnp.float32).at[:, :Vy].set(b_out[None, :])

    return {
        'enc_embedding': enc_emb,
        'dec_embedding': dec_emb,
        # fused / transposed, MXU-friendly: bf16 weights, f32 combined biases
        'enc_wih0_cat': jnp.concatenate([e0f[0].T, e0b[0].T], axis=1).astype(bf16),   # (H, 8H)
        'enc_b0_cat': jnp.concatenate([e0f[2] + e0f[3], e0b[2] + e0b[3]])[None, :],   # (1, 8H)
        'enc_whh0_cat': jnp.concatenate([e0f[1].T, e0b[1].T], axis=1).astype(bf16),   # (H, 8H)
        'enc_wih1_f': e1f[0][:, :H].T.astype(bf16),                                   # (H, 4H)
        'enc_wih1_b': e1f[0][:, H:].T.astype(bf16),                                   # (H, 4H)
        'enc_b1': (e1f[2] + e1f[3])[None, :],                                         # (1, 4H)
        'enc_whh1': e1f[1].T.astype(bf16),                                            # (H, 4H)
        'wh0': w_h0.T.astype(bf16),                                                   # (H, H)
        'bh0': b_h0[None, :],                                                         # (1, H)
        'dec_wih0': d0[0].T.astype(bf16),                                             # (H, 4H)
        'dec_b0': (d0[2] + d0[3])[None, :],                                           # (1, 4H)
        'dec_wih1': d1[0].T.astype(bf16),                                             # (H, 4H)
        'dec_b1': (d1[2] + d1[3])[None, :],                                           # (1, 4H)
        'dec_whh_cat': jnp.concatenate([d0[1].T, d1[1].T], axis=1).astype(bf16),      # (H, 8H)
        'w_out_t': w_out_t,                                                           # (H, Vp)
        'b_out': b_out_p,                                                             # (1, Vp)
    }


def seq2seq_forward(x, y, params):
    """Equivalent of Seq2Seq.forward(x, y, use_teacher_forcing=True) -> (B, absVocab, Ly)."""
    B, Lx = x.shape
    _, Ly = y.shape
    H = params['enc_embedding'].shape[1]
    G = 4 * H
    Vabs = params['dec_embedding'].shape[0]
    Vp = params['w_out_t'].shape[1]
    Bp = ((B + 7) // 8) * 8                                       # sublane-align batch
    Lmax = max(Lx, Ly)

    xp = jnp.pad(x, ((0, Bp - B), (0, 0)))                        # padded rows are all pad_token
    yp = jnp.pad(y, ((0, Bp - B), (0, 0)))

    # XLA glue: embedding gathers + relu, pack_padded length masks, time-major relayout.
    xemb = jnp.maximum(jnp.take(params['enc_embedding'], xp, axis=0), 0.0)    # (Bp, Lx, H)
    yemb = jnp.maximum(jnp.take(params['dec_embedding'], yp, axis=0), 0.0)    # (Bp, Ly, H)
    lens_x = jnp.sum((xp != 0).astype(jnp.int32), axis=1)
    lens_y = jnp.sum((yp != 0).astype(jnp.int32), axis=1)
    menc = (jnp.arange(Lx)[:, None] < lens_x[None, :]).astype(jnp.float32)    # (Lx, Bp)
    mdec = (jnp.arange(Ly)[:, None] < lens_y[None, :]).astype(jnp.float32)[:, :, None]
    # forward mask | time-flipped backward mask, matching the row-stacked fwd/bwd state
    menc2 = jnp.concatenate([menc, menc[::-1]], axis=1)[:, :, None]           # (Lx, 2Bp, 1)
    xenc_tm = jnp.transpose(xemb, (1, 0, 2))                                  # (Lx, Bp, H)
    xdec_tm = jnp.transpose(yemb, (1, 0, 2))                                  # (Ly, Bp, H)

    # Fuse the vocab projection into the recurrence kernel when its VMEM footprint is small;
    # otherwise keep it as a separate "parallel" kernel (uses both TCs on v7x).
    fuse_proj = (Ly * Bp * Vp * 4 + H * Vp * 2) <= (4 << 20)

    inputs = (xenc_tm, menc2, xdec_tm, mdec,
              params['enc_wih0_cat'], params['enc_b0_cat'], params['enc_whh0_cat'],
              params['enc_wih1_f'], params['enc_wih1_b'], params['enc_b1'], params['enc_whh1'],
              params['wh0'], params['bh0'],
              params['dec_wih0'], params['dec_b0'], params['dec_wih1'], params['dec_b1'],
              params['dec_whh_cat'])
    if fuse_proj:
        inputs = inputs + (params['w_out_t'], params['b_out'])

    def fullspec(a):
        nd = a.ndim
        return pl.BlockSpec(a.shape, lambda i, _nd=nd: (0,) * _nd)

    scratch = [
        pltpu.VMEM((Lx, Bp, 2 * G), jnp.bfloat16),    # enc layer-0 input gates [fwd | bwd]
        pltpu.VMEM((Lmax, Bp, G), jnp.bfloat16),      # enc layer-1 / dec layer-0 input gates
        pltpu.VMEM((Lx, Bp, H), jnp.float32),         # enc layer-0 fwd per-step outputs
        pltpu.VMEM((Lx, Bp, H), jnp.float32),         # enc layer-0 bwd per-step outputs
    ]
    if fuse_proj:
        scratch = scratch + [pltpu.VMEM((Ly, Bp, H), jnp.float32)]   # dec layer-1 outputs
        out_shape = jax.ShapeDtypeStruct((Ly * Bp, Vp), jnp.float32)
        out_spec = pl.BlockSpec((Ly * Bp, Vp), lambda i: (0, 0))
    else:
        out_shape = jax.ShapeDtypeStruct((Ly, Bp, H), jnp.float32)
        out_spec = pl.BlockSpec((Ly, Bp, H), lambda i: (0, 0, 0))

    res = pl.pallas_call(
        make_recurrence_kernel(fuse_proj),
        out_shape=out_shape,
        grid_spec=pltpu.PrefetchScalarGridSpec(
            num_scalar_prefetch=0,
            grid=(1,),
            in_specs=[fullspec(a) for a in inputs],
            out_specs=out_spec,
            scratch_shapes=scratch),
        compiler_params=pltpu.CompilerParams(
            dimension_semantics=("arbitrary",),
            vmem_limit_bytes=32 * 1024 * 1024),
    )(*inputs)

    if fuse_proj:
        logits_tm = res.reshape(Ly, Bp, Vp)
    else:
        # Separate tiled projection: V-tile outer, M-tile inner so the weight tile is reused.
        M = Ly * Bp
        TM = 256
        Mp = ((M + TM - 1) // TM) * TM
        TV = 512 if Vp % 512 == 0 else (256 if Vp % 256 == 0 else 128)
        y_flat = jnp.pad(res.reshape(M, H), ((0, Mp - M), (0, 0)))
        logits_flat = pl.pallas_call(
            outproj_kernel,
            out_shape=jax.ShapeDtypeStruct((Mp, Vp), jnp.float32),
            grid_spec=pltpu.PrefetchScalarGridSpec(
                num_scalar_prefetch=0,
                grid=(Vp // TV, Mp // TM),
                in_specs=[pl.BlockSpec((TM, H), lambda j, i: (i, 0)),
                          pl.BlockSpec((H, TV), lambda j, i: (0, j)),
                          pl.BlockSpec((1, TV), lambda j, i: (0, j))],
                out_specs=pl.BlockSpec((TM, TV), lambda j, i: (i, j))),
            compiler_params=pltpu.CompilerParams(
                dimension_semantics=("parallel", "parallel")),
        )(y_flat, params['w_out_t'], params['b_out'])
        logits_tm = logits_flat[:M].reshape(Ly, Bp, Vp)

    # TODO(synk): pad_packed_sequence truncates time to max(lens_y); here T == Ly because
    # at least one target row is full length. General support would slice to max(lens_y).
    return jnp.transpose(logits_tm[:, :B, :Vabs], (1, 2, 0))     # == y.permute(0, 2, 1)


if __name__ == "__main__":
    key = jax.random.PRNGKey(0)
    descV, absV, H = 60, 50, 32
    B, Lx, Ly = 2, 10, 8

    params = init_params(key, descV, absV, H)

    # pads only at the end; at least one full-length target so pad_packed T == Ly
    x = jnp.array([[5, 3, 9, 2, 7, 1, 4, 6, 11, 12],
                   [8, 2, 3, 4, 9, 0, 0, 0, 0, 0]], dtype=jnp.int32)
    y = jnp.array([[5, 3, 9, 2, 7, 1, 4, 6],
                   [8, 2, 3, 0, 0, 0, 0, 0]], dtype=jnp.int32)

    logits = jax.jit(seq2seq_forward)(x, y, params)
    jax.block_until_ready(logits)
    assert logits.shape == (B, absV, Ly)
    assert bool(jnp.all(jnp.isfinite(logits)))
    # packed-sequence semantics check: past a target's length the decoder output is
    # zero-padded, so the logits there must equal exactly the out_proj bias.
    bias = params['b_out'][0, :absV]
    assert bool(jnp.allclose(logits[1, :, 3:], bias[:, None], atol=1e-5))
    print("KERNEL_OK")
</pallas_src>

<mosaic_0001>
module attributes {stable_mosaic.version = 11 : i64} {
  func.func @kernel(%arg0: i32, %arg1: memref<10x8x32xf32, #tpu.memory_space<vmem>>, %arg2: memref<10x16x1xf32, #tpu.memory_space<vmem>>, %arg3: memref<8x8x32xf32, #tpu.memory_space<vmem>>, %arg4: memref<8x8x1xf32, #tpu.memory_space<vmem>>, %arg5: memref<32x256xbf16, #tpu.memory_space<vmem>>, %arg6: memref<1x256xf32, #tpu.memory_space<vmem>>, %arg7: memref<32x256xbf16, #tpu.memory_space<vmem>>, %arg8: memref<32x128xbf16, #tpu.memory_space<vmem>>, %arg9: memref<32x128xbf16, #tpu.memory_space<vmem>>, %arg10: memref<1x128xf32, #tpu.memory_space<vmem>>, %arg11: memref<32x128xbf16, #tpu.memory_space<vmem>>, %arg12: memref<32x32xbf16, #tpu.memory_space<vmem>>, %arg13: memref<1x32xf32, #tpu.memory_space<vmem>>, %arg14: memref<32x128xbf16, #tpu.memory_space<vmem>>, %arg15: memref<1x128xf32, #tpu.memory_space<vmem>>, %arg16: memref<32x128xbf16, #tpu.memory_space<vmem>>, %arg17: memref<1x128xf32, #tpu.memory_space<vmem>>, %arg18: memref<32x256xbf16, #tpu.memory_space<vmem>>, %arg19: memref<32x128xbf16, #tpu.memory_space<vmem>>, %arg20: memref<1x128xf32, #tpu.memory_space<vmem>>, %arg21: memref<64x128xf32, #tpu.memory_space<vmem>>, %arg22: memref<10x8x256xbf16, #tpu.memory_space<vmem>>, %arg23: memref<10x8x128xbf16, #tpu.memory_space<vmem>>, %arg24: memref<10x8x32xf32, #tpu.memory_space<vmem>>, %arg25: memref<10x8x32xf32, #tpu.memory_space<vmem>>, %arg26: memref<8x8x32xf32, #tpu.memory_space<vmem>>) attributes {dimension_semantics = [#tpu.dimension_semantics<arbitrary>], iteration_bounds = array<i64: 1>, scalar_prefetch = 0 : i64, scratch_operands = 5 : i64, tpu.core_type = #tpu.core_type<tc>, window_params = [{pipeline_mode = #tpu.pipeline_mode<synchronous>, transform_indices = @transform_0, window_bounds = array<i64: 10, 8, 32>}, {pipeline_mode = #tpu.pipeline_mode<synchronous>, transform_indices = @transform_1, window_bounds = array<i64: 10, 16, 1>}, {pipeline_mode = #tpu.pipeline_mode<synchronous>, transform_indices = @transform_2, window_bounds = array<i64: 8, 8, 32>}, {pipeline_mode = #tpu.pipeline_mode<synchronous>, transform_indices = @transform_3, window_bounds = array<i64: 8, 8, 1>}, {pipeline_mode = #tpu.pipeline_mode<synchronous>, transform_indices = @transform_4, window_bounds = array<i64: 32, 256>}, {pipeline_mode = #tpu.pipeline_mode<synchronous>, transform_indices = @transform_5, window_bounds = array<i64: 1, 256>}, {pipeline_mode = #tpu.pipeline_mode<synchronous>, transform_indices = @transform_6, window_bounds = array<i64: 32, 256>}, {pipeline_mode = #tpu.pipeline_mode<synchronous>, transform_indices = @transform_7, window_bounds = array<i64: 32, 128>}, {pipeline_mode = #tpu.pipeline_mode<synchronous>, transform_indices = @transform_8, window_bounds = array<i64: 32, 128>}, {pipeline_mode = #tpu.pipeline_mode<synchronous>, transform_indices = @transform_9, window_bounds = array<i64: 1, 128>}, {pipeline_mode = #tpu.pipeline_mode<synchronous>, transform_indices = @transform_10, window_bounds = array<i64: 32, 128>}, {pipeline_mode = #tpu.pipeline_mode<synchronous>, transform_indices = @transform_11, window_bounds = array<i64: 32, 32>}, {pipeline_mode = #tpu.pipeline_mode<synchronous>, transform_indices = @transform_12, window_bounds = array<i64: 1, 32>}, {pipeline_mode = #tpu.pipeline_mode<synchronous>, transform_indices = @transform_13, window_bounds = array<i64: 32, 128>}, {pipeline_mode = #tpu.pipeline_mode<synchronous>, transform_indices = @transform_14, window_bounds = array<i64: 1, 128>}, {pipeline_mode = #tpu.pipeline_mode<synchronous>, transform_indices = @transform_15, window_bounds = array<i64: 32, 128>}, {pipeline_mode = #tpu.pipeline_mode<synchronous>, transform_indices = @transform_16, window_bounds = array<i64: 1, 128>}, {pipeline_mode = #tpu.pipeline_mode<synchronous>, transform_indices = @transform_17, window_bounds = array<i64: 32, 256>}, {pipeline_mode = #tpu.pipeline_mode<synchronous>, transform_indices = @transform_18, window_bounds = array<i64: 32, 128>}, {pipeline_mode = #tpu.pipeline_mode<synchronous>, transform_indices = @transform_19, window_bounds = array<i64: 1, 128>}, {pipeline_mode = #tpu.pipeline_mode<synchronous>, transform_indices = @transform_20, window_bounds = array<i64: 64, 128>}]} {
    %cst = arith.constant 0.000000e+00 : f32
    %0 = vector.broadcast %cst : f32 to vector<8x32xf32>
    %cst_0 = arith.constant 0.000000e+00 : f32
    %1 = vector.broadcast %cst_0 : f32 to vector<16x32xf32>
    %c0 = arith.constant 0 : index
    %c0_1 = arith.constant 0 : index
    %c0_2 = arith.constant 0 : index
    %2 = vector.load %arg1[%c0, %c0_1, %c0_2] : memref<10x8x32xf32, #tpu.memory_space<vmem>>, vector<10x8x32xf32>
    %3 = vector.shape_cast %2 : vector<10x8x32xf32> to vector<80x32xf32>
    %4 = arith.truncf %3 : vector<80x32xf32> to vector<80x32xbf16>
    %c0_3 = arith.constant 0 : index
    %c0_4 = arith.constant 0 : index
    %5 = vector.load %arg5[%c0_3, %c0_4] : memref<32x256xbf16, #tpu.memory_space<vmem>>, vector<32x256xbf16>
    %cst_5 = arith.constant dense<0.000000e+00> : vector<80x256xf32>
    %6 = tpu.matmul %4, %5, %cst_5 {dimension_numbers = #tpu.dot_dimension_numbers<[1], [0], [0], [1], [0, 0, 1, 1], [], []>} : vector<80x32xbf16>, vector<32x256xbf16>, vector<80x256xf32> -> vector<80x256xf32>
    %c0_6 = arith.constant 0 : index
    %c0_7 = arith.constant 0 : index
    %7 = vector.load %arg6[%c0_6, %c0_7] : memref<1x256xf32, #tpu.memory_space<vmem>>, vector<1x256xf32>
    %8 = vector.broadcast %7 : vector<1x256xf32> to vector<80x256xf32>
    %9 = arith.addf %6, %8 : vector<80x256xf32>
    %10 = vector.shape_cast %9 : vector<80x256xf32> to vector<10x8x256xf32>
    %11 = arith.truncf %10 : vector<10x8x256xf32> to vector<10x8x256xbf16>
    %c0_8 = arith.constant 0 : index
    %c0_9 = arith.constant 0 : index
    %c0_10 = arith.constant 0 : index
    %12 = vector.load %arg22[%c0_8, %c0_9, %c0_10] : memref<10x8x256xbf16, #tpu.memory_space<vmem>>, vector<10x8x256xbf16>
    tpu.vector_store %arg22[%c0_8, %c0_9, %c0_10], %11 {strides = array<i32>} : memref<10x8x256xbf16, #tpu.memory_space<vmem>>, vector<10x8x256xbf16>,
    %c0_11 = arith.constant 0 : index
    %c0_12 = arith.constant 0 : index
    %13 = vector.load %arg7[%c0_11, %c0_12] : memref<32x256xbf16, #tpu.memory_space<vmem>>, vector<32x256xbf16>
    %c0_i32 = arith.constant 0 : i32
    %14 = arith.truncf %1 : vector<16x32xf32> to vector<16x32xbf16>
    %cst_13 = arith.constant dense<0.000000e+00> : vector<16x256xf32>
    %15 = tpu.matmul %14, %13, %cst_13 {dimension_numbers = #tpu.dot_dimension_numbers<[1], [0], [0], [1], [0, 0, 1, 1], [], []>} : vector<16x32xbf16>, vector<32x256xbf16>, vector<16x256xf32> -> vector<16x256xf32>
    %16 = vector.extract_strided_slice %15 {offsets = [0, 0], sizes = [8, 128], strides = [1, 1]} : vector<16x256xf32> to vector<8x128xf32>
    %17 = vector.extract_strided_slice %15 {offsets = [8, 128], sizes = [8, 128], strides = [1, 1]} : vector<16x256xf32> to vector<8x128xf32>
    %18 = tpu.concatenate %16, %17 in 0 : vector<8x128xf32>, vector<8x128xf32> -> vector<16x128xf32>
    %19 = arith.index_cast %c0_i32 : i32 to index
    %c0_14 = arith.constant 0 : index
    %c0_15 = arith.constant 0 : index
    %20 = vector.load %arg22[%19, %c0_14, %c0_15] : memref<10x8x256xbf16, #tpu.memory_space<vmem>>, vector<1x8x256xbf16>
    %21 = vector.shape_cast %20 : vector<1x8x256xbf16> to vector<8x256xbf16>
    %c9_i32 = arith.constant 9 : i32
    %22 = arith.subi %c9_i32, %c0_i32 : i32
    %23 = arith.index_cast %22 : i32 to index
    %c0_16 = arith.constant 0 : index
    %c0_17 = arith.constant 0 : index
    %24 = vector.load %arg22[%23, %c0_16, %c0_17] : memref<10x8x256xbf16, #tpu.memory_space<vmem>>, vector<1x8x256xbf16>
    %25 = vector.shape_cast %24 : vector<1x8x256xbf16> to vector<8x256xbf16>
    %26 = vector.extract_strided_slice %21 {offsets = [0, 0], sizes = [8, 128], strides = [1, 1]} : vector<8x256xbf16> to vector<8x128xbf16>
    %27 = vector.extract_strided_slice %25 {offsets = [0, 128], sizes = [8, 128], strides = [1, 1]} : vector<8x256xbf16> to vector<8x128xbf16>
    %28 = tpu.concatenate %26, %27 in 0 : vector<8x128xbf16>, vector<8x128xbf16> -> vector<16x128xbf16>
    %29 = arith.extf %28 : vector<16x128xbf16> to vector<16x128xf32>
    %30 = arith.index_cast %c0_i32 : i32 to index
    %c0_18 = arith.constant 0 : index
    %c0_19 = arith.constant 0 : index
    %31 = vector.load %arg2[%30, %c0_18, %c0_19] : memref<10x16x1xf32, #tpu.memory_space<vmem>>, vector<1x16x1xf32>
    %32 = vector.shape_cast %31 : vector<1x16x1xf32> to vector<16x1xf32>
    %cst_20 = arith.constant 5.000000e-01 : f32
    %33 = vector.broadcast %cst_20 : f32 to vector<16x1xf32>
    %34 = arith.cmpf ogt, %32, %33 : vector<16x1xf32>
    %35 = arith.addf %29, %18 : vector<16x128xf32>
    %36 = arith.negf %35 : vector<16x128xf32>
    %37 = math.exp %36 : vector<16x128xf32>
    %cst_21 = arith.constant 1.000000e+00 : f32
    %38 = vector.broadcast %cst_21 : f32 to vector<16x128xf32>
    %39 = arith.addf %38, %37 : vector<16x128xf32>
    %40 = arith.divf %38, %39 : vector<16x128xf32>
    %41 = math.tanh %35 : vector<16x128xf32>
    %42 = vector.extract_strided_slice %40 {offsets = [0, 32], sizes = [16, 32], strides = [1, 1]} : vector<16x128xf32> to vector<16x32xf32>
    %43 = arith.mulf %42, %1 : vector<16x32xf32>
    %44 = vector.extract_strided_slice %40 {offsets = [0, 0], sizes = [16, 32], strides = [1, 1]} : vector<16x128xf32> to vector<16x32xf32>
    %45 = vector.extract_strided_slice %41 {offsets = [0, 64], sizes = [16, 32], strides = [1, 1]} : vector<16x128xf32> to vector<16x32xf32>
    %46 = arith.mulf %44, %45 : vector<16x32xf32>
    %47 = arith.addf %43, %46 : vector<16x32xf32>
    %48 = vector.extract_strided_slice %40 {offsets = [0, 96], sizes = [16, 32], strides = [1, 1]} : vector<16x128xf32> to vector<16x32xf32>
    %49 = math.tanh %47 : vector<16x32xf32>
    %50 = arith.mulf %48, %49 : vector<16x32xf32>
    %51 = vector.shape_cast %34 : vector<16x1xi1> to vector<16x1xi1>
    %52 = vector.broadcast %51 : vector<16x1xi1> to vector<16x32xi1>
    %53 = arith.select %52, %50, %1 : vector<16x32xi1>, vector<16x32xf32>
    %54 = vector.shape_cast %34 : vector<16x1xi1> to vector<16x1xi1>
    %55 = vector.broadcast %54 : vector<16x1xi1> to vector<16x32xi1>
    %56 = arith.select %55, %47, %1 : vector<16x32xi1>, vector<16x32xf32>
    %57 = vector.extract_strided_slice %53 {offsets = [0, 0], sizes = [8, 32], strides = [1, 1]} : vector<16x32xf32> to vector<8x32xf32>
    %58 = arith.index_cast %c0_i32 : i32 to index
    %c0_22 = arith.constant 0 : index
    %c0_23 = arith.constant 0 : index
    %59 = vector.load %arg24[%58, %c0_22, %c0_23] : memref<10x8x32xf32, #tpu.memory_space<vmem>>, vector<1x8x32xf32>
    %60 = vector.shape_cast %59 : vector<1x8x32xf32> to vector<8x32xf32>
    %61 = vector.shape_cast %57 : vector<8x32xf32> to vector<1x8x32xf32>
    tpu.vector_store %arg24[%58, %c0_22, %c0_23], %61 {strides = array<i32>} : memref<10x8x32xf32, #tpu.memory_space<vmem>>, vector<1x8x32xf32>,
    %62 = vector.extract_strided_slice %53 {offsets = [8, 0], sizes = [8, 32], strides = [1, 1]} : vector<16x32xf32> to vector<8x32xf32>
    %c9_i32_24 = arith.constant 9 : i32
    %63 = arith.subi %c9_i32_24, %c0_i32 : i32
    %64 = arith.index_cast %63 : i32 to index
    %c0_25 = arith.constant 0 : index
    %c0_26 = arith.constant 0 : index
    %65 = vector.load %arg25[%64, %c0_25, %c0_26] : memref<10x8x32xf32, #tpu.memory_space<vmem>>, vector<1x8x32xf32>
    %66 = vector.shape_cast %65 : vector<1x8x32xf32> to vector<8x32xf32>
    %67 = vector.shape_cast %62 : vector<8x32xf32> to vector<1x8x32xf32>
    tpu.vector_store %arg25[%64, %c0_25, %c0_26], %67 {strides = array<i32>} : memref<10x8x32xf32, #tpu.memory_space<vmem>>, vector<1x8x32xf32>,
    %c1_i32 = arith.constant 1 : i32
    %68 = arith.truncf %53 : vector<16x32xf32> to vector<16x32xbf16>
    %cst_27 = arith.constant dense<0.000000e+00> : vector<16x256xf32>
    %69 = tpu.matmul %68, %13, %cst_27 {dimension_numbers = #tpu.dot_dimension_numbers<[1], [0], [0], [1], [0, 0, 1, 1], [], []>} : vector<16x32xbf16>, vector<32x256xbf16>, vector<16x256xf32> -> vector<16x256xf32>
    %70 = vector.extract_strided_slice %69 {offsets = [0, 0], sizes = [8, 128], strides = [1, 1]} : vector<16x256xf32> to vector<8x128xf32>
    %71 = vector.extract_strided_slice %69 {offsets = [8, 128], sizes = [8, 128], strides = [1, 1]} : vector<16x256xf32> to vector<8x128xf32>
    %72 = tpu.concatenate %70, %71 in 0 : vector<8x128xf32>, vector<8x128xf32> -> vector<16x128xf32>
    %73 = arith.index_cast %c1_i32 : i32 to index
    %c0_28 = arith.constant 0 : index
    %c0_29 = arith.constant 0 : index
    %74 = vector.load %arg22[%73, %c0_28, %c0_29] : memref<10x8x256xbf16, #tpu.memory_space<vmem>>, vector<1x8x256xbf16>
    %75 = vector.shape_cast %74 : vector<1x8x256xbf16> to vector<8x256xbf16>
    %c9_i32_30 = arith.constant 9 : i32
    %76 = arith.subi %c9_i32_30, %c1_i32 : i32
    %77 = arith.index_cast %76 : i32 to index
    %c0_31 = arith.constant 0 : index
    %c0_32 = arith.constant 0 : index
    %78 = vector.load %arg22[%77, %c0_31, %c0_32] : memref<10x8x256xbf16, #tpu.memory_space<vmem>>, vector<1x8x256xbf16>
    %79 = vector.shape_cast %78 : vector<1x8x256xbf16> to vector<8x256xbf16>
    %80 = vector.extract_strided_slice %75 {offsets = [0, 0], sizes = [8, 128], strides = [1, 1]} : vector<8x256xbf16> to vector<8x128xbf16>
    %81 = vector.extract_strided_slice %79 {offsets = [0, 128], sizes = [8, 128], strides = [1, 1]} : vector<8x256xbf16> to vector<8x128xbf16>
    %82 = tpu.concatenate %80, %81 in 0 : vector<8x128xbf16>, vector<8x128xbf16> -> vector<16x128xbf16>
    %83 = arith.extf %82 : vector<16x128xbf16> to vector<16x128xf32>
    %84 = arith.index_cast %c1_i32 : i32 to index
    %c0_33 = arith.constant 0 : index
    %c0_34 = arith.constant 0 : index
    %85 = vector.load %arg2[%84, %c0_33, %c0_34] : memref<10x16x1xf32, #tpu.memory_space<vmem>>, vector<1x16x1xf32>
    %86 = vector.shape_cast %85 : vector<1x16x1xf32> to vector<16x1xf32>
    %cst_35 = arith.constant 5.000000e-01 : f32
    %87 = vector.broadcast %cst_35 : f32 to vector<16x1xf32>
    %88 = arith.cmpf ogt, %86, %87 : vector<16x1xf32>
    %89 = arith.addf %83, %72 : vector<16x128xf32>
    %90 = arith.negf %89 : vector<16x128xf32>
    %91 = math.exp %90 : vector<16x128xf32>
    %cst_36 = arith.constant 1.000000e+00 : f32
    %92 = vector.broadcast %cst_36 : f32 to vector<16x128xf32>
    %93 = arith.addf %92, %91 : vector<16x128xf32>
    %94 = arith.divf %92, %93 : vector<16x128xf32>
    %95 = math.tanh %89 : vector<16x128xf32>
    %96 = vector.extract_strided_slice %94 {offsets = [0, 32], sizes = [16, 32], strides = [1, 1]} : vector<16x128xf32> to vector<16x32xf32>
    %97 = arith.mulf %96, %56 : vector<16x32xf32>
    %98 = vector.extract_strided_slice %94 {offsets = [0, 0], sizes = [16, 32], strides = [1, 1]} : vector<16x128xf32> to vector<16x32xf32>
    %99 = vector.extract_strided_slice %95 {offsets = [0, 64], sizes = [16, 32], strides = [1, 1]} : vector<16x128xf32> to vector<16x32xf32>
    %100 = arith.mulf %98, %99 : vector<16x32xf32>
    %101 = arith.addf %97, %100 : vector<16x32xf32>
    %102 = vector.extract_strided_slice %94 {offsets = [0, 96], sizes = [16, 32], strides = [1, 1]} : vector<16x128xf32> to vector<16x32xf32>
    %103 = math.tanh %101 : vector<16x32xf32>
    %104 = arith.mulf %102, %103 : vector<16x32xf32>
    %105 = vector.shape_cast %88 : vector<16x1xi1> to vector<16x1xi1>
    %106 = vector.broadcast %105 : vector<16x1xi1> to vector<16x32xi1>
    %107 = arith.select %106, %104, %53 : vector<16x32xi1>, vector<16x32xf32>
    %108 = vector.shape_cast %88 : vector<16x1xi1> to vector<16x1xi1>
    %109 = vector.broadcast %108 : vector<16x1xi1> to vector<16x32xi1>
    %110 = arith.select %109, %101, %56 : vector<16x32xi1>, vector<16x32xf32>
    %111 = vector.extract_strided_slice %107 {offsets = [0, 0], sizes = [8, 32], strides = [1, 1]} : vector<16x32xf32> to vector<8x32xf32>
    %112 = arith.index_cast %c1_i32 : i32 to index
    %c0_37 = arith.constant 0 : index
    %c0_38 = arith.constant 0 : index
    %113 = vector.load %arg24[%112, %c0_37, %c0_38] : memref<10x8x32xf32, #tpu.memory_space<vmem>>, vector<1x8x32xf32>
    %114 = vector.shape_cast %113 : vector<1x8x32xf32> to vector<8x32xf32>
    %115 = vector.shape_cast %111 : vector<8x32xf32> to vector<1x8x32xf32>
    tpu.vector_store %arg24[%112, %c0_37, %c0_38], %115 {strides = array<i32>} : memref<10x8x32xf32, #tpu.memory_space<vmem>>, vector<1x8x32xf32>,
    %116 = vector.extract_strided_slice %107 {offsets = [8, 0], sizes = [8, 32], strides = [1, 1]} : vector<16x32xf32> to vector<8x32xf32>
    %c9_i32_39 = arith.constant 9 : i32
    %117 = arith.subi %c9_i32_39, %c1_i32 : i32
    %118 = arith.index_cast %117 : i32 to index
    %c0_40 = arith.constant 0 : index
    %c0_41 = arith.constant 0 : index
    %119 = vector.load %arg25[%118, %c0_40, %c0_41] : memref<10x8x32xf32, #tpu.memory_space<vmem>>, vector<1x8x32xf32>
    %120 = vector.shape_cast %119 : vector<1x8x32xf32> to vector<8x32xf32>
    %121 = vector.shape_cast %116 : vector<8x32xf32> to vector<1x8x32xf32>
    tpu.vector_store %arg25[%118, %c0_40, %c0_41], %121 {strides = array<i32>} : memref<10x8x32xf32, #tpu.memory_space<vmem>>, vector<1x8x32xf32>,
    %c2_i32 = arith.constant 2 : i32
    %122 = arith.truncf %107 : vector<16x32xf32> to vector<16x32xbf16>
    %cst_42 = arith.constant dense<0.000000e+00> : vector<16x256xf32>
    %123 = tpu.matmul %122, %13, %cst_42 {dimension_numbers = #tpu.dot_dimension_numbers<[1], [0], [0], [1], [0, 0, 1, 1], [], []>} : vector<16x32xbf16>, vector<32x256xbf16>, vector<16x256xf32> -> vector<16x256xf32>
    %124 = vector.extract_strided_slice %123 {offsets = [0, 0], sizes = [8, 128], strides = [1, 1]} : vector<16x256xf32> to vector<8x128xf32>
    %125 = vector.extract_strided_slice %123 {offsets = [8, 128], sizes = [8, 128], strides = [1, 1]} : vector<16x256xf32> to vector<8x128xf32>
    %126 = tpu.concatenate %124, %125 in 0 : vector<8x128xf32>, vector<8x128xf32> -> vector<16x128xf32>
    %127 = arith.index_cast %c2_i32 : i32 to index
    %c0_43 = arith.constant 0 : index
    %c0_44 = arith.constant 0 : index
    %128 = vector.load %arg22[%127, %c0_43, %c0_44] : memref<10x8x256xbf16, #tpu.memory_space<vmem>>, vector<1x8x256xbf16>
    %129 = vector.shape_cast %128 : vector<1x8x256xbf16> to vector<8x256xbf16>
    %c9_i32_45 = arith.constant 9 : i32
    %130 = arith.subi %c9_i32_45, %c2_i32 : i32
    %131 = arith.index_cast %130 : i32 to index
    %c0_46 = arith.constant 0 : index
    %c0_47 = arith.constant 0 : index
    %132 = vector.load %arg22[%131, %c0_46, %c0_47] : memref<10x8x256xbf16, #tpu.memory_space<vmem>>, vector<1x8x256xbf16>
    %133 = vector.shape_cast %132 : vector<1x8x256xbf16> to vector<8x256xbf16>
    %134 = vector.extract_strided_slice %129 {offsets = [0, 0], sizes = [8, 128], strides = [1, 1]} : vector<8x256xbf16> to vector<8x128xbf16>
    %135 = vector.extract_strided_slice %133 {offsets = [0, 128], sizes = [8, 128], strides = [1, 1]} : vector<8x256xbf16> to vector<8x128xbf16>
    %136 = tpu.concatenate %134, %135 in 0 : vector<8x128xbf16>, vector<8x128xbf16> -> vector<16x128xbf16>
    %137 = arith.extf %136 : vector<16x128xbf16> to vector<16x128xf32>
    %138 = arith.index_cast %c2_i32 : i32 to index
    %c0_48 = arith.constant 0 : index
    %c0_49 = arith.constant 0 : index
    %139 = vector.load %arg2[%138, %c0_48, %c0_49] : memref<10x16x1xf32, #tpu.memory_space<vmem>>, vector<1x16x1xf32>
    %140 = vector.shape_cast %139 : vector<1x16x1xf32> to vector<16x1xf32>
    %cst_50 = arith.constant 5.000000e-01 : f32
    %141 = vector.broadcast %cst_50 : f32 to vector<16x1xf32>
    %142 = arith.cmpf ogt, %140, %141 : vector<16x1xf32>
    %143 = arith.addf %137, %126 : vector<16x128xf32>
    %144 = arith.negf %143 : vector<16x128xf32>
    %145 = math.exp %144 : vector<16x128xf32>
    %cst_51 = arith.constant 1.000000e+00 : f32
    %146 = vector.broadcast %cst_51 : f32 to vector<16x128xf32>
    %147 = arith.addf %146, %145 : vector<16x128xf32>
    %148 = arith.divf %146, %147 : vector<16x128xf32>
    %149 = math.tanh %143 : vector<16x128xf32>
    %150 = vector.extract_strided_slice %148 {offsets = [0, 32], sizes = [16, 32], strides = [1, 1]} : vector<16x128xf32> to vector<16x32xf32>
    %151 = arith.mulf %150, %110 : vector<16x32xf32>
    %152 = vector.extract_strided_slice %148 {offsets = [0, 0], sizes = [16, 32], strides = [1, 1]} : vector<16x128xf32> to vector<16x32xf32>
    %153 = vector.extract_strided_slice %149 {offsets = [0, 64], sizes = [16, 32], strides = [1, 1]} : vector<16x128xf32> to vector<16x32xf32>
    %154 = arith.mulf %152, %153 : vector<16x32xf32>
    %155 = arith.addf %151, %154 : vector<16x32xf32>
    %156 = vector.extract_strided_slice %148 {offsets = [0, 96], sizes = [16, 32], strides = [1, 1]} : vector<16x128xf32> to vector<16x32xf32>
    %157 = math.tanh %155 : vector<16x32xf32>
    %158 = arith.mulf %156, %157 : vector<16x32xf32>
    %159 = vector.shape_cast %142 : vector<16x1xi1> to vector<16x1xi1>
    %160 = vector.broadcast %159 : vector<16x1xi1> to vector<16x32xi1>
    %161 = arith.select %160, %158, %107 : vector<16x32xi1>, vector<16x32xf32>
    %162 = vector.shape_cast %142 : vector<16x1xi1> to vector<16x1xi1>
    %163 = vector.broadcast %162 : vector<16x1xi1> to vector<16x32xi1>
    %164 = arith.select %163, %155, %110 : vector<16x32xi1>, vector<16x32xf32>
    %165 = vector.extract_strided_slice %161 {offsets = [0, 0], sizes = [8, 32], strides = [1, 1]} : vector<16x32xf32> to vector<8x32xf32>
    %166 = arith.index_cast %c2_i32 : i32 to index
    %c0_52 = arith.constant 0 : index
    %c0_53 = arith.constant 0 : index
    %167 = vector.load %arg24[%166, %c0_52, %c0_53] : memref<10x8x32xf32, #tpu.memory_space<vmem>>, vector<1x8x32xf32>
    %168 = vector.shape_cast %167 : vector<1x8x32xf32> to vector<8x32xf32>
    %169 = vector.shape_cast %165 : vector<8x32xf32> to vector<1x8x32xf32>
    tpu.vector_store %arg24[%166, %c0_52, %c0_53], %169 {strides = array<i32>} : memref<10x8x32xf32, #tpu.memory_space<vmem>>, vector<1x8x32xf32>,
    %170 = vector.extract_strided_slice %161 {offsets = [8, 0], sizes = [8, 32], strides = [1, 1]} : vector<16x32xf32> to vector<8x32xf32>
    %c9_i32_54 = arith.constant 9 : i32
    %171 = arith.subi %c9_i32_54, %c2_i32 : i32
    %172 = arith.index_cast %171 : i32 to index
    %c0_55 = arith.constant 0 : index
    %c0_56 = arith.constant 0 : index
    %173 = vector.load %arg25[%172, %c0_55, %c0_56] : memref<10x8x32xf32, #tpu.memory_space<vmem>>, vector<1x8x32xf32>
    %174 = vector.shape_cast %173 : vector<1x8x32xf32> to vector<8x32xf32>
    %175 = vector.shape_cast %170 : vector<8x32xf32> to vector<1x8x32xf32>
    tpu.vector_store %arg25[%172, %c0_55, %c0_56], %175 {strides = array<i32>} : memref<10x8x32xf32, #tpu.memory_space<vmem>>, vector<1x8x32xf32>,
    %c3_i32 = arith.constant 3 : i32
    %176 = arith.truncf %161 : vector<16x32xf32> to vector<16x32xbf16>
    %cst_57 = arith.constant dense<0.000000e+00> : vector<16x256xf32>
    %177 = tpu.matmul %176, %13, %cst_57 {dimension_numbers = #tpu.dot_dimension_numbers<[1], [0], [0], [1], [0, 0, 1, 1], [], []>} : vector<16x32xbf16>, vector<32x256xbf16>, vector<16x256xf32> -> vector<16x256xf32>
    %178 = vector.extract_strided_slice %177 {offsets = [0, 0], sizes = [8, 128], strides = [1, 1]} : vector<16x256xf32> to vector<8x128xf32>
    %179 = vector.extract_strided_slice %177 {offsets = [8, 128], sizes = [8, 128], strides = [1, 1]} : vector<16x256xf32> to vector<8x128xf32>
    %180 = tpu.concatenate %178, %179 in 0 : vector<8x128xf32>, vector<8x128xf32> -> vector<16x128xf32>
    %181 = arith.index_cast %c3_i32 : i32 to index
    %c0_58 = arith.constant 0 : index
    %c0_59 = arith.constant 0 : index
    %182 = vector.load %arg22[%181, %c0_58, %c0_59] : memref<10x8x256xbf16, #tpu.memory_space<vmem>>, vector<1x8x256xbf16>
    %183 = vector.shape_cast %182 : vector<1x8x256xbf16> to vector<8x256xbf16>
    %c9_i32_60 = arith.constant 9 : i32
    %184 = arith.subi %c9_i32_60, %c3_i32 : i32
    %185 = arith.index_cast %184 : i32 to index
    %c0_61 = arith.constant 0 : index
    %c0_62 = arith.constant 0 : index
    %186 = vector.load %arg22[%185, %c0_61, %c0_62] : memref<10x8x256xbf16, #tpu.memory_space<vmem>>, vector<1x8x256xbf16>
    %187 = vector.shape_cast %186 : vector<1x8x256xbf16> to vector<8x256xbf16>
    %188 = vector.extract_strided_slice %183 {offsets = [0, 0], sizes = [8, 128], strides = [1, 1]} : vector<8x256xbf16> to vector<8x128xbf16>
    %189 = vector.extract_strided_slice %187 {offsets = [0, 128], sizes = [8, 128], strides = [1, 1]} : vector<8x256xbf16> to vector<8x128xbf16>
    %190 = tpu.concatenate %188, %189 in 0 : vector<8x128xbf16>, vector<8x128xbf16> -> vector<16x128xbf16>
    %191 = arith.extf %190 : vector<16x128xbf16> to vector<16x128xf32>
    %192 = arith.index_cast %c3_i32 : i32 to index
    %c0_63 = arith.constant 0 : index
    %c0_64 = arith.constant 0 : index
    %193 = vector.load %arg2[%192, %c0_63, %c0_64] : memref<10x16x1xf32, #tpu.memory_space<vmem>>, vector<1x16x1xf32>
    %194 = vector.shape_cast %193 : vector<1x16x1xf32> to vector<16x1xf32>
    %cst_65 = arith.constant 5.000000e-01 : f32
    %195 = vector.broadcast %cst_65 : f32 to vector<16x1xf32>
    %196 = arith.cmpf ogt, %194, %195 : vector<16x1xf32>
    %197 = arith.addf %191, %180 : vector<16x128xf32>
    %198 = arith.negf %197 : vector<16x128xf32>
    %199 = math.exp %198 : vector<16x128xf32>
    %cst_66 = arith.constant 1.000000e+00 : f32
    %200 = vector.broadcast %cst_66 : f32 to vector<16x128xf32>
    %201 = arith.addf %200, %199 : vector<16x128xf32>
    %202 = arith.divf %200, %201 : vector<16x128xf32>
    %203 = math.tanh %197 : vector<16x128xf32>
    %204 = vector.extract_strided_slice %202 {offsets = [0, 32], sizes = [16, 32], strides = [1, 1]} : vector<16x128xf32> to vector<16x32xf32>
    %205 = arith.mulf %204, %164 : vector<16x32xf32>
    %206 = vector.extract_strided_slice %202 {offsets = [0, 0], sizes = [16, 32], strides = [1, 1]} : vector<16x128xf32> to vector<16x32xf32>
    %207 = vector.extract_strided_slice %203 {offsets = [0, 64], sizes = [16, 32], strides = [1, 1]} : vector<16x128xf32> to vector<16x32xf32>
    %208 = arith.mulf %206, %207 : vector<16x32xf32>
    %209 = arith.addf %205, %208 : vector<16x32xf32>
    %210 = vector.extract_strided_slice %202 {offsets = [0, 96], sizes = [16, 32], strides = [1, 1]} : vector<16x128xf32> to vector<16x32xf32>
    %211 = math.tanh %209 : vector<16x32xf32>
    %212 = arith.mulf %210, %211 : vector<16x32xf32>
    %213 = vector.shape_cast %196 : vector<16x1xi1> to vector<16x1xi1>
    %214 = vector.broadcast %213 : vector<16x1xi1> to vector<16x32xi1>
    %215 = arith.select %214, %212, %161 : vector<16x32xi1>, vector<16x32xf32>
    %216 = vector.shape_cast %196 : vector<16x1xi1> to vector<16x1xi1>
    %217 = vector.broadcast %216 : vector<16x1xi1> to vector<16x32xi1>
    %218 = arith.select %217, %209, %164 : vector<16x32xi1>, vector<16x32xf32>
    %219 = vector.extract_strided_slice %215 {offsets = [0, 0], sizes = [8, 32], strides = [1, 1]} : vector<16x32xf32> to vector<8x32xf32>
    %220 = arith.index_cast %c3_i32 : i32 to index
    %c0_67 = arith.constant 0 : index
    %c0_68 = arith.constant 0 : index
    %221 = vector.load %arg24[%220, %c0_67, %c0_68] : memref<10x8x32xf32, #tpu.memory_space<vmem>>, vector<1x8x32xf32>
    %222 = vector.shape_cast %221 : vector<1x8x32xf32> to vector<8x32xf32>
    %223 = vector.shape_cast %219 : vector<8x32xf32> to vector<1x8x32xf32>
    tpu.vector_store %arg24[%220, %c0_67, %c0_68], %223 {strides = array<i32>} : memref<10x8x32xf32, #tpu.memory_space<vmem>>, vector<1x8x32xf32>,
    %224 = vector.extract_strided_slice %215 {offsets = [8, 0], sizes = [8, 32], strides = [1, 1]} : vector<16x32xf32> to vector<8x32xf32>
    %c9_i32_69 = arith.constant 9 : i32
    %225 = arith.subi %c9_i32_69, %c3_i32 : i32
    %226 = arith.index_cast %225 : i32 to index
    %c0_70 = arith.constant 0 : index
    %c0_71 = arith.constant 0 : index
    %227 = vector.load %arg25[%226, %c0_70, %c0_71] : memref<10x8x32xf32, #tpu.memory_space<vmem>>, vector<1x8x32xf32>
    %228 = vector.shape_cast %227 : vector<1x8x32xf32> to vector<8x32xf32>
    %229 = vector.shape_cast %224 : vector<8x32xf32> to vector<1x8x32xf32>
    tpu.vector_store %arg25[%226, %c0_70, %c0_71], %229 {strides = array<i32>} : memref<10x8x32xf32, #tpu.memory_space<vmem>>, vector<1x8x32xf32>,
    %c4_i32 = arith.constant 4 : i32
    %230 = arith.truncf %215 : vector<16x32xf32> to vector<16x32xbf16>
    %cst_72 = arith.constant dense<0.000000e+00> : vector<16x256xf32>
    %231 = tpu.matmul %230, %13, %cst_72 {dimension_numbers = #tpu.dot_dimension_numbers<[1], [0], [0], [1], [0, 0, 1, 1], [], []>} : vector<16x32xbf16>, vector<32x256xbf16>, vector<16x256xf32> -> vector<16x256xf32>
    %232 = vector.extract_strided_slice %231 {offsets = [0, 0], sizes = [8, 128], strides = [1, 1]} : vector<16x256xf32> to vector<8x128xf32>
    %233 = vector.extract_strided_slice %231 {offsets = [8, 128], sizes = [8, 128], strides = [1, 1]} : vector<16x256xf32> to vector<8x128xf32>
    %234 = tpu.concatenate %232, %233 in 0 : vector<8x128xf32>, vector<8x128xf32> -> vector<16x128xf32>
    %235 = arith.index_cast %c4_i32 : i32 to index
    %c0_73 = arith.constant 0 : index
    %c0_74 = arith.constant 0 : index
    %236 = vector.load %arg22[%235, %c0_73, %c0_74] : memref<10x8x256xbf16, #tpu.memory_space<vmem>>, vector<1x8x256xbf16>
    %237 = vector.shape_cast %236 : vector<1x8x256xbf16> to vector<8x256xbf16>
    %c9_i32_75 = arith.constant 9 : i32
    %238 = arith.subi %c9_i32_75, %c4_i32 : i32
    %239 = arith.index_cast %238 : i32 to index
    %c0_76 = arith.constant 0 : index
    %c0_77 = arith.constant 0 : index
    %240 = vector.load %arg22[%239, %c0_76, %c0_77] : memref<10x8x256xbf16, #tpu.memory_space<vmem>>, vector<1x8x256xbf16>
    %241 = vector.shape_cast %240 : vector<1x8x256xbf16> to vector<8x256xbf16>
    %242 = vector.extract_strided_slice %237 {offsets = [0, 0], sizes = [8, 128], strides = [1, 1]} : vector<8x256xbf16> to vector<8x128xbf16>
    %243 = vector.extract_strided_slice %241 {offsets = [0, 128], sizes = [8, 128], strides = [1, 1]} : vector<8x256xbf16> to vector<8x128xbf16>
    %244 = tpu.concatenate %242, %243 in 0 : vector<8x128xbf16>, vector<8x128xbf16> -> vector<16x128xbf16>
    %245 = arith.extf %244 : vector<16x128xbf16> to vector<16x128xf32>
    %246 = arith.index_cast %c4_i32 : i32 to index
    %c0_78 = arith.constant 0 : index
    %c0_79 = arith.constant 0 : index
    %247 = vector.load %arg2[%246, %c0_78, %c0_79] : memref<10x16x1xf32, #tpu.memory_space<vmem>>, vector<1x16x1xf32>
    %248 = vector.shape_cast %247 : vector<1x16x1xf32> to vector<16x1xf32>
    %cst_80 = arith.constant 5.000000e-01 : f32
    %249 = vector.broadcast %cst_80 : f32 to vector<16x1xf32>
    %250 = arith.cmpf ogt, %248, %249 : vector<16x1xf32>
    %251 = arith.addf %245, %234 : vector<16x128xf32>
    %252 = arith.negf %251 : vector<16x128xf32>
    %253 = math.exp %252 : vector<16x128xf32>
    %cst_81 = arith.constant 1.000000e+00 : f32
    %254 = vector.broadcast %cst_81 : f32 to vector<16x128xf32>
    %255 = arith.addf %254, %253 : vector<16x128xf32>
    %256 = arith.divf %254, %255 : vector<16x128xf32>
    %257 = math.tanh %251 : vector<16x128xf32>
    %258 = vector.extract_strided_slice %256 {offsets = [0, 32], sizes = [16, 32], strides = [1, 1]} : vector<16x128xf32> to vector<16x32xf32>
    %259 = arith.mulf %258, %218 : vector<16x32xf32>
    %260 = vector.extract_strided_slice %256 {offsets = [0, 0], sizes = [16, 32], strides = [1, 1]} : vector<16x128xf32> to vector<16x32xf32>
    %261 = vector.extract_strided_slice %257 {offsets = [0, 64], sizes = [16, 32], strides = [1, 1]} : vector<16x128xf32> to vector<16x32xf32>
    %262 = arith.mulf %260, %261 : vector<16x32xf32>
    %263 = arith.addf %259, %262 : vector<16x32xf32>
    %264 = vector.extract_strided_slice %256 {offsets = [0, 96], sizes = [16, 32], strides = [1, 1]} : vector<16x128xf32> to vector<16x32xf32>
    %265 = math.tanh %263 : vector<16x32xf32>
    %266 = arith.mulf %264, %265 : vector<16x32xf32>
    %267 = vector.shape_cast %250 : vector<16x1xi1> to vector<16x1xi1>
    %268 = vector.broadcast %267 : vector<16x1xi1> to vector<16x32xi1>
    %269 = arith.select %268, %266, %215 : vector<16x32xi1>, vector<16x32xf32>
    %270 = vector.shape_cast %250 : vector<16x1xi1> to vector<16x1xi1>
    %271 = vector.broadcast %270 : vector<16x1xi1> to vector<16x32xi1>
    %272 = arith.select %271, %263, %218 : vector<16x32xi1>, vector<16x32xf32>
    %273 = vector.extract_strided_slice %269 {offsets = [0, 0], sizes = [8, 32], strides = [1, 1]} : vector<16x32xf32> to vector<8x32xf32>
    %274 = arith.index_cast %c4_i32 : i32 to index
    %c0_82 = arith.constant 0 : index
    %c0_83 = arith.constant 0 : index
    %275 = vector.load %arg24[%274, %c0_82, %c0_83] : memref<10x8x32xf32, #tpu.memory_space<vmem>>, vector<1x8x32xf32>
    %276 = vector.shape_cast %275 : vector<1x8x32xf32> to vector<8x32xf32>
    %277 = vector.shape_cast %273 : vector<8x32xf32> to vector<1x8x32xf32>
    tpu.vector_store %arg24[%274, %c0_82, %c0_83], %277 {strides = array<i32>} : memref<10x8x32xf32, #tpu.memory_space<vmem>>, vector<1x8x32xf32>,
    %278 = vector.extract_strided_slice %269 {offsets = [8, 0], sizes = [8, 32], strides = [1, 1]} : vector<16x32xf32> to vector<8x32xf32>
    %c9_i32_84 = arith.constant 9 : i32
    %279 = arith.subi %c9_i32_84, %c4_i32 : i32
    %280 = arith.index_cast %279 : i32 to index
    %c0_85 = arith.constant 0 : index
    %c0_86 = arith.constant 0 : index
    %281 = vector.load %arg25[%280, %c0_85, %c0_86] : memref<10x8x32xf32, #tpu.memory_space<vmem>>, vector<1x8x32xf32>
    %282 = vector.shape_cast %281 : vector<1x8x32xf32> to vector<8x32xf32>
    %283 = vector.shape_cast %278 : vector<8x32xf32> to vector<1x8x32xf32>
    tpu.vector_store %arg25[%280, %c0_85, %c0_86], %283 {strides = array<i32>} : memref<10x8x32xf32, #tpu.memory_space<vmem>>, vector<1x8x32xf32>,
    %c5_i32 = arith.constant 5 : i32
    %284 = arith.truncf %269 : vector<16x32xf32> to vector<16x32xbf16>
    %cst_87 = arith.constant dense<0.000000e+00> : vector<16x256xf32>
    %285 = tpu.matmul %284, %13, %cst_87 {dimension_numbers = #tpu.dot_dimension_numbers<[1], [0], [0], [1], [0, 0, 1, 1], [], []>} : vector<16x32xbf16>, vector<32x256xbf16>, vector<16x256xf32> -> vector<16x256xf32>
    %286 = vector.extract_strided_slice %285 {offsets = [0, 0], sizes = [8, 128], strides = [1, 1]} : vector<16x256xf32> to vector<8x128xf32>
    %287 = vector.extract_strided_slice %285 {offsets = [8, 128], sizes = [8, 128], strides = [1, 1]} : vector<16x256xf32> to vector<8x128xf32>
    %288 = tpu.concatenate %286, %287 in 0 : vector<8x128xf32>, vector<8x128xf32> -> vector<16x128xf32>
    %289 = arith.index_cast %c5_i32 : i32 to index
    %c0_88 = arith.constant 0 : index
    %c0_89 = arith.constant 0 : index
    %290 = vector.load %arg22[%289, %c0_88, %c0_89] : memref<10x8x256xbf16, #tpu.memory_space<vmem>>, vector<1x8x256xbf16>
    %291 = vector.shape_cast %290 : vector<1x8x256xbf16> to vector<8x256xbf16>
    %c9_i32_90 = arith.constant 9 : i32
    %292 = arith.subi %c9_i32_90, %c5_i32 : i32
    %293 = arith.index_cast %292 : i32 to index
    %c0_91 = arith.constant 0 : index
    %c0_92 = arith.constant 0 : index
    %294 = vector.load %arg22[%293, %c0_91, %c0_92] : memref<10x8x256xbf16, #tpu.memory_space<vmem>>, vector<1x8x256xbf16>
    %295 = vector.shape_cast %294 : vector<1x8x256xbf16> to vector<8x256xbf16>
    %296 = vector.extract_strided_slice %291 {offsets = [0, 0], sizes = [8, 128], strides = [1, 1]} : vector<8x256xbf16> to vector<8x128xbf16>
    %297 = vector.extract_strided_slice %295 {offsets = [0, 128], sizes = [8, 128], strides = [1, 1]} : vector<8x256xbf16> to vector<8x128xbf16>
    %298 = tpu.concatenate %296, %297 in 0 : vector<8x128xbf16>, vector<8x128xbf16> -> vector<16x128xbf16>
    %299 = arith.extf %298 : vector<16x128xbf16> to vector<16x128xf32>
    %300 = arith.index_cast %c5_i32 : i32 to index
    %c0_93 = arith.constant 0 : index
    %c0_94 = arith.constant 0 : index
    %301 = vector.load %arg2[%300, %c0_93, %c0_94] : memref<10x16x1xf32, #tpu.memory_space<vmem>>, vector<1x16x1xf32>
    %302 = vector.shape_cast %301 : vector<1x16x1xf32> to vector<16x1xf32>
    %cst_95 = arith.constant 5.000000e-01 : f32
    %303 = vector.broadcast %cst_95 : f32 to vector<16x1xf32>
    %304 = arith.cmpf ogt, %302, %303 : vector<16x1xf32>
    %305 = arith.addf %299, %288 : vector<16x128xf32>
    %306 = arith.negf %305 : vector<16x128xf32>
    %307 = math.exp %306 : vector<16x128xf32>
    %cst_96 = arith.constant 1.000000e+00 : f32
    %308 = vector.broadcast %cst_96 : f32 to vector<16x128xf32>
    %309 = arith.addf %308, %307 : vector<16x128xf32>
    %310 = arith.divf %308, %309 : vector<16x128xf32>
    %311 = math.tanh %305 : vector<16x128xf32>
    %312 = vector.extract_strided_slice %310 {offsets = [0, 32], sizes = [16, 32], strides = [1, 1]} : vector<16x128xf32> to vector<16x32xf32>
    %313 = arith.mulf %312, %272 : vector<16x32xf32>
    %314 = vector.extract_strided_slice %310 {offsets = [0, 0], sizes = [16, 32], strides = [1, 1]} : vector<16x128xf32> to vector<16x32xf32>
    %315 = vector.extract_strided_slice %311 {offsets = [0, 64], sizes = [16, 32], strides = [1, 1]} : vector<16x128xf32> to vector<16x32xf32>
    %316 = arith.mulf %314, %315 : vector<16x32xf32>
    %317 = arith.addf %313, %316 : vector<16x32xf32>
    %318 = vector.extract_strided_slice %310 {offsets = [0, 96], sizes = [16, 32], strides = [1, 1]} : vector<16x128xf32> to vector<16x32xf32>
    %319 = math.tanh %317 : vector<16x32xf32>
    %320 = arith.mulf %318, %319 : vector<16x32xf32>
    %321 = vector.shape_cast %304 : vector<16x1xi1> to vector<16x1xi1>
    %322 = vector.broadcast %321 : vector<16x1xi1> to vector<16x32xi1>
    %323 = arith.select %322, %320, %269 : vector<16x32xi1>, vector<16x32xf32>
    %324 = vector.shape_cast %304 : vector<16x1xi1> to vector<16x1xi1>
    %325 = vector.broadcast %324 : vector<16x1xi1> to vector<16x32xi1>
    %326 = arith.select %325, %317, %272 : vector<16x32xi1>, vector<16x32xf32>
    %327 = vector.extract_strided_slice %323 {offsets = [0, 0], sizes = [8, 32], strides = [1, 1]} : vector<16x32xf32> to vector<8x32xf32>
    %328 = arith.index_cast %c5_i32 : i32 to index
    %c0_97 = arith.constant 0 : index
    %c0_98 = arith.constant 0 : index
    %329 = vector.load %arg24[%328, %c0_97, %c0_98] : memref<10x8x32xf32, #tpu.memory_space<vmem>>, vector<1x8x32xf32>
    %330 = vector.shape_cast %329 : vector<1x8x32xf32> to vector<8x32xf32>
    %331 = vector.shape_cast %327 : vector<8x32xf32> to vector<1x8x32xf32>
    tpu.vector_store %arg24[%328, %c0_97, %c0_98], %331 {strides = array<i32>} : memref<10x8x32xf32, #tpu.memory_space<vmem>>, vector<1x8x32xf32>,
    %332 = vector.extract_strided_slice %323 {offsets = [8, 0], sizes = [8, 32], strides = [1, 1]} : vector<16x32xf32> to vector<8x32xf32>
    %c9_i32_99 = arith.constant 9 : i32
    %333 = arith.subi %c9_i32_99, %c5_i32 : i32
    %334 = arith.index_cast %333 : i32 to index
    %c0_100 = arith.constant 0 : index
    %c0_101 = arith.constant 0 : index
    %335 = vector.load %arg25[%334, %c0_100, %c0_101] : memref<10x8x32xf32, #tpu.memory_space<vmem>>, vector<1x8x32xf32>
    %336 = vector.shape_cast %335 : vector<1x8x32xf32> to vector<8x32xf32>
    %337 = vector.shape_cast %332 : vector<8x32xf32> to vector<1x8x32xf32>
    tpu.vector_store %arg25[%334, %c0_100, %c0_101], %337 {strides = array<i32>} : memref<10x8x32xf32, #tpu.memory_space<vmem>>, vector<1x8x32xf32>,
    %c6_i32 = arith.constant 6 : i32
    %338 = arith.truncf %323 : vector<16x32xf32> to vector<16x32xbf16>
    %cst_102 = arith.constant dense<0.000000e+00> : vector<16x256xf32>
    %339 = tpu.matmul %338, %13, %cst_102 {dimension_numbers = #tpu.dot_dimension_numbers<[1], [0], [0], [1], [0, 0, 1, 1], [], []>} : vector<16x32xbf16>, vector<32x256xbf16>, vector<16x256xf32> -> vector<16x256xf32>
    %340 = vector.extract_strided_slice %339 {offsets = [0, 0], sizes = [8, 128], strides = [1, 1]} : vector<16x256xf32> to vector<8x128xf32>
    %341 = vector.extract_strided_slice %339 {offsets = [8, 128], sizes = [8, 128], strides = [1, 1]} : vector<16x256xf32> to vector<8x128xf32>
    %342 = tpu.concatenate %340, %341 in 0 : vector<8x128xf32>, vector<8x128xf32> -> vector<16x128xf32>
    %343 = arith.index_cast %c6_i32 : i32 to index
    %c0_103 = arith.constant 0 : index
    %c0_104 = arith.constant 0 : index
    %344 = vector.load %arg22[%343, %c0_103, %c0_104] : memref<10x8x256xbf16, #tpu.memory_space<vmem>>, vector<1x8x256xbf16>
    %345 = vector.shape_cast %344 : vector<1x8x256xbf16> to vector<8x256xbf16>
    %c9_i32_105 = arith.constant 9 : i32
    %346 = arith.subi %c9_i32_105, %c6_i32 : i32
    %347 = arith.index_cast %346 : i32 to index
    %c0_106 = arith.constant 0 : index
    %c0_107 = arith.constant 0 : index
    %348 = vector.load %arg22[%347, %c0_106, %c0_107] : memref<10x8x256xbf16, #tpu.memory_space<vmem>>, vector<1x8x256xbf16>
    %349 = vector.shape_cast %348 : vector<1x8x256xbf16> to vector<8x256xbf16>
    %350 = vector.extract_strided_slice %345 {offsets = [0, 0], sizes = [8, 128], strides = [1, 1]} : vector<8x256xbf16> to vector<8x128xbf16>
    %351 = vector.extract_strided_slice %349 {offsets = [0, 128], sizes = [8, 128], strides = [1, 1]} : vector<8x256xbf16> to vector<8x128xbf16>
    %352 = tpu.concatenate %350, %351 in 0 : vector<8x128xbf16>, vector<8x128xbf16> -> vector<16x128xbf16>
    %353 = arith.extf %352 : vector<16x128xbf16> to vector<16x128xf32>
    %354 = arith.index_cast %c6_i32 : i32 to index
    %c0_108 = arith.constant 0 : index
    %c0_109 = arith.constant 0 : index
    %355 = vector.load %arg2[%354, %c0_108, %c0_109] : memref<10x16x1xf32, #tpu.memory_space<vmem>>, vector<1x16x1xf32>
    %356 = vector.shape_cast %355 : vector<1x16x1xf32> to vector<16x1xf32>
    %cst_110 = arith.constant 5.000000e-01 : f32
    %357 = vector.broadcast %cst_110 : f32 to vector<16x1xf32>
    %358 = arith.cmpf ogt, %356, %357 : vector<16x1xf32>
    %359 = arith.addf %353, %342 : vector<16x128xf32>
    %360 = arith.negf %359 : vector<16x128xf32>
    %361 = math.exp %360 : vector<16x128xf32>
    %cst_111 = arith.constant 1.000000e+00 : f32
    %362 = vector.broadcast %cst_111 : f32 to vector<16x128xf32>
    %363 = arith.addf %362, %361 : vector<16x128xf32>
    %364 = arith.divf %362, %363 : vector<16x128xf32>
    %365 = math.tanh %359 : vector<16x128xf32>
    %366 = vector.extract_strided_slice %364 {offsets = [0, 32], sizes = [16, 32], strides = [1, 1]} : vector<16x128xf32> to vector<16x32xf32>
    %367 = arith.mulf %366, %326 : vector<16x32xf32>
    %368 = vector.extract_strided_slice %364 {offsets = [0, 0], sizes = [16, 32], strides = [1, 1]} : vector<16x128xf32> to vector<16x32xf32>
    %369 = vector.extract_strided_slice %365 {offsets = [0, 64], sizes = [16, 32], strides = [1, 1]} : vector<16x128xf32> to vector<16x32xf32>
    %370 = arith.mulf %368, %369 : vector<16x32xf32>
    %371 = arith.addf %367, %370 : vector<16x32xf32>
    %372 = vector.extract_strided_slice %364 {offsets = [0, 96], sizes = [16, 32], strides = [1, 1]} : vector<16x128xf32> to vector<16x32xf32>
    %373 = math.tanh %371 : vector<16x32xf32>
    %374 = arith.mulf %372, %373 : vector<16x32xf32>
    %375 = vector.shape_cast %358 : vector<16x1xi1> to vector<16x1xi1>
    %376 = vector.broadcast %375 : vector<16x1xi1> to vector<16x32xi1>
    %377 = arith.select %376, %374, %323 : vector<16x32xi1>, vector<16x32xf32>
    %378 = vector.shape_cast %358 : vector<16x1xi1> to vector<16x1xi1>
    %379 = vector.broadcast %378 : vector<16x1xi1> to vector<16x32xi1>
    %380 = arith.select %379, %371, %326 : vector<16x32xi1>, vector<16x32xf32>
    %381 = vector.extract_strided_slice %377 {offsets = [0, 0], sizes = [8, 32], strides = [1, 1]} : vector<16x32xf32> to vector<8x32xf32>
    %382 = arith.index_cast %c6_i32 : i32 to index
    %c0_112 = arith.constant 0 : index
    %c0_113 = arith.constant 0 : index
    %383 = vector.load %arg24[%382, %c0_112, %c0_113] : memref<10x8x32xf32, #tpu.memory_space<vmem>>, vector<1x8x32xf32>
    %384 = vector.shape_cast %383 : vector<1x8x32xf32> to vector<8x32xf32>
    %385 = vector.shape_cast %381 : vector<8x32xf32> to vector<1x8x32xf32>
    tpu.vector_store %arg24[%382, %c0_112, %c0_113], %385 {strides = array<i32>} : memref<10x8x32xf32, #tpu.memory_space<vmem>>, vector<1x8x32xf32>,
    %386 = vector.extract_strided_slice %377 {offsets = [8, 0], sizes = [8, 32], strides = [1, 1]} : vector<16x32xf32> to vector<8x32xf32>
    %c9_i32_114 = arith.constant 9 : i32
    %387 = arith.subi %c9_i32_114, %c6_i32 : i32
    %388 = arith.index_cast %387 : i32 to index
    %c0_115 = arith.constant 0 : index
    %c0_116 = arith.constant 0 : index
    %389 = vector.load %arg25[%388, %c0_115, %c0_116] : memref<10x8x32xf32, #tpu.memory_space<vmem>>, vector<1x8x32xf32>
    %390 = vector.shape_cast %389 : vector<1x8x32xf32> to vector<8x32xf32>
    %391 = vector.shape_cast %386 : vector<8x32xf32> to vector<1x8x32xf32>
    tpu.vector_store %arg25[%388, %c0_115, %c0_116], %391 {strides = array<i32>} : memref<10x8x32xf32, #tpu.memory_space<vmem>>, vector<1x8x32xf32>,
    %c7_i32 = arith.constant 7 : i32
    %392 = arith.truncf %377 : vector<16x32xf32> to vector<16x32xbf16>
    %cst_117 = arith.constant dense<0.000000e+00> : vector<16x256xf32>
    %393 = tpu.matmul %392, %13, %cst_117 {dimension_numbers = #tpu.dot_dimension_numbers<[1], [0], [0], [1], [0, 0, 1, 1], [], []>} : vector<16x32xbf16>, vector<32x256xbf16>, vector<16x256xf32> -> vector<16x256xf32>
    %394 = vector.extract_strided_slice %393 {offsets = [0, 0], sizes = [8, 128], strides = [1, 1]} : vector<16x256xf32> to vector<8x128xf32>
    %395 = vector.extract_strided_slice %393 {offsets = [8, 128], sizes = [8, 128], strides = [1, 1]} : vector<16x256xf32> to vector<8x128xf32>
    %396 = tpu.concatenate %394, %395 in 0 : vector<8x128xf32>, vector<8x128xf32> -> vector<16x128xf32>
    %397 = arith.index_cast %c7_i32 : i32 to index
    %c0_118 = arith.constant 0 : index
    %c0_119 = arith.constant 0 : index
    %398 = vector.load %arg22[%397, %c0_118, %c0_119] : memref<10x8x256xbf16, #tpu.memory_space<vmem>>, vector<1x8x256xbf16>
    %399 = vector.shape_cast %398 : vector<1x8x256xbf16> to vector<8x256xbf16>
    %c9_i32_120 = arith.constant 9 : i32
    %400 = arith.subi %c9_i32_120, %c7_i32 : i32
    %401 = arith.index_cast %400 : i32 to index
    %c0_121 = arith.constant 0 : index
    %c0_122 = arith.constant 0 : index
    %402 = vector.load %arg22[%401, %c0_121, %c0_122] : memref<10x8x256xbf16, #tpu.memory_space<vmem>>, vector<1x8x256xbf16>
    %403 = vector.shape_cast %402 : vector<1x8x256xbf16> to vector<8x256xbf16>
    %404 = vector.extract_strided_slice %399 {offsets = [0, 0], sizes = [8, 128], strides = [1, 1]} : vector<8x256xbf16> to vector<8x128xbf16>
    %405 = vector.extract_strided_slice %403 {offsets = [0, 128], sizes = [8, 128], strides = [1, 1]} : vector<8x256xbf16> to vector<8x128xbf16>
    %406 = tpu.concatenate %404, %405 in 0 : vector<8x128xbf16>, vector<8x128xbf16> -> vector<16x128xbf16>
    %407 = arith.extf %406 : vector<16x128xbf16> to vector<16x128xf32>
    %408 = arith.index_cast %c7_i32 : i32 to index
    %c0_123 = arith.constant 0 : index
    %c0_124 = arith.constant 0 : index
    %409 = vector.load %arg2[%408, %c0_123, %c0_124] : memref<10x16x1xf32, #tpu.memory_space<vmem>>, vector<1x16x1xf32>
    %410 = vector.shape_cast %409 : vector<1x16x1xf32> to vector<16x1xf32>
    %cst_125 = arith.constant 5.000000e-01 : f32
    %411 = vector.broadcast %cst_125 : f32 to vector<16x1xf32>
    %412 = arith.cmpf ogt, %410, %411 : vector<16x1xf32>
    %413 = arith.addf %407, %396 : vector<16x128xf32>
    %414 = arith.negf %413 : vector<16x128xf32>
    %415 = math.exp %414 : vector<16x128xf32>
    %cst_126 = arith.constant 1.000000e+00 : f32
    %416 = vector.broadcast %cst_126 : f32 to vector<16x128xf32>
    %417 = arith.addf %416, %415 : vector<16x128xf32>
    %418 = arith.divf %416, %417 : vector<16x128xf32>
    %419 = math.tanh %413 : vector<16x128xf32>
    %420 = vector.extract_strided_slice %418 {offsets = [0, 32], sizes = [16, 32], strides = [1, 1]} : vector<16x128xf32> to vector<16x32xf32>
    %421 = arith.mulf %420, %380 : vector<16x32xf32>
    %422 = vector.extract_strided_slice %418 {offsets = [0, 0], sizes = [16, 32], strides = [1, 1]} : vector<16x128xf32> to vector<16x32xf32>
    %423 = vector.extract_strided_slice %419 {offsets = [0, 64], sizes = [16, 32], strides = [1, 1]} : vector<16x128xf32> to vector<16x32xf32>
    %424 = arith.mulf %422, %423 : vector<16x32xf32>
    %425 = arith.addf %421, %424 : vector<16x32xf32>
    %426 = vector.extract_strided_slice %418 {offsets = [0, 96], sizes = [16, 32], strides = [1, 1]} : vector<16x128xf32> to vector<16x32xf32>
    %427 = math.tanh %425 : vector<16x32xf32>
    %428 = arith.mulf %426, %427 : vector<16x32xf32>
    %429 = vector.shape_cast %412 : vector<16x1xi1> to vector<16x1xi1>
    %430 = vector.broadcast %429 : vector<16x1xi1> to vector<16x32xi1>
    %431 = arith.select %430, %428, %377 : vector<16x32xi1>, vector<16x32xf32>
    %432 = vector.shape_cast %412 : vector<16x1xi1> to vector<16x1xi1>
    %433 = vector.broadcast %432 : vector<16x1xi1> to vector<16x32xi1>
    %434 = arith.select %433, %425, %380 : vector<16x32xi1>, vector<16x32xf32>
    %435 = vector.extract_strided_slice %431 {offsets = [0, 0], sizes = [8, 32], strides = [1, 1]} : vector<16x32xf32> to vector<8x32xf32>
    %436 = arith.index_cast %c7_i32 : i32 to index
    %c0_127 = arith.constant 0 : index
    %c0_128 = arith.constant 0 : index
    %437 = vector.load %arg24[%436, %c0_127, %c0_128] : memref<10x8x32xf32, #tpu.memory_space<vmem>>, vector<1x8x32xf32>
    %438 = vector.shape_cast %437 : vector<1x8x32xf32> to vector<8x32xf32>
    %439 = vector.shape_cast %435 : vector<8x32xf32> to vector<1x8x32xf32>
    tpu.vector_store %arg24[%436, %c0_127, %c0_128], %439 {strides = array<i32>} : memref<10x8x32xf32, #tpu.memory_space<vmem>>, vector<1x8x32xf32>,
    %440 = vector.extract_strided_slice %431 {offsets = [8, 0], sizes = [8, 32], strides = [1, 1]} : vector<16x32xf32> to vector<8x32xf32>
    %c9_i32_129 = arith.constant 9 : i32
    %441 = arith.subi %c9_i32_129, %c7_i32 : i32
    %442 = arith.index_cast %441 : i32 to index
    %c0_130 = arith.constant 0 : index
    %c0_131 = arith.constant 0 : index
    %443 = vector.load %arg25[%442, %c0_130, %c0_131] : memref<10x8x32xf32, #tpu.memory_space<vmem>>, vector<1x8x32xf32>
    %444 = vector.shape_cast %443 : vector<1x8x32xf32> to vector<8x32xf32>
    %445 = vector.shape_cast %440 : vector<8x32xf32> to vector<1x8x32xf32>
    tpu.vector_store %arg25[%442, %c0_130, %c0_131], %445 {strides = array<i32>} : memref<10x8x32xf32, #tpu.memory_space<vmem>>, vector<1x8x32xf32>,
    %c8_i32 = arith.constant 8 : i32
    %446 = arith.truncf %431 : vector<16x32xf32> to vector<16x32xbf16>
    %cst_132 = arith.constant dense<0.000000e+00> : vector<16x256xf32>
    %447 = tpu.matmul %446, %13, %cst_132 {dimension_numbers = #tpu.dot_dimension_numbers<[1], [0], [0], [1], [0, 0, 1, 1], [], []>} : vector<16x32xbf16>, vector<32x256xbf16>, vector<16x256xf32> -> vector<16x256xf32>
    %448 = vector.extract_strided_slice %447 {offsets = [0, 0], sizes = [8, 128], strides = [1, 1]} : vector<16x256xf32> to vector<8x128xf32>
    %449 = vector.extract_strided_slice %447 {offsets = [8, 128], sizes = [8, 128], strides = [1, 1]} : vector<16x256xf32> to vector<8x128xf32>
    %450 = tpu.concatenate %448, %449 in 0 : vector<8x128xf32>, vector<8x128xf32> -> vector<16x128xf32>
    %451 = arith.index_cast %c8_i32 : i32 to index
    %c0_133 = arith.constant 0 : index
    %c0_134 = arith.constant 0 : index
    %452 = vector.load %arg22[%451, %c0_133, %c0_134] : memref<10x8x256xbf16, #tpu.memory_space<vmem>>, vector<1x8x256xbf16>
    %453 = vector.shape_cast %452 : vector<1x8x256xbf16> to vector<8x256xbf16>
    %c9_i32_135 = arith.constant 9 : i32
    %454 = arith.subi %c9_i32_135, %c8_i32 : i32
    %455 = arith.index_cast %454 : i32 to index
    %c0_136 = arith.constant 0 : index
    %c0_137 = arith.constant 0 : index
    %456 = vector.load %arg22[%455, %c0_136, %c0_137] : memref<10x8x256xbf16, #tpu.memory_space<vmem>>, vector<1x8x256xbf16>
    %457 = vector.shape_cast %456 : vector<1x8x256xbf16> to vector<8x256xbf16>
    %458 = vector.extract_strided_slice %453 {offsets = [0, 0], sizes = [8, 128], strides = [1, 1]} : vector<8x256xbf16> to vector<8x128xbf16>
    %459 = vector.extract_strided_slice %457 {offsets = [0, 128], sizes = [8, 128], strides = [1, 1]} : vector<8x256xbf16> to vector<8x128xbf16>
    %460 = tpu.concatenate %458, %459 in 0 : vector<8x128xbf16>, vector<8x128xbf16> -> vector<16x128xbf16>
    %461 = arith.extf %460 : vector<16x128xbf16> to vector<16x128xf32>
    %462 = arith.index_cast %c8_i32 : i32 to index
    %c0_138 = arith.constant 0 : index
    %c0_139 = arith.constant 0 : index
    %463 = vector.load %arg2[%462, %c0_138, %c0_139] : memref<10x16x1xf32, #tpu.memory_space<vmem>>, vector<1x16x1xf32>
    %464 = vector.shape_cast %463 : vector<1x16x1xf32> to vector<16x1xf32>
    %cst_140 = arith.constant 5.000000e-01 : f32
    %465 = vector.broadcast %cst_140 : f32 to vector<16x1xf32>
    %466 = arith.cmpf ogt, %464, %465 : vector<16x1xf32>
    %467 = arith.addf %461, %450 : vector<16x128xf32>
    %468 = arith.negf %467 : vector<16x128xf32>
    %469 = math.exp %468 : vector<16x128xf32>
    %cst_141 = arith.constant 1.000000e+00 : f32
    %470 = vector.broadcast %cst_141 : f32 to vector<16x128xf32>
    %471 = arith.addf %470, %469 : vector<16x128xf32>
    %472 = arith.divf %470, %471 : vector<16x128xf32>
    %473 = math.tanh %467 : vector<16x128xf32>
    %474 = vector.extract_strided_slice %472 {offsets = [0, 32], sizes = [16, 32], strides = [1, 1]} : vector<16x128xf32> to vector<16x32xf32>
    %475 = arith.mulf %474, %434 : vector<16x32xf32>
    %476 = vector.extract_strided_slice %472 {offsets = [0, 0], sizes = [16, 32], strides = [1, 1]} : vector<16x128xf32> to vector<16x32xf32>
    %477 = vector.extract_strided_slice %473 {offsets = [0, 64], sizes = [16, 32], strides = [1, 1]} : vector<16x128xf32> to vector<16x32xf32>
    %478 = arith.mulf %476, %477 : vector<16x32xf32>
    %479 = arith.addf %475, %478 : vector<16x32xf32>
    %480 = vector.extract_strided_slice %472 {offsets = [0, 96], sizes = [16, 32], strides = [1, 1]} : vector<16x128xf32> to vector<16x32xf32>
    %481 = math.tanh %479 : vector<16x32xf32>
    %482 = arith.mulf %480, %481 : vector<16x32xf32>
    %483 = vector.shape_cast %466 : vector<16x1xi1> to vector<16x1xi1>
    %484 = vector.broadcast %483 : vector<16x1xi1> to vector<16x32xi1>
    %485 = arith.select %484, %482, %431 : vector<16x32xi1>, vector<16x32xf32>
    %486 = vector.shape_cast %466 : vector<16x1xi1> to vector<16x1xi1>
    %487 = vector.broadcast %486 : vector<16x1xi1> to vector<16x32xi1>
    %488 = arith.select %487, %479, %434 : vector<16x32xi1>, vector<16x32xf32>
    %489 = vector.extract_strided_slice %485 {offsets = [0, 0], sizes = [8, 32], strides = [1, 1]} : vector<16x32xf32> to vector<8x32xf32>
    %490 = arith.index_cast %c8_i32 : i32 to index
    %c0_142 = arith.constant 0 : index
    %c0_143 = arith.constant 0 : index
    %491 = vector.load %arg24[%490, %c0_142, %c0_143] : memref<10x8x32xf32, #tpu.memory_space<vmem>>, vector<1x8x32xf32>
    %492 = vector.shape_cast %491 : vector<1x8x32xf32> to vector<8x32xf32>
    %493 = vector.shape_cast %489 : vector<8x32xf32> to vector<1x8x32xf32>
    tpu.vector_store %arg24[%490, %c0_142, %c0_143], %493 {strides = array<i32>} : memref<10x8x32xf32, #tpu.memory_space<vmem>>, vector<1x8x32xf32>,
    %494 = vector.extract_strided_slice %485 {offsets = [8, 0], sizes = [8, 32], strides = [1, 1]} : vector<16x32xf32> to vector<8x32xf32>
    %c9_i32_144 = arith.constant 9 : i32
    %495 = arith.subi %c9_i32_144, %c8_i32 : i32
    %496 = arith.index_cast %495 : i32 to index
    %c0_145 = arith.constant 0 : index
    %c0_146 = arith.constant 0 : index
    %497 = vector.load %arg25[%496, %c0_145, %c0_146] : memref<10x8x32xf32, #tpu.memory_space<vmem>>, vector<1x8x32xf32>
    %498 = vector.shape_cast %497 : vector<1x8x32xf32> to vector<8x32xf32>
    %499 = vector.shape_cast %494 : vector<8x32xf32> to vector<1x8x32xf32>
    tpu.vector_store %arg25[%496, %c0_145, %c0_146], %499 {strides = array<i32>} : memref<10x8x32xf32, #tpu.memory_space<vmem>>, vector<1x8x32xf32>,
    %c9_i32_147 = arith.constant 9 : i32
    %500 = arith.truncf %485 : vector<16x32xf32> to vector<16x32xbf16>
    %cst_148 = arith.constant dense<0.000000e+00> : vector<16x256xf32>
    %501 = tpu.matmul %500, %13, %cst_148 {dimension_numbers = #tpu.dot_dimension_numbers<[1], [0], [0], [1], [0, 0, 1, 1], [], []>} : vector<16x32xbf16>, vector<32x256xbf16>, vector<16x256xf32> -> vector<16x256xf32>
    %502 = vector.extract_strided_slice %501 {offsets = [0, 0], sizes = [8, 128], strides = [1, 1]} : vector<16x256xf32> to vector<8x128xf32>
    %503 = vector.extract_strided_slice %501 {offsets = [8, 128], sizes = [8, 128], strides = [1, 1]} : vector<16x256xf32> to vector<8x128xf32>
    %504 = tpu.concatenate %502, %503 in 0 : vector<8x128xf32>, vector<8x128xf32> -> vector<16x128xf32>
    %505 = arith.index_cast %c9_i32_147 : i32 to index
    %c0_149 = arith.constant 0 : index
    %c0_150 = arith.constant 0 : index
    %506 = vector.load %arg22[%505, %c0_149, %c0_150] : memref<10x8x256xbf16, #tpu.memory_space<vmem>>, vector<1x8x256xbf16>
    %507 = vector.shape_cast %506 : vector<1x8x256xbf16> to vector<8x256xbf16>
    %c9_i32_151 = arith.constant 9 : i32
    %508 = arith.subi %c9_i32_151, %c9_i32_147 : i32
    %509 = arith.index_cast %508 : i32 to index
    %c0_152 = arith.constant 0 : index
    %c0_153 = arith.constant 0 : index
    %510 = vector.load %arg22[%509, %c0_152, %c0_153] : memref<10x8x256xbf16, #tpu.memory_space<vmem>>, vector<1x8x256xbf16>
    %511 = vector.shape_cast %510 : vector<1x8x256xbf16> to vector<8x256xbf16>
    %512 = vector.extract_strided_slice %507 {offsets = [0, 0], sizes = [8, 128], strides = [1, 1]} : vector<8x256xbf16> to vector<8x128xbf16>
    %513 = vector.extract_strided_slice %511 {offsets = [0, 128], sizes = [8, 128], strides = [1, 1]} : vector<8x256xbf16> to vector<8x128xbf16>
    %514 = tpu.concatenate %512, %513 in 0 : vector<8x128xbf16>, vector<8x128xbf16> -> vector<16x128xbf16>
    %515 = arith.extf %514 : vector<16x128xbf16> to vector<16x128xf32>
    %516 = arith.index_cast %c9_i32_147 : i32 to index
    %c0_154 = arith.constant 0 : index
    %c0_155 = arith.constant 0 : index
    %517 = vector.load %arg2[%516, %c0_154, %c0_155] : memref<10x16x1xf32, #tpu.memory_space<vmem>>, vector<1x16x1xf32>
    %518 = vector.shape_cast %517 : vector<1x16x1xf32> to vector<16x1xf32>
    %cst_156 = arith.constant 5.000000e-01 : f32
    %519 = vector.broadcast %cst_156 : f32 to vector<16x1xf32>
    %520 = arith.cmpf ogt, %518, %519 : vector<16x1xf32>
    %521 = arith.addf %515, %504 : vector<16x128xf32>
    %522 = arith.negf %521 : vector<16x128xf32>
    %523 = math.exp %522 : vector<16x128xf32>
    %cst_157 = arith.constant 1.000000e+00 : f32
    %524 = vector.broadcast %cst_157 : f32 to vector<16x128xf32>
    %525 = arith.addf %524, %523 : vector<16x128xf32>
    %526 = arith.divf %524, %525 : vector<16x128xf32>
    %527 = math.tanh %521 : vector<16x128xf32>
    %528 = vector.extract_strided_slice %526 {offsets = [0, 32], sizes = [16, 32], strides = [1, 1]} : vector<16x128xf32> to vector<16x32xf32>
    %529 = arith.mulf %528, %488 : vector<16x32xf32>
    %530 = vector.extract_strided_slice %526 {offsets = [0, 0], sizes = [16, 32], strides = [1, 1]} : vector<16x128xf32> to vector<16x32xf32>
    %531 = vector.extract_strided_slice %527 {offsets = [0, 64], sizes = [16, 32], strides = [1, 1]} : vector<16x128xf32> to vector<16x32xf32>
    %532 = arith.mulf %530, %531 : vector<16x32xf32>
    %533 = arith.addf %529, %532 : vector<16x32xf32>
    %534 = vector.extract_strided_slice %526 {offsets = [0, 96], sizes = [16, 32], strides = [1, 1]} : vector<16x128xf32> to vector<16x32xf32>
    %535 = math.tanh %533 : vector<16x32xf32>
    %536 = arith.mulf %534, %535 : vector<16x32xf32>
    %537 = vector.shape_cast %520 : vector<16x1xi1> to vector<16x1xi1>
    %538 = vector.broadcast %537 : vector<16x1xi1> to vector<16x32xi1>
    %539 = arith.select %538, %536, %485 : vector<16x32xi1>, vector<16x32xf32>
    %540 = vector.shape_cast %520 : vector<16x1xi1> to vector<16x1xi1>
    %541 = vector.broadcast %540 : vector<16x1xi1> to vector<16x32xi1>
    %542 = arith.select %541, %533, %488 : vector<16x32xi1>, vector<16x32xf32>
    %543 = vector.extract_strided_slice %539 {offsets = [0, 0], sizes = [8, 32], strides = [1, 1]} : vector<16x32xf32> to vector<8x32xf32>
    %544 = arith.index_cast %c9_i32_147 : i32 to index
    %c0_158 = arith.constant 0 : index
    %c0_159 = arith.constant 0 : index
    %545 = vector.load %arg24[%544, %c0_158, %c0_159] : memref<10x8x32xf32, #tpu.memory_space<vmem>>, vector<1x8x32xf32>
    %546 = vector.shape_cast %545 : vector<1x8x32xf32> to vector<8x32xf32>
    %547 = vector.shape_cast %543 : vector<8x32xf32> to vector<1x8x32xf32>
    tpu.vector_store %arg24[%544, %c0_158, %c0_159], %547 {strides = array<i32>} : memref<10x8x32xf32, #tpu.memory_space<vmem>>, vector<1x8x32xf32>,
    %548 = vector.extract_strided_slice %539 {offsets = [8, 0], sizes = [8, 32], strides = [1, 1]} : vector<16x32xf32> to vector<8x32xf32>
    %c9_i32_160 = arith.constant 9 : i32
    %549 = arith.subi %c9_i32_160, %c9_i32_147 : i32
    %550 = arith.index_cast %549 : i32 to index
    %c0_161 = arith.constant 0 : index
    %c0_162 = arith.constant 0 : index
    %551 = vector.load %arg25[%550, %c0_161, %c0_162] : memref<10x8x32xf32, #tpu.memory_space<vmem>>, vector<1x8x32xf32>
    %552 = vector.shape_cast %551 : vector<1x8x32xf32> to vector<8x32xf32>
    %553 = vector.shape_cast %548 : vector<8x32xf32> to vector<1x8x32xf32>
    tpu.vector_store %arg25[%550, %c0_161, %c0_162], %553 {strides = array<i32>} : memref<10x8x32xf32, #tpu.memory_space<vmem>>, vector<1x8x32xf32>,
    %c10_i32 = arith.constant 10 : i32
    %c0_163 = arith.constant 0 : index
    %c0_164 = arith.constant 0 : index
    %c0_165 = arith.constant 0 : index
    %554 = vector.load %arg24[%c0_163, %c0_164, %c0_165] : memref<10x8x32xf32, #tpu.memory_space<vmem>>, vector<10x8x32xf32>
    %555 = vector.shape_cast %554 : vector<10x8x32xf32> to vector<80x32xf32>
    %556 = arith.truncf %555 : vector<80x32xf32> to vector<80x32xbf16>
    %c0_166 = arith.constant 0 : index
    %c0_167 = arith.constant 0 : index
    %557 = vector.load %arg8[%c0_166, %c0_167] : memref<32x128xbf16, #tpu.memory_space<vmem>>, vector<32x128xbf16>
    %cst_168 = arith.constant dense<0.000000e+00> : vector<80x128xf32>
    %558 = tpu.matmul %556, %557, %cst_168 {dimension_numbers = #tpu.dot_dimension_numbers<[1], [0], [0], [1], [0, 0, 1, 1], [], []>} : vector<80x32xbf16>, vector<32x128xbf16>, vector<80x128xf32> -> vector<80x128xf32>
    %c0_169 = arith.constant 0 : index
    %c0_170 = arith.constant 0 : index
    %c0_171 = arith.constant 0 : index
    %559 = vector.load %arg25[%c0_169, %c0_170, %c0_171] : memref<10x8x32xf32, #tpu.memory_space<vmem>>, vector<10x8x32xf32>
    %560 = vector.shape_cast %559 : vector<10x8x32xf32> to vector<80x32xf32>
    %561 = arith.truncf %560 : vector<80x32xf32> to vector<80x32xbf16>
    %c0_172 = arith.constant 0 : index
    %c0_173 = arith.constant 0 : index
    %562 = vector.load %arg9[%c0_172, %c0_173] : memref<32x128xbf16, #tpu.memory_space<vmem>>, vector<32x128xbf16>
    %cst_174 = arith.constant dense<0.000000e+00> : vector<80x128xf32>
    %563 = tpu.matmul %561, %562, %cst_174 {dimension_numbers = #tpu.dot_dimension_numbers<[1], [0], [0], [1], [0, 0, 1, 1], [], []>} : vector<80x32xbf16>, vector<32x128xbf16>, vector<80x128xf32> -> vector<80x128xf32>
    %564 = arith.addf %558, %563 : vector<80x128xf32>
    %c0_175 = arith.constant 0 : index
    %c0_176 = arith.constant 0 : index
    %565 = vector.load %arg10[%c0_175, %c0_176] : memref<1x128xf32, #tpu.memory_space<vmem>>, vector<1x128xf32>
    %566 = vector.broadcast %565 : vector<1x128xf32> to vector<80x128xf32>
    %567 = arith.addf %564, %566 : vector<80x128xf32>
    %568 = vector.shape_cast %567 : vector<80x128xf32> to vector<10x8x128xf32>
    %569 = arith.truncf %568 : vector<10x8x128xf32> to vector<10x8x128xbf16>
    %c0_177 = arith.constant 0 : index
    %c0_178 = arith.constant 0 : index
    %c0_179 = arith.constant 0 : index
    %570 = vector.load %arg23[%c0_177, %c0_178, %c0_179] : memref<10x8x128xbf16, #tpu.memory_space<vmem>>, vector<10x8x128xbf16>
    tpu.vector_store %arg23[%c0_177, %c0_178, %c0_179], %569 {strides = array<i32>} : memref<10x8x128xbf16, #tpu.memory_space<vmem>>, vector<10x8x128xbf16>,
    %c0_180 = arith.constant 0 : index
    %c0_181 = arith.constant 0 : index
    %571 = vector.load %arg11[%c0_180, %c0_181] : memref<32x128xbf16, #tpu.memory_space<vmem>>, vector<32x128xbf16>
    %c0_i32_182 = arith.constant 0 : i32
    %572 = arith.truncf %0 : vector<8x32xf32> to vector<8x32xbf16>
    %cst_183 = arith.constant dense<0.000000e+00> : vector<8x128xf32>
    %573 = tpu.matmul %572, %571, %cst_183 {dimension_numbers = #tpu.dot_dimension_numbers<[1], [0], [0], [1], [0, 0, 1, 1], [], []>} : vector<8x32xbf16>, vector<32x128xbf16>, vector<8x128xf32> -> vector<8x128xf32>
    %574 = arith.index_cast %c0_i32_182 : i32 to index
    %c0_184 = arith.constant 0 : index
    %c0_185 = arith.constant 0 : index
    %575 = vector.load %arg2[%574, %c0_184, %c0_185] : memref<10x16x1xf32, #tpu.memory_space<vmem>>, vector<1x16x1xf32>
    %576 = vector.shape_cast %575 : vector<1x16x1xf32> to vector<16x1xf32>
    %577 = vector.extract_strided_slice %576 {offsets = [0, 0], sizes = [8, 1], strides = [1, 1]} : vector<16x1xf32> to vector<8x1xf32>
    %cst_186 = arith.constant 5.000000e-01 : f32
    %578 = vector.broadcast %cst_186 : f32 to vector<8x1xf32>
    %579 = arith.cmpf ogt, %577, %578 : vector<8x1xf32>
    %580 = arith.index_cast %c0_i32_182 : i32 to index
    %c0_187 = arith.constant 0 : index
    %c0_188 = arith.constant 0 : index
    %581 = vector.load %arg23[%580, %c0_187, %c0_188] : memref<10x8x128xbf16, #tpu.memory_space<vmem>>, vector<1x8x128xbf16>
    %582 = vector.shape_cast %581 : vector<1x8x128xbf16> to vector<8x128xbf16>
    %583 = arith.extf %582 : vector<8x128xbf16> to vector<8x128xf32>
    %584 = arith.addf %583, %573 : vector<8x128xf32>
    %585 = arith.negf %584 : vector<8x128xf32>
    %586 = math.exp %585 : vector<8x128xf32>
    %cst_189 = arith.constant 1.000000e+00 : f32
    %587 = vector.broadcast %cst_189 : f32 to vector<8x128xf32>
    %588 = arith.addf %587, %586 : vector<8x128xf32>
    %589 = arith.divf %587, %588 : vector<8x128xf32>
    %590 = math.tanh %584 : vector<8x128xf32>
    %591 = vector.extract_strided_slice %589 {offsets = [0, 32], sizes = [8, 32], strides = [1, 1]} : vector<8x128xf32> to vector<8x32xf32>
    %592 = arith.mulf %591, %0 : vector<8x32xf32>
    %593 = vector.extract_strided_slice %589 {offsets = [0, 0], sizes = [8, 32], strides = [1, 1]} : vector<8x128xf32> to vector<8x32xf32>
    %594 = vector.extract_strided_slice %590 {offsets = [0, 64], sizes = [8, 32], strides = [1, 1]} : vector<8x128xf32> to vector<8x32xf32>
    %595 = arith.mulf %593, %594 : vector<8x32xf32>
    %596 = arith.addf %592, %595 : vector<8x32xf32>
    %597 = vector.extract_strided_slice %589 {offsets = [0, 96], sizes = [8, 32], strides = [1, 1]} : vector<8x128xf32> to vector<8x32xf32>
    %598 = math.tanh %596 : vector<8x32xf32>
    %599 = arith.mulf %597, %598 : vector<8x32xf32>
    %600 = vector.shape_cast %579 : vector<8x1xi1> to vector<8x1xi1>
    %601 = vector.broadcast %600 : vector<8x1xi1> to vector<8x32xi1>
    %602 = arith.select %601, %599, %0 : vector<8x32xi1>, vector<8x32xf32>
    %603 = vector.shape_cast %579 : vector<8x1xi1> to vector<8x1xi1>
    %604 = vector.broadcast %603 : vector<8x1xi1> to vector<8x32xi1>
    %605 = arith.select %604, %596, %0 : vector<8x32xi1>, vector<8x32xf32>
    %c1_i32_190 = arith.constant 1 : i32
    %606 = arith.truncf %602 : vector<8x32xf32> to vector<8x32xbf16>
    %cst_191 = arith.constant dense<0.000000e+00> : vector<8x128xf32>
    %607 = tpu.matmul %606, %571, %cst_191 {dimension_numbers = #tpu.dot_dimension_numbers<[1], [0], [0], [1], [0, 0, 1, 1], [], []>} : vector<8x32xbf16>, vector<32x128xbf16>, vector<8x128xf32> -> vector<8x128xf32>
    %608 = arith.index_cast %c1_i32_190 : i32 to index
    %c0_192 = arith.constant 0 : index
    %c0_193 = arith.constant 0 : index
    %609 = vector.load %arg2[%608, %c0_192, %c0_193] : memref<10x16x1xf32, #tpu.memory_space<vmem>>, vector<1x16x1xf32>
    %610 = vector.shape_cast %609 : vector<1x16x1xf32> to vector<16x1xf32>
    %611 = vector.extract_strided_slice %610 {offsets = [0, 0], sizes = [8, 1], strides = [1, 1]} : vector<16x1xf32> to vector<8x1xf32>
    %cst_194 = arith.constant 5.000000e-01 : f32
    %612 = vector.broadcast %cst_194 : f32 to vector<8x1xf32>
    %613 = arith.cmpf ogt, %611, %612 : vector<8x1xf32>
    %614 = arith.index_cast %c1_i32_190 : i32 to index
    %c0_195 = arith.constant 0 : index
    %c0_196 = arith.constant 0 : index
    %615 = vector.load %arg23[%614, %c0_195, %c0_196] : memref<10x8x128xbf16, #tpu.memory_space<vmem>>, vector<1x8x128xbf16>
    %616 = vector.shape_cast %615 : vector<1x8x128xbf16> to vector<8x128xbf16>
    %617 = arith.extf %616 : vector<8x128xbf16> to vector<8x128xf32>
    %618 = arith.addf %617, %607 : vector<8x128xf32>
    %619 = arith.negf %618 : vector<8x128xf32>
    %620 = math.exp %619 : vector<8x128xf32>
    %cst_197 = arith.constant 1.000000e+00 : f32
    %621 = vector.broadcast %cst_197 : f32 to vector<8x128xf32>
    %622 = arith.addf %621, %620 : vector<8x128xf32>
    %623 = arith.divf %621, %622 : vector<8x128xf32>
    %624 = math.tanh %618 : vector<8x128xf32>
    %625 = vector.extract_strided_slice %623 {offsets = [0, 32], sizes = [8, 32], strides = [1, 1]} : vector<8x128xf32> to vector<8x32xf32>
    %626 = arith.mulf %625, %605 : vector<8x32xf32>
    %627 = vector.extract_strided_slice %623 {offsets = [0, 0], sizes = [8, 32], strides = [1, 1]} : vector<8x128xf32> to vector<8x32xf32>
    %628 = vector.extract_strided_slice %624 {offsets = [0, 64], sizes = [8, 32], strides = [1, 1]} : vector<8x128xf32> to vector<8x32xf32>
    %629 = arith.mulf %627, %628 : vector<8x32xf32>
    %630 = arith.addf %626, %629 : vector<8x32xf32>
    %631 = vector.extract_strided_slice %623 {offsets = [0, 96], sizes = [8, 32], strides = [1, 1]} : vector<8x128xf32> to vector<8x32xf32>
    %632 = math.tanh %630 : vector<8x32xf32>
    %633 = arith.mulf %631, %632 : vector<8x32xf32>
    %634 = vector.shape_cast %613 : vector<8x1xi1> to vector<8x1xi1>
    %635 = vector.broadcast %634 : vector<8x1xi1> to vector<8x32xi1>
    %636 = arith.select %635, %633, %602 : vector<8x32xi1>, vector<8x32xf32>
    %637 = vector.shape_cast %613 : vector<8x1xi1> to vector<8x1xi1>
    %638 = vector.broadcast %637 : vector<8x1xi1> to vector<8x32xi1>
    %639 = arith.select %638, %630, %605 : vector<8x32xi1>, vector<8x32xf32>
    %c2_i32_198 = arith.constant 2 : i32
    %640 = arith.truncf %636 : vector<8x32xf32> to vector<8x32xbf16>
    %cst_199 = arith.constant dense<0.000000e+00> : vector<8x128xf32>
    %641 = tpu.matmul %640, %571, %cst_199 {dimension_numbers = #tpu.dot_dimension_numbers<[1], [0], [0], [1], [0, 0, 1, 1], [], []>} : vector<8x32xbf16>, vector<32x128xbf16>, vector<8x128xf32> -> vector<8x128xf32>
    %642 = arith.index_cast %c2_i32_198 : i32 to index
    %c0_200 = arith.constant 0 : index
    %c0_201 = arith.constant 0 : index
    %643 = vector.load %arg2[%642, %c0_200, %c0_201] : memref<10x16x1xf32, #tpu.memory_space<vmem>>, vector<1x16x1xf32>
    %644 = vector.shape_cast %643 : vector<1x16x1xf32> to vector<16x1xf32>
    %645 = vector.extract_strided_slice %644 {offsets = [0, 0], sizes = [8, 1], strides = [1, 1]} : vector<16x1xf32> to vector<8x1xf32>
    %cst_202 = arith.constant 5.000000e-01 : f32
    %646 = vector.broadcast %cst_202 : f32 to vector<8x1xf32>
    %647 = arith.cmpf ogt, %645, %646 : vector<8x1xf32>
    %648 = arith.index_cast %c2_i32_198 : i32 to index
    %c0_203 = arith.constant 0 : index
    %c0_204 = arith.constant 0 : index
    %649 = vector.load %arg23[%648, %c0_203, %c0_204] : memref<10x8x128xbf16, #tpu.memory_space<vmem>>, vector<1x8x128xbf16>
    %650 = vector.shape_cast %649 : vector<1x8x128xbf16> to vector<8x128xbf16>
    %651 = arith.extf %650 : vector<8x128xbf16> to vector<8x128xf32>
    %652 = arith.addf %651, %641 : vector<8x128xf32>
    %653 = arith.negf %652 : vector<8x128xf32>
    %654 = math.exp %653 : vector<8x128xf32>
    %cst_205 = arith.constant 1.000000e+00 : f32
    %655 = vector.broadcast %cst_205 : f32 to vector<8x128xf32>
    %656 = arith.addf %655, %654 : vector<8x128xf32>
    %657 = arith.divf %655, %656 : vector<8x128xf32>
    %658 = math.tanh %652 : vector<8x128xf32>
    %659 = vector.extract_strided_slice %657 {offsets = [0, 32], sizes = [8, 32], strides = [1, 1]} : vector<8x128xf32> to vector<8x32xf32>
    %660 = arith.mulf %659, %639 : vector<8x32xf32>
    %661 = vector.extract_strided_slice %657 {offsets = [0, 0], sizes = [8, 32], strides = [1, 1]} : vector<8x128xf32> to vector<8x32xf32>
    %662 = vector.extract_strided_slice %658 {offsets = [0, 64], sizes = [8, 32], strides = [1, 1]} : vector<8x128xf32> to vector<8x32xf32>
    %663 = arith.mulf %661, %662 : vector<8x32xf32>
    %664 = arith.addf %660, %663 : vector<8x32xf32>
    %665 = vector.extract_strided_slice %657 {offsets = [0, 96], sizes = [8, 32], strides = [1, 1]} : vector<8x128xf32> to vector<8x32xf32>
    %666 = math.tanh %664 : vector<8x32xf32>
    %667 = arith.mulf %665, %666 : vector<8x32xf32>
    %668 = vector.shape_cast %647 : vector<8x1xi1> to vector<8x1xi1>
    %669 = vector.broadcast %668 : vector<8x1xi1> to vector<8x32xi1>
    %670 = arith.select %669, %667, %636 : vector<8x32xi1>, vector<8x32xf32>
    %671 = vector.shape_cast %647 : vector<8x1xi1> to vector<8x1xi1>
    %672 = vector.broadcast %671 : vector<8x1xi1> to vector<8x32xi1>
    %673 = arith.select %672, %664, %639 : vector<8x32xi1>, vector<8x32xf32>
    %c3_i32_206 = arith.constant 3 : i32
    %674 = arith.truncf %670 : vector<8x32xf32> to vector<8x32xbf16>
    %cst_207 = arith.constant dense<0.000000e+00> : vector<8x128xf32>
    %675 = tpu.matmul %674, %571, %cst_207 {dimension_numbers = #tpu.dot_dimension_numbers<[1], [0], [0], [1], [0, 0, 1, 1], [], []>} : vector<8x32xbf16>, vector<32x128xbf16>, vector<8x128xf32> -> vector<8x128xf32>
    %676 = arith.index_cast %c3_i32_206 : i32 to index
    %c0_208 = arith.constant 0 : index
    %c0_209 = arith.constant 0 : index
    %677 = vector.load %arg2[%676, %c0_208, %c0_209] : memref<10x16x1xf32, #tpu.memory_space<vmem>>, vector<1x16x1xf32>
    %678 = vector.shape_cast %677 : vector<1x16x1xf32> to vector<16x1xf32>
    %679 = vector.extract_strided_slice %678 {offsets = [0, 0], sizes = [8, 1], strides = [1, 1]} : vector<16x1xf32> to vector<8x1xf32>
    %cst_210 = arith.constant 5.000000e-01 : f32
    %680 = vector.broadcast %cst_210 : f32 to vector<8x1xf32>
    %681 = arith.cmpf ogt, %679, %680 : vector<8x1xf32>
    %682 = arith.index_cast %c3_i32_206 : i32 to index
    %c0_211 = arith.constant 0 : index
    %c0_212 = arith.constant 0 : index
    %683 = vector.load %arg23[%682, %c0_211, %c0_212] : memref<10x8x128xbf16, #tpu.memory_space<vmem>>, vector<1x8x128xbf16>
    %684 = vector.shape_cast %683 : vector<1x8x128xbf16> to vector<8x128xbf16>
    %685 = arith.extf %684 : vector<8x128xbf16> to vector<8x128xf32>
    %686 = arith.addf %685, %675 : vector<8x128xf32>
    %687 = arith.negf %686 : vector<8x128xf32>
    %688 = math.exp %687 : vector<8x128xf32>
    %cst_213 = arith.constant 1.000000e+00 : f32
    %689 = vector.broadcast %cst_213 : f32 to vector<8x128xf32>
    %690 = arith.addf %689, %688 : vector<8x128xf32>
    %691 = arith.divf %689, %690 : vector<8x128xf32>
    %692 = math.tanh %686 : vector<8x128xf32>
    %693 = vector.extract_strided_slice %691 {offsets = [0, 32], sizes = [8, 32], strides = [1, 1]} : vector<8x128xf32> to vector<8x32xf32>
    %694 = arith.mulf %693, %673 : vector<8x32xf32>
    %695 = vector.extract_strided_slice %691 {offsets = [0, 0], sizes = [8, 32], strides = [1, 1]} : vector<8x128xf32> to vector<8x32xf32>
    %696 = vector.extract_strided_slice %692 {offsets = [0, 64], sizes = [8, 32], strides = [1, 1]} : vector<8x128xf32> to vector<8x32xf32>
    %697 = arith.mulf %695, %696 : vector<8x32xf32>
    %698 = arith.addf %694, %697 : vector<8x32xf32>
    %699 = vector.extract_strided_slice %691 {offsets = [0, 96], sizes = [8, 32], strides = [1, 1]} : vector<8x128xf32> to vector<8x32xf32>
    %700 = math.tanh %698 : vector<8x32xf32>
    %701 = arith.mulf %699, %700 : vector<8x32xf32>
    %702 = vector.shape_cast %681 : vector<8x1xi1> to vector<8x1xi1>
    %703 = vector.broadcast %702 : vector<8x1xi1> to vector<8x32xi1>
    %704 = arith.select %703, %701, %670 : vector<8x32xi1>, vector<8x32xf32>
    %705 = vector.shape_cast %681 : vector<8x1xi1> to vector<8x1xi1>
    %706 = vector.broadcast %705 : vector<8x1xi1> to vector<8x32xi1>
    %707 = arith.select %706, %698, %673 : vector<8x32xi1>, vector<8x32xf32>
    %c4_i32_214 = arith.constant 4 : i32
    %708 = arith.truncf %704 : vector<8x32xf32> to vector<8x32xbf16>
    %cst_215 = arith.constant dense<0.000000e+00> : vector<8x128xf32>
    %709 = tpu.matmul %708, %571, %cst_215 {dimension_numbers = #tpu.dot_dimension_numbers<[1], [0], [0], [1], [0, 0, 1, 1], [], []>} : vector<8x32xbf16>, vector<32x128xbf16>, vector<8x128xf32> -> vector<8x128xf32>
    %710 = arith.index_cast %c4_i32_214 : i32 to index
    %c0_216 = arith.constant 0 : index
    %c0_217 = arith.constant 0 : index
    %711 = vector.load %arg2[%710, %c0_216, %c0_217] : memref<10x16x1xf32, #tpu.memory_space<vmem>>, vector<1x16x1xf32>
    %712 = vector.shape_cast %711 : vector<1x16x1xf32> to vector<16x1xf32>
    %713 = vector.extract_strided_slice %712 {offsets = [0, 0], sizes = [8, 1], strides = [1, 1]} : vector<16x1xf32> to vector<8x1xf32>
    %cst_218 = arith.constant 5.000000e-01 : f32
    %714 = vector.broadcast %cst_218 : f32 to vector<8x1xf32>
    %715 = arith.cmpf ogt, %713, %714 : vector<8x1xf32>
    %716 = arith.index_cast %c4_i32_214 : i32 to index
    %c0_219 = arith.constant 0 : index
    %c0_220 = arith.constant 0 : index
    %717 = vector.load %arg23[%716, %c0_219, %c0_220] : memref<10x8x128xbf16, #tpu.memory_space<vmem>>, vector<1x8x128xbf16>
    %718 = vector.shape_cast %717 : vector<1x8x128xbf16> to vector<8x128xbf16>
    %719 = arith.extf %718 : vector<8x128xbf16> to vector<8x128xf32>
    %720 = arith.addf %719, %709 : vector<8x128xf32>
    %721 = arith.negf %720 : vector<8x128xf32>
    %722 = math.exp %721 : vector<8x128xf32>
    %cst_221 = arith.constant 1.000000e+00 : f32
    %723 = vector.broadcast %cst_221 : f32 to vector<8x128xf32>
    %724 = arith.addf %723, %722 : vector<8x128xf32>
    %725 = arith.divf %723, %724 : vector<8x128xf32>
    %726 = math.tanh %720 : vector<8x128xf32>
    %727 = vector.extract_strided_slice %725 {offsets = [0, 32], sizes = [8, 32], strides = [1, 1]} : vector<8x128xf32> to vector<8x32xf32>
    %728 = arith.mulf %727, %707 : vector<8x32xf32>
    %729 = vector.extract_strided_slice %725 {offsets = [0, 0], sizes = [8, 32], strides = [1, 1]} : vector<8x128xf32> to vector<8x32xf32>
    %730 = vector.extract_strided_slice %726 {offsets = [0, 64], sizes = [8, 32], strides = [1, 1]} : vector<8x128xf32> to vector<8x32xf32>
    %731 = arith.mulf %729, %730 : vector<8x32xf32>
    %732 = arith.addf %728, %731 : vector<8x32xf32>
    %733 = vector.extract_strided_slice %725 {offsets = [0, 96], sizes = [8, 32], strides = [1, 1]} : vector<8x128xf32> to vector<8x32xf32>
    %734 = math.tanh %732 : vector<8x32xf32>
    %735 = arith.mulf %733, %734 : vector<8x32xf32>
    %736 = vector.shape_cast %715 : vector<8x1xi1> to vector<8x1xi1>
    %737 = vector.broadcast %736 : vector<8x1xi1> to vector<8x32xi1>
    %738 = arith.select %737, %735, %704 : vector<8x32xi1>, vector<8x32xf32>
    %739 = vector.shape_cast %715 : vector<8x1xi1> to vector<8x1xi1>
    %740 = vector.broadcast %739 : vector<8x1xi1> to vector<8x32xi1>
    %741 = arith.select %740, %732, %707 : vector<8x32xi1>, vector<8x32xf32>
    %c5_i32_222 = arith.constant 5 : i32
    %742 = arith.truncf %738 : vector<8x32xf32> to vector<8x32xbf16>
    %cst_223 = arith.constant dense<0.000000e+00> : vector<8x128xf32>
    %743 = tpu.matmul %742, %571, %cst_223 {dimension_numbers = #tpu.dot_dimension_numbers<[1], [0], [0], [1], [0, 0, 1, 1], [], []>} : vector<8x32xbf16>, vector<32x128xbf16>, vector<8x128xf32> -> vector<8x128xf32>
    %744 = arith.index_cast %c5_i32_222 : i32 to index
    %c0_224 = arith.constant 0 : index
    %c0_225 = arith.constant 0 : index
    %745 = vector.load %arg2[%744, %c0_224, %c0_225] : memref<10x16x1xf32, #tpu.memory_space<vmem>>, vector<1x16x1xf32>
    %746 = vector.shape_cast %745 : vector<1x16x1xf32> to vector<16x1xf32>
    %747 = vector.extract_strided_slice %746 {offsets = [0, 0], sizes = [8, 1], strides = [1, 1]} : vector<16x1xf32> to vector<8x1xf32>
    %cst_226 = arith.constant 5.000000e-01 : f32
    %748 = vector.broadcast %cst_226 : f32 to vector<8x1xf32>
    %749 = arith.cmpf ogt, %747, %748 : vector<8x1xf32>
    %750 = arith.index_cast %c5_i32_222 : i32 to index
    %c0_227 = arith.constant 0 : index
    %c0_228 = arith.constant 0 : index
    %751 = vector.load %arg23[%750, %c0_227, %c0_228] : memref<10x8x128xbf16, #tpu.memory_space<vmem>>, vector<1x8x128xbf16>
    %752 = vector.shape_cast %751 : vector<1x8x128xbf16> to vector<8x128xbf16>
    %753 = arith.extf %752 : vector<8x128xbf16> to vector<8x128xf32>
    %754 = arith.addf %753, %743 : vector<8x128xf32>
    %755 = arith.negf %754 : vector<8x128xf32>
    %756 = math.exp %755 : vector<8x128xf32>
    %cst_229 = arith.constant 1.000000e+00 : f32
    %757 = vector.broadcast %cst_229 : f32 to vector<8x128xf32>
    %758 = arith.addf %757, %756 : vector<8x128xf32>
    %759 = arith.divf %757, %758 : vector<8x128xf32>
    %760 = math.tanh %754 : vector<8x128xf32>
    %761 = vector.extract_strided_slice %759 {offsets = [0, 32], sizes = [8, 32], strides = [1, 1]} : vector<8x128xf32> to vector<8x32xf32>
    %762 = arith.mulf %761, %741 : vector<8x32xf32>
    %763 = vector.extract_strided_slice %759 {offsets = [0, 0], sizes = [8, 32], strides = [1, 1]} : vector<8x128xf32> to vector<8x32xf32>
    %764 = vector.extract_strided_slice %760 {offsets = [0, 64], sizes = [8, 32], strides = [1, 1]} : vector<8x128xf32> to vector<8x32xf32>
    %765 = arith.mulf %763, %764 : vector<8x32xf32>
    %766 = arith.addf %762, %765 : vector<8x32xf32>
    %767 = vector.extract_strided_slice %759 {offsets = [0, 96], sizes = [8, 32], strides = [1, 1]} : vector<8x128xf32> to vector<8x32xf32>
    %768 = math.tanh %766 : vector<8x32xf32>
    %769 = arith.mulf %767, %768 : vector<8x32xf32>
    %770 = vector.shape_cast %749 : vector<8x1xi1> to vector<8x1xi1>
    %771 = vector.broadcast %770 : vector<8x1xi1> to vector<8x32xi1>
    %772 = arith.select %771, %769, %738 : vector<8x32xi1>, vector<8x32xf32>
    %773 = vector.shape_cast %749 : vector<8x1xi1> to vector<8x1xi1>
    %774 = vector.broadcast %773 : vector<8x1xi1> to vector<8x32xi1>
    %775 = arith.select %774, %766, %741 : vector<8x32xi1>, vector<8x32xf32>
    %c6_i32_230 = arith.constant 6 : i32
    %776 = arith.truncf %772 : vector<8x32xf32> to vector<8x32xbf16>
    %cst_231 = arith.constant dense<0.000000e+00> : vector<8x128xf32>
    %777 = tpu.matmul %776, %571, %cst_231 {dimension_numbers = #tpu.dot_dimension_numbers<[1], [0], [0], [1], [0, 0, 1, 1], [], []>} : vector<8x32xbf16>, vector<32x128xbf16>, vector<8x128xf32> -> vector<8x128xf32>
    %778 = arith.index_cast %c6_i32_230 : i32 to index
    %c0_232 = arith.constant 0 : index
    %c0_233 = arith.constant 0 : index
    %779 = vector.load %arg2[%778, %c0_232, %c0_233] : memref<10x16x1xf32, #tpu.memory_space<vmem>>, vector<1x16x1xf32>
    %780 = vector.shape_cast %779 : vector<1x16x1xf32> to vector<16x1xf32>
    %781 = vector.extract_strided_slice %780 {offsets = [0, 0], sizes = [8, 1], strides = [1, 1]} : vector<16x1xf32> to vector<8x1xf32>
    %cst_234 = arith.constant 5.000000e-01 : f32
    %782 = vector.broadcast %cst_234 : f32 to vector<8x1xf32>
    %783 = arith.cmpf ogt, %781, %782 : vector<8x1xf32>
    %784 = arith.index_cast %c6_i32_230 : i32 to index
    %c0_235 = arith.constant 0 : index
    %c0_236 = arith.constant 0 : index
    %785 = vector.load %arg23[%784, %c0_235, %c0_236] : memref<10x8x128xbf16, #tpu.memory_space<vmem>>, vector<1x8x128xbf16>
    %786 = vector.shape_cast %785 : vector<1x8x128xbf16> to vector<8x128xbf16>
    %787 = arith.extf %786 : vector<8x128xbf16> to vector<8x128xf32>
    %788 = arith.addf %787, %777 : vector<8x128xf32>
    %789 = arith.negf %788 : vector<8x128xf32>
    %790 = math.exp %789 : vector<8x128xf32>
    %cst_237 = arith.constant 1.000000e+00 : f32
    %791 = vector.broadcast %cst_237 : f32 to vector<8x128xf32>
    %792 = arith.addf %791, %790 : vector<8x128xf32>
    %793 = arith.divf %791, %792 : vector<8x128xf32>
    %794 = math.tanh %788 : vector<8x128xf32>
    %795 = vector.extract_strided_slice %793 {offsets = [0, 32], sizes = [8, 32], strides = [1, 1]} : vector<8x128xf32> to vector<8x32xf32>
    %796 = arith.mulf %795, %775 : vector<8x32xf32>
    %797 = vector.extract_strided_slice %793 {offsets = [0, 0], sizes = [8, 32], strides = [1, 1]} : vector<8x128xf32> to vector<8x32xf32>
    %798 = vector.extract_strided_slice %794 {offsets = [0, 64], sizes = [8, 32], strides = [1, 1]} : vector<8x128xf32> to vector<8x32xf32>
    %799 = arith.mulf %797, %798 : vector<8x32xf32>
    %800 = arith.addf %796, %799 : vector<8x32xf32>
    %801 = vector.extract_strided_slice %793 {offsets = [0, 96], sizes = [8, 32], strides = [1, 1]} : vector<8x128xf32> to vector<8x32xf32>
    %802 = math.tanh %800 : vector<8x32xf32>
    %803 = arith.mulf %801, %802 : vector<8x32xf32>
    %804 = vector.shape_cast %783 : vector<8x1xi1> to vector<8x1xi1>
    %805 = vector.broadcast %804 : vector<8x1xi1> to vector<8x32xi1>
    %806 = arith.select %805, %803, %772 : vector<8x32xi1>, vector<8x32xf32>
    %807 = vector.shape_cast %783 : vector<8x1xi1> to vector<8x1xi1>
    %808 = vector.broadcast %807 : vector<8x1xi1> to vector<8x32xi1>
    %809 = arith.select %808, %800, %775 : vector<8x32xi1>, vector<8x32xf32>
    %c7_i32_238 = arith.constant 7 : i32
    %810 = arith.truncf %806 : vector<8x32xf32> to vector<8x32xbf16>
    %cst_239 = arith.constant dense<0.000000e+00> : vector<8x128xf32>
    %811 = tpu.matmul %810, %571, %cst_239 {dimension_numbers = #tpu.dot_dimension_numbers<[1], [0], [0], [1], [0, 0, 1, 1], [], []>} : vector<8x32xbf16>, vector<32x128xbf16>, vector<8x128xf32> -> vector<8x128xf32>
    %812 = arith.index_cast %c7_i32_238 : i32 to index
    %c0_240 = arith.constant 0 : index
    %c0_241 = arith.constant 0 : index
    %813 = vector.load %arg2[%812, %c0_240, %c0_241] : memref<10x16x1xf32, #tpu.memory_space<vmem>>, vector<1x16x1xf32>
    %814 = vector.shape_cast %813 : vector<1x16x1xf32> to vector<16x1xf32>
    %815 = vector.extract_strided_slice %814 {offsets = [0, 0], sizes = [8, 1], strides = [1, 1]} : vector<16x1xf32> to vector<8x1xf32>
    %cst_242 = arith.constant 5.000000e-01 : f32
    %816 = vector.broadcast %cst_242 : f32 to vector<8x1xf32>
    %817 = arith.cmpf ogt, %815, %816 : vector<8x1xf32>
    %818 = arith.index_cast %c7_i32_238 : i32 to index
    %c0_243 = arith.constant 0 : index
    %c0_244 = arith.constant 0 : index
    %819 = vector.load %arg23[%818, %c0_243, %c0_244] : memref<10x8x128xbf16, #tpu.memory_space<vmem>>, vector<1x8x128xbf16>
    %820 = vector.shape_cast %819 : vector<1x8x128xbf16> to vector<8x128xbf16>
    %821 = arith.extf %820 : vector<8x128xbf16> to vector<8x128xf32>
    %822 = arith.addf %821, %811 : vector<8x128xf32>
    %823 = arith.negf %822 : vector<8x128xf32>
    %824 = math.exp %823 : vector<8x128xf32>
    %cst_245 = arith.constant 1.000000e+00 : f32
    %825 = vector.broadcast %cst_245 : f32 to vector<8x128xf32>
    %826 = arith.addf %825, %824 : vector<8x128xf32>
    %827 = arith.divf %825, %826 : vector<8x128xf32>
    %828 = math.tanh %822 : vector<8x128xf32>
    %829 = vector.extract_strided_slice %827 {offsets = [0, 32], sizes = [8, 32], strides = [1, 1]} : vector<8x128xf32> to vector<8x32xf32>
    %830 = arith.mulf %829, %809 : vector<8x32xf32>
    %831 = vector.extract_strided_slice %827 {offsets = [0, 0], sizes = [8, 32], strides = [1, 1]} : vector<8x128xf32> to vector<8x32xf32>
    %832 = vector.extract_strided_slice %828 {offsets = [0, 64], sizes = [8, 32], strides = [1, 1]} : vector<8x128xf32> to vector<8x32xf32>
    %833 = arith.mulf %831, %832 : vector<8x32xf32>
    %834 = arith.addf %830, %833 : vector<8x32xf32>
    %835 = vector.extract_strided_slice %827 {offsets = [0, 96], sizes = [8, 32], strides = [1, 1]} : vector<8x128xf32> to vector<8x32xf32>
    %836 = math.tanh %834 : vector<8x32xf32>
    %837 = arith.mulf %835, %836 : vector<8x32xf32>
    %838 = vector.shape_cast %817 : vector<8x1xi1> to vector<8x1xi1>
    %839 = vector.broadcast %838 : vector<8x1xi1> to vector<8x32xi1>
    %840 = arith.select %839, %837, %806 : vector<8x32xi1>, vector<8x32xf32>
    %841 = vector.shape_cast %817 : vector<8x1xi1> to vector<8x1xi1>
    %842 = vector.broadcast %841 : vector<8x1xi1> to vector<8x32xi1>
    %843 = arith.select %842, %834, %809 : vector<8x32xi1>, vector<8x32xf32>
    %c8_i32_246 = arith.constant 8 : i32
    %844 = arith.truncf %840 : vector<8x32xf32> to vector<8x32xbf16>
    %cst_247 = arith.constant dense<0.000000e+00> : vector<8x128xf32>
    %845 = tpu.matmul %844, %571, %cst_247 {dimension_numbers = #tpu.dot_dimension_numbers<[1], [0], [0], [1], [0, 0, 1, 1], [], []>} : vector<8x32xbf16>, vector<32x128xbf16>, vector<8x128xf32> -> vector<8x128xf32>
    %846 = arith.index_cast %c8_i32_246 : i32 to index
    %c0_248 = arith.constant 0 : index
    %c0_249 = arith.constant 0 : index
    %847 = vector.load %arg2[%846, %c0_248, %c0_249] : memref<10x16x1xf32, #tpu.memory_space<vmem>>, vector<1x16x1xf32>
    %848 = vector.shape_cast %847 : vector<1x16x1xf32> to vector<16x1xf32>
    %849 = vector.extract_strided_slice %848 {offsets = [0, 0], sizes = [8, 1], strides = [1, 1]} : vector<16x1xf32> to vector<8x1xf32>
    %cst_250 = arith.constant 5.000000e-01 : f32
    %850 = vector.broadcast %cst_250 : f32 to vector<8x1xf32>
    %851 = arith.cmpf ogt, %849, %850 : vector<8x1xf32>
    %852 = arith.index_cast %c8_i32_246 : i32 to index
    %c0_251 = arith.constant 0 : index
    %c0_252 = arith.constant 0 : index
    %853 = vector.load %arg23[%852, %c0_251, %c0_252] : memref<10x8x128xbf16, #tpu.memory_space<vmem>>, vector<1x8x128xbf16>
    %854 = vector.shape_cast %853 : vector<1x8x128xbf16> to vector<8x128xbf16>
    %855 = arith.extf %854 : vector<8x128xbf16> to vector<8x128xf32>
    %856 = arith.addf %855, %845 : vector<8x128xf32>
    %857 = arith.negf %856 : vector<8x128xf32>
    %858 = math.exp %857 : vector<8x128xf32>
    %cst_253 = arith.constant 1.000000e+00 : f32
    %859 = vector.broadcast %cst_253 : f32 to vector<8x128xf32>
    %860 = arith.addf %859, %858 : vector<8x128xf32>
    %861 = arith.divf %859, %860 : vector<8x128xf32>
    %862 = math.tanh %856 : vector<8x128xf32>
    %863 = vector.extract_strided_slice %861 {offsets = [0, 32], sizes = [8, 32], strides = [1, 1]} : vector<8x128xf32> to vector<8x32xf32>
    %864 = arith.mulf %863, %843 : vector<8x32xf32>
    %865 = vector.extract_strided_slice %861 {offsets = [0, 0], sizes = [8, 32], strides = [1, 1]} : vector<8x128xf32> to vector<8x32xf32>
    %866 = vector.extract_strided_slice %862 {offsets = [0, 64], sizes = [8, 32], strides = [1, 1]} : vector<8x128xf32> to vector<8x32xf32>
    %867 = arith.mulf %865, %866 : vector<8x32xf32>
    %868 = arith.addf %864, %867 : vector<8x32xf32>
    %869 = vector.extract_strided_slice %861 {offsets = [0, 96], sizes = [8, 32], strides = [1, 1]} : vector<8x128xf32> to vector<8x32xf32>
    %870 = math.tanh %868 : vector<8x32xf32>
    %871 = arith.mulf %869, %870 : vector<8x32xf32>
    %872 = vector.shape_cast %851 : vector<8x1xi1> to vector<8x1xi1>
    %873 = vector.broadcast %872 : vector<8x1xi1> to vector<8x32xi1>
    %874 = arith.select %873, %871, %840 : vector<8x32xi1>, vector<8x32xf32>
    %875 = vector.shape_cast %851 : vector<8x1xi1> to vector<8x1xi1>
    %876 = vector.broadcast %875 : vector<8x1xi1> to vector<8x32xi1>
    %877 = arith.select %876, %868, %843 : vector<8x32xi1>, vector<8x32xf32>
    %c9_i32_254 = arith.constant 9 : i32
    %878 = arith.truncf %874 : vector<8x32xf32> to vector<8x32xbf16>
    %cst_255 = arith.constant dense<0.000000e+00> : vector<8x128xf32>
    %879 = tpu.matmul %878, %571, %cst_255 {dimension_numbers = #tpu.dot_dimension_numbers<[1], [0], [0], [1], [0, 0, 1, 1], [], []>} : vector<8x32xbf16>, vector<32x128xbf16>, vector<8x128xf32> -> vector<8x128xf32>
    %880 = arith.index_cast %c9_i32_254 : i32 to index
    %c0_256 = arith.constant 0 : index
    %c0_257 = arith.constant 0 : index
    %881 = vector.load %arg2[%880, %c0_256, %c0_257] : memref<10x16x1xf32, #tpu.memory_space<vmem>>, vector<1x16x1xf32>
    %882 = vector.shape_cast %881 : vector<1x16x1xf32> to vector<16x1xf32>
    %883 = vector.extract_strided_slice %882 {offsets = [0, 0], sizes = [8, 1], strides = [1, 1]} : vector<16x1xf32> to vector<8x1xf32>
    %cst_258 = arith.constant 5.000000e-01 : f32
    %884 = vector.broadcast %cst_258 : f32 to vector<8x1xf32>
    %885 = arith.cmpf ogt, %883, %884 : vector<8x1xf32>
    %886 = arith.index_cast %c9_i32_254 : i32 to index
    %c0_259 = arith.constant 0 : index
    %c0_260 = arith.constant 0 : index
    %887 = vector.load %arg23[%886, %c0_259, %c0_260] : memref<10x8x128xbf16, #tpu.memory_space<vmem>>, vector<1x8x128xbf16>
    %888 = vector.shape_cast %887 : vector<1x8x128xbf16> to vector<8x128xbf16>
    %889 = arith.extf %888 : vector<8x128xbf16> to vector<8x128xf32>
    %890 = arith.addf %889, %879 : vector<8x128xf32>
    %891 = arith.negf %890 : vector<8x128xf32>
    %892 = math.exp %891 : vector<8x128xf32>
    %cst_261 = arith.constant 1.000000e+00 : f32
    %893 = vector.broadcast %cst_261 : f32 to vector<8x128xf32>
    %894 = arith.addf %893, %892 : vector<8x128xf32>
    %895 = arith.divf %893, %894 : vector<8x128xf32>
    %896 = math.tanh %890 : vector<8x128xf32>
    %897 = vector.extract_strided_slice %895 {offsets = [0, 32], sizes = [8, 32], strides = [1, 1]} : vector<8x128xf32> to vector<8x32xf32>
    %898 = arith.mulf %897, %877 : vector<8x32xf32>
    %899 = vector.extract_strided_slice %895 {offsets = [0, 0], sizes = [8, 32], strides = [1, 1]} : vector<8x128xf32> to vector<8x32xf32>
    %900 = vector.extract_strided_slice %896 {offsets = [0, 64], sizes = [8, 32], strides = [1, 1]} : vector<8x128xf32> to vector<8x32xf32>
    %901 = arith.mulf %899, %900 : vector<8x32xf32>
    %902 = arith.addf %898, %901 : vector<8x32xf32>
    %903 = vector.extract_strided_slice %895 {offsets = [0, 96], sizes = [8, 32], strides = [1, 1]} : vector<8x128xf32> to vector<8x32xf32>
    %904 = math.tanh %902 : vector<8x32xf32>
    %905 = arith.mulf %903, %904 : vector<8x32xf32>
    %906 = vector.shape_cast %885 : vector<8x1xi1> to vector<8x1xi1>
    %907 = vector.broadcast %906 : vector<8x1xi1> to vector<8x32xi1>
    %908 = arith.select %907, %905, %874 : vector<8x32xi1>, vector<8x32xf32>
    %909 = vector.shape_cast %885 : vector<8x1xi1> to vector<8x1xi1>
    %910 = vector.broadcast %909 : vector<8x1xi1> to vector<8x32xi1>
    %911 = arith.select %910, %902, %877 : vector<8x32xi1>, vector<8x32xf32>
    %c10_i32_262 = arith.constant 10 : i32
    %912 = vector.extract_strided_slice %539 {offsets = [0, 0], sizes = [8, 32], strides = [1, 1]} : vector<16x32xf32> to vector<8x32xf32>
    %913 = tpu.concatenate %912, %908 in 0 : vector<8x32xf32>, vector<8x32xf32> -> vector<16x32xf32>
    %914 = arith.truncf %913 : vector<16x32xf32> to vector<16x32xbf16>
    %c0_263 = arith.constant 0 : index
    %c0_264 = arith.constant 0 : index
    %915 = vector.load %arg12[%c0_263, %c0_264] : memref<32x32xbf16, #tpu.memory_space<vmem>>, vector<32x32xbf16>
    %cst_265 = arith.constant dense<0.000000e+00> : vector<16x32xf32>
    %916 = tpu.matmul %914, %915, %cst_265 {dimension_numbers = #tpu.dot_dimension_numbers<[1], [0], [0], [1], [0, 0, 1, 1], [], []>} : vector<16x32xbf16>, vector<32x32xbf16>, vector<16x32xf32> -> vector<16x32xf32>
    %c0_266 = arith.constant 0 : index
    %c0_267 = arith.constant 0 : index
    %917 = vector.load %arg13[%c0_266, %c0_267] : memref<1x32xf32, #tpu.memory_space<vmem>>, vector<1x32xf32>
    %918 = vector.broadcast %917 : vector<1x32xf32> to vector<16x32xf32>
    %919 = arith.addf %916, %918 : vector<16x32xf32>
    %c0_268 = arith.constant 0 : index
    %c0_269 = arith.constant 0 : index
    %c0_270 = arith.constant 0 : index
    %920 = vector.load %arg3[%c0_268, %c0_269, %c0_270] : memref<8x8x32xf32, #tpu.memory_space<vmem>>, vector<8x8x32xf32>
    %921 = vector.shape_cast %920 : vector<8x8x32xf32> to vector<64x32xf32>
    %922 = arith.truncf %921 : vector<64x32xf32> to vector<64x32xbf16>
    %c0_271 = arith.constant 0 : index
    %c0_272 = arith.constant 0 : index
    %923 = vector.load %arg14[%c0_271, %c0_272] : memref<32x128xbf16, #tpu.memory_space<vmem>>, vector<32x128xbf16>
    %cst_273 = arith.constant dense<0.000000e+00> : vector<64x128xf32>
    %924 = tpu.matmul %922, %923, %cst_273 {dimension_numbers = #tpu.dot_dimension_numbers<[1], [0], [0], [1], [0, 0, 1, 1], [], []>} : vector<64x32xbf16>, vector<32x128xbf16>, vector<64x128xf32> -> vector<64x128xf32>
    %c0_274 = arith.constant 0 : index
    %c0_275 = arith.constant 0 : index
    %925 = vector.load %arg15[%c0_274, %c0_275] : memref<1x128xf32, #tpu.memory_space<vmem>>, vector<1x128xf32>
    %926 = vector.broadcast %925 : vector<1x128xf32> to vector<64x128xf32>
    %927 = arith.addf %924, %926 : vector<64x128xf32>
    %928 = vector.shape_cast %927 : vector<64x128xf32> to vector<8x8x128xf32>
    %929 = arith.truncf %928 : vector<8x8x128xf32> to vector<8x8x128xbf16>
    %c0_276 = arith.constant 0 : index
    %c0_277 = arith.constant 0 : index
    %c0_278 = arith.constant 0 : index
    %930 = vector.load %arg23[%c0_276, %c0_277, %c0_278] : memref<10x8x128xbf16, #tpu.memory_space<vmem>>, vector<8x8x128xbf16>
    tpu.vector_store %arg23[%c0_276, %c0_277, %c0_278], %929 {strides = array<i32>} : memref<10x8x128xbf16, #tpu.memory_space<vmem>>, vector<8x8x128xbf16>,
    %c0_279 = arith.constant 0 : index
    %c0_280 = arith.constant 0 : index
    %931 = vector.load %arg18[%c0_279, %c0_280] : memref<32x256xbf16, #tpu.memory_space<vmem>>, vector<32x256xbf16>
    %c0_281 = arith.constant 0 : index
    %c0_282 = arith.constant 0 : index
    %932 = vector.load %arg16[%c0_281, %c0_282] : memref<32x128xbf16, #tpu.memory_space<vmem>>, vector<32x128xbf16>
    %c0_283 = arith.constant 0 : index
    %c0_284 = arith.constant 0 : index
    %933 = vector.load %arg17[%c0_283, %c0_284] : memref<1x128xf32, #tpu.memory_space<vmem>>, vector<1x128xf32>
    %934 = vector.shape_cast %933 : vector<1x128xf32> to vector<1x128xf32>
    %935 = vector.broadcast %934 : vector<1x128xf32> to vector<8x128xf32>
    %c0_i32_285 = arith.constant 0 : i32
    %936 = arith.truncf %919 : vector<16x32xf32> to vector<16x32xbf16>
    %cst_286 = arith.constant dense<0.000000e+00> : vector<16x256xf32>
    %937 = tpu.matmul %936, %931, %cst_286 {dimension_numbers = #tpu.dot_dimension_numbers<[1], [0], [0], [1], [0, 0, 1, 1], [], []>} : vector<16x32xbf16>, vector<32x256xbf16>, vector<16x256xf32> -> vector<16x256xf32>
    %938 = arith.index_cast %c0_i32_285 : i32 to index
    %c0_287 = arith.constant 0 : index
    %c0_288 = arith.constant 0 : index
    %939 = vector.load %arg4[%938, %c0_287, %c0_288] : memref<8x8x1xf32, #tpu.memory_space<vmem>>, vector<1x8x1xf32>
    %940 = vector.shape_cast %939 : vector<1x8x1xf32> to vector<8x1xf32>
    %cst_289 = arith.constant 5.000000e-01 : f32
    %941 = vector.broadcast %cst_289 : f32 to vector<8x1xf32>
    %942 = arith.cmpf ogt, %940, %941 : vector<8x1xf32>
    %943 = arith.index_cast %c0_i32_285 : i32 to index
    %c0_290 = arith.constant 0 : index
    %c0_291 = arith.constant 0 : index
    %944 = vector.load %arg23[%943, %c0_290, %c0_291] : memref<10x8x128xbf16, #tpu.memory_space<vmem>>, vector<1x8x128xbf16>
    %945 = vector.shape_cast %944 : vector<1x8x128xbf16> to vector<8x128xbf16>
    %946 = arith.extf %945 : vector<8x128xbf16> to vector<8x128xf32>
    %947 = vector.extract_strided_slice %937 {offsets = [0, 0], sizes = [8, 128], strides = [1, 1]} : vector<16x256xf32> to vector<8x128xf32>
    %948 = arith.addf %946, %947 : vector<8x128xf32>
    %949 = vector.extract_strided_slice %919 {offsets = [0, 0], sizes = [8, 32], strides = [1, 1]} : vector<16x32xf32> to vector<8x32xf32>
    %950 = vector.extract_strided_slice %1 {offsets = [0, 0], sizes = [8, 32], strides = [1, 1]} : vector<16x32xf32> to vector<8x32xf32>
    %951 = arith.negf %948 : vector<8x128xf32>
    %952 = math.exp %951 : vector<8x128xf32>
    %cst_292 = arith.constant 1.000000e+00 : f32
    %953 = vector.broadcast %cst_292 : f32 to vector<8x128xf32>
    %954 = arith.addf %953, %952 : vector<8x128xf32>
    %955 = arith.divf %953, %954 : vector<8x128xf32>
    %956 = math.tanh %948 : vector<8x128xf32>
    %957 = vector.extract_strided_slice %955 {offsets = [0, 32], sizes = [8, 32], strides = [1, 1]} : vector<8x128xf32> to vector<8x32xf32>
    %958 = arith.mulf %957, %950 : vector<8x32xf32>
    %959 = vector.extract_strided_slice %955 {offsets = [0, 0], sizes = [8, 32], strides = [1, 1]} : vector<8x128xf32> to vector<8x32xf32>
    %960 = vector.extract_strided_slice %956 {offsets = [0, 64], sizes = [8, 32], strides = [1, 1]} : vector<8x128xf32> to vector<8x32xf32>
    %961 = arith.mulf %959, %960 : vector<8x32xf32>
    %962 = arith.addf %958, %961 : vector<8x32xf32>
    %963 = vector.extract_strided_slice %955 {offsets = [0, 96], sizes = [8, 32], strides = [1, 1]} : vector<8x128xf32> to vector<8x32xf32>
    %964 = math.tanh %962 : vector<8x32xf32>
    %965 = arith.mulf %963, %964 : vector<8x32xf32>
    %966 = vector.shape_cast %942 : vector<8x1xi1> to vector<8x1xi1>
    %967 = vector.broadcast %966 : vector<8x1xi1> to vector<8x32xi1>
    %968 = arith.select %967, %965, %949 : vector<8x32xi1>, vector<8x32xf32>
    %969 = vector.shape_cast %942 : vector<8x1xi1> to vector<8x1xi1>
    %970 = vector.broadcast %969 : vector<8x1xi1> to vector<8x32xi1>
    %971 = arith.select %970, %962, %950 : vector<8x32xi1>, vector<8x32xf32>
    %972 = arith.truncf %968 : vector<8x32xf32> to vector<8x32xbf16>
    %cst_293 = arith.constant dense<0.000000e+00> : vector<8x128xf32>
    %973 = tpu.matmul %972, %932, %cst_293 {dimension_numbers = #tpu.dot_dimension_numbers<[1], [0], [0], [1], [0, 0, 1, 1], [], []>} : vector<8x32xbf16>, vector<32x128xbf16>, vector<8x128xf32> -> vector<8x128xf32>
    %974 = arith.addf %973, %935 : vector<8x128xf32>
    %975 = vector.extract_strided_slice %937 {offsets = [8, 128], sizes = [8, 128], strides = [1, 1]} : vector<16x256xf32> to vector<8x128xf32>
    %976 = arith.addf %974, %975 : vector<8x128xf32>
    %977 = vector.extract_strided_slice %919 {offsets = [8, 0], sizes = [8, 32], strides = [1, 1]} : vector<16x32xf32> to vector<8x32xf32>
    %978 = vector.extract_strided_slice %1 {offsets = [8, 0], sizes = [8, 32], strides = [1, 1]} : vector<16x32xf32> to vector<8x32xf32>
    %979 = arith.negf %976 : vector<8x128xf32>
    %980 = math.exp %979 : vector<8x128xf32>
    %cst_294 = arith.constant 1.000000e+00 : f32
    %981 = vector.broadcast %cst_294 : f32 to vector<8x128xf32>
    %982 = arith.addf %981, %980 : vector<8x128xf32>
    %983 = arith.divf %981, %982 : vector<8x128xf32>
    %984 = math.tanh %976 : vector<8x128xf32>
    %985 = vector.extract_strided_slice %983 {offsets = [0, 32], sizes = [8, 32], strides = [1, 1]} : vector<8x128xf32> to vector<8x32xf32>
    %986 = arith.mulf %985, %978 : vector<8x32xf32>
    %987 = vector.extract_strided_slice %983 {offsets = [0, 0], sizes = [8, 32], strides = [1, 1]} : vector<8x128xf32> to vector<8x32xf32>
    %988 = vector.extract_strided_slice %984 {offsets = [0, 64], sizes = [8, 32], strides = [1, 1]} : vector<8x128xf32> to vector<8x32xf32>
    %989 = arith.mulf %987, %988 : vector<8x32xf32>
    %990 = arith.addf %986, %989 : vector<8x32xf32>
    %991 = vector.extract_strided_slice %983 {offsets = [0, 96], sizes = [8, 32], strides = [1, 1]} : vector<8x128xf32> to vector<8x32xf32>
    %992 = math.tanh %990 : vector<8x32xf32>
    %993 = arith.mulf %991, %992 : vector<8x32xf32>
    %994 = vector.shape_cast %942 : vector<8x1xi1> to vector<8x1xi1>
    %995 = vector.broadcast %994 : vector<8x1xi1> to vector<8x32xi1>
    %996 = arith.select %995, %993, %977 : vector<8x32xi1>, vector<8x32xf32>
    %997 = vector.shape_cast %942 : vector<8x1xi1> to vector<8x1xi1>
    %998 = vector.broadcast %997 : vector<8x1xi1> to vector<8x32xi1>
    %999 = arith.select %998, %990, %978 : vector<8x32xi1>, vector<8x32xf32>
    %cst_295 = arith.constant 0.000000e+00 : f32
    %1000 = vector.shape_cast %942 : vector<8x1xi1> to vector<8x1xi1>
    %1001 = vector.broadcast %1000 : vector<8x1xi1> to vector<8x32xi1>
    %1002 = vector.broadcast %cst_295 : f32 to vector<8x32xf32>
    %1003 = arith.select %1001, %996, %1002 : vector<8x32xi1>, vector<8x32xf32>
    %1004 = arith.index_cast %c0_i32_285 : i32 to index
    %c0_296 = arith.constant 0 : index
    %c0_297 = arith.constant 0 : index
    %1005 = vector.load %arg26[%1004, %c0_296, %c0_297] : memref<8x8x32xf32, #tpu.memory_space<vmem>>, vector<1x8x32xf32>
    %1006 = vector.shape_cast %1005 : vector<1x8x32xf32> to vector<8x32xf32>
    %1007 = vector.shape_cast %1003 : vector<8x32xf32> to vector<1x8x32xf32>
    tpu.vector_store %arg26[%1004, %c0_296, %c0_297], %1007 {strides = array<i32>} : memref<8x8x32xf32, #tpu.memory_space<vmem>>, vector<1x8x32xf32>,
    %1008 = tpu.concatenate %968, %996 in 0 : vector<8x32xf32>, vector<8x32xf32> -> vector<16x32xf32>
    %1009 = tpu.concatenate %971, %999 in 0 : vector<8x32xf32>, vector<8x32xf32> -> vector<16x32xf32>
    %c1_i32_298 = arith.constant 1 : i32
    %1010 = arith.truncf %1008 : vector<16x32xf32> to vector<16x32xbf16>
    %cst_299 = arith.constant dense<0.000000e+00> : vector<16x256xf32>
    %1011 = tpu.matmul %1010, %931, %cst_299 {dimension_numbers = #tpu.dot_dimension_numbers<[1], [0], [0], [1], [0, 0, 1, 1], [], []>} : vector<16x32xbf16>, vector<32x256xbf16>, vector<16x256xf32> -> vector<16x256xf32>
    %1012 = arith.index_cast %c1_i32_298 : i32 to index
    %c0_300 = arith.constant 0 : index
    %c0_301 = arith.constant 0 : index
    %1013 = vector.load %arg4[%1012, %c0_300, %c0_301] : memref<8x8x1xf32, #tpu.memory_space<vmem>>, vector<1x8x1xf32>
    %1014 = vector.shape_cast %1013 : vector<1x8x1xf32> to vector<8x1xf32>
    %cst_302 = arith.constant 5.000000e-01 : f32
    %1015 = vector.broadcast %cst_302 : f32 to vector<8x1xf32>
    %1016 = arith.cmpf ogt, %1014, %1015 : vector<8x1xf32>
    %1017 = arith.index_cast %c1_i32_298 : i32 to index
    %c0_303 = arith.constant 0 : index
    %c0_304 = arith.constant 0 : index
    %1018 = vector.load %arg23[%1017, %c0_303, %c0_304] : memref<10x8x128xbf16, #tpu.memory_space<vmem>>, vector<1x8x128xbf16>
    %1019 = vector.shape_cast %1018 : vector<1x8x128xbf16> to vector<8x128xbf16>
    %1020 = arith.extf %1019 : vector<8x128xbf16> to vector<8x128xf32>
    %1021 = vector.extract_strided_slice %1011 {offsets = [0, 0], sizes = [8, 128], strides = [1, 1]} : vector<16x256xf32> to vector<8x128xf32>
    %1022 = arith.addf %1020, %1021 : vector<8x128xf32>
    %1023 = vector.extract_strided_slice %1008 {offsets = [0, 0], sizes = [8, 32], strides = [1, 1]} : vector<16x32xf32> to vector<8x32xf32>
    %1024 = vector.extract_strided_slice %1009 {offsets = [0, 0], sizes = [8, 32], strides = [1, 1]} : vector<16x32xf32> to vector<8x32xf32>
    %1025 = arith.negf %1022 : vector<8x128xf32>
    %1026 = math.exp %1025 : vector<8x128xf32>
    %cst_305 = arith.constant 1.000000e+00 : f32
    %1027 = vector.broadcast %cst_305 : f32 to vector<8x128xf32>
    %1028 = arith.addf %1027, %1026 : vector<8x128xf32>
    %1029 = arith.divf %1027, %1028 : vector<8x128xf32>
    %1030 = math.tanh %1022 : vector<8x128xf32>
    %1031 = vector.extract_strided_slice %1029 {offsets = [0, 32], sizes = [8, 32], strides = [1, 1]} : vector<8x128xf32> to vector<8x32xf32>
    %1032 = arith.mulf %1031, %1024 : vector<8x32xf32>
    %1033 = vector.extract_strided_slice %1029 {offsets = [0, 0], sizes = [8, 32], strides = [1, 1]} : vector<8x128xf32> to vector<8x32xf32>
    %1034 = vector.extract_strided_slice %1030 {offsets = [0, 64], sizes = [8, 32], strides = [1, 1]} : vector<8x128xf32> to vector<8x32xf32>
    %1035 = arith.mulf %1033, %1034 : vector<8x32xf32>
    %1036 = arith.addf %1032, %1035 : vector<8x32xf32>
    %1037 = vector.extract_strided_slice %1029 {offsets = [0, 96], sizes = [8, 32], strides = [1, 1]} : vector<8x128xf32> to vector<8x32xf32>
    %1038 = math.tanh %1036 : vector<8x32xf32>
    %1039 = arith.mulf %1037, %1038 : vector<8x32xf32>
    %1040 = vector.shape_cast %1016 : vector<8x1xi1> to vector<8x1xi1>
    %1041 = vector.broadcast %1040 : vector<8x1xi1> to vector<8x32xi1>
    %1042 = arith.select %1041, %1039, %1023 : vector<8x32xi1>, vector<8x32xf32>
    %1043 = vector.shape_cast %1016 : vector<8x1xi1> to vector<8x1xi1>
    %1044 = vector.broadcast %1043 : vector<8x1xi1> to vector<8x32xi1>
    %1045 = arith.select %1044, %1036, %1024 : vector<8x32xi1>, vector<8x32xf32>
    %1046 = arith.truncf %1042 : vector<8x32xf32> to vector<8x32xbf16>
    %cst_306 = arith.constant dense<0.000000e+00> : vector<8x128xf32>
    %1047 = tpu.matmul %1046, %932, %cst_306 {dimension_numbers = #tpu.dot_dimension_numbers<[1], [0], [0], [1], [0, 0, 1, 1], [], []>} : vector<8x32xbf16>, vector<32x128xbf16>, vector<8x128xf32> -> vector<8x128xf32>
    %1048 = arith.addf %1047, %935 : vector<8x128xf32>
    %1049 = vector.extract_strided_slice %1011 {offsets = [8, 128], sizes = [8, 128], strides = [1, 1]} : vector<16x256xf32> to vector<8x128xf32>
    %1050 = arith.addf %1048, %1049 : vector<8x128xf32>
    %1051 = vector.extract_strided_slice %1008 {offsets = [8, 0], sizes = [8, 32], strides = [1, 1]} : vector<16x32xf32> to vector<8x32xf32>
    %1052 = vector.extract_strided_slice %1009 {offsets = [8, 0], sizes = [8, 32], strides = [1, 1]} : vector<16x32xf32> to vector<8x32xf32>
    %1053 = arith.negf %1050 : vector<8x128xf32>
    %1054 = math.exp %1053 : vector<8x128xf32>
    %cst_307 = arith.constant 1.000000e+00 : f32
    %1055 = vector.broadcast %cst_307 : f32 to vector<8x128xf32>
    %1056 = arith.addf %1055, %1054 : vector<8x128xf32>
    %1057 = arith.divf %1055, %1056 : vector<8x128xf32>
    %1058 = math.tanh %1050 : vector<8x128xf32>
    %1059 = vector.extract_strided_slice %1057 {offsets = [0, 32], sizes = [8, 32], strides = [1, 1]} : vector<8x128xf32> to vector<8x32xf32>
    %1060 = arith.mulf %1059, %1052 : vector<8x32xf32>
    %1061 = vector.extract_strided_slice %1057 {offsets = [0, 0], sizes = [8, 32], strides = [1, 1]} : vector<8x128xf32> to vector<8x32xf32>
    %1062 = vector.extract_strided_slice %1058 {offsets = [0, 64], sizes = [8, 32], strides = [1, 1]} : vector<8x128xf32> to vector<8x32xf32>
    %1063 = arith.mulf %1061, %1062 : vector<8x32xf32>
    %1064 = arith.addf %1060, %1063 : vector<8x32xf32>
    %1065 = vector.extract_strided_slice %1057 {offsets = [0, 96], sizes = [8, 32], strides = [1, 1]} : vector<8x128xf32> to vector<8x32xf32>
    %1066 = math.tanh %1064 : vector<8x32xf32>
    %1067 = arith.mulf %1065, %1066 : vector<8x32xf32>
    %1068 = vector.shape_cast %1016 : vector<8x1xi1> to vector<8x1xi1>
    %1069 = vector.broadcast %1068 : vector<8x1xi1> to vector<8x32xi1>
    %1070 = arith.select %1069, %1067, %1051 : vector<8x32xi1>, vector<8x32xf32>
    %1071 = vector.shape_cast %1016 : vector<8x1xi1> to vector<8x1xi1>
    %1072 = vector.broadcast %1071 : vector<8x1xi1> to vector<8x32xi1>
    %1073 = arith.select %1072, %1064, %1052 : vector<8x32xi1>, vector<8x32xf32>
    %cst_308 = arith.constant 0.000000e+00 : f32
    %1074 = vector.shape_cast %1016 : vector<8x1xi1> to vector<8x1xi1>
    %1075 = vector.broadcast %1074 : vector<8x1xi1> to vector<8x32xi1>
    %1076 = vector.broadcast %cst_308 : f32 to vector<8x32xf32>
    %1077 = arith.select %1075, %1070, %1076 : vector<8x32xi1>, vector<8x32xf32>
    %1078 = arith.index_cast %c1_i32_298 : i32 to index
    %c0_309 = arith.constant 0 : index
    %c0_310 = arith.constant 0 : index
    %1079 = vector.load %arg26[%1078, %c0_309, %c0_310] : memref<8x8x32xf32, #tpu.memory_space<vmem>>, vector<1x8x32xf32>
    %1080 = vector.shape_cast %1079 : vector<1x8x32xf32> to vector<8x32xf32>
    %1081 = vector.shape_cast %1077 : vector<8x32xf32> to vector<1x8x32xf32>
    tpu.vector_store %arg26[%1078, %c0_309, %c0_310], %1081 {strides = array<i32>} : memref<8x8x32xf32, #tpu.memory_space<vmem>>, vector<1x8x32xf32>,
    %1082 = tpu.concatenate %1042, %1070 in 0 : vector<8x32xf32>, vector<8x32xf32> -> vector<16x32xf32>
    %1083 = tpu.concatenate %1045, %1073 in 0 : vector<8x32xf32>, vector<8x32xf32> -> vector<16x32xf32>
    %c2_i32_311 = arith.constant 2 : i32
    %1084 = arith.truncf %1082 : vector<16x32xf32> to vector<16x32xbf16>
    %cst_312 = arith.constant dense<0.000000e+00> : vector<16x256xf32>
    %1085 = tpu.matmul %1084, %931, %cst_312 {dimension_numbers = #tpu.dot_dimension_numbers<[1], [0], [0], [1], [0, 0, 1, 1], [], []>} : vector<16x32xbf16>, vector<32x256xbf16>, vector<16x256xf32> -> vector<16x256xf32>
    %1086 = arith.index_cast %c2_i32_311 : i32 to index
    %c0_313 = arith.constant 0 : index
    %c0_314 = arith.constant 0 : index
    %1087 = vector.load %arg4[%1086, %c0_313, %c0_314] : memref<8x8x1xf32, #tpu.memory_space<vmem>>, vector<1x8x1xf32>
    %1088 = vector.shape_cast %1087 : vector<1x8x1xf32> to vector<8x1xf32>
    %cst_315 = arith.constant 5.000000e-01 : f32
    %1089 = vector.broadcast %cst_315 : f32 to vector<8x1xf32>
    %1090 = arith.cmpf ogt, %1088, %1089 : vector<8x1xf32>
    %1091 = arith.index_cast %c2_i32_311 : i32 to index
    %c0_316 = arith.constant 0 : index
    %c0_317 = arith.constant 0 : index
    %1092 = vector.load %arg23[%1091, %c0_316, %c0_317] : memref<10x8x128xbf16, #tpu.memory_space<vmem>>, vector<1x8x128xbf16>
    %1093 = vector.shape_cast %1092 : vector<1x8x128xbf16> to vector<8x128xbf16>
    %1094 = arith.extf %1093 : vector<8x128xbf16> to vector<8x128xf32>
    %1095 = vector.extract_strided_slice %1085 {offsets = [0, 0], sizes = [8, 128], strides = [1, 1]} : vector<16x256xf32> to vector<8x128xf32>
    %1096 = arith.addf %1094, %1095 : vector<8x128xf32>
    %1097 = vector.extract_strided_slice %1082 {offsets = [0, 0], sizes = [8, 32], strides = [1, 1]} : vector<16x32xf32> to vector<8x32xf32>
    %1098 = vector.extract_strided_slice %1083 {offsets = [0, 0], sizes = [8, 32], strides = [1, 1]} : vector<16x32xf32> to vector<8x32xf32>
    %1099 = arith.negf %1096 : vector<8x128xf32>
    %1100 = math.exp %1099 : vector<8x128xf32>
    %cst_318 = arith.constant 1.000000e+00 : f32
    %1101 = vector.broadcast %cst_318 : f32 to vector<8x128xf32>
    %1102 = arith.addf %1101, %1100 : vector<8x128xf32>
    %1103 = arith.divf %1101, %1102 : vector<8x128xf32>
    %1104 = math.tanh %1096 : vector<8x128xf32>
    %1105 = vector.extract_strided_slice %1103 {offsets = [0, 32], sizes = [8, 32], strides = [1, 1]} : vector<8x128xf32> to vector<8x32xf32>
    %1106 = arith.mulf %1105, %1098 : vector<8x32xf32>
    %1107 = vector.extract_strided_slice %1103 {offsets = [0, 0], sizes = [8, 32], strides = [1, 1]} : vector<8x128xf32> to vector<8x32xf32>
    %1108 = vector.extract_strided_slice %1104 {offsets = [0, 64], sizes = [8, 32], strides = [1, 1]} : vector<8x128xf32> to vector<8x32xf32>
    %1109 = arith.mulf %1107, %1108 : vector<8x32xf32>
    %1110 = arith.addf %1106, %1109 : vector<8x32xf32>
    %1111 = vector.extract_strided_slice %1103 {offsets = [0, 96], sizes = [8, 32], strides = [1, 1]} : vector<8x128xf32> to vector<8x32xf32>
    %1112 = math.tanh %1110 : vector<8x32xf32>
    %1113 = arith.mulf %1111, %1112 : vector<8x32xf32>
    %1114 = vector.shape_cast %1090 : vector<8x1xi1> to vector<8x1xi1>
    %1115 = vector.broadcast %1114 : vector<8x1xi1> to vector<8x32xi1>
    %1116 = arith.select %1115, %1113, %1097 : vector<8x32xi1>, vector<8x32xf32>
    %1117 = vector.shape_cast %1090 : vector<8x1xi1> to vector<8x1xi1>
    %1118 = vector.broadcast %1117 : vector<8x1xi1> to vector<8x32xi1>
    %1119 = arith.select %1118, %1110, %1098 : vector<8x32xi1>, vector<8x32xf32>
    %1120 = arith.truncf %1116 : vector<8x32xf32> to vector<8x32xbf16>
    %cst_319 = arith.constant dense<0.000000e+00> : vector<8x128xf32>
    %1121 = tpu.matmul %1120, %932, %cst_319 {dimension_numbers = #tpu.dot_dimension_numbers<[1], [0], [0], [1], [0, 0, 1, 1], [], []>} : vector<8x32xbf16>, vector<32x128xbf16>, vector<8x128xf32> -> vector<8x128xf32>
    %1122 = arith.addf %1121, %935 : vector<8x128xf32>
    %1123 = vector.extract_strided_slice %1085 {offsets = [8, 128], sizes = [8, 128], strides = [1, 1]} : vector<16x256xf32> to vector<8x128xf32>
    %1124 = arith.addf %1122, %1123 : vector<8x128xf32>
    %1125 = vector.extract_strided_slice %1082 {offsets = [8, 0], sizes = [8, 32], strides = [1, 1]} : vector<16x32xf32> to vector<8x32xf32>
    %1126 = vector.extract_strided_slice %1083 {offsets = [8, 0], sizes = [8, 32], strides = [1, 1]} : vector<16x32xf32> to vector<8x32xf32>
    %1127 = arith.negf %1124 : vector<8x128xf32>
    %1128 = math.exp %1127 : vector<8x128xf32>
    %cst_320 = arith.constant 1.000000e+00 : f32
    %1129 = vector.broadcast %cst_320 : f32 to vector<8x128xf32>
    %1130 = arith.addf %1129, %1128 : vector<8x128xf32>
    %1131 = arith.divf %1129, %1130 : vector<8x128xf32>
    %1132 = math.tanh %1124 : vector<8x128xf32>
    %1133 = vector.extract_strided_slice %1131 {offsets = [0, 32], sizes = [8, 32], strides = [1, 1]} : vector<8x128xf32> to vector<8x32xf32>
    %1134 = arith.mulf %1133, %1126 : vector<8x32xf32>
    %1135 = vector.extract_strided_slice %1131 {offsets = [0, 0], sizes = [8, 32], strides = [1, 1]} : vector<8x128xf32> to vector<8x32xf32>
    %1136 = vector.extract_strided_slice %1132 {offsets = [0, 64], sizes = [8, 32], strides = [1, 1]} : vector<8x128xf32> to vector<8x32xf32>
    %1137 = arith.mulf %1135, %1136 : vector<8x32xf32>
    %1138 = arith.addf %1134, %1137 : vector<8x32xf32>
    %1139 = vector.extract_strided_slice %1131 {offsets = [0, 96], sizes = [8, 32], strides = [1, 1]} : vector<8x128xf32> to vector<8x32xf32>
    %1140 = math.tanh %1138 : vector<8x32xf32>
    %1141 = arith.mulf %1139, %1140 : vector<8x32xf32>
    %1142 = vector.shape_cast %1090 : vector<8x1xi1> to vector<8x1xi1>
    %1143 = vector.broadcast %1142 : vector<8x1xi1> to vector<8x32xi1>
    %1144 = arith.select %1143, %1141, %1125 : vector<8x32xi1>, vector<8x32xf32>
    %1145 = vector.shape_cast %1090 : vector<8x1xi1> to vector<8x1xi1>
    %1146 = vector.broadcast %1145 : vector<8x1xi1> to vector<8x32xi1>
    %1147 = arith.select %1146, %1138, %1126 : vector<8x32xi1>, vector<8x32xf32>
    %cst_321 = arith.constant 0.000000e+00 : f32
    %1148 = vector.shape_cast %1090 : vector<8x1xi1> to vector<8x1xi1>
    %1149 = vector.broadcast %1148 : vector<8x1xi1> to vector<8x32xi1>
    %1150 = vector.broadcast %cst_321 : f32 to vector<8x32xf32>
    %1151 = arith.select %1149, %1144, %1150 : vector<8x32xi1>, vector<8x32xf32>
    %1152 = arith.index_cast %c2_i32_311 : i32 to index
    %c0_322 = arith.constant 0 : index
    %c0_323 = arith.constant 0 : index
    %1153 = vector.load %arg26[%1152, %c0_322, %c0_323] : memref<8x8x32xf32, #tpu.memory_space<vmem>>, vector<1x8x32xf32>
    %1154 = vector.shape_cast %1153 : vector<1x8x32xf32> to vector<8x32xf32>
    %1155 = vector.shape_cast %1151 : vector<8x32xf32> to vector<1x8x32xf32>
    tpu.vector_store %arg26[%1152, %c0_322, %c0_323], %1155 {strides = array<i32>} : memref<8x8x32xf32, #tpu.memory_space<vmem>>, vector<1x8x32xf32>,
    %1156 = tpu.concatenate %1116, %1144 in 0 : vector<8x32xf32>, vector<8x32xf32> -> vector<16x32xf32>
    %1157 = tpu.concatenate %1119, %1147 in 0 : vector<8x32xf32>, vector<8x32xf32> -> vector<16x32xf32>
    %c3_i32_324 = arith.constant 3 : i32
    %1158 = arith.truncf %1156 : vector<16x32xf32> to vector<16x32xbf16>
    %cst_325 = arith.constant dense<0.000000e+00> : vector<16x256xf32>
    %1159 = tpu.matmul %1158, %931, %cst_325 {dimension_numbers = #tpu.dot_dimension_numbers<[1], [0], [0], [1], [0, 0, 1, 1], [], []>} : vector<16x32xbf16>, vector<32x256xbf16>, vector<16x256xf32> -> vector<16x256xf32>
    %1160 = arith.index_cast %c3_i32_324 : i32 to index
    %c0_326 = arith.constant 0 : index
    %c0_327 = arith.constant 0 : index
    %1161 = vector.load %arg4[%1160, %c0_326, %c0_327] : memref<8x8x1xf32, #tpu.memory_space<vmem>>, vector<1x8x1xf32>
    %1162 = vector.shape_cast %1161 : vector<1x8x1xf32> to vector<8x1xf32>
    %cst_328 = arith.constant 5.000000e-01 : f32
    %1163 = vector.broadcast %cst_328 : f32 to vector<8x1xf32>
    %1164 = arith.cmpf ogt, %1162, %1163 : vector<8x1xf32>
    %1165 = arith.index_cast %c3_i32_324 : i32 to index
    %c0_329 = arith.constant 0 : index
    %c0_330 = arith.constant 0 : index
    %1166 = vector.load %arg23[%1165, %c0_329, %c0_330] : memref<10x8x128xbf16, #tpu.memory_space<vmem>>, vector<1x8x128xbf16>
    %1167 = vector.shape_cast %1166 : vector<1x8x128xbf16> to vector<8x128xbf16>
    %1168 = arith.extf %1167 : vector<8x128xbf16> to vector<8x128xf32>
    %1169 = vector.extract_strided_slice %1159 {offsets = [0, 0], sizes = [8, 128], strides = [1, 1]} : vector<16x256xf32> to vector<8x128xf32>
    %1170 = arith.addf %1168, %1169 : vector<8x128xf32>
    %1171 = vector.extract_strided_slice %1156 {offsets = [0, 0], sizes = [8, 32], strides = [1, 1]} : vector<16x32xf32> to vector<8x32xf32>
    %1172 = vector.extract_strided_slice %1157 {offsets = [0, 0], sizes = [8, 32], strides = [1, 1]} : vector<16x32xf32> to vector<8x32xf32>
    %1173 = arith.negf %1170 : vector<8x128xf32>
    %1174 = math.exp %1173 : vector<8x128xf32>
    %cst_331 = arith.constant 1.000000e+00 : f32
    %1175 = vector.broadcast %cst_331 : f32 to vector<8x128xf32>
    %1176 = arith.addf %1175, %1174 : vector<8x128xf32>
    %1177 = arith.divf %1175, %1176 : vector<8x128xf32>
    %1178 = math.tanh %1170 : vector<8x128xf32>
    %1179 = vector.extract_strided_slice %1177 {offsets = [0, 32], sizes = [8, 32], strides = [1, 1]} : vector<8x128xf32> to vector<8x32xf32>
    %1180 = arith.mulf %1179, %1172 : vector<8x32xf32>
    %1181 = vector.extract_strided_slice %1177 {offsets = [0, 0], sizes = [8, 32], strides = [1, 1]} : vector<8x128xf32> to vector<8x32xf32>
    %1182 = vector.extract_strided_slice %1178 {offsets = [0, 64], sizes = [8, 32], strides = [1, 1]} : vector<8x128xf32> to vector<8x32xf32>
    %1183 = arith.mulf %1181, %1182 : vector<8x32xf32>
    %1184 = arith.addf %1180, %1183 : vector<8x32xf32>
    %1185 = vector.extract_strided_slice %1177 {offsets = [0, 96], sizes = [8, 32], strides = [1, 1]} : vector<8x128xf32> to vector<8x32xf32>
    %1186 = math.tanh %1184 : vector<8x32xf32>
    %1187 = arith.mulf %1185, %1186 : vector<8x32xf32>
    %1188 = vector.shape_cast %1164 : vector<8x1xi1> to vector<8x1xi1>
    %1189 = vector.broadcast %1188 : vector<8x1xi1> to vector<8x32xi1>
    %1190 = arith.select %1189, %1187, %1171 : vector<8x32xi1>, vector<8x32xf32>
    %1191 = vector.shape_cast %1164 : vector<8x1xi1> to vector<8x1xi1>
    %1192 = vector.broadcast %1191 : vector<8x1xi1> to vector<8x32xi1>
    %1193 = arith.select %1192, %1184, %1172 : vector<8x32xi1>, vector<8x32xf32>
    %1194 = arith.truncf %1190 : vector<8x32xf32> to vector<8x32xbf16>
    %cst_332 = arith.constant dense<0.000000e+00> : vector<8x128xf32>
    %1195 = tpu.matmul %1194, %932, %cst_332 {dimension_numbers = #tpu.dot_dimension_numbers<[1], [0], [0], [1], [0, 0, 1, 1], [], []>} : vector<8x32xbf16>, vector<32x128xbf16>, vector<8x128xf32> -> vector<8x128xf32>
    %1196 = arith.addf %1195, %935 : vector<8x128xf32>
    %1197 = vector.extract_strided_slice %1159 {offsets = [8, 128], sizes = [8, 128], strides = [1, 1]} : vector<16x256xf32> to vector<8x128xf32>
    %1198 = arith.addf %1196, %1197 : vector<8x128xf32>
    %1199 = vector.extract_strided_slice %1156 {offsets = [8, 0], sizes = [8, 32], strides = [1, 1]} : vector<16x32xf32> to vector<8x32xf32>
    %1200 = vector.extract_strided_slice %1157 {offsets = [8, 0], sizes = [8, 32], strides = [1, 1]} : vector<16x32xf32> to vector<8x32xf32>
    %1201 = arith.negf %1198 : vector<8x128xf32>
    %1202 = math.exp %1201 : vector<8x128xf32>
    %cst_333 = arith.constant 1.000000e+00 : f32
    %1203 = vector.broadcast %cst_333 : f32 to vector<8x128xf32>
    %1204 = arith.addf %1203, %1202 : vector<8x128xf32>
    %1205 = arith.divf %1203, %1204 : vector<8x128xf32>
    %1206 = math.tanh %1198 : vector<8x128xf32>
    %1207 = vector.extract_strided_slice %1205 {offsets = [0, 32], sizes = [8, 32], strides = [1, 1]} : vector<8x128xf32> to vector<8x32xf32>
    %1208 = arith.mulf %1207, %1200 : vector<8x32xf32>
    %1209 = vector.extract_strided_slice %1205 {offsets = [0, 0], sizes = [8, 32], strides = [1, 1]} : vector<8x128xf32> to vector<8x32xf32>
    %1210 = vector.extract_strided_slice %1206 {offsets = [0, 64], sizes = [8, 32], strides = [1, 1]} : vector<8x128xf32> to vector<8x32xf32>
    %1211 = arith.mulf %1209, %1210 : vector<8x32xf32>
    %1212 = arith.addf %1208, %1211 : vector<8x32xf32>
    %1213 = vector.extract_strided_slice %1205 {offsets = [0, 96], sizes = [8, 32], strides = [1, 1]} : vector<8x128xf32> to vector<8x32xf32>
    %1214 = math.tanh %1212 : vector<8x32xf32>
    %1215 = arith.mulf %1213, %1214 : vector<8x32xf32>
    %1216 = vector.shape_cast %1164 : vector<8x1xi1> to vector<8x1xi1>
    %1217 = vector.broadcast %1216 : vector<8x1xi1> to vector<8x32xi1>
    %1218 = arith.select %1217, %1215, %1199 : vector<8x32xi1>, vector<8x32xf32>
    %1219 = vector.shape_cast %1164 : vector<8x1xi1> to vector<8x1xi1>
    %1220 = vector.broadcast %1219 : vector<8x1xi1> to vector<8x32xi1>
    %1221 = arith.select %1220, %1212, %1200 : vector<8x32xi1>, vector<8x32xf32>
    %cst_334 = arith.constant 0.000000e+00 : f32
    %1222 = vector.shape_cast %1164 : vector<8x1xi1> to vector<8x1xi1>
    %1223 = vector.broadcast %1222 : vector<8x1xi1> to vector<8x32xi1>
    %1224 = vector.broadcast %cst_334 : f32 to vector<8x32xf32>
    %1225 = arith.select %1223, %1218, %1224 : vector<8x32xi1>, vector<8x32xf32>
    %1226 = arith.index_cast %c3_i32_324 : i32 to index
    %c0_335 = arith.constant 0 : index
    %c0_336 = arith.constant 0 : index
    %1227 = vector.load %arg26[%1226, %c0_335, %c0_336] : memref<8x8x32xf32, #tpu.memory_space<vmem>>, vector<1x8x32xf32>
    %1228 = vector.shape_cast %1227 : vector<1x8x32xf32> to vector<8x32xf32>
    %1229 = vector.shape_cast %1225 : vector<8x32xf32> to vector<1x8x32xf32>
    tpu.vector_store %arg26[%1226, %c0_335, %c0_336], %1229 {strides = array<i32>} : memref<8x8x32xf32, #tpu.memory_space<vmem>>, vector<1x8x32xf32>,
    %1230 = tpu.concatenate %1190, %1218 in 0 : vector<8x32xf32>, vector<8x32xf32> -> vector<16x32xf32>
    %1231 = tpu.concatenate %1193, %1221 in 0 : vector<8x32xf32>, vector<8x32xf32> -> vector<16x32xf32>
    %c4_i32_337 = arith.constant 4 : i32
    %1232 = arith.truncf %1230 : vector<16x32xf32> to vector<16x32xbf16>
    %cst_338 = arith.constant dense<0.000000e+00> : vector<16x256xf32>
    %1233 = tpu.matmul %1232, %931, %cst_338 {dimension_numbers = #tpu.dot_dimension_numbers<[1], [0], [0], [1], [0, 0, 1, 1], [], []>} : vector<16x32xbf16>, vector<32x256xbf16>, vector<16x256xf32> -> vector<16x256xf32>
    %1234 = arith.index_cast %c4_i32_337 : i32 to index
    %c0_339 = arith.constant 0 : index
    %c0_340 = arith.constant 0 : index
    %1235 = vector.load %arg4[%1234, %c0_339, %c0_340] : memref<8x8x1xf32, #tpu.memory_space<vmem>>, vector<1x8x1xf32>
    %1236 = vector.shape_cast %1235 : vector<1x8x1xf32> to vector<8x1xf32>
    %cst_341 = arith.constant 5.000000e-01 : f32
    %1237 = vector.broadcast %cst_341 : f32 to vector<8x1xf32>
    %1238 = arith.cmpf ogt, %1236, %1237 : vector<8x1xf32>
    %1239 = arith.index_cast %c4_i32_337 : i32 to index
    %c0_342 = arith.constant 0 : index
    %c0_343 = arith.constant 0 : index
    %1240 = vector.load %arg23[%1239, %c0_342, %c0_343] : memref<10x8x128xbf16, #tpu.memory_space<vmem>>, vector<1x8x128xbf16>
    %1241 = vector.shape_cast %1240 : vector<1x8x128xbf16> to vector<8x128xbf16>
    %1242 = arith.extf %1241 : vector<8x128xbf16> to vector<8x128xf32>
    %1243 = vector.extract_strided_slice %1233 {offsets = [0, 0], sizes = [8, 128], strides = [1, 1]} : vector<16x256xf32> to vector<8x128xf32>
    %1244 = arith.addf %1242, %1243 : vector<8x128xf32>
    %1245 = vector.extract_strided_slice %1230 {offsets = [0, 0], sizes = [8, 32], strides = [1, 1]} : vector<16x32xf32> to vector<8x32xf32>
    %1246 = vector.extract_strided_slice %1231 {offsets = [0, 0], sizes = [8, 32], strides = [1, 1]} : vector<16x32xf32> to vector<8x32xf32>
    %1247 = arith.negf %1244 : vector<8x128xf32>
    %1248 = math.exp %1247 : vector<8x128xf32>
    %cst_344 = arith.constant 1.000000e+00 : f32
    %1249 = vector.broadcast %cst_344 : f32 to vector<8x128xf32>
    %1250 = arith.addf %1249, %1248 : vector<8x128xf32>
    %1251 = arith.divf %1249, %1250 : vector<8x128xf32>
    %1252 = math.tanh %1244 : vector<8x128xf32>
    %1253 = vector.extract_strided_slice %1251 {offsets = [0, 32], sizes = [8, 32], strides = [1, 1]} : vector<8x128xf32> to vector<8x32xf32>
    %1254 = arith.mulf %1253, %1246 : vector<8x32xf32>
    %1255 = vector.extract_strided_slice %1251 {offsets = [0, 0], sizes = [8, 32], strides = [1, 1]} : vector<8x128xf32> to vector<8x32xf32>
    %1256 = vector.extract_strided_slice %1252 {offsets = [0, 64], sizes = [8, 32], strides = [1, 1]} : vector<8x128xf32> to vector<8x32xf32>
    %1257 = arith.mulf %1255, %1256 : vector<8x32xf32>
    %1258 = arith.addf %1254, %1257 : vector<8x32xf32>
    %1259 = vector.extract_strided_slice %1251 {offsets = [0, 96], sizes = [8, 32], strides = [1, 1]} : vector<8x128xf32> to vector<8x32xf32>
    %1260 = math.tanh %1258 : vector<8x32xf32>
    %1261 = arith.mulf %1259, %1260 : vector<8x32xf32>
    %1262 = vector.shape_cast %1238 : vector<8x1xi1> to vector<8x1xi1>
    %1263 = vector.broadcast %1262 : vector<8x1xi1> to vector<8x32xi1>
    %1264 = arith.select %1263, %1261, %1245 : vector<8x32xi1>, vector<8x32xf32>
    %1265 = vector.shape_cast %1238 : vector<8x1xi1> to vector<8x1xi1>
    %1266 = vector.broadcast %1265 : vector<8x1xi1> to vector<8x32xi1>
    %1267 = arith.select %1266, %1258, %1246 : vector<8x32xi1>, vector<8x32xf32>
    %1268 = arith.truncf %1264 : vector<8x32xf32> to vector<8x32xbf16>
    %cst_345 = arith.constant dense<0.000000e+00> : vector<8x128xf32>
    %1269 = tpu.matmul %1268, %932, %cst_345 {dimension_numbers = #tpu.dot_dimension_numbers<[1], [0], [0], [1], [0, 0, 1, 1], [], []>} : vector<8x32xbf16>, vector<32x128xbf16>, vector<8x128xf32> -> vector<8x128xf32>
    %1270 = arith.addf %1269, %935 : vector<8x128xf32>
    %1271 = vector.extract_strided_slice %1233 {offsets = [8, 128], sizes = [8, 128], strides = [1, 1]} : vector<16x256xf32> to vector<8x128xf32>
    %1272 = arith.addf %1270, %1271 : vector<8x128xf32>
    %1273 = vector.extract_strided_slice %1230 {offsets = [8, 0], sizes = [8, 32], strides = [1, 1]} : vector<16x32xf32> to vector<8x32xf32>
    %1274 = vector.extract_strided_slice %1231 {offsets = [8, 0], sizes = [8, 32], strides = [1, 1]} : vector<16x32xf32> to vector<8x32xf32>
    %1275 = arith.negf %1272 : vector<8x128xf32>
    %1276 = math.exp %1275 : vector<8x128xf32>
    %cst_346 = arith.constant 1.000000e+00 : f32
    %1277 = vector.broadcast %cst_346 : f32 to vector<8x128xf32>
    %1278 = arith.addf %1277, %1276 : vector<8x128xf32>
    %1279 = arith.divf %1277, %1278 : vector<8x128xf32>
    %1280 = math.tanh %1272 : vector<8x128xf32>
    %1281 = vector.extract_strided_slice %1279 {offsets = [0, 32], sizes = [8, 32], strides = [1, 1]} : vector<8x128xf32> to vector<8x32xf32>
    %1282 = arith.mulf %1281, %1274 : vector<8x32xf32>
    %1283 = vector.extract_strided_slice %1279 {offsets = [0, 0], sizes = [8, 32], strides = [1, 1]} : vector<8x128xf32> to vector<8x32xf32>
    %1284 = vector.extract_strided_slice %1280 {offsets = [0, 64], sizes = [8, 32], strides = [1, 1]} : vector<8x128xf32> to vector<8x32xf32>
    %1285 = arith.mulf %1283, %1284 : vector<8x32xf32>
    %1286 = arith.addf %1282, %1285 : vector<8x32xf32>
    %1287 = vector.extract_strided_slice %1279 {offsets = [0, 96], sizes = [8, 32], strides = [1, 1]} : vector<8x128xf32> to vector<8x32xf32>
    %1288 = math.tanh %1286 : vector<8x32xf32>
    %1289 = arith.mulf %1287, %1288 : vector<8x32xf32>
    %1290 = vector.shape_cast %1238 : vector<8x1xi1> to vector<8x1xi1>
    %1291 = vector.broadcast %1290 : vector<8x1xi1> to vector<8x32xi1>
    %1292 = arith.select %1291, %1289, %1273 : vector<8x32xi1>, vector<8x32xf32>
    %1293 = vector.shape_cast %1238 : vector<8x1xi1> to vector<8x1xi1>
    %1294 = vector.broadcast %1293 : vector<8x1xi1> to vector<8x32xi1>
    %1295 = arith.select %1294, %1286, %1274 : vector<8x32xi1>, vector<8x32xf32>
    %cst_347 = arith.constant 0.000000e+00 : f32
    %1296 = vector.shape_cast %1238 : vector<8x1xi1> to vector<8x1xi1>
    %1297 = vector.broadcast %1296 : vector<8x1xi1> to vector<8x32xi1>
    %1298 = vector.broadcast %cst_347 : f32 to vector<8x32xf32>
    %1299 = arith.select %1297, %1292, %1298 : vector<8x32xi1>, vector<8x32xf32>
    %1300 = arith.index_cast %c4_i32_337 : i32 to index
    %c0_348 = arith.constant 0 : index
    %c0_349 = arith.constant 0 : index
    %1301 = vector.load %arg26[%1300, %c0_348, %c0_349] : memref<8x8x32xf32, #tpu.memory_space<vmem>>, vector<1x8x32xf32>
    %1302 = vector.shape_cast %1301 : vector<1x8x32xf32> to vector<8x32xf32>
    %1303 = vector.shape_cast %1299 : vector<8x32xf32> to vector<1x8x32xf32>
    tpu.vector_store %arg26[%1300, %c0_348, %c0_349], %1303 {strides = array<i32>} : memref<8x8x32xf32, #tpu.memory_space<vmem>>, vector<1x8x32xf32>,
    %1304 = tpu.concatenate %1264, %1292 in 0 : vector<8x32xf32>, vector<8x32xf32> -> vector<16x32xf32>
    %1305 = tpu.concatenate %1267, %1295 in 0 : vector<8x32xf32>, vector<8x32xf32> -> vector<16x32xf32>
    %c5_i32_350 = arith.constant 5 : i32
    %1306 = arith.truncf %1304 : vector<16x32xf32> to vector<16x32xbf16>
    %cst_351 = arith.constant dense<0.000000e+00> : vector<16x256xf32>
    %1307 = tpu.matmul %1306, %931, %cst_351 {dimension_numbers = #tpu.dot_dimension_numbers<[1], [0], [0], [1], [0, 0, 1, 1], [], []>} : vector<16x32xbf16>, vector<32x256xbf16>, vector<16x256xf32> -> vector<16x256xf32>
    %1308 = arith.index_cast %c5_i32_350 : i32 to index
    %c0_352 = arith.constant 0 : index
    %c0_353 = arith.constant 0 : index
    %1309 = vector.load %arg4[%1308, %c0_352, %c0_353] : memref<8x8x1xf32, #tpu.memory_space<vmem>>, vector<1x8x1xf32>
    %1310 = vector.shape_cast %1309 : vector<1x8x1xf32> to vector<8x1xf32>
    %cst_354 = arith.constant 5.000000e-01 : f32
    %1311 = vector.broadcast %cst_354 : f32 to vector<8x1xf32>
    %1312 = arith.cmpf ogt, %1310, %1311 : vector<8x1xf32>
    %1313 = arith.index_cast %c5_i32_350 : i32 to index
    %c0_355 = arith.constant 0 : index
    %c0_356 = arith.constant 0 : index
    %1314 = vector.load %arg23[%1313, %c0_355, %c0_356] : memref<10x8x128xbf16, #tpu.memory_space<vmem>>, vector<1x8x128xbf16>
    %1315 = vector.shape_cast %1314 : vector<1x8x128xbf16> to vector<8x128xbf16>
    %1316 = arith.extf %1315 : vector<8x128xbf16> to vector<8x128xf32>
    %1317 = vector.extract_strided_slice %1307 {offsets = [0, 0], sizes = [8, 128], strides = [1, 1]} : vector<16x256xf32> to vector<8x128xf32>
    %1318 = arith.addf %1316, %1317 : vector<8x128xf32>
    %1319 = vector.extract_strided_slice %1304 {offsets = [0, 0], sizes = [8, 32], strides = [1, 1]} : vector<16x32xf32> to vector<8x32xf32>
    %1320 = vector.extract_strided_slice %1305 {offsets = [0, 0], sizes = [8, 32], strides = [1, 1]} : vector<16x32xf32> to vector<8x32xf32>
    %1321 = arith.negf %1318 : vector<8x128xf32>
    %1322 = math.exp %1321 : vector<8x128xf32>
    %cst_357 = arith.constant 1.000000e+00 : f32
    %1323 = vector.broadcast %cst_357 : f32 to vector<8x128xf32>
    %1324 = arith.addf %1323, %1322 : vector<8x128xf32>
    %1325 = arith.divf %1323, %1324 : vector<8x128xf32>
    %1326 = math.tanh %1318 : vector<8x128xf32>
    %1327 = vector.extract_strided_slice %1325 {offsets = [0, 32], sizes = [8, 32], strides = [1, 1]} : vector<8x128xf32> to vector<8x32xf32>
    %1328 = arith.mulf %1327, %1320 : vector<8x32xf32>
    %1329 = vector.extract_strided_slice %1325 {offsets = [0, 0], sizes = [8, 32], strides = [1, 1]} : vector<8x128xf32> to vector<8x32xf32>
    %1330 = vector.extract_strided_slice %1326 {offsets = [0, 64], sizes = [8, 32], strides = [1, 1]} : vector<8x128xf32> to vector<8x32xf32>
    %1331 = arith.mulf %1329, %1330 : vector<8x32xf32>
    %1332 = arith.addf %1328, %1331 : vector<8x32xf32>
    %1333 = vector.extract_strided_slice %1325 {offsets = [0, 96], sizes = [8, 32], strides = [1, 1]} : vector<8x128xf32> to vector<8x32xf32>
    %1334 = math.tanh %1332 : vector<8x32xf32>
    %1335 = arith.mulf %1333, %1334 : vector<8x32xf32>
    %1336 = vector.shape_cast %1312 : vector<8x1xi1> to vector<8x1xi1>
    %1337 = vector.broadcast %1336 : vector<8x1xi1> to vector<8x32xi1>
    %1338 = arith.select %1337, %1335, %1319 : vector<8x32xi1>, vector<8x32xf32>
    %1339 = vector.shape_cast %1312 : vector<8x1xi1> to vector<8x1xi1>
    %1340 = vector.broadcast %1339 : vector<8x1xi1> to vector<8x32xi1>
    %1341 = arith.select %1340, %1332, %1320 : vector<8x32xi1>, vector<8x32xf32>
    %1342 = arith.truncf %1338 : vector<8x32xf32> to vector<8x32xbf16>
    %cst_358 = arith.constant dense<0.000000e+00> : vector<8x128xf32>
    %1343 = tpu.matmul %1342, %932, %cst_358 {dimension_numbers = #tpu.dot_dimension_numbers<[1], [0], [0], [1], [0, 0, 1, 1], [], []>} : vector<8x32xbf16>, vector<32x128xbf16>, vector<8x128xf32> -> vector<8x128xf32>
    %1344 = arith.addf %1343, %935 : vector<8x128xf32>
    %1345 = vector.extract_strided_slice %1307 {offsets = [8, 128], sizes = [8, 128], strides = [1, 1]} : vector<16x256xf32> to vector<8x128xf32>
    %1346 = arith.addf %1344, %1345 : vector<8x128xf32>
    %1347 = vector.extract_strided_slice %1304 {offsets = [8, 0], sizes = [8, 32], strides = [1, 1]} : vector<16x32xf32> to vector<8x32xf32>
    %1348 = vector.extract_strided_slice %1305 {offsets = [8, 0], sizes = [8, 32], strides = [1, 1]} : vector<16x32xf32> to vector<8x32xf32>
    %1349 = arith.negf %1346 : vector<8x128xf32>
    %1350 = math.exp %1349 : vector<8x128xf32>
    %cst_359 = arith.constant 1.000000e+00 : f32
    %1351 = vector.broadcast %cst_359 : f32 to vector<8x128xf32>
    %1352 = arith.addf %1351, %1350 : vector<8x128xf32>
    %1353 = arith.divf %1351, %1352 : vector<8x128xf32>
    %1354 = math.tanh %1346 : vector<8x128xf32>
    %1355 = vector.extract_strided_slice %1353 {offsets = [0, 32], sizes = [8, 32], strides = [1, 1]} : vector<8x128xf32> to vector<8x32xf32>
    %1356 = arith.mulf %1355, %1348 : vector<8x32xf32>
    %1357 = vector.extract_strided_slice %1353 {offsets = [0, 0], sizes = [8, 32], strides = [1, 1]} : vector<8x128xf32> to vector<8x32xf32>
    %1358 = vector.extract_strided_slice %1354 {offsets = [0, 64], sizes = [8, 32], strides = [1, 1]} : vector<8x128xf32> to vector<8x32xf32>
    %1359 = arith.mulf %1357, %1358 : vector<8x32xf32>
    %1360 = arith.addf %1356, %1359 : vector<8x32xf32>
    %1361 = vector.extract_strided_slice %1353 {offsets = [0, 96], sizes = [8, 32], strides = [1, 1]} : vector<8x128xf32> to vector<8x32xf32>
    %1362 = math.tanh %1360 : vector<8x32xf32>
    %1363 = arith.mulf %1361, %1362 : vector<8x32xf32>
    %1364 = vector.shape_cast %1312 : vector<8x1xi1> to vector<8x1xi1>
    %1365 = vector.broadcast %1364 : vector<8x1xi1> to vector<8x32xi1>
    %1366 = arith.select %1365, %1363, %1347 : vector<8x32xi1>, vector<8x32xf32>
    %1367 = vector.shape_cast %1312 : vector<8x1xi1> to vector<8x1xi1>
    %1368 = vector.broadcast %1367 : vector<8x1xi1> to vector<8x32xi1>
    %1369 = arith.select %1368, %1360, %1348 : vector<8x32xi1>, vector<8x32xf32>
    %cst_360 = arith.constant 0.000000e+00 : f32
    %1370 = vector.shape_cast %1312 : vector<8x1xi1> to vector<8x1xi1>
    %1371 = vector.broadcast %1370 : vector<8x1xi1> to vector<8x32xi1>
    %1372 = vector.broadcast %cst_360 : f32 to vector<8x32xf32>
    %1373 = arith.select %1371, %1366, %1372 : vector<8x32xi1>, vector<8x32xf32>
    %1374 = arith.index_cast %c5_i32_350 : i32 to index
    %c0_361 = arith.constant 0 : index
    %c0_362 = arith.constant 0 : index
    %1375 = vector.load %arg26[%1374, %c0_361, %c0_362] : memref<8x8x32xf32, #tpu.memory_space<vmem>>, vector<1x8x32xf32>
    %1376 = vector.shape_cast %1375 : vector<1x8x32xf32> to vector<8x32xf32>
    %1377 = vector.shape_cast %1373 : vector<8x32xf32> to vector<1x8x32xf32>
    tpu.vector_store %arg26[%1374, %c0_361, %c0_362], %1377 {strides = array<i32>} : memref<8x8x32xf32, #tpu.memory_space<vmem>>, vector<1x8x32xf32>,
    %1378 = tpu.concatenate %1338, %1366 in 0 : vector<8x32xf32>, vector<8x32xf32> -> vector<16x32xf32>
    %1379 = tpu.concatenate %1341, %1369 in 0 : vector<8x32xf32>, vector<8x32xf32> -> vector<16x32xf32>
    %c6_i32_363 = arith.constant 6 : i32
    %1380 = arith.truncf %1378 : vector<16x32xf32> to vector<16x32xbf16>
    %cst_364 = arith.constant dense<0.000000e+00> : vector<16x256xf32>
    %1381 = tpu.matmul %1380, %931, %cst_364 {dimension_numbers = #tpu.dot_dimension_numbers<[1], [0], [0], [1], [0, 0, 1, 1], [], []>} : vector<16x32xbf16>, vector<32x256xbf16>, vector<16x256xf32> -> vector<16x256xf32>
    %1382 = arith.index_cast %c6_i32_363 : i32 to index
    %c0_365 = arith.constant 0 : index
    %c0_366 = arith.constant 0 : index
    %1383 = vector.load %arg4[%1382, %c0_365, %c0_366] : memref<8x8x1xf32, #tpu.memory_space<vmem>>, vector<1x8x1xf32>
    %1384 = vector.shape_cast %1383 : vector<1x8x1xf32> to vector<8x1xf32>
    %cst_367 = arith.constant 5.000000e-01 : f32
    %1385 = vector.broadcast %cst_367 : f32 to vector<8x1xf32>
    %1386 = arith.cmpf ogt, %1384, %1385 : vector<8x1xf32>
    %1387 = arith.index_cast %c6_i32_363 : i32 to index
    %c0_368 = arith.constant 0 : index
    %c0_369 = arith.constant 0 : index
    %1388 = vector.load %arg23[%1387, %c0_368, %c0_369] : memref<10x8x128xbf16, #tpu.memory_space<vmem>>, vector<1x8x128xbf16>
    %1389 = vector.shape_cast %1388 : vector<1x8x128xbf16> to vector<8x128xbf16>
    %1390 = arith.extf %1389 : vector<8x128xbf16> to vector<8x128xf32>
    %1391 = vector.extract_strided_slice %1381 {offsets = [0, 0], sizes = [8, 128], strides = [1, 1]} : vector<16x256xf32> to vector<8x128xf32>
    %1392 = arith.addf %1390, %1391 : vector<8x128xf32>
    %1393 = vector.extract_strided_slice %1378 {offsets = [0, 0], sizes = [8, 32], strides = [1, 1]} : vector<16x32xf32> to vector<8x32xf32>
    %1394 = vector.extract_strided_slice %1379 {offsets = [0, 0], sizes = [8, 32], strides = [1, 1]} : vector<16x32xf32> to vector<8x32xf32>
    %1395 = arith.negf %1392 : vector<8x128xf32>
    %1396 = math.exp %1395 : vector<8x128xf32>
    %cst_370 = arith.constant 1.000000e+00 : f32
    %1397 = vector.broadcast %cst_370 : f32 to vector<8x128xf32>
    %1398 = arith.addf %1397, %1396 : vector<8x128xf32>
    %1399 = arith.divf %1397, %1398 : vector<8x128xf32>
    %1400 = math.tanh %1392 : vector<8x128xf32>
    %1401 = vector.extract_strided_slice %1399 {offsets = [0, 32], sizes = [8, 32], strides = [1, 1]} : vector<8x128xf32> to vector<8x32xf32>
    %1402 = arith.mulf %1401, %1394 : vector<8x32xf32>
    %1403 = vector.extract_strided_slice %1399 {offsets = [0, 0], sizes = [8, 32], strides = [1, 1]} : vector<8x128xf32> to vector<8x32xf32>
    %1404 = vector.extract_strided_slice %1400 {offsets = [0, 64], sizes = [8, 32], strides = [1, 1]} : vector<8x128xf32> to vector<8x32xf32>
    %1405 = arith.mulf %1403, %1404 : vector<8x32xf32>
    %1406 = arith.addf %1402, %1405 : vector<8x32xf32>
    %1407 = vector.extract_strided_slice %1399 {offsets = [0, 96], sizes = [8, 32], strides = [1, 1]} : vector<8x128xf32> to vector<8x32xf32>
    %1408 = math.tanh %1406 : vector<8x32xf32>
    %1409 = arith.mulf %1407, %1408 : vector<8x32xf32>
    %1410 = vector.shape_cast %1386 : vector<8x1xi1> to vector<8x1xi1>
    %1411 = vector.broadcast %1410 : vector<8x1xi1> to vector<8x32xi1>
    %1412 = arith.select %1411, %1409, %1393 : vector<8x32xi1>, vector<8x32xf32>
    %1413 = vector.shape_cast %1386 : vector<8x1xi1> to vector<8x1xi1>
    %1414 = vector.broadcast %1413 : vector<8x1xi1> to vector<8x32xi1>
    %1415 = arith.select %1414, %1406, %1394 : vector<8x32xi1>, vector<8x32xf32>
    %1416 = arith.truncf %1412 : vector<8x32xf32> to vector<8x32xbf16>
    %cst_371 = arith.constant dense<0.000000e+00> : vector<8x128xf32>
    %1417 = tpu.matmul %1416, %932, %cst_371 {dimension_numbers = #tpu.dot_dimension_numbers<[1], [0], [0], [1], [0, 0, 1, 1], [], []>} : vector<8x32xbf16>, vector<32x128xbf16>, vector<8x128xf32> -> vector<8x128xf32>
    %1418 = arith.addf %1417, %935 : vector<8x128xf32>
    %1419 = vector.extract_strided_slice %1381 {offsets = [8, 128], sizes = [8, 128], strides = [1, 1]} : vector<16x256xf32> to vector<8x128xf32>
    %1420 = arith.addf %1418, %1419 : vector<8x128xf32>
    %1421 = vector.extract_strided_slice %1378 {offsets = [8, 0], sizes = [8, 32], strides = [1, 1]} : vector<16x32xf32> to vector<8x32xf32>
    %1422 = vector.extract_strided_slice %1379 {offsets = [8, 0], sizes = [8, 32], strides = [1, 1]} : vector<16x32xf32> to vector<8x32xf32>
    %1423 = arith.negf %1420 : vector<8x128xf32>
    %1424 = math.exp %1423 : vector<8x128xf32>
    %cst_372 = arith.constant 1.000000e+00 : f32
    %1425 = vector.broadcast %cst_372 : f32 to vector<8x128xf32>
    %1426 = arith.addf %1425, %1424 : vector<8x128xf32>
    %1427 = arith.divf %1425, %1426 : vector<8x128xf32>
    %1428 = math.tanh %1420 : vector<8x128xf32>
    %1429 = vector.extract_strided_slice %1427 {offsets = [0, 32], sizes = [8, 32], strides = [1, 1]} : vector<8x128xf32> to vector<8x32xf32>
    %1430 = arith.mulf %1429, %1422 : vector<8x32xf32>
    %1431 = vector.extract_strided_slice %1427 {offsets = [0, 0], sizes = [8, 32], strides = [1, 1]} : vector<8x128xf32> to vector<8x32xf32>
    %1432 = vector.extract_strided_slice %1428 {offsets = [0, 64], sizes = [8, 32], strides = [1, 1]} : vector<8x128xf32> to vector<8x32xf32>
    %1433 = arith.mulf %1431, %1432 : vector<8x32xf32>
    %1434 = arith.addf %1430, %1433 : vector<8x32xf32>
    %1435 = vector.extract_strided_slice %1427 {offsets = [0, 96], sizes = [8, 32], strides = [1, 1]} : vector<8x128xf32> to vector<8x32xf32>
    %1436 = math.tanh %1434 : vector<8x32xf32>
    %1437 = arith.mulf %1435, %1436 : vector<8x32xf32>
    %1438 = vector.shape_cast %1386 : vector<8x1xi1> to vector<8x1xi1>
    %1439 = vector.broadcast %1438 : vector<8x1xi1> to vector<8x32xi1>
    %1440 = arith.select %1439, %1437, %1421 : vector<8x32xi1>, vector<8x32xf32>
    %1441 = vector.shape_cast %1386 : vector<8x1xi1> to vector<8x1xi1>
    %1442 = vector.broadcast %1441 : vector<8x1xi1> to vector<8x32xi1>
    %1443 = arith.select %1442, %1434, %1422 : vector<8x32xi1>, vector<8x32xf32>
    %cst_373 = arith.constant 0.000000e+00 : f32
    %1444 = vector.shape_cast %1386 : vector<8x1xi1> to vector<8x1xi1>
    %1445 = vector.broadcast %1444 : vector<8x1xi1> to vector<8x32xi1>
    %1446 = vector.broadcast %cst_373 : f32 to vector<8x32xf32>
    %1447 = arith.select %1445, %1440, %1446 : vector<8x32xi1>, vector<8x32xf32>
    %1448 = arith.index_cast %c6_i32_363 : i32 to index
    %c0_374 = arith.constant 0 : index
    %c0_375 = arith.constant 0 : index
    %1449 = vector.load %arg26[%1448, %c0_374, %c0_375] : memref<8x8x32xf32, #tpu.memory_space<vmem>>, vector<1x8x32xf32>
    %1450 = vector.shape_cast %1449 : vector<1x8x32xf32> to vector<8x32xf32>
    %1451 = vector.shape_cast %1447 : vector<8x32xf32> to vector<1x8x32xf32>
    tpu.vector_store %arg26[%1448, %c0_374, %c0_375], %1451 {strides = array<i32>} : memref<8x8x32xf32, #tpu.memory_space<vmem>>, vector<1x8x32xf32>,
    %1452 = tpu.concatenate %1412, %1440 in 0 : vector<8x32xf32>, vector<8x32xf32> -> vector<16x32xf32>
    %1453 = tpu.concatenate %1415, %1443 in 0 : vector<8x32xf32>, vector<8x32xf32> -> vector<16x32xf32>
    %c7_i32_376 = arith.constant 7 : i32
    %1454 = arith.truncf %1452 : vector<16x32xf32> to vector<16x32xbf16>
    %cst_377 = arith.constant dense<0.000000e+00> : vector<16x256xf32>
    %1455 = tpu.matmul %1454, %931, %cst_377 {dimension_numbers = #tpu.dot_dimension_numbers<[1], [0], [0], [1], [0, 0, 1, 1], [], []>} : vector<16x32xbf16>, vector<32x256xbf16>, vector<16x256xf32> -> vector<16x256xf32>
    %1456 = arith.index_cast %c7_i32_376 : i32 to index
    %c0_378 = arith.constant 0 : index
    %c0_379 = arith.constant 0 : index
    %1457 = vector.load %arg4[%1456, %c0_378, %c0_379] : memref<8x8x1xf32, #tpu.memory_space<vmem>>, vector<1x8x1xf32>
    %1458 = vector.shape_cast %1457 : vector<1x8x1xf32> to vector<8x1xf32>
    %cst_380 = arith.constant 5.000000e-01 : f32
    %1459 = vector.broadcast %cst_380 : f32 to vector<8x1xf32>
    %1460 = arith.cmpf ogt, %1458, %1459 : vector<8x1xf32>
    %1461 = arith.index_cast %c7_i32_376 : i32 to index
    %c0_381 = arith.constant 0 : index
    %c0_382 = arith.constant 0 : index
    %1462 = vector.load %arg23[%1461, %c0_381, %c0_382] : memref<10x8x128xbf16, #tpu.memory_space<vmem>>, vector<1x8x128xbf16>
    %1463 = vector.shape_cast %1462 : vector<1x8x128xbf16> to vector<8x128xbf16>
    %1464 = arith.extf %1463 : vector<8x128xbf16> to vector<8x128xf32>
    %1465 = vector.extract_strided_slice %1455 {offsets = [0, 0], sizes = [8, 128], strides = [1, 1]} : vector<16x256xf32> to vector<8x128xf32>
    %1466 = arith.addf %1464, %1465 : vector<8x128xf32>
    %1467 = vector.extract_strided_slice %1452 {offsets = [0, 0], sizes = [8, 32], strides = [1, 1]} : vector<16x32xf32> to vector<8x32xf32>
    %1468 = vector.extract_strided_slice %1453 {offsets = [0, 0], sizes = [8, 32], strides = [1, 1]} : vector<16x32xf32> to vector<8x32xf32>
    %1469 = arith.negf %1466 : vector<8x128xf32>
    %1470 = math.exp %1469 : vector<8x128xf32>
    %cst_383 = arith.constant 1.000000e+00 : f32
    %1471 = vector.broadcast %cst_383 : f32 to vector<8x128xf32>
    %1472 = arith.addf %1471, %1470 : vector<8x128xf32>
    %1473 = arith.divf %1471, %1472 : vector<8x128xf32>
    %1474 = math.tanh %1466 : vector<8x128xf32>
    %1475 = vector.extract_strided_slice %1473 {offsets = [0, 32], sizes = [8, 32], strides = [1, 1]} : vector<8x128xf32> to vector<8x32xf32>
    %1476 = arith.mulf %1475, %1468 : vector<8x32xf32>
    %1477 = vector.extract_strided_slice %1473 {offsets = [0, 0], sizes = [8, 32], strides = [1, 1]} : vector<8x128xf32> to vector<8x32xf32>
    %1478 = vector.extract_strided_slice %1474 {offsets = [0, 64], sizes = [8, 32], strides = [1, 1]} : vector<8x128xf32> to vector<8x32xf32>
    %1479 = arith.mulf %1477, %1478 : vector<8x32xf32>
    %1480 = arith.addf %1476, %1479 : vector<8x32xf32>
    %1481 = vector.extract_strided_slice %1473 {offsets = [0, 96], sizes = [8, 32], strides = [1, 1]} : vector<8x128xf32> to vector<8x32xf32>
    %1482 = math.tanh %1480 : vector<8x32xf32>
    %1483 = arith.mulf %1481, %1482 : vector<8x32xf32>
    %1484 = vector.shape_cast %1460 : vector<8x1xi1> to vector<8x1xi1>
    %1485 = vector.broadcast %1484 : vector<8x1xi1> to vector<8x32xi1>
    %1486 = arith.select %1485, %1483, %1467 : vector<8x32xi1>, vector<8x32xf32>
    %1487 = vector.shape_cast %1460 : vector<8x1xi1> to vector<8x1xi1>
    %1488 = vector.broadcast %1487 : vector<8x1xi1> to vector<8x32xi1>
    %1489 = arith.select %1488, %1480, %1468 : vector<8x32xi1>, vector<8x32xf32>
    %1490 = arith.truncf %1486 : vector<8x32xf32> to vector<8x32xbf16>
    %cst_384 = arith.constant dense<0.000000e+00> : vector<8x128xf32>
    %1491 = tpu.matmul %1490, %932, %cst_384 {dimension_numbers = #tpu.dot_dimension_numbers<[1], [0], [0], [1], [0, 0, 1, 1], [], []>} : vector<8x32xbf16>, vector<32x128xbf16>, vector<8x128xf32> -> vector<8x128xf32>
    %1492 = arith.addf %1491, %935 : vector<8x128xf32>
    %1493 = vector.extract_strided_slice %1455 {offsets = [8, 128], sizes = [8, 128], strides = [1, 1]} : vector<16x256xf32> to vector<8x128xf32>
    %1494 = arith.addf %1492, %1493 : vector<8x128xf32>
    %1495 = vector.extract_strided_slice %1452 {offsets = [8, 0], sizes = [8, 32], strides = [1, 1]} : vector<16x32xf32> to vector<8x32xf32>
    %1496 = vector.extract_strided_slice %1453 {offsets = [8, 0], sizes = [8, 32], strides = [1, 1]} : vector<16x32xf32> to vector<8x32xf32>
    %1497 = arith.negf %1494 : vector<8x128xf32>
    %1498 = math.exp %1497 : vector<8x128xf32>
    %cst_385 = arith.constant 1.000000e+00 : f32
    %1499 = vector.broadcast %cst_385 : f32 to vector<8x128xf32>
    %1500 = arith.addf %1499, %1498 : vector<8x128xf32>
    %1501 = arith.divf %1499, %1500 : vector<8x128xf32>
    %1502 = math.tanh %1494 : vector<8x128xf32>
    %1503 = vector.extract_strided_slice %1501 {offsets = [0, 32], sizes = [8, 32], strides = [1, 1]} : vector<8x128xf32> to vector<8x32xf32>
    %1504 = arith.mulf %1503, %1496 : vector<8x32xf32>
    %1505 = vector.extract_strided_slice %1501 {offsets = [0, 0], sizes = [8, 32], strides = [1, 1]} : vector<8x128xf32> to vector<8x32xf32>
    %1506 = vector.extract_strided_slice %1502 {offsets = [0, 64], sizes = [8, 32], strides = [1, 1]} : vector<8x128xf32> to vector<8x32xf32>
    %1507 = arith.mulf %1505, %1506 : vector<8x32xf32>
    %1508 = arith.addf %1504, %1507 : vector<8x32xf32>
    %1509 = vector.extract_strided_slice %1501 {offsets = [0, 96], sizes = [8, 32], strides = [1, 1]} : vector<8x128xf32> to vector<8x32xf32>
    %1510 = math.tanh %1508 : vector<8x32xf32>
    %1511 = arith.mulf %1509, %1510 : vector<8x32xf32>
    %1512 = vector.shape_cast %1460 : vector<8x1xi1> to vector<8x1xi1>
    %1513 = vector.broadcast %1512 : vector<8x1xi1> to vector<8x32xi1>
    %1514 = arith.select %1513, %1511, %1495 : vector<8x32xi1>, vector<8x32xf32>
    %1515 = vector.shape_cast %1460 : vector<8x1xi1> to vector<8x1xi1>
    %1516 = vector.broadcast %1515 : vector<8x1xi1> to vector<8x32xi1>
    %1517 = arith.select %1516, %1508, %1496 : vector<8x32xi1>, vector<8x32xf32>
    %cst_386 = arith.constant 0.000000e+00 : f32
    %1518 = vector.shape_cast %1460 : vector<8x1xi1> to vector<8x1xi1>
    %1519 = vector.broadcast %1518 : vector<8x1xi1> to vector<8x32xi1>
    %1520 = vector.broadcast %cst_386 : f32 to vector<8x32xf32>
    %1521 = arith.select %1519, %1514, %1520 : vector<8x32xi1>, vector<8x32xf32>
    %1522 = arith.index_cast %c7_i32_376 : i32 to index
    %c0_387 = arith.constant 0 : index
    %c0_388 = arith.constant 0 : index
    %1523 = vector.load %arg26[%1522, %c0_387, %c0_388] : memref<8x8x32xf32, #tpu.memory_space<vmem>>, vector<1x8x32xf32>
    %1524 = vector.shape_cast %1523 : vector<1x8x32xf32> to vector<8x32xf32>
    %1525 = vector.shape_cast %1521 : vector<8x32xf32> to vector<1x8x32xf32>
    tpu.vector_store %arg26[%1522, %c0_387, %c0_388], %1525 {strides = array<i32>} : memref<8x8x32xf32, #tpu.memory_space<vmem>>, vector<1x8x32xf32>,
    %1526 = tpu.concatenate %1486, %1514 in 0 : vector<8x32xf32>, vector<8x32xf32> -> vector<16x32xf32>
    %1527 = tpu.concatenate %1489, %1517 in 0 : vector<8x32xf32>, vector<8x32xf32> -> vector<16x32xf32>
    %c8_i32_389 = arith.constant 8 : i32
    %c0_390 = arith.constant 0 : index
    %c0_391 = arith.constant 0 : index
    %c0_392 = arith.constant 0 : index
    %1528 = vector.load %arg26[%c0_390, %c0_391, %c0_392] : memref<8x8x32xf32, #tpu.memory_space<vmem>>, vector<8x8x32xf32>
    %1529 = vector.shape_cast %1528 : vector<8x8x32xf32> to vector<64x32xf32>
    %1530 = arith.truncf %1529 : vector<64x32xf32> to vector<64x32xbf16>
    %c0_393 = arith.constant 0 : index
    %c0_394 = arith.constant 0 : index
    %1531 = vector.load %arg19[%c0_393, %c0_394] : memref<32x128xbf16, #tpu.memory_space<vmem>>, vector<32x128xbf16>
    %cst_395 = arith.constant dense<0.000000e+00> : vector<64x128xf32>
    %1532 = tpu.matmul %1530, %1531, %cst_395 {dimension_numbers = #tpu.dot_dimension_numbers<[1], [0], [0], [1], [0, 0, 1, 1], [], []>} : vector<64x32xbf16>, vector<32x128xbf16>, vector<64x128xf32> -> vector<64x128xf32>
    %c0_396 = arith.constant 0 : index
    %c0_397 = arith.constant 0 : index
    %1533 = vector.load %arg20[%c0_396, %c0_397] : memref<1x128xf32, #tpu.memory_space<vmem>>, vector<1x128xf32>
    %1534 = vector.broadcast %1533 : vector<1x128xf32> to vector<64x128xf32>
    %1535 = arith.addf %1532, %1534 : vector<64x128xf32>
    %c0_398 = arith.constant 0 : index
    %c0_399 = arith.constant 0 : index
    %1536 = vector.load %arg21[%c0_398, %c0_399] : memref<64x128xf32, #tpu.memory_space<vmem>>, vector<64x128xf32>
    tpu.vector_store %arg21[%c0_398, %c0_399], %1535 {strides = array<i32>} : memref<64x128xf32, #tpu.memory_space<vmem>>, vector<64x128xf32>,
    return
  }
  func.func @transform_0(%arg0: i32) -> (i32, i32, i32) {
    %c0_i32 = arith.constant 0 : i32
    %c0_i32_0 = arith.constant 0 : i32
    %c0_i32_1 = arith.constant 0 : i32
    %c0_i32_2 = arith.constant 0 : i32
    return %c0_i32, %c0_i32_0, %c0_i32_1 : i32, i32, i32
  }
  func.func @transform_1(%arg0: i32) -> (i32, i32, i32) {
    %c0_i32 = arith.constant 0 : i32
    %c0_i32_0 = arith.constant 0 : i32
    %c0_i32_1 = arith.constant 0 : i32
    %c0_i32_2 = arith.constant 0 : i32
    return %c0_i32, %c0_i32_0, %c0_i32_1 : i32, i32, i32
  }
  func.func @transform_2(%arg0: i32) -> (i32, i32, i32) {
    %c0_i32 = arith.constant 0 : i32
    %c0_i32_0 = arith.constant 0 : i32
    %c0_i32_1 = arith.constant 0 : i32
    %c0_i32_2 = arith.constant 0 : i32
    return %c0_i32, %c0_i32_0, %c0_i32_1 : i32, i32, i32
  }
  func.func @transform_3(%arg0: i32) -> (i32, i32, i32) {
    %c0_i32 = arith.constant 0 : i32
    %c0_i32_0 = arith.constant 0 : i32
    %c0_i32_1 = arith.constant 0 : i32
    %c0_i32_2 = arith.constant 0 : i32
    return %c0_i32, %c0_i32_0, %c0_i32_1 : i32, i32, i32
  }
  func.func @transform_4(%arg0: i32) -> (i32, i32) {
    %c0_i32 = arith.constant 0 : i32
    %c0_i32_0 = arith.constant 0 : i32
    %c0_i32_1 = arith.constant 0 : i32
    return %c0_i32, %c0_i32_0 : i32, i32
  }
  func.func @transform_5(%arg0: i32) -> (i32, i32) {
    %c0_i32 = arith.constant 0 : i32
    %c0_i32_0 = arith.constant 0 : i32
    %c0_i32_1 = arith.constant 0 : i32
    return %c0_i32, %c0_i32_0 : i32, i32
  }
  func.func @transform_6(%arg0: i32) -> (i32, i32) {
    %c0_i32 = arith.constant 0 : i32
    %c0_i32_0 = arith.constant 0 : i32
    %c0_i32_1 = arith.constant 0 : i32
    return %c0_i32, %c0_i32_0 : i32, i32
  }
  func.func @transform_7(%arg0: i32) -> (i32, i32) {
    %c0_i32 = arith.constant 0 : i32
    %c0_i32_0 = arith.constant 0 : i32
    %c0_i32_1 = arith.constant 0 : i32
    return %c0_i32, %c0_i32_0 : i32, i32
  }
  func.func @transform_8(%arg0: i32) -> (i32, i32) {
    %c0_i32 = arith.constant 0 : i32
    %c0_i32_0 = arith.constant 0 : i32
    %c0_i32_1 = arith.constant 0 : i32
    return %c0_i32, %c0_i32_0 : i32, i32
  }
  func.func @transform_9(%arg0: i32) -> (i32, i32) {
    %c0_i32 = arith.constant 0 : i32
    %c0_i32_0 = arith.constant 0 : i32
    %c0_i32_1 = arith.constant 0 : i32
    return %c0_i32, %c0_i32_0 : i32, i32
  }
  func.func @transform_10(%arg0: i32) -> (i32, i32) {
    %c0_i32 = arith.constant 0 : i32
    %c0_i32_0 = arith.constant 0 : i32
    %c0_i32_1 = arith.constant 0 : i32
    return %c0_i32, %c0_i32_0 : i32, i32
  }
  func.func @transform_11(%arg0: i32) -> (i32, i32) {
    %c0_i32 = arith.constant 0 : i32
    %c0_i32_0 = arith.constant 0 : i32
    %c0_i32_1 = arith.constant 0 : i32
    return %c0_i32, %c0_i32_0 : i32, i32
  }
  func.func @transform_12(%arg0: i32) -> (i32, i32) {
    %c0_i32 = arith.constant 0 : i32
    %c0_i32_0 = arith.constant 0 : i32
    %c0_i32_1 = arith.constant 0 : i32
    return %c0_i32, %c0_i32_0 : i32, i32
  }
  func.func @transform_13(%arg0: i32) -> (i32, i32) {
    %c0_i32 = arith.constant 0 : i32
    %c0_i32_0 = arith.constant 0 : i32
    %c0_i32_1 = arith.constant 0 : i32
    return %c0_i32, %c0_i32_0 : i32, i32
  }
  func.func @transform_14(%arg0: i32) -> (i32, i32) {
    %c0_i32 = arith.constant 0 : i32
    %c0_i32_0 = arith.constant 0 : i32
    %c0_i32_1 = arith.constant 0 : i32
    return %c0_i32, %c0_i32_0 : i32, i32
  }
  func.func @transform_15(%arg0: i32) -> (i32, i32) {
    %c0_i32 = arith.constant 0 : i32
    %c0_i32_0 = arith.constant 0 : i32
    %c0_i32_1 = arith.constant 0 : i32
    return %c0_i32, %c0_i32_0 : i32, i32
  }
  func.func @transform_16(%arg0: i32) -> (i32, i32) {
    %c0_i32 = arith.constant 0 : i32
    %c0_i32_0 = arith.constant 0 : i32
    %c0_i32_1 = arith.constant 0 : i32
    return %c0_i32, %c0_i32_0 : i32, i32
  }
  func.func @transform_17(%arg0: i32) -> (i32, i32) {
    %c0_i32 = arith.constant 0 : i32
    %c0_i32_0 = arith.constant 0 : i32
    %c0_i32_1 = arith.constant 0 : i32
    return %c0_i32, %c0_i32_0 : i32, i32
  }
  func.func @transform_18(%arg0: i32) -> (i32, i32) {
    %c0_i32 = arith.constant 0 : i32
    %c0_i32_0 = arith.constant 0 : i32
    %c0_i32_1 = arith.constant 0 : i32
    return %c0_i32, %c0_i32_0 : i32, i32
  }
  func.func @transform_19(%arg0: i32) -> (i32, i32) {
    %c0_i32 = arith.constant 0 : i32
    %c0_i32_0 = arith.constant 0 : i32
    %c0_i32_1 = arith.constant 0 : i32
    return %c0_i32, %c0_i32_0 : i32, i32
  }
  func.func @transform_20(%arg0: i32) -> (i32, i32) {
    %c0_i32 = arith.constant 0 : i32
    %c0_i32_0 = arith.constant 0 : i32
    %c0_i32_1 = arith.constant 0 : i32
    return %c0_i32, %c0_i32_0 : i32, i32
  }
}

</mosaic_0001>

<bundles_post_ra>
// kernel: seq2seq_forward.1
= control target key start
LH: loop header
LB: loop body
LE: loop exit
PB: predicated region body
PF: predicated region fallthrough
CT: control target
= control target key end

     0   :  { %v5538_v1 = vmov 0   ;;  %vm117_vm0 = vcmask 261120   ;;  %v87_v15 = vlaneseq  ;;  %vm380_vm1 = vcmask 1043456   ;;  %s5540_s27 = smov 32   ;;  %s7361_s4 = inlined_call_operand.vmem [shape: bf16[32,256], index: 4, kind: input, shape index: {}]   ;;  %s7362_s0 = inlined_call_operand.vmem [shape: f32[10,8,32], index: 0, kind: input, shape index: {}]   ;;  %s7363_s6 = inlined_call_operand.vmem [shape: bf16[32,256], index: 6, kind: input, shape index: {}]   ;;  %s7364_s5 = inlined_call_operand.vmem [shape: f32[1,256], index: 5, kind: input, shape index: {}]   ;;  %s7365_s1 = inlined_call_operand.vmem [shape: f32[10,16,1], index: 1, kind: input, shape index: {}]   ;;  %s7366_s8 = inlined_call_operand.vmem [shape: bf16[32,128], index: 8, kind: input, shape index: {}]   ;;  %s7367_s10 = inlined_call_operand.vmem [shape: bf16[32,128], index: 10, kind: input, shape index: {}]   ;;  %s7368_s7 = inlined_call_operand.vmem [shape: bf16[32,128], index: 7, kind: input, shape index: {}]   ;;  %s7369_s9 = inlined_call_operand.vmem [shape: f32[1,128], index: 9, kind: input, shape index: {}]   ;;  %s7370_s11 = inlined_call_operand.vmem [shape: bf16[32,32], index: 11, kind: input, shape index: {}]   ;;  %s7371_s13 = inlined_call_operand.vmem [shape: bf16[32,128], index: 13, kind: input, shape index: {}]   ;;  %s7372_s2 = inlined_call_operand.vmem [shape: f32[8,8,32], index: 2, kind: input, shape index: {}]   ;;  %s7373_s17 = inlined_call_operand.vmem [shape: bf16[32,256], index: 17, kind: input, shape index: {}]   ;;  %s7374_s14 = inlined_call_operand.vmem [shape: f32[1,128], index: 14, kind: input, shape index: {}]   ;;  %s7375_s12 = inlined_call_operand.vmem [shape: f32[1,32], index: 12, kind: input, shape index: {}]   ;;  %s7376_s3 = inlined_call_operand.vmem [shape: f32[8,8,1], index: 3, kind: input, shape index: {}]   ;;  %s7377_s15 = inlined_call_operand.vmem [shape: bf16[32,128], index: 15, kind: input, shape index: {}]   ;;  %s7378_s16 = inlined_call_operand.vmem [shape: f32[1,128], index: 16, kind: input, shape index: {}]   ;;  %s7379_s18 = inlined_call_operand.vmem [shape: bf16[32,128], index: 18, kind: input, shape index: {}]   ;;  %s7380_s19 = inlined_call_operand.vmem [shape: f32[1,128], index: 19, kind: input, shape index: {}]   ;;  %s7381_s20 = inlined_call_operand.vmem [shape: f32[64,128], index: 20, kind: output, shape index: {}]  }
   0x1   :  { %7386 = sst [smem:[#allocation7_spill]] %s7361_s4  ;;  %165 = vmatprep.mubr.bf16.mxu0 %v5538_v1  ;;  %205 = vmatprep.mubr.bf16.mxu1 %v5538_v1 }
   0x2   :  { %7387 = sst [smem:[#allocation8_spill]] %s7362_s0  ;;  %s7391_s23 = sld [smem:[#allocation7_spill]]  ;;  %5129 = vset.pattern.permute.xlu0 %v5538_v1  ;;  %5130 = vset.pattern.permute.xlu1 %v5538_v1  ;;  %v88_v16 = vshrl.u32 %v87_v15, 7 }
   0x3   :  { %7388 = sst [smem:[#allocation9_spill]] %s7363_s6  ;;  %s7392_s29 = sld [smem:[#allocation8_spill]] }
   0x4   :  { %7389 = sst [smem:[#allocation10_spill]] %s7364_s5  ;;  %s7393_s25 = sld [smem:[#allocation9_spill]]  ;;  %v89_v17 = vsub.s32 0, %v88_v16  ;;  %v93_v19 = vsub.s32 1, %v88_v16 }
   0x5   :  { %7390 = sst [smem:[#allocation11_spill]] %s7365_s1  ;;  %s7394_s0 = sld [smem:[#allocation10_spill]] }
   0x6   :  { %s5539_s6 = smov 64  }
   0x8   :  { %v5131_v0 = vld [vmem:[%s7391_s23 + $0x4] ss:$8 sps:$4 sm:$0xff]   ;;  %v5133_v2 = vld [vmem:[%s7391_s23] ss:$8 sps:$4 sm:$0xff]   ;;  %v5134_v3 = vld [vmem:[%s7391_s23 + $0x14] ss:$8 sps:$4 sm:$0xff]  }
   0x9   :  { %133 = vmatprep.subr.bf16.mxu0 %v5131_v0  ;;  %5119 = vmatprep.subr.bf16.mxu1 %v5131_v0  ;;  %v5136_v4 = vld [vmem:[%s7391_s23 + $0x10] ss:$8 sps:$4 sm:$0xff]   ;;  %v66_v5 = vld [vmem:[%s7392_s29] sm:$0xff]  ;;  %v67_v6 = vld [vmem:[%s7392_s29 + $0x8] sm:$0xff]  ;;  %s7395_s23 = sld [smem:[#allocation11_spill]] }
   0xa   :  { %134 = vmatpush1.bf16.msra.mxu0 %v5133_v2  ;;  %5121 = vmatpush1.bf16.msra.mxu1 %v5133_v2  ;;  %v74_v7 = vld [vmem:[%s7392_s29 + $0x40] sm:$0xff]  ;;  %v75_v8 = vld [vmem:[%s7392_s29 + $0x48] sm:$0xff]  ;;  %v76_v10 = vpack.c.bf16 %v67_v6, %v66_v5  ;;  %v5691_v13 = vld [vmem:[%s7393_s25 + $0x14] ss:$8 sps:$4 sm:$0xff]  }
   0xb   :  { %135 = vmatprep.subr.bf16.mxu0 %v5134_v3  ;;  %5120 = vmatprep.subr.bf16.mxu1 %v5134_v3  ;;  %v5680_v9 = vld [vmem:[%s7393_s25 + $0x4] ss:$8 sps:$4 sm:$0xff]   ;;  %v80_v11 = vpack.c.bf16 %v75_v8, %v74_v7  ;;  %v5685_v12 = vld [vmem:[%s7393_s25] ss:$8 sps:$4 sm:$0xff]   ;;  %v5700_v14 = vld [vmem:[%s7393_s25 + $0x10] ss:$8 sps:$4 sm:$0xff]  }
   0xc   :  { %v85_v18 = vld [vmem:[%s7394_s0] sm:$0x3] }
   0xd   :  { %v5720_v20 = vrot.slane %v85_v18, %v89_v17  ;;  %v5722_v21 = vrot.slane %v85_v18, %v93_v19 }
   0xe   :  { %136 = vmatpush1.bf16.msra.mxu0 %v5136_v4  ;;  %5122 = vmatpush1.bf16.msra.mxu1 %v5136_v4 }
   0xf   :  { %333 = vmatprep.subr.bf16.mxu1 %v5680_v9  ;;  %1041 = vmatprep.subr.bf16.mxu0 %v5680_v9  ;;  %v387_v59 = vld [vmem:[%s7395_s23] sm:$0xff]  ;;  %v388_v8 = vld [vmem:[%s7395_s23 + $0x8] sm:$0xff] }
  0x10   :  { %vm389_vm2 = vcmp.gt.f32.partialorder %v387_v59, 0.5  ;;  %vm390_vm3 = vcmp.gt.f32.partialorder %v388_v8, 0.5  ;;  %v4580_v59 = vld [vmem:[%s7395_s23 + $0x18] sm:$0xff] }
  0x11   :  { %4555 = vmatmul.mubr.msk.bf16.vlgmr.msra.gmra.mrb[0].mxu0 %vm117_vm0, %v76_v10  ;;  %4559 = vmatmul.mubr.msk.bf16.vlgmr.msra.gmra.mrb[0].mxu1 %vm117_vm0, %v80_v11  ;;  %v441_v61 = vsel %vm389_vm2, 1, %v5538_v1  ;;  %v442_v16 = vsel %vm390_vm3, 1, %v5538_v1  ;;  %vm531_vm7 = vcmp.gt.f32.partialorder %v4580_v59, 0.5 }
  0x12   :  { %334 = vmatpush1.bf16.msra.mxu1 %v5685_v12  ;;  %365 = vmatprep.mubr.bf16.mxu1 %v5538_v1 }
  0x13   :  { %335 = vmatprep.subr.bf16.mxu1 %v5691_v13  ;;  %175 = vmatprep.mubr.bf16.mxu0 %v5538_v1 }
  0x14   :  { %1042 = vmatpush1.bf16.msra.mxu0 %v5685_v12 }
  0x15   :  { %1043 = vmatprep.subr.bf16.mxu0 %v5691_v13 }
  0x16   :  { %336 = vmatpush1.bf16.msra.mxu1 %v5700_v14 }
  0x17   :  { %473 = vmatprep.subr.bf16.mxu1 %v5680_v9 }
  0x18   :  { %1044 = vmatpush1.bf16.msra.mxu0 %v5700_v14 }
  0x19   :  { %366 = vmatmul.mubr.bf16.vlgmr.msra.gmra.mrb[4].mxu1 %v5538_v1  ;;  %1321 = vmatprep.subr.bf16.mxu0 %v5680_v9 }
  0x1a   :  { %474 = vmatpush1.bf16.msra.mxu1 %v5685_v12  ;;  %505 = vmatprep.mubr.bf16.mxu1 %v5538_v1 }
  0x1b   :  { %475 = vmatprep.subr.bf16.mxu1 %v5691_v13 }
  0x1e   :  { %476 = vmatpush1.bf16.msra.mxu1 %v5700_v14 }
  0x1f   :  { %615 = vmatprep.subr.bf16.mxu1 %v5680_v9 }
  0xe4   :  { %v167_v22 = vpop.f32.mrb[0].mxu0  ;;  %v207_v23 = vpop.f32.mrb[0].mxu1 }
  0xe5   :  { %v168_v24 = vadd.f32 %v167_v22, %v5720_v20  ;;  %v208_v25 = vadd.f32 %v207_v23, %v5720_v20  ;;  %v169_v26 = vpop.f32.mrb[1].mxu0  ;;  %v209_v27 = vpop.f32.mrb[1].mxu1 }
  0xe6   :  { %v170_v28 = vadd.f32 %v169_v26, %v5722_v21  ;;  %v210_v29 = vadd.f32 %v209_v27, %v5722_v21  ;;  %v171_v30 = vpop.f32.mrb[2].mxu0  ;;  %v211_v31 = vpop.f32.mrb[2].mxu1 }
  0xe7   :  { %v172_v32 = vadd.f32 %v171_v30, %v5720_v20  ;;  %v212_v33 = vadd.f32 %v211_v31, %v5720_v20  ;;  %v173_v34 = vpop.f32.mrb[3].mxu0  ;;  %v213_v35 = vpop.f32.mrb[3].mxu1 }
  0xe8   :  { %v4740_v36 = vpack.c.bf16 %v170_v28, %v168_v24  ;;  %v4748_v37 = vpack.c.bf16 %v210_v29, %v208_v25  ;;  %v4811_v38 = vpack.c.bf16 %v170_v28, %v170_v28  ;;  %v174_v39 = vadd.f32 %v173_v34, %v5722_v21 }
  0xe9   :  { %v214_v40 = vadd.f32 %v213_v35, %v5722_v21  ;;  %v4803_v41 = vpack.c.bf16 %v210_v29, %v210_v29 }
  0xea   :  { %v4741_v42 = vpack.c.bf16 %v174_v39, %v172_v32  ;;  %v4810_v43 = vpack.c.bf16 %v174_v39, %v174_v39 }
  0xeb   :  { %v4749_v44 = vpack.c.bf16 %v214_v40, %v212_v33  ;;  %v4802_v45 = vpack.c.bf16 %v214_v40, %v214_v40 }
  0xec   :  { %v367_v46 = vpop.f32.mrb[4].mxu1  ;;  %v5734_v49 = vsel %vm380_vm1, %v4741_v42, %v4803_v41  ;;  %v5737_v50 = vsel %vm380_vm1, %v4748_v37, %v4810_v43 }
  0xed   :  { %v383_v47 = vsel %vm380_vm1, %v4740_v36, %v4802_v45  ;;  %v369_v48 = vpop.f32.mrb[5].mxu1  ;;  %v5740_v51 = vsel %vm380_vm1, %v4749_v44, %v4811_v38  ;;  %v525_v37 = vunpack.c.l.bf16 %v5734_v49  ;;  %v526_v42 = vunpack.c.h.bf16 %v5734_v49  ;;  %v4579_v49 = vld [vmem:[%s7395_s23 + $0x10] sm:$0xff] }
  0xee   :  { %v385_v52 = vunpack.c.l.bf16 %v383_v47  ;;  %v370_v53 = vpop.f32.mrb[6].mxu1  ;;  %v386_v54 = vunpack.c.h.bf16 %v383_v47  ;;  %vm530_vm6 = vcmp.gt.f32.partialorder %v4579_v49, 0.5 }
  0xef   :  { %v371_v55 = vpop.f32.mrb[7].mxu1 }
  0xf0   :  { %v391_v56 = vadd.f32 %v385_v52, %v367_v46  ;;  %v392_v57 = vadd.f32 %v386_v54, %v371_v55 }
  0xf2   :  { %5163 = vtanh.f32 %v391_v56  ;;  %v4575_v62 = vmul.f32 -1.442695, %v391_v56  ;;  %v4576_v63 = vmul.f32 -1.442695, %v392_v57 }
  0xf3   :  { %5165 = vtanh.f32 %v392_v57 }
  0xf4   :  { %5167 = vpow2.f32 %v4575_v62 }
  0xf5   :  { %5169 = vpow2.f32 %v4576_v63  ;;  %v582_v63 = vsel %vm530_vm6, 1, %v5538_v1 }
  0xfc   :  { %v5164_v58 = vpop.eup %5163 }
  0xfd   :  { %411 = vrot.lane.b32.xlu0 %v5164_v58, %s5539_s6  ;;  %v5166_v60 = vpop.eup %5165 }
  0xfe   :  { %v5168_v0 = vpop.eup %5167 }
  0xff   :  { %v399_v2 = vadd.f32 1.0, %v5168_v0  ;;  %v5170_v3 = vpop.eup %5169  ;;  %v583_v0 = vsel %vm531_vm7, 1, %v5538_v1 }
 0x100   :  { %v400_v4 = vadd.f32 1.0, %v5170_v3 }
 0x101   :  { %413 = vrot.lane.b32.xlu0 %v5166_v60, %s5539_s6  ;;  %5171 = vrcp.f32 %v399_v2 }
 0x102   :  { %5173 = vrcp.f32 %v400_v4 }
 0x105   :  { %444 = vperm.xlu0 %5129, %v441_v61  }
 0x10b   :  { %v5172_v5 = vpop.eup %5171 }
 0x10c   :  { %v5174_v10 = vpop.eup %5173  ;;  %v407_v17 = vmul.f32 0.0, %v5172_v5 }
 0x10d   :  { %v408_v22 = vmul.f32 0.0, %v5174_v10 }
 0x16f   :  { %v412_v6 = vpop.permute.xlu0 %411 }
 0x170   :  { %v417_v7 = vmul.f32 %v5172_v5, %v412_v6 }
 0x172   :  { %421 = vrot.lane.b32.xlu1 %v417_v7, %s5540_s27 }
 0x173   :  { %v414_v11 = vpop.permute.xlu0 %413 }
 0x174   :  { %v418_v15 = vmul.f32 %v5174_v10, %v414_v11  ;;  %v68_v11 = vld [vmem:[%s7392_s29 + $0x10] sm:$0xff] }
 0x176   :  { %423 = vrot.lane.b32.xlu1 %v418_v15, %s5540_s27  ;;  %v69_v15 = vld [vmem:[%s7392_s29 + $0x18] sm:$0xff] }
 0x17a   :  { %447 = vperm.xlu1 %5130, %v442_v16   ;;  %v77_v16 = vpack.c.bf16 %v69_v15, %v68_v11 }
 0x17c   :  { %4556 = vmatmul.mubr.msk.bf16.gmra.mrb[4].mxu0 %vm117_vm0, %v77_v16 }
 0x17d   :  { %185 = vmatprep.mubr.bf16.mxu0 %v5538_v1 }
 0x184   :  { %v445_v28 = vpop.permute.xlu0 %444 }
 0x185   :  { %vm449_vm4 = vcmp.eq.s32.totalorder %v445_v28, 1 }
 0x1e4   :  { %v422_v18 = vpop.permute.xlu1 %421 }
 0x1e5   :  { %v5754_v19 = vadd.f32 %v422_v18, %v407_v17  ;;  %v70_v18 = vld [vmem:[%s7392_s29 + $0x20] sm:$0xff] }
 0x1e7   :  { %5175 = vtanh.f32 %v5754_v19  ;;  %v5797_v2 = vsel %vm449_vm4, %v5754_v19, 0.0  ;;  %v71_v19 = vld [vmem:[%s7392_s29 + $0x28] sm:$0xff] }
 0x1e8   :  { %v424_v23 = vpop.permute.xlu1 %423 }
 0x1e9   :  { %v5757_v24 = vadd.f32 %v424_v23, %v408_v22  ;;  %v78_v23 = vpack.c.bf16 %v71_v19, %v70_v18 }
 0x1eb   :  { %5177 = vtanh.f32 %v5757_v24  ;;  %4557 = vmatmul.mubr.msk.bf16.gmra.mrb[8].mxu0 %vm117_vm0, %v78_v23 }
 0x1ec   :  { %195 = vmatprep.mubr.bf16.mxu0 %v5538_v1 }
 0x1f1   :  { %v5176_v25 = vpop.eup %5175 }
 0x1f2   :  { %433 = vrot.lane.b32.xlu1 %v5176_v25, %s5539_s6  ;;  %v73_v25 = vld [vmem:[%s7392_s29 + $0x38] sm:$0xff] }
 0x1f5   :  { %v5178_v26 = vpop.eup %5177 }
 0x1f6   :  { %435 = vrot.lane.b32.xlu0 %v5178_v26, %s5539_s6 }
 0x1f9   :  { %v5762_v27 = vpop.permute.xlu1 %447 }
 0x1fa   :  { %vm450_vm5 = vcmp.eq.s32.totalorder %v5762_v27, 1 }
 0x264   :  { %v434_v29 = vpop.permute.xlu1 %433 }
 0x265   :  { %v439_v30 = vmul.f32 %v5172_v5, %v434_v29  ;;  %v5803_v5 = vsel %vm450_vm5, %v5757_v24, 0.0  ;;  %v72_v24 = vld [vmem:[%s7392_s29 + $0x30] sm:$0xff] }
 0x266   :  { %v79_v26 = vpack.c.bf16 %v73_v25, %v72_v24 }
 0x267   :  { %v5766_v33 = vsel %vm449_vm4, %v439_v30, 0.0 }
 0x268   :  { %v436_v31 = vpop.permute.xlu0 %435  ;;  %4558 = vmatmul.mubr.msk.bf16.gmra.mrb[12].mxu0 %vm117_vm0, %v79_v26 }
 0x269   :  { %v440_v32 = vmul.f32 %v5174_v10, %v436_v31  ;;  %1073 = vmatprep.mubr.bf16.mxu0 %v5538_v1 }
 0x26b   :  { %v5770_v34 = vsel %vm450_vm5, %v440_v32, 0.0 }
 0x26c   :  { %v466_v35 = vpack.c.bf16 %v5770_v34, %v5766_v33 }
 0x26e   :  { %468 = vrot.lane.b32.xlu1 %v466_v35, %s5540_s27 }
 0x2e0   :  { %v469_v36 = vpop.permute.xlu1 %468 }
 0x2e1   :  { %4577 = vmatmul.mubr.msk.bf16.vlgmr.msra.gmra.mrb[8].mxu1 %vm117_vm0, %v469_v36 }
 0x2e2   :  { %616 = vmatpush1.bf16.msra.mxu1 %v5685_v12  ;;  %647 = vmatprep.mubr.bf16.mxu1 %v5538_v1 }
 0x2e3   :  { %617 = vmatprep.subr.bf16.mxu1 %v5691_v13 }
 0x2e6   :  { %618 = vmatpush1.bf16.msra.mxu1 %v5700_v14 }
 0x2e7   :  { %757 = vmatprep.subr.bf16.mxu1 %v5680_v9 }
 0x3b4   :  { %v507_v38 = vpop.f32.mrb[8].mxu1 }
 0x3b5   :  { %v532_v39 = vadd.f32 %v525_v37, %v507_v38  ;;  %v509_v40 = vpop.f32.mrb[9].mxu1  ;;  %v177_v38 = vpop.f32.mrb[4].mxu0 }
 0x3b6   :  { %v510_v41 = vpop.f32.mrb[10].mxu1  ;;  %v179_v40 = vpop.f32.mrb[5].mxu0 }
 0x3b7   :  { %5179 = vtanh.f32 %v532_v39  ;;  %v511_v43 = vpop.f32.mrb[11].mxu1  ;;  %v4581_v47 = vmul.f32 -1.442695, %v532_v39  ;;  %v178_v39 = vadd.f32 %v177_v38, %v5720_v20  ;;  %v180_v41 = vadd.f32 %v179_v40, %v5722_v21 }
 0x3b8   :  { %v533_v44 = vadd.f32 %v526_v42, %v511_v43  ;;  %v181_v42 = vpop.f32.mrb[6].mxu0 }
 0x3b9   :  { %v182_v43 = vadd.f32 %v181_v42, %v5720_v20  ;;  %v4809_v16 = vpack.c.bf16 %v180_v41, %v180_v41 }
 0x3ba   :  { %5181 = vtanh.f32 %v533_v44  ;;  %v4582_v48 = vmul.f32 -1.442695, %v533_v44  ;;  %v183_v44 = vpop.f32.mrb[7].mxu0 }
 0x3bb   :  { %5183 = vpow2.f32 %v4581_v47 }
 0x3bc   :  { %5185 = vpow2.f32 %v4582_v48  ;;  %v187_v48 = vpop.f32.mrb[8].mxu0 }
 0x3c1   :  { %v5180_v45 = vpop.eup %5179 }
 0x3c2   :  { %552 = vrot.lane.b32.xlu0 %v5180_v45, %s5539_s6  ;;  %v4742_v45 = vpack.c.bf16 %v180_v41, %v178_v39 }
 0x3c4   :  { %v5182_v46 = vpop.eup %5181 }
 0x3c5   :  { %554 = vrot.lane.b32.xlu1 %v5182_v46, %s5539_s6  ;;  %v5184_v52 = vpop.eup %5183  ;;  %v184_v46 = vadd.f32 %v183_v44, %v5722_v21 }
 0x3c6   :  { %v5186_v53 = vpop.eup %5185  ;;  %v540_v54 = vadd.f32 1.0, %v5184_v52  ;;  %v188_v52 = vadd.f32 %v187_v48, %v5720_v20 }
 0x3c7   :  { %v541_v55 = vadd.f32 1.0, %v5186_v53  ;;  %v4743_v47 = vpack.c.bf16 %v184_v46, %v182_v43  ;;  %v189_v53 = vpop.f32.mrb[9].mxu0 }
 0x3c8   :  { %5187 = vrcp.f32 %v540_v54  ;;  %v190_v54 = vadd.f32 %v189_v53, %v5722_v21  ;;  %v4585_v53 = vld [vmem:[%s7395_s23 + $0x20] sm:$0xff] }
 0x3c9   :  { %5189 = vrcp.f32 %v541_v55  ;;  %v191_v55 = vpop.f32.mrb[10].mxu0  ;;  %vm672_vm10 = vcmp.gt.f32.partialorder %v4585_v53, 0.5 }
 0x3ca   :  { %v192_v49 = vadd.f32 %v191_v55, %v5720_v20  ;;  %v4807_v24 = vpack.c.bf16 %v190_v54, %v190_v54 }
 0x3d2   :  { %v5188_v56 = vpop.eup %5187 }
 0x3d3   :  { %v5190_v60 = vpop.eup %5189  ;;  %v548_v3 = vmul.f32 %v5188_v56, %v5797_v2 }
 0x3d4   :  { %v549_v7 = vmul.f32 %v5190_v60, %v5803_v5 }
 0x434   :  { %v553_v57 = vpop.permute.xlu0 %552 }
 0x435   :  { %v558_v58 = vmul.f32 %v5188_v56, %v553_v57  ;;  %v4744_v57 = vpack.c.bf16 %v190_v54, %v188_v52 }
 0x437   :  { %562 = vrot.lane.b32.xlu0 %v558_v58, %s5540_s27  ;;  %v555_v61 = vpop.permute.xlu1 %554 }
 0x438   :  { %v559_v62 = vmul.f32 %v5190_v60, %v555_v61 }
 0x43a   :  { %564 = vrot.lane.b32.xlu1 %v559_v62, %s5540_s27 }
 0x43b   :  { %585 = vperm.xlu0 %5129, %v582_v63  }
 0x43e   :  { %588 = vperm.xlu1 %5130, %v583_v0  }
 0x4a9   :  { %v563_v4 = vpop.permute.xlu0 %562 }
 0x4aa   :  { %v5805_v6 = vadd.f32 %v563_v4, %v548_v3 }
 0x4ac   :  { %5191 = vtanh.f32 %v5805_v6  ;;  %v565_v8 = vpop.permute.xlu1 %564 }
 0x4ad   :  { %v5809_v10 = vadd.f32 %v565_v8, %v549_v7 }
 0x4af   :  { %5193 = vtanh.f32 %v5809_v10 }
 0x4b6   :  { %v5192_v17 = vpop.eup %5191 }
 0x4b7   :  { %574 = vrot.lane.b32.xlu0 %v5192_v17, %s5539_s6 }
 0x4b9   :  { %v5194_v22 = vpop.eup %5193 }
 0x4ba   :  { %576 = vrot.lane.b32.xlu1 %v5194_v22, %s5539_s6  ;;  %v5838_v27 = vpop.permute.xlu0 %585 }
 0x4bb   :  { %vm590_vm8 = vcmp.eq.s32.totalorder %v5838_v27, 1 }
 0x4bd   :  { %v5840_v28 = vpop.permute.xlu1 %588 }
 0x4be   :  { %vm591_vm9 = vcmp.eq.s32.totalorder %v5840_v28, 1 }
 0x529   :  { %v575_v29 = vpop.permute.xlu0 %574 }
 0x52a   :  { %v580_v30 = vmul.f32 %v5188_v56, %v575_v29  ;;  %v193_v56 = vpop.f32.mrb[11].mxu0 }
 0x52b   :  { %v194_v58 = vadd.f32 %v193_v56, %v5722_v21  ;;  %v4586_v56 = vld [vmem:[%s7395_s23 + $0x28] sm:$0xff] }
 0x52c   :  { %v577_v31 = vpop.permute.xlu1 %576  ;;  %v5847_v35 = vsel %vm590_vm8, %v580_v30, %v5766_v33  ;;  %vm673_vm11 = vcmp.gt.f32.partialorder %v4586_v56, 0.5 }
 0x52d   :  { %v581_v32 = vmul.f32 %v5190_v60, %v577_v31  ;;  %v4745_v59 = vpack.c.bf16 %v194_v58, %v192_v49  ;;  %v197_v60 = vpop.f32.mrb[12].mxu0  ;;  %v4806_v25 = vpack.c.bf16 %v194_v58, %v194_v58 }
 0x52e   :  { %v198_v61 = vadd.f32 %v197_v60, %v5720_v20  ;;  %v199_v62 = vpop.f32.mrb[13].mxu0  ;;  %v724_v60 = vsel %vm672_vm10, 1, %v5538_v1 }
 0x52f   :  { %v5852_v36 = vsel %vm591_vm9, %v581_v32, %v5770_v34  ;;  %v200_v63 = vadd.f32 %v199_v62, %v5722_v21  ;;  %v201_v0 = vpop.f32.mrb[14].mxu0  ;;  %v5886_v26 = vsel %vm380_vm1, %v4744_v57, %v4806_v25  ;;  %v5889_v29 = vsel %vm380_vm1, %v4745_v59, %v4807_v24 }
 0x530   :  { %v608_v37 = vpack.c.bf16 %v5852_v36, %v5847_v35  ;;  %v202_v3 = vadd.f32 %v201_v0, %v5720_v20  ;;  %v203_v4 = vpop.f32.mrb[15].mxu0  ;;  %v4808_v20 = vpack.c.bf16 %v184_v46, %v184_v46  ;;  %v5907_v62 = vsel %vm590_vm8, %v5805_v6, %v5797_v2 }
 0x531   :  { %v4746_v7 = vpack.c.bf16 %v200_v63, %v198_v61  ;;  %v204_v8 = vadd.f32 %v203_v4, %v5722_v21  ;;  %v4805_v17 = vpack.c.bf16 %v200_v63, %v200_v63  ;;  %v725_v61 = vsel %vm673_vm11, 1, %v5538_v1 }
 0x532   :  { %610 = vrot.lane.b32.xlu0 %v608_v37, %s5540_s27 }
 0x533   :  { %v4747_v11 = vpack.c.bf16 %v204_v8, %v202_v3  ;;  %v4804_v18 = vpack.c.bf16 %v204_v8, %v204_v8  ;;  %v5877_v19 = vsel %vm380_vm1, %v4743_v47, %v4805_v17  ;;  %v5880_v22 = vsel %vm380_vm1, %v4746_v7, %v4808_v20 }
 0x534   :  { %v5914_v3 = vsel %vm591_vm9, %v5809_v10, %v5803_v5  ;;  %v809_v24 = vunpack.c.l.bf16 %v5877_v19 }
 0x535   :  { %v665_v21 = vsel %vm380_vm1, %v4742_v45, %v4804_v18  ;;  %v5883_v23 = vsel %vm380_vm1, %v4747_v11, %v4809_v16 }
 0x536   :  { %v667_v30 = vunpack.c.l.bf16 %v665_v21  ;;  %v668_v39 = vunpack.c.h.bf16 %v665_v21 }
 0x5a4   :  { %v611_v15 = vpop.permute.xlu0 %610 }
 0x5a5   :  { %4583 = vmatmul.mubr.msk.bf16.vlgmr.msra.gmra.mrb[12].mxu1 %vm117_vm0, %v611_v15 }
 0x5a6   :  { %758 = vmatpush1.bf16.msra.mxu1 %v5685_v12  ;;  %789 = vmatprep.mubr.bf16.mxu1 %v5538_v1 }
 0x5a7   :  { %759 = vmatprep.subr.bf16.mxu1 %v5691_v13 }
 0x5aa   :  { %760 = vmatpush1.bf16.msra.mxu1 %v5700_v14 }
 0x5ab   :  { %899 = vmatprep.subr.bf16.mxu1 %v5680_v9 }
 0x678   :  { %v649_v31 = vpop.f32.mrb[12].mxu1 }
 0x679   :  { %v674_v32 = vadd.f32 %v667_v30, %v649_v31  ;;  %v651_v37 = vpop.f32.mrb[13].mxu1 }
 0x67a   :  { %v652_v38 = vpop.f32.mrb[14].mxu1  ;;  %v810_v37 = vunpack.c.h.bf16 %v5877_v19  ;;  %v4591_v19 = vld [vmem:[%s7395_s23 + $0x30] sm:$0xff] }
 0x67b   :  { %5195 = vtanh.f32 %v674_v32  ;;  %v653_v40 = vpop.f32.mrb[15].mxu1  ;;  %v4587_v44 = vmul.f32 -1.442695, %v674_v32  ;;  %vm814_vm14 = vcmp.gt.f32.partialorder %v4591_v19, 0.5 }
 0x67c   :  { %v675_v41 = vadd.f32 %v668_v39, %v653_v40 }
 0x67e   :  { %5197 = vtanh.f32 %v675_v41  ;;  %v4588_v45 = vmul.f32 -1.442695, %v675_v41 }
 0x67f   :  { %5199 = vpow2.f32 %v4587_v44 }
 0x680   :  { %5201 = vpow2.f32 %v4588_v45 }
 0x685   :  { %v5196_v42 = vpop.eup %5195 }
 0x686   :  { %694 = vrot.lane.b32.xlu1 %v5196_v42, %s5539_s6 }
 0x688   :  { %v5198_v43 = vpop.eup %5197 }
 0x689   :  { %696 = vrot.lane.b32.xlu0 %v5198_v43, %s5539_s6  ;;  %v5200_v46 = vpop.eup %5199 }
 0x68a   :  { %v5202_v47 = vpop.eup %5201  ;;  %v682_v48 = vadd.f32 1.0, %v5200_v46 }
 0x68b   :  { %v683_v52 = vadd.f32 1.0, %v5202_v47 }
 0x68c   :  { %5203 = vrcp.f32 %v682_v48 }
 0x68d   :  { %5205 = vrcp.f32 %v683_v52 }
 0x696   :  { %v5204_v54 = vpop.eup %5203 }
 0x697   :  { %v5206_v57 = vpop.eup %5205  ;;  %v690_v63 = vmul.f32 %v5204_v54, %v5907_v62 }
 0x698   :  { %v691_v7 = vmul.f32 %v5206_v57, %v5914_v3 }
 0x6f8   :  { %v695_v55 = vpop.permute.xlu1 %694 }
 0x6f9   :  { %v700_v49 = vmul.f32 %v5204_v54, %v695_v55 }
 0x6fb   :  { %704 = vrot.lane.b32.xlu1 %v700_v49, %s5540_s27  ;;  %v697_v58 = vpop.permute.xlu0 %696 }
 0x6fc   :  { %v701_v59 = vmul.f32 %v5206_v57, %v697_v58 }
 0x6fe   :  { %706 = vrot.lane.b32.xlu0 %v701_v59, %s5540_s27 }
 0x6ff   :  { %727 = vperm.xlu1 %5130, %v724_v60  }
 0x702   :  { %730 = vperm.xlu0 %5129, %v725_v61  }
 0x76d   :  { %v705_v0 = vpop.permute.xlu1 %704 }
 0x76e   :  { %v5916_v4 = vadd.f32 %v705_v0, %v690_v63 }
 0x770   :  { %5207 = vtanh.f32 %v5916_v4  ;;  %v707_v8 = vpop.permute.xlu0 %706 }
 0x771   :  { %v5920_v11 = vadd.f32 %v707_v8, %v691_v7 }
 0x773   :  { %5209 = vtanh.f32 %v5920_v11 }
 0x77a   :  { %v5208_v2 = vpop.eup %5207 }
 0x77b   :  { %716 = vrot.lane.b32.xlu1 %v5208_v2, %s5539_s6 }
 0x77d   :  { %v5210_v6 = vpop.eup %5209 }
 0x77e   :  { %718 = vrot.lane.b32.xlu0 %v5210_v6, %s5539_s6  ;;  %v728_v27 = vpop.permute.xlu1 %727 }
 0x77f   :  { %vm732_vm12 = vcmp.eq.s32.totalorder %v728_v27, 1 }
 0x780   :  { %v5963_v59 = vsel %vm732_vm12, %v5916_v4, %v5907_v62 }
 0x781   :  { %v5925_v5 = vpop.permute.xlu0 %730 }
 0x782   :  { %vm733_vm13 = vcmp.eq.s32.totalorder %v5925_v5, 1 }
 0x783   :  { %v5970_v63 = vsel %vm733_vm13, %v5920_v11, %v5914_v3 }
 0x7ed   :  { %v717_v10 = vpop.permute.xlu1 %716 }
 0x7ee   :  { %v722_v28 = vmul.f32 %v5204_v54, %v717_v10  ;;  %v4592_v54 = vld [vmem:[%s7395_s23 + $0x38] sm:$0xff] }
 0x7ef   :  { %vm815_vm15 = vcmp.gt.f32.partialorder %v4592_v54, 0.5 }
 0x7f0   :  { %v719_v15 = vpop.permute.xlu0 %718  ;;  %v5930_v20 = vsel %vm732_vm12, %v722_v28, %v5847_v35  ;;  %v867_v58 = vsel %vm815_vm15, 1, %v5538_v1 }
 0x7f1   :  { %v723_v16 = vmul.f32 %v5206_v57, %v719_v15  ;;  %v866_v57 = vsel %vm814_vm14, 1, %v5538_v1 }
 0x7f3   :  { %v5935_v17 = vsel %vm733_vm13, %v723_v16, %v5852_v36 }
 0x7f4   :  { %v750_v18 = vpack.c.bf16 %v5935_v17, %v5930_v20 }
 0x7f6   :  { %752 = vrot.lane.b32.xlu1 %v750_v18, %s5540_s27 }
 0x868   :  { %v753_v21 = vpop.permute.xlu1 %752 }
 0x869   :  { %4589 = vmatmul.mubr.msk.bf16.vlgmr.msra.gmra.mrb[16].mxu1 %vm117_vm0, %v753_v21  ;;  %v951_v21 = vunpack.c.l.bf16 %v5886_v26 }
 0x86a   :  { %900 = vmatpush1.bf16.msra.mxu1 %v5685_v12  ;;  %931 = vmatprep.mubr.bf16.mxu1 %v5538_v1 }
 0x86b   :  { %901 = vmatprep.subr.bf16.mxu1 %v5691_v13 }
 0x86e   :  { %902 = vmatpush1.bf16.msra.mxu1 %v5700_v14 }
 0x86f   :  { %1181 = vmatprep.subr.bf16.mxu1 %v5680_v9 }
 0x93c   :  { %v791_v25 = vpop.f32.mrb[16].mxu1 }
 0x93d   :  { %v816_v30 = vadd.f32 %v809_v24, %v791_v25  ;;  %v793_v31 = vpop.f32.mrb[17].mxu1 }
 0x93e   :  { %v794_v32 = vpop.f32.mrb[18].mxu1 }
 0x93f   :  { %5211 = vtanh.f32 %v816_v30  ;;  %v795_v38 = vpop.f32.mrb[19].mxu1  ;;  %v4593_v42 = vmul.f32 -1.442695, %v816_v30  ;;  %v952_v32 = vunpack.c.h.bf16 %v5886_v26  ;;  %v4597_v26 = vld [vmem:[%s7395_s23 + $0x40] sm:$0xff] }
 0x940   :  { %v817_v39 = vadd.f32 %v810_v37, %v795_v38  ;;  %vm956_vm3 = vcmp.gt.f32.partialorder %v4597_v26, 0.5 }
 0x942   :  { %5213 = vtanh.f32 %v817_v39  ;;  %v4594_v43 = vmul.f32 -1.442695, %v817_v39 }
 0x943   :  { %5215 = vpow2.f32 %v4593_v42 }
 0x944   :  { %5217 = vpow2.f32 %v4594_v43 }
 0x949   :  { %v5212_v40 = vpop.eup %5211 }
 0x94a   :  { %836 = vrot.lane.b32.xlu0 %v5212_v40, %s5539_s6 }
 0x94c   :  { %v5214_v41 = vpop.eup %5213 }
 0x94d   :  { %838 = vrot.lane.b32.xlu1 %v5214_v41, %s5539_s6  ;;  %v5216_v44 = vpop.eup %5215 }
 0x94e   :  { %v5218_v45 = vpop.eup %5217  ;;  %v824_v46 = vadd.f32 1.0, %v5216_v44 }
 0x94f   :  { %v825_v47 = vadd.f32 1.0, %v5218_v45 }
 0x950   :  { %5219 = vrcp.f32 %v824_v46 }
 0x951   :  { %5221 = vrcp.f32 %v825_v47 }
 0x95a   :  { %v5220_v48 = vpop.eup %5219 }
 0x95b   :  { %v5222_v55 = vpop.eup %5221  ;;  %v832_v60 = vmul.f32 %v5220_v48, %v5963_v59 }
 0x95c   :  { %v833_v7 = vmul.f32 %v5222_v55, %v5970_v63 }
 0x9bc   :  { %v837_v52 = vpop.permute.xlu0 %836 }
 0x9bd   :  { %v842_v53 = vmul.f32 %v5220_v48, %v837_v52  ;;  %v4598_v52 = vld [vmem:[%s7395_s23 + $0x48] sm:$0xff] }
 0x9be   :  { %vm957_vm4 = vcmp.gt.f32.partialorder %v4598_v52, 0.5 }
 0x9bf   :  { %846 = vrot.lane.b32.xlu0 %v842_v53, %s5540_s27  ;;  %v839_v49 = vpop.permute.xlu1 %838 }
 0x9c0   :  { %v843_v56 = vmul.f32 %v5222_v55, %v839_v49  ;;  %v1008_v49 = vsel %vm956_vm3, 1, %v5538_v1 }
 0x9c2   :  { %848 = vrot.lane.b32.xlu1 %v843_v56, %s5540_s27  ;;  %v1009_v56 = vsel %vm957_vm4, 1, %v5538_v1 }
 0x9c3   :  { %869 = vperm.xlu0 %5129, %v866_v57  }
 0x9c6   :  { %872 = vperm.xlu1 %5130, %v867_v58  }
 0xa31   :  { %v847_v61 = vpop.permute.xlu0 %846 }
 0xa32   :  { %v5972_v0 = vadd.f32 %v847_v61, %v832_v60 }
 0xa34   :  { %5223 = vtanh.f32 %v5972_v0  ;;  %v849_v8 = vpop.permute.xlu1 %848 }
 0xa35   :  { %v5976_v2 = vadd.f32 %v849_v8, %v833_v7 }
 0xa37   :  { %5225 = vtanh.f32 %v5976_v2 }
 0xa3e   :  { %v5224_v62 = vpop.eup %5223 }
 0xa3f   :  { %858 = vrot.lane.b32.xlu0 %v5224_v62, %s5539_s6 }
 0xa41   :  { %v5226_v4 = vpop.eup %5225 }
 0xa42   :  { %860 = vrot.lane.b32.xlu1 %v5226_v4, %s5539_s6  ;;  %v870_v6 = vpop.permute.xlu0 %869 }
 0xa43   :  { %vm874_vm1 = vcmp.eq.s32.totalorder %v870_v6, 1 }
 0xa44   :  { %v6019_v57 = vsel %vm874_vm1, %v5972_v0, %v5963_v59 }
 0xa45   :  { %v5981_v3 = vpop.permute.xlu1 %872 }
 0xa46   :  { %vm875_vm2 = vcmp.eq.s32.totalorder %v5981_v3, 1 }
 0xa47   :  { %v6026_v61 = vsel %vm875_vm2, %v5976_v2, %v5970_v63 }
 0xab1   :  { %v859_v11 = vpop.permute.xlu0 %858 }
 0xab2   :  { %v864_v27 = vmul.f32 %v5220_v48, %v859_v11 }
 0xab4   :  { %v861_v5 = vpop.permute.xlu1 %860  ;;  %v5986_v28 = vsel %vm874_vm1, %v864_v27, %v5930_v20 }
 0xab5   :  { %v865_v10 = vmul.f32 %v5222_v55, %v861_v5 }
 0xab7   :  { %v5991_v15 = vsel %vm875_vm2, %v865_v10, %v5935_v17 }
 0xab8   :  { %v892_v16 = vpack.c.bf16 %v5991_v15, %v5986_v28 }
 0xaba   :  { %894 = vrot.lane.b32.xlu0 %v892_v16, %s5540_s27 }
 0xb2c   :  { %v895_v18 = vpop.permute.xlu0 %894 }
 0xb2d   :  { %4595 = vmatmul.mubr.msk.bf16.vlgmr.msra.gmra.mrb[20].mxu1 %vm117_vm0, %v895_v18 }
 0xb2e   :  { %1182 = vmatpush1.bf16.msra.mxu1 %v5685_v12  ;;  %1213 = vmatprep.mubr.bf16.mxu1 %v5538_v1 }
 0xb2f   :  { %1183 = vmatprep.subr.bf16.mxu1 %v5691_v13 }
 0xb32   :  { %1184 = vmatpush1.bf16.msra.mxu1 %v5700_v14 }
 0xb33   :  { %1461 = vmatprep.subr.bf16.mxu1 %v5680_v9 }
 0xc00   :  { %v933_v24 = vpop.f32.mrb[20].mxu1 }
 0xc01   :  { %v958_v25 = vadd.f32 %v951_v21, %v933_v24  ;;  %v935_v30 = vpop.f32.mrb[21].mxu1  ;;  %v1091_v21 = vunpack.c.l.bf16 %v5889_v29 }
 0xc02   :  { %v936_v31 = vpop.f32.mrb[22].mxu1 }
 0xc03   :  { %5227 = vtanh.f32 %v958_v25  ;;  %v937_v37 = vpop.f32.mrb[23].mxu1  ;;  %v4599_v41 = vmul.f32 -1.442695, %v958_v25 }
 0xc04   :  { %v959_v38 = vadd.f32 %v952_v32, %v937_v37  ;;  %v1092_v32 = vunpack.c.h.bf16 %v5889_v29  ;;  %v4603_v29 = vld [vmem:[%s7395_s23 + $0x50] sm:$0xff] }
 0xc05   :  { %vm1096_vm7 = vcmp.gt.f32.partialorder %v4603_v29, 0.5 }
 0xc06   :  { %5229 = vtanh.f32 %v959_v38  ;;  %v4600_v42 = vmul.f32 -1.442695, %v959_v38 }
 0xc07   :  { %5231 = vpow2.f32 %v4599_v41 }
 0xc08   :  { %5233 = vpow2.f32 %v4600_v42 }
 0xc0d   :  { %v5228_v39 = vpop.eup %5227 }
 0xc0e   :  { %978 = vrot.lane.b32.xlu1 %v5228_v39, %s5539_s6 }
 0xc10   :  { %v5230_v40 = vpop.eup %5229 }
 0xc11   :  { %980 = vrot.lane.b32.xlu0 %v5230_v40, %s5539_s6  ;;  %v5232_v43 = vpop.eup %5231 }
 0xc12   :  { %v5234_v44 = vpop.eup %5233  ;;  %v966_v45 = vadd.f32 1.0, %v5232_v43 }
 0xc13   :  { %v967_v46 = vadd.f32 1.0, %v5234_v44 }
 0xc14   :  { %5235 = vrcp.f32 %v966_v45 }
 0xc15   :  { %5237 = vrcp.f32 %v967_v46  ;;  %v4604_v46 = vld [vmem:[%s7395_s23 + $0x58] sm:$0xff] }
 0xc16   :  { %vm1097_vm8 = vcmp.gt.f32.partialorder %v4604_v46, 0.5 }
 0xc17   :  { %v1149_v52 = vsel %vm1097_vm8, 1, %v5538_v1 }
 0xc1e   :  { %v5236_v47 = vpop.eup %5235 }
 0xc1f   :  { %v5238_v53 = vpop.eup %5237  ;;  %v974_v58 = vmul.f32 %v5236_v47, %v6019_v57 }
 0xc20   :  { %v975_v8 = vmul.f32 %v5238_v53, %v6026_v61 }
 0xc80   :  { %v979_v19 = vpop.permute.xlu1 %978 }
 0xc81   :  { %v984_v48 = vmul.f32 %v5236_v47, %v979_v19 }
 0xc83   :  { %988 = vrot.lane.b32.xlu1 %v984_v48, %s5540_s27  ;;  %v981_v54 = vpop.permute.xlu0 %980  ;;  %v1148_v48 = vsel %vm1096_vm7, 1, %v5538_v1 }
 0xc84   :  { %v985_v55 = vmul.f32 %v5238_v53, %v981_v54 }
 0xc86   :  { %990 = vrot.lane.b32.xlu0 %v985_v55, %s5540_s27 }
 0xc87   :  { %1011 = vperm.xlu1 %5130, %v1008_v49  }
 0xc8a   :  { %1014 = vperm.xlu0 %5129, %v1009_v56  }
 0xcf5   :  { %v989_v60 = vpop.permute.xlu1 %988 }
 0xcf6   :  { %v6028_v7 = vadd.f32 %v989_v60, %v974_v58 }
 0xcf8   :  { %5239 = vtanh.f32 %v6028_v7  ;;  %v991_v62 = vpop.permute.xlu0 %990 }
 0xcf9   :  { %v6032_v4 = vadd.f32 %v991_v62, %v975_v8 }
 0xcfb   :  { %5241 = vtanh.f32 %v6032_v4 }
 0xd02   :  { %v5240_v59 = vpop.eup %5239 }
 0xd03   :  { %1000 = vrot.lane.b32.xlu1 %v5240_v59, %s5539_s6 }
 0xd05   :  { %v5242_v0 = vpop.eup %5241 }
 0xd06   :  { %1002 = vrot.lane.b32.xlu0 %v5242_v0, %s5539_s6  ;;  %v1012_v6 = vpop.permute.xlu1 %1011 }
 0xd07   :  { %vm1016_vm5 = vcmp.eq.s32.totalorder %v1012_v6, 1 }
 0xd09   :  { %v6037_v63 = vpop.permute.xlu0 %1014 }
 0xd0a   :  { %vm1017_vm6 = vcmp.eq.s32.totalorder %v6037_v63, 1 }
 0xd0b   :  { %v6082_v49 = vsel %vm1017_vm6, %v6032_v4, %v6026_v61 }
 0xd75   :  { %v1001_v2 = vpop.permute.xlu1 %1000 }
 0xd76   :  { %v1006_v3 = vmul.f32 %v5236_v47, %v1001_v2 }
 0xd78   :  { %v1003_v11 = vpop.permute.xlu0 %1002  ;;  %v6042_v5 = vsel %vm1016_vm5, %v1006_v3, %v5986_v28 }
 0xd79   :  { %v1007_v27 = vmul.f32 %v5238_v53, %v1003_v11  ;;  %v6075_v53 = vsel %vm1016_vm5, %v6028_v7, %v6019_v57 }
 0xd7b   :  { %v6047_v10 = vsel %vm1017_vm6, %v1007_v27, %v5991_v15  ;;  %v6116_v27 = vld [vmem:[%s7393_s25] ss:$8 sps:$4 sm:$0xff]  }
 0xd7c   :  { %v1034_v16 = vpack.c.bf16 %v6047_v10, %v6042_v5 }
 0xd7e   :  { %1036 = vrot.lane.b32.xlu1 %v1034_v16, %s5540_s27  ;;  %v6123_v16 = vld [vmem:[%s7393_s25 + $0x14] ss:$8 sps:$4 sm:$0xff]  }
 0xdf0   :  { %v1037_v18 = vpop.permute.xlu1 %1036 }
 0xdf1   :  { %4601 = vmatmul.mubr.msk.bf16.vlgmr.msra.gmra.mrb[16].mxu0 %vm117_vm0, %v1037_v18  ;;  %v6129_v18 = vld [vmem:[%s7393_s25 + $0x10] ss:$8 sps:$4 sm:$0xff]  }
 0xdf2   :  { %1322 = vmatpush1.bf16.msra.mxu0 %v5685_v12  ;;  %1353 = vmatprep.mubr.bf16.mxu0 %v5538_v1 }
 0xdf3   :  { %1323 = vmatprep.subr.bf16.mxu0 %v5691_v13 }
 0xdf6   :  { %1324 = vmatpush1.bf16.msra.mxu0 %v5700_v14 }
 0xdf7   :  { %1601 = vmatprep.subr.bf16.mxu0 %v5680_v9 }
 0xec4   :  { %v1075_v24 = vpop.f32.mrb[16].mxu0 }
 0xec5   :  { %v1098_v25 = vadd.f32 %v1091_v21, %v1075_v24  ;;  %v1077_v30 = vpop.f32.mrb[17].mxu0  ;;  %v1231_v21 = vunpack.c.l.bf16 %v5880_v22 }
 0xec6   :  { %v1078_v31 = vpop.f32.mrb[18].mxu0 }
 0xec7   :  { %5243 = vtanh.f32 %v1098_v25  ;;  %v1079_v37 = vpop.f32.mrb[19].mxu0  ;;  %v4605_v14 = vmul.f32 -1.442695, %v1098_v25 }
 0xec8   :  { %v1099_v38 = vadd.f32 %v1092_v32, %v1079_v37  ;;  %v1232_v32 = vunpack.c.h.bf16 %v5880_v22  ;;  %v4609_v22 = vld [vmem:[%s7395_s23 + $0x60] sm:$0xff] }
 0xec9   :  { %vm1236_vm11 = vcmp.gt.f32.partialorder %v4609_v22, 0.5 }
 0xeca   :  { %5245 = vtanh.f32 %v1099_v38  ;;  %v4606_v9 = vmul.f32 -1.442695, %v1099_v38 }
 0xecb   :  { %5247 = vpow2.f32 %v4605_v14 }
 0xecc   :  { %5249 = vpow2.f32 %v4606_v9 }
 0xed1   :  { %v5244_v12 = vpop.eup %5243 }
 0xed2   :  { %1118 = vrot.lane.b32.xlu0 %v5244_v12, %s5539_s6 }
 0xed4   :  { %v5246_v13 = vpop.eup %5245 }
 0xed5   :  { %1120 = vrot.lane.b32.xlu1 %v5246_v13, %s5539_s6  ;;  %v5248_v39 = vpop.eup %5247 }
 0xed6   :  { %v5250_v40 = vpop.eup %5249  ;;  %v1106_v41 = vadd.f32 1.0, %v5248_v39 }
 0xed7   :  { %v1107_v42 = vadd.f32 1.0, %v5250_v40 }
 0xed8   :  { %5251 = vrcp.f32 %v1106_v41 }
 0xed9   :  { %5253 = vrcp.f32 %v1107_v42 }
 0xee2   :  { %v5252_v43 = vpop.eup %5251 }
 0xee3   :  { %v5254_v26 = vpop.eup %5253  ;;  %v1114_v54 = vmul.f32 %v5252_v43, %v6075_v53 }
 0xee4   :  { %v1115_v58 = vmul.f32 %v5254_v26, %v6082_v49 }
 0xf44   :  { %v1119_v44 = vpop.permute.xlu0 %1118 }
 0xf45   :  { %v1124_v45 = vmul.f32 %v5252_v43, %v1119_v44 }
 0xf47   :  { %1128 = vrot.lane.b32.xlu0 %v1124_v45, %s5540_s27  ;;  %v1121_v47 = vpop.permute.xlu1 %1120  ;;  %v4610_v45 = vld [vmem:[%s7395_s23 + $0x68] sm:$0xff] }
 0xf48   :  { %v1125_v19 = vmul.f32 %v5254_v26, %v1121_v47  ;;  %vm1237_vm12 = vcmp.gt.f32.partialorder %v4610_v45, 0.5 }
 0xf4a   :  { %1130 = vrot.lane.b32.xlu1 %v1125_v19, %s5540_s27  ;;  %v1288_v19 = vsel %vm1236_vm11, 1, %v5538_v1  ;;  %vm5542_vm11 = vmmov 0  }
 0xf4b   :  { %1151 = vperm.xlu0 %5129, %v1148_v48   ;;  %v1289_v48 = vsel %vm1237_vm12, 1, %v5538_v1 }
 0xf4e   :  { %1154 = vperm.xlu1 %5130, %v1149_v52  }
 0xfb9   :  { %v1129_v55 = vpop.permute.xlu0 %1128 }
 0xfba   :  { %v6084_v56 = vadd.f32 %v1129_v55, %v1114_v54 }
 0xfbc   :  { %5255 = vtanh.f32 %v6084_v56  ;;  %v1131_v60 = vpop.permute.xlu1 %1130 }
 0xfbd   :  { %v6088_v8 = vadd.f32 %v1131_v60, %v1115_v58 }
 0xfbf   :  { %5257 = vtanh.f32 %v6088_v8 }
 0xfc6   :  { %v5256_v57 = vpop.eup %5255 }
 0xfc7   :  { %1140 = vrot.lane.b32.xlu0 %v5256_v57, %s5539_s6 }
 0xfc9   :  { %v5258_v7 = vpop.eup %5257 }
 0xfca   :  { %1142 = vrot.lane.b32.xlu1 %v5258_v7, %s5539_s6  ;;  %v6093_v62 = vpop.permute.xlu0 %1151 }
 0xfcb   :  { %vm1156_vm9 = vcmp.eq.s32.totalorder %v6093_v62, 1 }
 0xfcc   :  { %v6150_v52 = vsel %vm1156_vm9, %v6084_v56, %v6075_v53 }
 0xfcd   :  { %v6095_v61 = vpop.permute.xlu1 %1154 }
 0xfce   :  { %vm1157_vm10 = vcmp.eq.s32.totalorder %v6095_v61, 1 }
 0xfcf   :  { %v6157_v58 = vsel %vm1157_vm10, %v6088_v8, %v6082_v49 }
0x1039   :  { %v1141_v4 = vpop.permute.xlu0 %1140 }
0x103a   :  { %v1146_v59 = vmul.f32 %v5252_v43, %v1141_v4 }
0x103c   :  { %v1143_v0 = vpop.permute.xlu1 %1142  ;;  %v6102_v63 = vsel %vm1156_vm9, %v1146_v59, %v6042_v5 }
0x103d   :  { %v1147_v6 = vmul.f32 %v5254_v26, %v1143_v0 }
0x103f   :  { %v6107_v2 = vsel %vm1157_vm10, %v1147_v6, %v6047_v10 }
0x1040   :  { %v1174_v3 = vpack.c.bf16 %v6107_v2, %v6102_v63 }
0x1042   :  { %1176 = vrot.lane.b32.xlu0 %v1174_v3, %s5540_s27 }
0x10b4   :  { %v1177_v11 = vpop.permute.xlu0 %1176 }
0x10b5   :  { %4607 = vmatmul.mubr.msk.bf16.vlgmr.msra.gmra.mrb[24].mxu1 %vm117_vm0, %v1177_v11 }
0x10b6   :  { %1462 = vmatpush1.bf16.msra.mxu1 %v6116_v27  ;;  %1493 = vmatprep.mubr.bf16.mxu1 %v5538_v1 }
0x10b7   :  { %1463 = vmatprep.subr.bf16.mxu1 %v6123_v16 }
0x10ba   :  { %1464 = vmatpush1.bf16.msra.mxu1 %v6129_v18 }
0x1188   :  { %v1215_v24 = vpop.f32.mrb[24].mxu1 }
0x1189   :  { %v1238_v25 = vadd.f32 %v1231_v21, %v1215_v24  ;;  %v1217_v30 = vpop.f32.mrb[25].mxu1  ;;  %v1371_v24 = vunpack.c.l.bf16 %v5883_v23 }
0x118a   :  { %v1218_v31 = vpop.f32.mrb[26].mxu1 }
0x118b   :  { %5259 = vtanh.f32 %v1238_v25  ;;  %v1219_v37 = vpop.f32.mrb[27].mxu1  ;;  %v4611_v14 = vmul.f32 -1.442695, %v1238_v25 }
0x118c   :  { %v1239_v38 = vadd.f32 %v1232_v32, %v1219_v37  ;;  %v1372_v37 = vunpack.c.h.bf16 %v5883_v23  ;;  %v4615_v23 = vld [vmem:[%s7395_s23 + $0x70] sm:$0xff] }
0x118d   :  { %vm1376_vm15 = vcmp.gt.f32.partialorder %v4615_v23, 0.5 }
0x118e   :  { %5261 = vtanh.f32 %v1239_v38  ;;  %v4612_v9 = vmul.f32 -1.442695, %v1239_v38 }
0x118f   :  { %5263 = vpow2.f32 %v4611_v14 }
0x1190   :  { %5265 = vpow2.f32 %v4612_v9 }
0x1195   :  { %v5260_v12 = vpop.eup %5259 }
0x1196   :  { %1258 = vrot.lane.b32.xlu1 %v5260_v12, %s5539_s6 }
0x1198   :  { %v5262_v13 = vpop.eup %5261 }
0x1199   :  { %1260 = vrot.lane.b32.xlu0 %v5262_v13, %s5539_s6  ;;  %v5264_v39 = vpop.eup %5263 }
0x119a   :  { %v5266_v40 = vpop.eup %5265  ;;  %v1246_v41 = vadd.f32 1.0, %v5264_v39 }
0x119b   :  { %v1247_v42 = vadd.f32 1.0, %v5266_v40 }
0x119c   :  { %5267 = vrcp.f32 %v1246_v41 }
0x119d   :  { %5269 = vrcp.f32 %v1247_v42 }
0x11a6   :  { %v5268_v29 = vpop.eup %5267 }
0x11a7   :  { %v5270_v46 = vpop.eup %5269  ;;  %v1254_v54 = vmul.f32 %v5268_v29, %v6150_v52 }
0x11a8   :  { %v1255_v57 = vmul.f32 %v5270_v46, %v6157_v58 }
0x1208   :  { %v1259_v43 = vpop.permute.xlu1 %1258 }
0x1209   :  { %v1264_v44 = vmul.f32 %v5268_v29, %v1259_v43 }
0x120b   :  { %1268 = vrot.lane.b32.xlu1 %v1264_v44, %s5540_s27  ;;  %v1261_v26 = vpop.permute.xlu0 %1260 }
0x120c   :  { %v1265_v47 = vmul.f32 %v5270_v46, %v1261_v26 }
0x120e   :  { %1270 = vrot.lane.b32.xlu0 %v1265_v47, %s5540_s27 }
0x120f   :  { %1291 = vperm.xlu1 %5130, %v1288_v19  }
0x1212   :  { %1294 = vperm.xlu0 %5129, %v1289_v48  }
0x127d   :  { %v1269_v55 = vpop.permute.xlu1 %1268 }
0x127e   :  { %v6159_v60 = vadd.f32 %v1269_v55, %v1254_v54 }
0x1280   :  { %5271 = vtanh.f32 %v6159_v60  ;;  %v1271_v7 = vpop.permute.xlu0 %1270 }
0x1281   :  { %v6163_v4 = vadd.f32 %v1271_v7, %v1255_v57 }
0x1283   :  { %5273 = vtanh.f32 %v6163_v4 }
0x128a   :  { %v5272_v53 = vpop.eup %5271 }
0x128b   :  { %1280 = vrot.lane.b32.xlu1 %v5272_v53, %s5539_s6 }
0x128d   :  { %v5274_v56 = vpop.eup %5273 }
0x128e   :  { %1282 = vrot.lane.b32.xlu0 %v5274_v56, %s5539_s6  ;;  %v1292_v62 = vpop.permute.xlu1 %1291 }
0x128f   :  { %vm1296_vm13 = vcmp.eq.s32.totalorder %v1292_v62, 1 }
0x1290   :  { %v6201_v47 = vsel %vm1296_vm13, %v6159_v60, %v6150_v52 }
0x1291   :  { %v1295_v49 = vpop.permute.xlu0 %1294 }
0x1292   :  { %vm1297_vm14 = vcmp.eq.s32.totalorder %v1295_v49, 1 }
0x1293   :  { %v6207_v54 = vsel %vm1297_vm14, %v6163_v4, %v6157_v58 }
0x12fd   :  { %v1281_v8 = vpop.permute.xlu1 %1280 }
0x12fe   :  { %v1286_v61 = vmul.f32 %v5268_v29, %v1281_v8  ;;  %v4616_v29 = vld [vmem:[%s7395_s23 + $0x78] sm:$0xff] }
0x12ff   :  { %vm1377_vm1 = vcmp.gt.f32.partialorder %v4616_v29, 0.5 }
0x1300   :  { %v1283_v59 = vpop.permute.xlu0 %1282  ;;  %v6170_v6 = vsel %vm1296_vm13, %v1286_v61, %v6102_v63  ;;  %v1429_v26 = vsel %vm1377_vm1, 1, %v5538_v1 }
0x1301   :  { %v1287_v0 = vmul.f32 %v5270_v46, %v1283_v59  ;;  %v1428_v46 = vsel %vm1376_vm15, 1, %v5538_v1 }
0x1303   :  { %v6174_v3 = vsel %vm1297_vm14, %v1287_v0, %v6107_v2 }
0x1304   :  { %v1314_v11 = vpack.c.bf16 %v6174_v3, %v6170_v6 }
0x1306   :  { %1316 = vrot.lane.b32.xlu1 %v1314_v11, %s5540_s27 }
0x1378   :  { %v1317_v21 = vpop.permute.xlu1 %1316 }
0x1379   :  { %4613 = vmatmul.mubr.msk.bf16.vlgmr.msra.gmra.mrb[20].mxu0 %vm117_vm0, %v1317_v21  ;;  %v1511_v21 = vunpack.c.l.bf16 %v5737_v50 }
0x137a   :  { %1602 = vmatpush1.bf16.msra.mxu0 %v6116_v27  ;;  %1633 = vmatprep.mubr.bf16.mxu0 %v5538_v1 }
0x137b   :  { %1603 = vmatprep.subr.bf16.mxu0 %v6123_v16 }
0x137e   :  { %1604 = vmatpush1.bf16.msra.mxu0 %v6129_v18 }
0x144c   :  { %v1355_v25 = vpop.f32.mrb[20].mxu0 }
0x144d   :  { %v1378_v30 = vadd.f32 %v1371_v24, %v1355_v25  ;;  %v1357_v31 = vpop.f32.mrb[21].mxu0 }
0x144e   :  { %v1358_v32 = vpop.f32.mrb[22].mxu0 }
0x144f   :  { %5275 = vtanh.f32 %v1378_v30  ;;  %v1359_v38 = vpop.f32.mrb[23].mxu0  ;;  %v4617_v16 = vmul.f32 -1.442695, %v1378_v30  ;;  %v1512_v32 = vunpack.c.h.bf16 %v5737_v50  ;;  %v4621_v50 = vld [vmem:[%s7395_s23 + $0x80] sm:$0xff] }
0x1450   :  { %v1379_v12 = vadd.f32 %v1372_v37, %v1359_v38  ;;  %vm1516_vm4 = vcmp.gt.f32.partialorder %v4621_v50, 0.5 }
0x1452   :  { %5277 = vtanh.f32 %v1379_v12  ;;  %v4618_v18 = vmul.f32 -1.442695, %v1379_v12 }
0x1453   :  { %5279 = vpow2.f32 %v4617_v16 }
0x1454   :  { %5281 = vpow2.f32 %v4618_v18 }
0x1459   :  { %v5276_v13 = vpop.eup %5275 }
0x145a   :  { %1398 = vrot.lane.b32.xlu0 %v5276_v13, %s5539_s6 }
0x145c   :  { %v5278_v27 = vpop.eup %5277 }
0x145d   :  { %1400 = vrot.lane.b32.xlu1 %v5278_v27, %s5539_s6  ;;  %v5280_v14 = vpop.eup %5279 }
0x145e   :  { %v5282_v9 = vpop.eup %5281  ;;  %v1386_v39 = vadd.f32 1.0, %v5280_v14 }
0x145f   :  { %v1387_v40 = vadd.f32 1.0, %v5282_v9 }
0x1460   :  { %5283 = vrcp.f32 %v1386_v39 }
0x1461   :  { %5285 = vrcp.f32 %v1387_v40 }
0x146a   :  { %v5284_v41 = vpop.eup %5283 }
0x146b   :  { %v5286_v43 = vpop.eup %5285  ;;  %v1394_v19 = vmul.f32 %v5284_v41, %v6201_v47 }
0x146c   :  { %v1395_v57 = vmul.f32 %v5286_v43, %v6207_v54 }
0x14cc   :  { %v1399_v42 = vpop.permute.xlu0 %1398 }
0x14cd   :  { %v1404_v22 = vmul.f32 %v5284_v41, %v1399_v42  ;;  %v4622_v42 = vld [vmem:[%s7395_s23 + $0x88] sm:$0xff] }
0x14ce   :  { %vm1517_vm5 = vcmp.gt.f32.partialorder %v4622_v42, 0.5 }
0x14cf   :  { %1408 = vrot.lane.b32.xlu0 %v1404_v22, %s5540_s27  ;;  %v1401_v44 = vpop.permute.xlu1 %1400 }
0x14d0   :  { %v1405_v45 = vmul.f32 %v5286_v43, %v1401_v44  ;;  %v1568_v44 = vsel %vm1516_vm4, 1, %v5538_v1 }
0x14d2   :  { %1410 = vrot.lane.b32.xlu1 %v1405_v45, %s5540_s27  ;;  %v1569_v45 = vsel %vm1517_vm5, 1, %v5538_v1 }
0x14d3   :  { %1431 = vperm.xlu0 %5129, %v1428_v46  }
0x14d6   :  { %1434 = vperm.xlu1 %5130, %v1429_v26  }
0x1541   :  { %v1409_v48 = vpop.permute.xlu0 %1408 }
0x1542   :  { %v6209_v55 = vadd.f32 %v1409_v48, %v1394_v19 }
0x1544   :  { %5287 = vtanh.f32 %v6209_v55  ;;  %v1411_v7 = vpop.permute.xlu1 %1410 }
0x1545   :  { %v6213_v53 = vadd.f32 %v1411_v7, %v1395_v57 }
0x1547   :  { %5289 = vtanh.f32 %v6213_v53 }
0x154e   :  { %v5288_v52 = vpop.eup %5287 }
0x154f   :  { %1420 = vrot.lane.b32.xlu0 %v5288_v52, %s5539_s6 }
0x1551   :  { %v5290_v60 = vpop.eup %5289 }
0x1552   :  { %1422 = vrot.lane.b32.xlu1 %v5290_v60, %s5539_s6  ;;  %v1432_v56 = vpop.permute.xlu0 %1431 }
0x1553   :  { %vm1436_vm2 = vcmp.eq.s32.totalorder %v1432_v56, 1 }
0x1554   :  { %v6247_v46 = vsel %vm1436_vm2, %v6209_v55, %v6201_v47 }
0x1555   :  { %v1435_v58 = vpop.permute.xlu1 %1434 }
0x1556   :  { %vm1437_vm3 = vcmp.eq.s32.totalorder %v1435_v58, 1 }
0x1557   :  { %v6253_v48 = vsel %vm1437_vm3, %v6213_v53, %v6207_v54 }
0x15c1   :  { %v1421_v4 = vpop.permute.xlu0 %1420 }
0x15c2   :  { %v1426_v62 = vmul.f32 %v5284_v41, %v1421_v4 }
0x15c4   :  { %v1423_v49 = vpop.permute.xlu1 %1422  ;;  %v6220_v61 = vsel %vm1436_vm2, %v1426_v62, %v6170_v6 }
0x15c5   :  { %v1427_v8 = vmul.f32 %v5286_v43, %v1423_v49 }
0x15c7   :  { %v6224_v59 = vsel %vm1437_vm3, %v1427_v8, %v6174_v3 }
0x15c8   :  { %v1454_v0 = vpack.c.bf16 %v6224_v59, %v6220_v61 }
0x15ca   :  { %1456 = vrot.lane.b32.xlu0 %v1454_v0, %s5540_s27 }
0x163c   :  { %v1457_v11 = vpop.permute.xlu0 %1456 }
0x163d   :  { %4619 = vmatmul.mubr.msk.bf16.vlgmr.msra.gmra.mrb[28].mxu1 %vm117_vm0, %v1457_v11 }
0x1710   :  { %v1495_v24 = vpop.f32.mrb[28].mxu1 }
0x1711   :  { %v1518_v25 = vadd.f32 %v1511_v21, %v1495_v24  ;;  %v1497_v30 = vpop.f32.mrb[29].mxu1  ;;  %v1651_v21 = vunpack.c.l.bf16 %v5740_v51 }
0x1712   :  { %v1498_v31 = vpop.f32.mrb[30].mxu1 }
0x1713   :  { %5291 = vtanh.f32 %v1518_v25  ;;  %v1499_v37 = vpop.f32.mrb[31].mxu1  ;;  %v4623_v27 = vmul.f32 -1.442695, %v1518_v25 }
0x1714   :  { %v1519_v38 = vadd.f32 %v1512_v32, %v1499_v37  ;;  %v1652_v32 = vunpack.c.h.bf16 %v5740_v51 }
0x1716   :  { %5293 = vtanh.f32 %v1519_v38  ;;  %v4624_v16 = vmul.f32 -1.442695, %v1519_v38 }
0x1717   :  { %5295 = vpow2.f32 %v4623_v27 }
0x1718   :  { %5297 = vpow2.f32 %v4624_v16 }
0x171d   :  { %v5292_v12 = vpop.eup %5291 }
0x171e   :  { %1538 = vrot.lane.b32.xlu1 %v5292_v12, %s5539_s6  ;;  %v4628_v12 = vld [vmem:[%s7395_s23 + $0x98] sm:$0xff] }
0x171f   :  { %vm1657_vm8 = vcmp.gt.f32.partialorder %v4628_v12, 0.5 }
0x1720   :  { %v5294_v13 = vpop.eup %5293  ;;  %v1709_v27 = vsel %vm1657_vm8, 1, %v5538_v1 }
0x1721   :  { %1540 = vrot.lane.b32.xlu0 %v5294_v13, %s5539_s6  ;;  %v5296_v18 = vpop.eup %5295 }
0x1722   :  { %v5298_v14 = vpop.eup %5297  ;;  %v1526_v9 = vadd.f32 1.0, %v5296_v18 }
0x1723   :  { %v1527_v39 = vadd.f32 1.0, %v5298_v14 }
0x1724   :  { %5299 = vrcp.f32 %v1526_v9 }
0x1725   :  { %5301 = vrcp.f32 %v1527_v39 }
0x172e   :  { %v5300_v40 = vpop.eup %5299 }
0x172f   :  { %v5302_v22 = vpop.eup %5301  ;;  %v1534_v26 = vmul.f32 %v5300_v40, %v6247_v46 }
0x1730   :  { %v1535_v7 = vmul.f32 %v5302_v22, %v6253_v48 }
0x1790   :  { %v1539_v23 = vpop.permute.xlu1 %1538 }
0x1791   :  { %v1544_v41 = vmul.f32 %v5300_v40, %v1539_v23 }
0x1793   :  { %1548 = vrot.lane.b32.xlu1 %v1544_v41, %s5540_s27  ;;  %v1541_v29 = vpop.permute.xlu0 %1540 }
0x1794   :  { %v1545_v43 = vmul.f32 %v5302_v22, %v1541_v29  ;;  %v4627_v29 = vld [vmem:[%s7395_s23 + $0x90] sm:$0xff] }
0x1795   :  { %vm1656_vm9 = vcmp.gt.f32.partialorder %v4627_v29, 0.5 }
0x1796   :  { %1550 = vrot.lane.b32.xlu0 %v1545_v43, %s5540_s27 }
0x1797   :  { %1571 = vperm.xlu1 %5130, %v1568_v44  }
0x179a   :  { %1574 = vperm.xlu0 %5129, %v1569_v45  }
0x1805   :  { %v1549_v19 = vpop.permute.xlu1 %1548 }
0x1806   :  { %v6255_v57 = vadd.f32 %v1549_v19, %v1534_v26  ;;  %v2062_v26 = vld [vmem:[%s7395_s23] sm:$0xff]  ;;  %v1708_v19 = vsel %vm1656_vm9, 1, %v5538_v1 }
0x1807   :  { %vm2063_vm10 = vcmp.gt.f32.partialorder %v2062_v26, 0.5 }
0x1808   :  { %5303 = vtanh.f32 %v6255_v57  ;;  %v1551_v52 = vpop.permute.xlu0 %1550 }
0x1809   :  { %v6259_v60 = vadd.f32 %v1551_v52, %v1535_v7  ;;  %v2091_v7 = vsel %vm2063_vm10, 1, %v5538_v1 }
0x180b   :  { %5305 = vtanh.f32 %v6259_v60 }
0x1812   :  { %v5304_v47 = vpop.eup %5303 }
0x1813   :  { %1560 = vrot.lane.b32.xlu1 %v5304_v47, %s5539_s6 }
0x1815   :  { %v5306_v55 = vpop.eup %5305 }
0x1816   :  { %1562 = vrot.lane.b32.xlu0 %v5306_v55, %s5539_s6  ;;  %v6264_v56 = vpop.permute.xlu1 %1571 }
0x1817   :  { %vm1576_vm6 = vcmp.eq.s32.totalorder %v6264_v56, 1 }
0x1819   :  { %v6266_v54 = vpop.permute.xlu0 %1574 }
0x181a   :  { %vm1577_vm7 = vcmp.eq.s32.totalorder %v6266_v54, 1  ;;  %v5541_v54 = vmov 0.0  }
0x181b   :  { %v1581_v52 = vsel %vm1577_vm7, %v6259_v60, %v6253_v48  ;;  %4895 = vmatprep.subr.bf16.mxu1 %v5541_v54  ;;  %4919 = vmatprep.subr.bf16.mxu0 %v5541_v54 }
0x181c   :  { %4899 = vmatprep.mubr.msk.bf16.mxu1 %vm5542_vm11, %v5541_v54 }
0x1885   :  { %v1561_v53 = vpop.permute.xlu1 %1560 }
0x1886   :  { %v1566_v58 = vmul.f32 %v5300_v40, %v1561_v53 }
0x1888   :  { %v1563_v4 = vpop.permute.xlu0 %1562  ;;  %v6273_v49 = vsel %vm1576_vm6, %v1566_v58, %v6220_v61 }
0x1889   :  { %v1567_v62 = vmul.f32 %v5302_v22, %v1563_v4 }
0x188b   :  { %v6278_v8 = vsel %vm1577_vm7, %v1567_v62, %v6224_v59 }
0x188c   :  { %v1594_v0 = vpack.c.bf16 %v6278_v8, %v6273_v49 }
0x188e   :  { %1596 = vrot.lane.b32.xlu1 %v1594_v0, %s5540_s27  ;;  %v5143_v0 = vld [vmem:[%s7366_s8] sm:$0xff]  }
0x188f   :  { %4896 = vmatpush3.bf16.msra.mxu1 %v5143_v0 }
0x1890   :  { %4897 = vmatprep.subr.bf16.mxu1 %v5541_v54 }
0x1900   :  { %v1597_v11 = vpop.permute.xlu1 %1596 }
0x1901   :  { %4625 = vmatmul.mubr.msk.bf16.vlgmr.msra.gmra.mrb[24].mxu0 %vm117_vm0, %v1597_v11  ;;  %v5144_v11 = vld [vmem:[%s7366_s8 + $0x8] sm:$0xff]  }
0x1902   :  { %4898 = vmatpush3.bf16.msra.mxu1 %v5144_v11  ;;  %4923 = vmatprep.mubr.msk.bf16.mxu0 %vm5542_vm11, %v5541_v54 }
0x1903   :  { %4943 = vmatprep.subr.bf16.mxu1 %v5541_v54 }
0x19d4   :  { %v1635_v24 = vpop.f32.mrb[24].mxu0 }
0x19d5   :  { %v1658_v25 = vadd.f32 %v1651_v21, %v1635_v24  ;;  %v1637_v30 = vpop.f32.mrb[25].mxu0 }
0x19d6   :  { %v1638_v31 = vpop.f32.mrb[26].mxu0  ;;  %v5146_v30 = vld [vmem:[%s7368_s7] sm:$0xff]  }
0x19d7   :  { %v1639_v37 = vpop.f32.mrb[27].mxu0  ;;  %v4629_v9 = vmul.f32 -1.442695, %v1658_v25  ;;  %4920 = vmatpush3.bf16.msra.mxu0 %v5146_v30  ;;  %v5147_v31 = vld [vmem:[%s7368_s7 + $0x8] sm:$0xff]  }
0x19d8   :  { %v1659_v38 = vadd.f32 %v1652_v32, %v1639_v37  ;;  %4921 = vmatprep.subr.bf16.mxu0 %v5541_v54 }
0x19da   :  { %5307 = vtanh.f32 %v1659_v38  ;;  %v4630_v16 = vmul.f32 -1.442695, %v1659_v38  ;;  %v6393_v38 = vld [vmem:[%s7367_s10] sm:$0xff]  }
0x19db   :  { %5309 = vtanh.f32 %v1658_v25  ;;  %4922 = vmatpush3.bf16.msra.mxu0 %v5147_v31 }
0x19dc   :  { %5311 = vpow2.f32 %v4630_v16  ;;  %4951 = vmatprep.subr.bf16.mxu0 %v5541_v54 }
0x19e4   :  { %v5308_v13 = vpop.eup %5307 }
0x19e5   :  { %1680 = vrot.lane.b32.xlu0 %v5308_v13, %s5539_s6  ;;  %v5310_v51 = vpop.eup %5309 }
0x19e6   :  { %v5312_v18 = vpop.eup %5311 }
0x19e9   :  { %1714 = vperm.xlu0 %5129, %v1709_v27  }
0x19ed   :  { %1589 = vrot.lane.b32.xlu0 %v6278_v8, %s5540_s27 }
0x19f1   :  { %1309 = vrot.lane.b32.xlu0 %v6174_v3, %s5540_s27  ;;  %v1667_v3 = vadd.f32 1.0, %v5312_v18 }
0x19f3   :  { %5313 = vrcp.f32 %v1667_v3 }
0x19f4   :  { %5315 = vpow2.f32 %v4629_v9 }
0x19f5   :  { %1029 = vrot.lane.b32.xlu0 %v6047_v10, %s5540_s27 }
0x19f9   :  { %456 = vrot.lane.b32.xlu0 %v5766_v33, %s5540_s27 }
0x19fd   :  { %745 = vrot.lane.b32.xlu0 %v5935_v17, %s5540_s27  ;;  %v6304_v14 = vpop.eup %5313 }
0x19fe   :  { %v5316_v50 = vpop.eup %5315  ;;  %v1675_v47 = vmul.f32 %v6304_v14, %v1581_v52 }
0x19ff   :  { %v1666_v23 = vadd.f32 1.0, %v5316_v50 }
0x1a01   :  { %461 = vrot.lane.b32.xlu0 %v5770_v34, %s5540_s27  ;;  %5317 = vrcp.f32 %v1666_v23 }
0x1a05   :  { %1678 = vrot.lane.b32.xlu0 %v5310_v51, %s5539_s6 }
0x1a0b   :  { %v6319_v43 = vpop.eup %5317 }
0x1a57   :  { %v1681_v10 = vpop.permute.xlu0 %1680 }
0x1a58   :  { %v1685_v33 = vmul.f32 %v6304_v14, %v1681_v10 }
0x1a5a   :  { %1690 = vrot.lane.b32.xlu1 %v1685_v33, %s5540_s27 }
0x1a68   :  { %v6308_v17 = vpop.permute.xlu0 %1714 }
0x1a69   :  { %vm1717_vm12 = vcmp.eq.s32.totalorder %v6308_v17, 1 }
0x1a6c   :  { %v1590_v34 = vpop.permute.xlu0 %1589 }
0x1a6d   :  { %1593 = vst.msk [vmem:[#allocation5 + $0x8] sm:$0xff] %vm117_vm0, %v1590_v34 }
0x1a70   :  { %v1310_v39 = vpop.permute.xlu0 %1309 }
0x1a71   :  { %1313 = vst.msk [vmem:[#allocation5 + $0x18] sm:$0xff] %vm117_vm0, %v1310_v39 }
0x1a74   :  { %v1030_v40 = vpop.permute.xlu0 %1029 }
0x1a75   :  { %1033 = vst.msk [vmem:[#allocation5 + $0x28] sm:$0xff] %vm117_vm0, %v1030_v40 }
0x1a78   :  { %v457_v41 = vpop.permute.xlu0 %456  ;;  %v1753_v27 = vld [vmem:[#allocation5 + $0x18] sm:$0xff] }
0x1a79   :  { %459 = vst.msk [vmem:[#allocation4] sm:$0xff] %vm117_vm0, %v457_v41 }
0x1a7c   :  { %v746_v42 = vpop.permute.xlu0 %745  ;;  %v1755_v33 = vld [vmem:[#allocation5 + $0x28] sm:$0xff] }
0x1a7d   :  { %749 = vst.msk [vmem:[#allocation5 + $0x38] sm:$0xff] %vm117_vm0, %v746_v42 }
0x1a80   :  { %v462_v22 = vpop.permute.xlu0 %461  ;;  %v1731_v18 = vld [vmem:[#allocation4] sm:$0xff] }
0x1a81   :  { %465 = vst.msk [vmem:[#allocation5 + $0x48] sm:$0xff] %vm117_vm0, %v462_v22 }
0x1a84   :  { %v1679_v44 = vpop.permute.xlu0 %1678  ;;  %v1757_v34 = vld [vmem:[#allocation5 + $0x38] sm:$0xff] }
0x1a85   :  { %v1684_v45 = vmul.f32 %v6319_v43, %v1679_v44 }
0x1a87   :  { %1688 = vrot.lane.b32.xlu0 %v1684_v45, %s5540_s27 }
0x1a88   :  { %v1759_v40 = vld [vmem:[#allocation5 + $0x48] sm:$0xff] }
0x1a8b   :  { %1711 = vperm.xlu0 %5129, %v1708_v19  }
0x1a8f   :  { %2093 = vperm.xlu0 %5129, %v2091_v7  }
0x1a93   :  { %739 = vrot.lane.b32.xlu0 %v5930_v20, %s5540_s27 }
0x1a97   :  { %1023 = vrot.lane.b32.xlu0 %v6042_v5, %s5540_s27 }
0x1a9b   :  { %1303 = vrot.lane.b32.xlu0 %v6170_v6, %s5540_s27 }
0x1a9f   :  { %1583 = vrot.lane.b32.xlu0 %v6273_v49, %s5540_s27 }
0x1acc   :  { %v1691_v55 = vpop.permute.xlu1 %1690 }
0x1acd   :  { %v1695_v53 = vadd.f32 %v1691_v55, %v1675_v47  ;;  %v6444_v55 = vld [vmem:[%s7369_s9] ss:$0 sm:$0xff] }
0x1acf   :  { %5319 = vtanh.f32 %v1695_v53 }
0x1ad9   :  { %v5320_v20 = vpop.eup %5319 }
0x1ada   :  { %1702 = vrot.lane.b32.xlu1 %v5320_v20, %s5539_s6 }
0x1af9   :  { %v6342_v5 = vpop.permute.xlu0 %1688 }
0x1b0a   :  { %v6344_v58 = vpop.permute.xlu0 %1711 }
0x1b0b   :  { %vm1716_vm13 = vcmp.eq.s32.totalorder %v6344_v58, 1 }
0x1b0e   :  { %v6346_v6 = vpop.permute.xlu0 %2093 }
0x1b0f   :  { %vm2095_vm14 = vcmp.eq.s32.totalorder %v6346_v6, 1 }
0x1b12   :  { %v740_v4 = vpop.permute.xlu0 %739 }
0x1b13   :  { %743 = vst.msk [vmem:[#allocation4 + $0x10] sm:$0xff] %vm117_vm0, %v740_v4 }
0x1b16   :  { %v1024_v62 = vpop.permute.xlu0 %1023 }
0x1b17   :  { %1027 = vst.msk [vmem:[#allocation4 + $0x20] sm:$0xff] %vm117_vm0, %v1024_v62 }
0x1b1a   :  { %v1304_v48 = vpop.permute.xlu0 %1303  ;;  %v1733_v58 = vld [vmem:[#allocation4 + $0x10] sm:$0xff] }
0x1b1b   :  { %1307 = vst.msk [vmem:[#allocation4 + $0x30] sm:$0xff] %vm117_vm0, %v1304_v48 }
0x1b1e   :  { %v1584_v60 = vpop.permute.xlu0 %1583 }
0x1b1f   :  { %1587 = vst.msk [vmem:[#allocation4 + $0x40] sm:$0xff] %vm117_vm0, %v1584_v60 }
0x1b4c   :  { %v1703_v21 = vpop.permute.xlu1 %1702 }
0x1b4d   :  { %v1707_v24 = vmul.f32 %v6304_v14, %v1703_v21 }
0x1b4f   :  { %v1719_v25 = vsel %vm1717_vm12, %v1707_v24, %v6278_v8 }
0x1b50   :  { %1727 = vrot.lane.b32.xlu1 %v1719_v25, %s5540_s27 }
0x1b54   :  { %1449 = vrot.lane.b32.xlu1 %v6224_v59, %s5540_s27 }
0x1b58   :  { %1169 = vrot.lane.b32.xlu1 %v6107_v2, %s5540_s27  ;;  %v1751_v2 = vld [vmem:[#allocation5 + $0x8] sm:$0xff] }
0x1b5c   :  { %597 = vrot.lane.b32.xlu1 %v5847_v35, %s5540_s27 }
0x1b60   :  { %887 = vrot.lane.b32.xlu1 %v5991_v15, %s5540_s27  ;;  %v6403_v15 = vld [vmem:[%s7367_s10 + $0x8] sm:$0xff]  }
0x1b64   :  { %603 = vrot.lane.b32.xlu1 %v5852_v36, %s5540_s27 }
0x1bc2   :  { %v1728_v59 = vpop.permute.xlu1 %1727 }
0x1bc3   :  { %1730 = vst.msk [vmem:[#allocation5] sm:$0xff] %vm117_vm0, %v1728_v59 }
0x1bc6   :  { %v1450_v8 = vpop.permute.xlu1 %1449 }
0x1bc7   :  { %1453 = vst.msk [vmem:[#allocation5 + $0x10] sm:$0xff] %vm117_vm0, %v1450_v8 }
0x1bca   :  { %v1170_v32 = vpop.permute.xlu1 %1169  ;;  %v1750_v37 = vld [vmem:[#allocation5] sm:$0xff] }
0x1bcb   :  { %1173 = vst.msk [vmem:[#allocation5 + $0x20] sm:$0xff] %vm117_vm0, %v1170_v32  ;;  %v1760_v35 = vpack.c.bf16 %v1751_v2, %v1750_v37 }
0x1bcd   :  { %4900 = vmatmul.mubr.msk.bf16.vlgmr.msra.gmra.mrb[32].mxu1 %vm117_vm0, %v1760_v35 }
0x1bce   :  { %4944 = vmatpush3.bf16.msra.mxu1 %v6393_v38  ;;  %v598_v36 = vpop.permute.xlu1 %597  ;;  %4903 = vmatprep.mubr.msk.bf16.mxu1 %vm5542_vm11, %v5541_v54  ;;  %v1752_v12 = vld [vmem:[#allocation5 + $0x10] sm:$0xff] }
0x1bcf   :  { %601 = vst.msk [vmem:[#allocation4 + $0x8] sm:$0xff] %vm117_vm0, %v598_v36  ;;  %4945 = vmatprep.subr.bf16.mxu1 %v5541_v54  ;;  %v1761_v51 = vpack.c.bf16 %v1753_v27, %v1752_v12 }
0x1bd2   :  { %v888_v13 = vpop.permute.xlu1 %887  ;;  %4946 = vmatpush3.bf16.msra.mxu1 %v6403_v15  ;;  %v1754_v10 = vld [vmem:[#allocation5 + $0x20] sm:$0xff] }
0x1bd3   :  { %891 = vst.msk [vmem:[#allocation5 + $0x30] sm:$0xff] %vm117_vm0, %v888_v13  ;;  %4959 = vmatprep.subr.bf16.mxu1 %v5541_v54  ;;  %v1762_v9 = vpack.c.bf16 %v1755_v33, %v1754_v10  ;;  %v1580_v33 = vsel %vm1576_vm6, %v6255_v57, %v6247_v46 }
0x1bd5   :  { %4904 = vmatmul.mubr.msk.bf16.gmra.mrb[36].mxu1 %vm117_vm0, %v1761_v51 }
0x1bd6   :  { %v604_v16 = vpop.permute.xlu1 %603  ;;  %v1732_v3 = vld [vmem:[#allocation4 + $0x8] sm:$0xff]  ;;  %4907 = vmatprep.mubr.msk.bf16.mxu1 %vm5542_vm11, %v5541_v54 }
0x1bd7   :  { %607 = vst.msk [vmem:[#allocation5 + $0x40] sm:$0xff] %vm117_vm0, %v604_v16  ;;  %v1741_v14 = vpack.c.bf16 %v1732_v3, %v1731_v18 }
0x1bd9   :  { %4924 = vmatmul.mubr.msk.bf16.vlgmr.msra.gmra.mrb[28].mxu0 %vm117_vm0, %v1741_v14 }
0x1bda   :  { %4927 = vmatprep.mubr.msk.bf16.mxu0 %vm5542_vm11, %v5541_v54  ;;  %4952 = vmatpush3.bf16.msra.mxu0 %v6393_v38  ;;  %v1756_v17 = vld [vmem:[#allocation5 + $0x30] sm:$0xff] }
0x1bdb   :  { %4953 = vmatprep.subr.bf16.mxu0 %v5541_v54  ;;  %v1763_v39 = vpack.c.bf16 %v1757_v34, %v1756_v17 }
0x1bdd   :  { %4908 = vmatmul.mubr.msk.bf16.gmra.mrb[40].mxu1 %vm117_vm0, %v1762_v9  ;;  %v1674_v9 = vmul.f32 %v6319_v43, %v1580_v33 }
0x1bde   :  { %4911 = vmatprep.mubr.msk.bf16.mxu1 %vm5542_vm11, %v5541_v54  ;;  %4954 = vmatpush3.bf16.msra.mxu0 %v6403_v15  ;;  %v1758_v50 = vld [vmem:[#allocation5 + $0x40] sm:$0xff] }
0x1bdf   :  { %4967 = vmatprep.subr.bf16.mxu0 %v5541_v54  ;;  %v1764_v23 = vpack.c.bf16 %v1759_v40, %v1758_v50  ;;  %v1694_v17 = vadd.f32 %v6342_v5, %v1674_v9 }
0x1be5   :  { %4912 = vmatmul.mubr.msk.bf16.gmra.mrb[44].mxu1 %vm117_vm0, %v1763_v39 }
0x1be6   :  { %4915 = vmatprep.mubr.msk.bf16.mxu1 %vm5542_vm11, %v5541_v54 }
0x1bed   :  { %4916 = vmatmul.mubr.msk.bf16.gmra.mrb[48].mxu1 %vm117_vm0, %v1764_v23 }
0x1bee   :  { %4947 = vmatprep.mubr.msk.bf16.mxu1 %vm5542_vm11, %v5541_v54 }
0x1bf5   :  { %4948 = vmatmul.mubr.bf16.vlgmr.msra.gmra.mrb[52].mxu1 %v5538_v1 }
0x1bf6   :  { %4960 = vmatpush3.bf16.msra.mxu1 %v6393_v38  ;;  %4963 = vmatprep.mubr.msk.bf16.mxu1 %vm5542_vm11, %v5541_v54 }
0x1bf7   :  { %4961 = vmatprep.subr.bf16.mxu1 %v5541_v54 }
0x1bfa   :  { %4962 = vmatpush3.bf16.msra.mxu1 %v6403_v15 }
0x1bfb   :  { %4975 = vmatprep.subr.bf16.mxu1 %v5541_v54 }
0x1ca0   :  { %v1830_v41 = vpop.f32.mrb[32].mxu1 }
0x1ca1   :  { %v4901_v42 = vpop.f32.mrb[33].mxu1 }
0x1ca2   :  { %v1833_v22 = vpop.f32.mrb[34].mxu1 }
0x1ca3   :  { %v4902_v29 = vpop.f32.mrb[35].mxu1 }
0x1ca8   :  { %v6437_v44 = vpop.f32.mrb[36].mxu1 }
0x1ca9   :  { %v4905_v45 = vpop.f32.mrb[37].mxu1 }
0x1caa   :  { %v6439_v26 = vpop.f32.mrb[38].mxu1 }
0x1cab   :  { %v4906_v19 = vpop.f32.mrb[39].mxu1 }
0x1cac   :  { %v1930_v7 = vpop.f32.mrb[28].mxu0 }
0x1cad   :  { %v1931_v52 = vadd.f32 %v1930_v7, %v1830_v41  ;;  %v4925_v47 = vpop.f32.mrb[29].mxu0 }
0x1cae   :  { %v1933_v53 = vpop.f32.mrb[30].mxu0  ;;  %v1735_v47 = vld [vmem:[#allocation4 + $0x20] sm:$0xff] }
0x1caf   :  { %v1934_v20 = vadd.f32 %v1933_v53, %v1833_v22  ;;  %v4926_v4 = vpop.f32.mrb[31].mxu0  ;;  %v1976_v48 = vadd.f32 %v6444_v55, %v1931_v52 }
0x1cb0   :  { %v6446_v62 = vpop.f32.mrb[40].mxu1  ;;  %v1737_v4 = vld [vmem:[#allocation4 + $0x30] sm:$0xff] }
0x1cb1   :  { %v1977_v60 = vadd.f32 %v6444_v55, %v1934_v20  ;;  %v4909_v0 = vpop.f32.mrb[41].mxu1 }
0x1cb2   :  { %v6450_v11 = vpop.f32.mrb[42].mxu1  ;;  %v1739_v0 = vld [vmem:[#allocation4 + $0x40] sm:$0xff] }
0x1cb3   :  { %v4753_v21 = vpack.c.bf16 %v1977_v60, %v1976_v48  ;;  %v4910_v24 = vpop.f32.mrb[43].mxu1 }
0x1cb5   :  { %4754 = vst [vmem:[#allocation3] sm:$0xff] %v4753_v21  }
0x1cb8   :  { %v6452_v25 = vpop.f32.mrb[44].mxu1 }
0x1cb9   :  { %v4913_v30 = vpop.f32.mrb[45].mxu1 }
0x1cba   :  { %v6454_v31 = vpop.f32.mrb[46].mxu1 }
0x1cbb   :  { %v4914_v59 = vpop.f32.mrb[47].mxu1 }
0x1cbc   :  { %v6460_v35 = vld [vmem:[#allocation3] sm:$0xff]  }
0x1cbd   :  { %v2065_v36 = vunpack.c.l.bf16 %v6460_v35 }
0x1cc0   :  { %v6456_v8 = vpop.f32.mrb[48].mxu1 }
0x1cc1   :  { %v4917_v32 = vpop.f32.mrb[49].mxu1 }
0x1cc2   :  { %v6458_v37 = vpop.f32.mrb[50].mxu1 }
0x1cc3   :  { %v4918_v2 = vpop.f32.mrb[51].mxu1 }
0x1cc8   :  { %v2056_v12 = vpop.f32.mrb[52].mxu1 }
0x1cc9   :  { %v2066_v13 = vadd.f32 %v2065_v36, %v2056_v12  ;;  %v4949_v27 = vpop.f32.mrb[53].mxu1 }
0x1cca   :  { %v2059_v51 = vpop.f32.mrb[54].mxu1 }
0x1ccb   :  { %5321 = vtanh.f32 %v2066_v13  ;;  %v4950_v16 = vpop.f32.mrb[55].mxu1  ;;  %v4648_v3 = vmul.f32 -1.442695, %v2066_v13 }
0x1ccd   :  { %5323 = vpow2.f32 %v4648_v3 }
0x1cd5   :  { %v5322_v18 = vpop.eup %5321 }
0x1cd6   :  { %2076 = vrot.lane.b32.xlu1 %v5322_v18, %s5539_s6 }
0x1cd7   :  { %v5324_v14 = vpop.eup %5323 }
0x1cd8   :  { %v2070_v10 = vadd.f32 1.0, %v5324_v14 }
0x1cda   :  { %5325 = vrcp.f32 %v2070_v10 }
0x1cdb   :  { %5327 = vtanh.f32 %v1694_v17 }
0x1ce4   :  { %v5326_v34 = vpop.eup %5325 }
0x1ce5   :  { %v5328_v40 = vpop.eup %5327  ;;  %v2074_v23 = vmul.f32 0.0, %v5326_v34 }
0x1d48   :  { %v2077_v39 = vpop.permute.xlu1 %2076 }
0x1d49   :  { %v2079_v50 = vmul.f32 %v5326_v34, %v2077_v39 }
0x1d4b   :  { %2081 = vrot.lane.b32.xlu1 %v2079_v50, %s5540_s27 }
0x1d4f   :  { %1700 = vrot.lane.b32.xlu1 %v5328_v40, %s5539_s6 }
0x1dbd   :  { %v2082_v41 = vpop.permute.xlu1 %2081 }
0x1dbe   :  { %v6472_v42 = vadd.f32 %v2082_v41, %v2074_v23 }
0x1dc0   :  { %5329 = vtanh.f32 %v6472_v42 }
0x1dc1   :  { %v1701_v57 = vpop.permute.xlu1 %1700 }
0x1dc2   :  { %v1706_v56 = vmul.f32 %v6319_v43, %v1701_v57 }
0x1dc4   :  { %v6485_v5 = vsel %vm1716_vm13, %v1706_v56, %v6273_v49 }
0x1dca   :  { %v5330_v46 = vpop.eup %5329 }
0x1dcb   :  { %2087 = vrot.lane.b32.xlu1 %v5330_v46, %s5539_s6 }
0x1dcf   :  { %881 = vrot.lane.b32.xlu1 %v5986_v28, %s5540_s27 }
0x1dd3   :  { %1163 = vrot.lane.b32.xlu1 %v6102_v63, %s5540_s27 }
0x1dd7   :  { %1443 = vrot.lane.b32.xlu1 %v6220_v61, %s5540_s27 }
0x1ddb   :  { %1721 = vrot.lane.b32.xlu1 %v6485_v5, %s5540_s27 }
0x1e3d   :  { %v2088_v22 = vpop.permute.xlu1 %2087 }
0x1e3e   :  { %v2090_v29 = vmul.f32 %v5326_v34, %v2088_v22 }
0x1e40   :  { %v6492_v28 = vsel %vm2095_vm14, %v2090_v29, 0.0 }
0x1e41   :  { %v2098_v63 = vpack.c.bf16 %v6492_v28, %v6492_v28  ;;  %v882_v61 = vpop.permute.xlu1 %881 }
0x1e42   :  { %885 = vst.msk [vmem:[#allocation4 + $0x18] sm:$0xff] %vm117_vm0, %v882_v61 }
0x1e43   :  { %2100 = vrot.lane.b32.xlu0 %v2098_v63, %s5540_s27 }
0x1e45   :  { %v1164_v49 = vpop.permute.xlu1 %1163 }
0x1e46   :  { %1167 = vst.msk [vmem:[#allocation4 + $0x28] sm:$0xff] %vm117_vm0, %v1164_v49  ;;  %v2149_v49 = vunpack.c.h.bf16 %v6460_v35 }
0x1e49   :  { %v1444_v43 = vpop.permute.xlu1 %1443  ;;  %v1734_v45 = vld [vmem:[#allocation4 + $0x18] sm:$0xff] }
0x1e4a   :  { %1447 = vst.msk [vmem:[#allocation4 + $0x38] sm:$0xff] %vm117_vm0, %v1444_v43  ;;  %v1742_v19 = vpack.c.bf16 %v1734_v45, %v1733_v58 }
0x1e4c   :  { %4928 = vmatmul.mubr.msk.bf16.gmra.mrb[32].mxu0 %vm117_vm0, %v1742_v19 }
0x1e4d   :  { %v1722_v7 = vpop.permute.xlu1 %1721  ;;  %4931 = vmatprep.mubr.msk.bf16.mxu0 %vm5542_vm11, %v5541_v54  ;;  %v1736_v52 = vld [vmem:[#allocation4 + $0x28] sm:$0xff] }
0x1e4e   :  { %1725 = vst.msk [vmem:[#allocation4 + $0x48] sm:$0xff] %vm117_vm0, %v1722_v7  ;;  %v1743_v53 = vpack.c.bf16 %v1736_v52, %v1735_v47 }
0x1e51   :  { %v1738_v20 = vld [vmem:[#allocation4 + $0x38] sm:$0xff] }
0x1e52   :  { %v1744_v48 = vpack.c.bf16 %v1738_v20, %v1737_v4 }
0x1e54   :  { %4932 = vmatmul.mubr.msk.bf16.gmra.mrb[36].mxu0 %vm117_vm0, %v1743_v53 }
0x1e55   :  { %4935 = vmatprep.mubr.msk.bf16.mxu0 %vm5542_vm11, %v5541_v54  ;;  %v1740_v60 = vld [vmem:[#allocation4 + $0x48] sm:$0xff] }
0x1e56   :  { %v1745_v21 = vpack.c.bf16 %v1740_v60, %v1739_v0 }
0x1e5c   :  { %4936 = vmatmul.mubr.msk.bf16.gmra.mrb[40].mxu0 %vm117_vm0, %v1744_v48  ;;  %v2097_v48 = vsel %vm2095_vm14, %v6472_v42, 0.0 }
0x1e5d   :  { %4939 = vmatprep.mubr.msk.bf16.mxu0 %vm5542_vm11, %v5541_v54 }
0x1e64   :  { %4940 = vmatmul.mubr.msk.bf16.gmra.mrb[44].mxu0 %vm117_vm0, %v1745_v21 }
0x1e65   :  { %4955 = vmatprep.mubr.msk.bf16.mxu0 %vm5542_vm11, %v5541_v54 }
0x1eb5   :  { %v2101_v24 = vpop.permute.xlu0 %2100 }
0x1eb6   :  { %4956 = vmatmul.mubr.msk.bf16.vlgmr.msra.gmra.mrb[48].mxu0 %vm117_vm0, %v2101_v24 }
0x1eb7   :  { %4968 = vmatpush3.bf16.msra.mxu0 %v6393_v38  ;;  %4971 = vmatprep.mubr.msk.bf16.mxu0 %vm5542_vm11, %v5541_v54 }
0x1eb8   :  { %4969 = vmatprep.subr.bf16.mxu0 %v5541_v54 }
0x1ebb   :  { %4970 = vmatpush3.bf16.msra.mxu0 %v6403_v15 }
0x1ebc   :  { %4983 = vmatprep.subr.bf16.mxu0 %v5541_v54 }
0x1f1f   :  { %v1938_v30 = vpop.f32.mrb[32].mxu0 }
0x1f20   :  { %v1939_v59 = vadd.f32 %v1938_v30, %v6437_v44  ;;  %v4929_v32 = vpop.f32.mrb[33].mxu0 }
0x1f21   :  { %v1941_v2 = vpop.f32.mrb[34].mxu0 }
0x1f22   :  { %v1942_v36 = vadd.f32 %v1941_v2, %v6439_v26  ;;  %v4930_v12 = vpop.f32.mrb[35].mxu0  ;;  %v1978_v13 = vadd.f32 %v6444_v55, %v1939_v59 }
0x1f24   :  { %v1979_v27 = vadd.f32 %v6444_v55, %v1942_v36 }
0x1f26   :  { %v4758_v51 = vpack.c.bf16 %v1979_v27, %v1978_v13 }
0x1f27   :  { %v1946_v16 = vpop.f32.mrb[36].mxu0 }
0x1f28   :  { %4795 = vst [vmem:[#allocation3 + $0x8] sm:$0xff] %v4758_v51   ;;  %v1947_v18 = vadd.f32 %v1946_v16, %v6446_v62  ;;  %v4933_v3 = vpop.f32.mrb[37].mxu0 }
0x1f29   :  { %v1949_v14 = vpop.f32.mrb[38].mxu0 }
0x1f2a   :  { %v1950_v10 = vadd.f32 %v1949_v14, %v6450_v11  ;;  %v4934_v33 = vpop.f32.mrb[39].mxu0  ;;  %v1980_v44 = vadd.f32 %v6444_v55, %v1947_v18  ;;  %v4653_v18 = vld [vmem:[%s7395_s23 + $0x20] sm:$0xff] }
0x1f2b   :  { %vm2230_vm2 = vcmp.gt.f32.partialorder %v4653_v18, 0.5 }
0x1f2c   :  { %v1981_v9 = vadd.f32 %v6444_v55, %v1950_v10  ;;  %v2259_v14 = vsel %vm2230_vm2, 1, %v5538_v1 }
0x1f2e   :  { %v4763_v26 = vpack.c.bf16 %v1981_v9, %v1980_v44 }
0x1f2f   :  { %v1954_v17 = vpop.f32.mrb[40].mxu0  ;;  %v2232_v6 = vld [vmem:[#allocation3 + $0x8] sm:$0xff]  }
0x1f30   :  { %4796 = vst [vmem:[#allocation3 + $0x10] sm:$0xff] %v4763_v26   ;;  %v1955_v34 = vadd.f32 %v1954_v17, %v6452_v25  ;;  %v4937_v39 = vpop.f32.mrb[41].mxu0  ;;  %v2233_v42 = vunpack.c.l.bf16 %v2232_v6 }
0x1f31   :  { %v1957_v50 = vpop.f32.mrb[42].mxu0 }
0x1f32   :  { %v1958_v40 = vadd.f32 %v1957_v50, %v6454_v31  ;;  %v4938_v23 = vpop.f32.mrb[43].mxu0  ;;  %v1982_v62 = vadd.f32 %v6444_v55, %v1955_v34 }
0x1f34   :  { %v1983_v41 = vadd.f32 %v6444_v55, %v1958_v40 }
0x1f36   :  { %v4768_v11 = vpack.c.bf16 %v1983_v41, %v1982_v62 }
0x1f37   :  { %v1962_v46 = vpop.f32.mrb[44].mxu0 }
0x1f38   :  { %4797 = vst [vmem:[#allocation3 + $0x18] sm:$0xff] %v4768_v11   ;;  %v1963_v57 = vadd.f32 %v1962_v46, %v6456_v8  ;;  %v4941_v56 = vpop.f32.mrb[45].mxu0  ;;  %v4650_v8 = vld [vmem:[%s7395_s23 + $0x10] sm:$0xff] }
0x1f39   :  { %v1965_v22 = vpop.f32.mrb[46].mxu0  ;;  %vm2146_vm15 = vcmp.gt.f32.partialorder %v4650_v8, 0.5 }
0x1f3a   :  { %v1966_v29 = vadd.f32 %v1965_v22, %v6458_v37  ;;  %v4942_v63 = vpop.f32.mrb[47].mxu0  ;;  %v1984_v25 = vadd.f32 %v6444_v55, %v1963_v57  ;;  %v2317_v22 = vunpack.c.h.bf16 %v2232_v6 }
0x1f3c   :  { %v1985_v61 = vadd.f32 %v6444_v55, %v1966_v29  ;;  %v2175_v55 = vsel %vm2146_vm15, 1, %v5538_v1 }
0x1f3e   :  { %v4773_v31 = vpack.c.bf16 %v1985_v61, %v1984_v25 }
0x1f40   :  { %4798 = vst [vmem:[#allocation3 + $0x20] sm:$0xff] %v4773_v31  }
0x1f89   :  { %v2139_v43 = vpop.f32.mrb[48].mxu0 }
0x1f8a   :  { %v2150_v58 = vadd.f32 %v2149_v49, %v2139_v43  ;;  %v4957_v45 = vpop.f32.mrb[49].mxu0  ;;  %v4656_v49 = vld [vmem:[%s7395_s23 + $0x30] sm:$0xff] }
0x1f8b   :  { %v2142_v19 = vpop.f32.mrb[50].mxu0  ;;  %vm2314_vm4 = vcmp.gt.f32.partialorder %v4656_v49, 0.5 }
0x1f8c   :  { %5331 = vtanh.f32 %v2150_v58  ;;  %v4958_v7 = vpop.f32.mrb[51].mxu0  ;;  %v4651_v52 = vmul.f32 -1.442695, %v2150_v58  ;;  %v2343_v58 = vsel %vm2314_vm4, 1, %v5538_v1 }
0x1f8e   :  { %5333 = vpow2.f32 %v4651_v52 }
0x1f96   :  { %v5332_v37 = vpop.eup %5331 }
0x1f97   :  { %2160 = vrot.lane.b32.xlu1 %v5332_v37, %s5539_s6 }
0x1f98   :  { %v5334_v35 = vpop.eup %5333 }
0x1f99   :  { %v2154_v47 = vadd.f32 1.0, %v5334_v35 }
0x1f9b   :  { %2177 = vperm.xlu1 %5130, %v2175_v55   ;;  %5335 = vrcp.f32 %v2154_v47 }
0x1fa5   :  { %v5336_v53 = vpop.eup %5335 }
0x1fa6   :  { %v2158_v60 = vmul.f32 %v5336_v53, %v2097_v48 }
0x2009   :  { %v2161_v20 = vpop.permute.xlu1 %2160 }
0x200a   :  { %v2163_v4 = vmul.f32 %v5336_v53, %v2161_v20 }
0x200c   :  { %2165 = vrot.lane.b32.xlu0 %v2163_v4, %s5540_s27 }
0x201a   :  { %v2178_v30 = vpop.permute.xlu1 %2177 }
0x201b   :  { %vm2179_vm1 = vcmp.eq.s32.totalorder %v2178_v30, 1  ;;  %v2400_v30 = vld [vmem:[#allocation3 + $0x10] sm:$0xff]  }
0x207e   :  { %v2166_v0 = vpop.permute.xlu0 %2165 }
0x207f   :  { %v2168_v21 = vadd.f32 %v2166_v0, %v2158_v60 }
0x2081   :  { %5337 = vtanh.f32 %v2168_v21  ;;  %v2181_v34 = vsel %vm2179_vm1, %v2168_v21, %v2097_v48 }
0x208b   :  { %v5338_v24 = vpop.eup %5337 }
0x208c   :  { %2171 = vrot.lane.b32.xlu0 %v5338_v24, %s5539_s6 }
0x20fe   :  { %v2172_v59 = vpop.permute.xlu0 %2171 }
0x20ff   :  { %v2174_v32 = vmul.f32 %v5336_v53, %v2172_v59  ;;  %v2401_v59 = vunpack.c.l.bf16 %v2400_v30 }
0x2101   :  { %v2180_v2 = vsel %vm2179_vm1, %v2174_v32, %v6492_v28 }
0x2102   :  { %v2182_v36 = vpack.c.bf16 %v2180_v2, %v2180_v2 }
0x2104   :  { %2184 = vrot.lane.b32.xlu1 %v2182_v36, %s5540_s27 }
0x2176   :  { %v2185_v12 = vpop.permute.xlu1 %2184 }
0x2177   :  { %4964 = vmatmul.mubr.msk.bf16.vlgmr.msra.gmra.mrb[56].mxu1 %vm117_vm0, %v2185_v12 }
0x2178   :  { %4976 = vmatpush3.bf16.msra.mxu1 %v6393_v38  ;;  %4979 = vmatprep.mubr.msk.bf16.mxu1 %vm5542_vm11, %v5541_v54 }
0x2179   :  { %4977 = vmatprep.subr.bf16.mxu1 %v5541_v54 }
0x217c   :  { %4978 = vmatpush3.bf16.msra.mxu1 %v6403_v15 }
0x217d   :  { %4991 = vmatprep.subr.bf16.mxu1 %v5541_v54 }
0x224a   :  { %v2223_v28 = vpop.f32.mrb[56].mxu1 }
0x224b   :  { %v2234_v13 = vadd.f32 %v2233_v42, %v2223_v28  ;;  %v4965_v27 = vpop.f32.mrb[57].mxu1  ;;  %v4659_v42 = vld [vmem:[%s7395_s23 + $0x40] sm:$0xff] }
0x224c   :  { %v2226_v51 = vpop.f32.mrb[58].mxu1  ;;  %vm2398_vm6 = vcmp.gt.f32.partialorder %v4659_v42, 0.5 }
0x224d   :  { %5339 = vtanh.f32 %v2234_v13  ;;  %v4966_v16 = vpop.f32.mrb[59].mxu1  ;;  %v4654_v10 = vmul.f32 -1.442695, %v2234_v13  ;;  %v2427_v13 = vsel %vm2398_vm6, 1, %v5538_v1 }
0x224f   :  { %5341 = vpow2.f32 %v4654_v10 }
0x2257   :  { %v5340_v3 = vpop.eup %5339 }
0x2258   :  { %2244 = vrot.lane.b32.xlu0 %v5340_v3, %s5539_s6 }
0x2259   :  { %v5342_v33 = vpop.eup %5341 }
0x225a   :  { %v2238_v44 = vadd.f32 1.0, %v5342_v33 }
0x225c   :  { %2261 = vperm.xlu0 %5129, %v2259_v14   ;;  %5343 = vrcp.f32 %v2238_v44 }
0x2266   :  { %v5344_v9 = vpop.eup %5343 }
0x2267   :  { %v2242_v39 = vmul.f32 %v5344_v9, %v2181_v34 }
0x22ca   :  { %v2245_v26 = vpop.permute.xlu0 %2244 }
0x22cb   :  { %v2247_v17 = vmul.f32 %v5344_v9, %v2245_v26 }
0x22cd   :  { %2249 = vrot.lane.b32.xlu1 %v2247_v17, %s5540_s27 }
0x22db   :  { %v2262_v62 = vpop.permute.xlu0 %2261 }
0x22dc   :  { %vm2263_vm3 = vcmp.eq.s32.totalorder %v2262_v62, 1  ;;  %v2485_v62 = vunpack.c.h.bf16 %v2400_v30 }
0x233f   :  { %v2250_v50 = vpop.permute.xlu1 %2249 }
0x2340   :  { %v2252_v40 = vadd.f32 %v2250_v50, %v2242_v39 }
0x2342   :  { %5345 = vtanh.f32 %v2252_v40  ;;  %v2265_v52 = vsel %vm2263_vm3, %v2252_v40, %v2181_v34 }
0x234c   :  { %v5346_v23 = vpop.eup %5345 }
0x234d   :  { %2255 = vrot.lane.b32.xlu1 %v5346_v23, %s5539_s6 }
0x23bf   :  { %v2256_v41 = vpop.permute.xlu1 %2255 }
0x23c0   :  { %v2258_v11 = vmul.f32 %v5344_v9, %v2256_v41 }
0x23c2   :  { %v2264_v46 = vsel %vm2263_vm3, %v2258_v11, %v2180_v2 }
0x23c3   :  { %v2266_v57 = vpack.c.bf16 %v2264_v46, %v2264_v46 }
0x23c5   :  { %2268 = vrot.lane.b32.xlu0 %v2266_v57, %s5540_s27 }
0x2437   :  { %v2269_v56 = vpop.permute.xlu0 %2268 }
0x2438   :  { %4972 = vmatmul.mubr.msk.bf16.vlgmr.msra.gmra.mrb[52].mxu0 %vm117_vm0, %v2269_v56 }
0x2439   :  { %4984 = vmatpush3.bf16.msra.mxu0 %v6393_v38  ;;  %4987 = vmatprep.mubr.msk.bf16.mxu0 %vm5542_vm11, %v5541_v54 }
0x243a   :  { %4985 = vmatprep.subr.bf16.mxu0 %v5541_v54 }
0x243d   :  { %4986 = vmatpush3.bf16.msra.mxu0 %v6403_v15 }
0x243e   :  { %4999 = vmatprep.subr.bf16.mxu0 %v5541_v54 }
0x250b   :  { %v2307_v29 = vpop.f32.mrb[52].mxu0 }
0x250c   :  { %v2318_v63 = vadd.f32 %v2317_v22, %v2307_v29  ;;  %v4973_v25 = vpop.f32.mrb[53].mxu0  ;;  %v4662_v22 = vld [vmem:[%s7395_s23 + $0x50] sm:$0xff] }
0x250d   :  { %v2310_v61 = vpop.f32.mrb[54].mxu0  ;;  %vm2482_vm8 = vcmp.gt.f32.partialorder %v4662_v22, 0.5 }
0x250e   :  { %5347 = vtanh.f32 %v2318_v63  ;;  %v4974_v31 = vpop.f32.mrb[55].mxu0  ;;  %v4657_v45 = vmul.f32 -1.442695, %v2318_v63  ;;  %v2511_v63 = vsel %vm2482_vm8, 1, %v5538_v1 }
0x2510   :  { %5349 = vpow2.f32 %v4657_v45 }
0x2518   :  { %v5348_v43 = vpop.eup %5347 }
0x2519   :  { %2328 = vrot.lane.b32.xlu1 %v5348_v43, %s5539_s6 }
0x251a   :  { %v5350_v19 = vpop.eup %5349 }
0x251b   :  { %v2322_v7 = vadd.f32 1.0, %v5350_v19 }
0x251d   :  { %2345 = vperm.xlu1 %5130, %v2343_v58   ;;  %5351 = vrcp.f32 %v2322_v7 }
0x2527   :  { %v5352_v8 = vpop.eup %5351 }
0x2528   :  { %v2326_v35 = vmul.f32 %v5352_v8, %v2265_v52 }
0x258b   :  { %v2329_v37 = vpop.permute.xlu1 %2328 }
0x258c   :  { %v2331_v55 = vmul.f32 %v5352_v8, %v2329_v37 }
0x258e   :  { %2333 = vrot.lane.b32.xlu0 %v2331_v55, %s5540_s27 }
0x259c   :  { %v2346_v4 = vpop.permute.xlu1 %2345 }
0x259d   :  { %vm2347_vm5 = vcmp.eq.s32.totalorder %v2346_v4, 1  ;;  %v2568_v4 = vld [vmem:[#allocation3 + $0x18] sm:$0xff]  }
0x2600   :  { %v2334_v47 = vpop.permute.xlu0 %2333 }
0x2601   :  { %v2336_v53 = vadd.f32 %v2334_v47, %v2326_v35 }
0x2603   :  { %5353 = vtanh.f32 %v2336_v53  ;;  %v2349_v10 = vsel %vm2347_vm5, %v2336_v53, %v2265_v52 }
0x260d   :  { %v5354_v20 = vpop.eup %5353 }
0x260e   :  { %2339 = vrot.lane.b32.xlu0 %v5354_v20, %s5539_s6 }
0x2680   :  { %v2340_v48 = vpop.permute.xlu0 %2339 }
0x2681   :  { %v2342_v60 = vmul.f32 %v5352_v8, %v2340_v48  ;;  %v2569_v48 = vunpack.c.l.bf16 %v2568_v4 }
0x2683   :  { %v2348_v0 = vsel %vm2347_vm5, %v2342_v60, %v2264_v46 }
0x2684   :  { %v2350_v21 = vpack.c.bf16 %v2348_v0, %v2348_v0 }
0x2686   :  { %2352 = vrot.lane.b32.xlu1 %v2350_v21, %s5540_s27 }
0x26f8   :  { %v2353_v24 = vpop.permute.xlu1 %2352 }
0x26f9   :  { %4980 = vmatmul.mubr.msk.bf16.vlgmr.msra.gmra.mrb[60].mxu1 %vm117_vm0, %v2353_v24 }
0x26fa   :  { %4992 = vmatpush3.bf16.msra.mxu1 %v6393_v38  ;;  %4995 = vmatprep.mubr.msk.bf16.mxu1 %vm5542_vm11, %v5541_v54 }
0x26fb   :  { %4993 = vmatprep.subr.bf16.mxu1 %v5541_v54 }
0x26fe   :  { %4994 = vmatpush3.bf16.msra.mxu1 %v6403_v15 }
0x26ff   :  { %5007 = vmatprep.subr.bf16.mxu1 %v5541_v54 }
0x27cc   :  { %v2391_v32 = vpop.f32.mrb[60].mxu1 }
0x27cd   :  { %v2402_v2 = vadd.f32 %v2401_v59, %v2391_v32  ;;  %v4981_v36 = vpop.f32.mrb[61].mxu1  ;;  %v4665_v59 = vld [vmem:[%s7395_s23 + $0x60] sm:$0xff] }
0x27ce   :  { %v2394_v12 = vpop.f32.mrb[62].mxu1  ;;  %vm2566_vm10 = vcmp.gt.f32.partialorder %v4665_v59, 0.5 }
0x27cf   :  { %5355 = vtanh.f32 %v2402_v2  ;;  %v4982_v6 = vpop.f32.mrb[63].mxu1  ;;  %v4660_v27 = vmul.f32 -1.442695, %v2402_v2  ;;  %v2595_v2 = vsel %vm2566_vm10, 1, %v5538_v1 }
0x27d1   :  { %5357 = vpow2.f32 %v4660_v27 }
0x27d9   :  { %v5356_v28 = vpop.eup %5355 }
0x27da   :  { %2412 = vrot.lane.b32.xlu0 %v5356_v28, %s5539_s6 }
0x27db   :  { %v5358_v51 = vpop.eup %5357 }
0x27dc   :  { %v2406_v16 = vadd.f32 1.0, %v5358_v51 }
0x27de   :  { %2429 = vperm.xlu0 %5129, %v2427_v13   ;;  %5359 = vrcp.f32 %v2406_v16 }
0x27e8   :  { %v5360_v18 = vpop.eup %5359 }
0x27e9   :  { %v2410_v33 = vmul.f32 %v5360_v18, %v2349_v10 }
0x284c   :  { %v2413_v3 = vpop.permute.xlu0 %2412 }
0x284d   :  { %v2415_v14 = vmul.f32 %v5360_v18, %v2413_v3 }
0x284f   :  { %2417 = vrot.lane.b32.xlu1 %v2415_v14, %s5540_s27 }
0x285d   :  { %v2430_v17 = vpop.permute.xlu0 %2429 }
0x285e   :  { %vm2431_vm7 = vcmp.eq.s32.totalorder %v2430_v17, 1  ;;  %v2653_v17 = vunpack.c.h.bf16 %v2568_v4 }
0x28c1   :  { %v2418_v44 = vpop.permute.xlu1 %2417 }
0x28c2   :  { %v2420_v9 = vadd.f32 %v2418_v44, %v2410_v33 }
0x28c4   :  { %5361 = vtanh.f32 %v2420_v9  ;;  %v2433_v45 = vsel %vm2431_vm7, %v2420_v9, %v2349_v10 }
0x28ce   :  { %v5362_v26 = vpop.eup %5361 }
0x28cf   :  { %2423 = vrot.lane.b32.xlu1 %v5362_v26, %s5539_s6 }
0x2941   :  { %v2424_v34 = vpop.permute.xlu1 %2423 }
0x2942   :  { %v2426_v39 = vmul.f32 %v5360_v18, %v2424_v34 }
0x2944   :  { %v2432_v50 = vsel %vm2431_vm7, %v2426_v39, %v2348_v0 }
0x2945   :  { %v2434_v40 = vpack.c.bf16 %v2432_v50, %v2432_v50 }
0x2947   :  { %2436 = vrot.lane.b32.xlu0 %v2434_v40, %s5540_s27 }
0x29b9   :  { %v2437_v23 = vpop.permute.xlu0 %2436 }
0x29ba   :  { %4988 = vmatmul.mubr.msk.bf16.vlgmr.msra.gmra.mrb[56].mxu0 %vm117_vm0, %v2437_v23 }
0x29bb   :  { %5000 = vmatpush3.bf16.msra.mxu0 %v6393_v38  ;;  %5003 = vmatprep.mubr.msk.bf16.mxu0 %vm5542_vm11, %v5541_v54 }
0x29bc   :  { %5001 = vmatprep.subr.bf16.mxu0 %v5541_v54 }
0x29bf   :  { %5002 = vmatpush3.bf16.msra.mxu0 %v6403_v15 }
0x29c0   :  { %5015 = vmatprep.subr.bf16.mxu0 %v5541_v54 }
0x2a8d   :  { %v2475_v41 = vpop.f32.mrb[56].mxu0 }
0x2a8e   :  { %v2486_v11 = vadd.f32 %v2485_v62, %v2475_v41  ;;  %v4989_v46 = vpop.f32.mrb[57].mxu0  ;;  %v4668_v62 = vld [vmem:[%s7395_s23 + $0x70] sm:$0xff] }
0x2a8f   :  { %v2478_v57 = vpop.f32.mrb[58].mxu0  ;;  %vm2650_vm13 = vcmp.gt.f32.partialorder %v4668_v62, 0.5 }
0x2a90   :  { %5363 = vtanh.f32 %v2486_v11  ;;  %v4990_v56 = vpop.f32.mrb[59].mxu0  ;;  %v4663_v25 = vmul.f32 -1.442695, %v2486_v11  ;;  %v2679_v41 = vsel %vm2650_vm13, 1, %v5538_v1 }
0x2a92   :  { %5365 = vpow2.f32 %v4663_v25 }
0x2a9a   :  { %v5364_v29 = vpop.eup %5363 }
0x2a9b   :  { %2496 = vrot.lane.b32.xlu1 %v5364_v29, %s5539_s6 }
0x2a9c   :  { %v5366_v61 = vpop.eup %5365 }
0x2a9d   :  { %v2490_v31 = vadd.f32 1.0, %v5366_v61 }
0x2a9f   :  { %2513 = vperm.xlu1 %5130, %v2511_v63   ;;  %5367 = vrcp.f32 %v2490_v31 }
0x2aa9   :  { %v5368_v49 = vpop.eup %5367 }
0x2aaa   :  { %v2494_v19 = vmul.f32 %v5368_v49, %v2433_v45 }
0x2b0d   :  { %v2497_v43 = vpop.permute.xlu1 %2496 }
0x2b0e   :  { %v2499_v58 = vmul.f32 %v5368_v49, %v2497_v43 }
0x2b10   :  { %2501 = vrot.lane.b32.xlu0 %v2499_v58, %s5540_s27 }
0x2b1e   :  { %v2514_v55 = vpop.permute.xlu1 %2513 }
0x2b1f   :  { %vm2515_vm9 = vcmp.eq.s32.totalorder %v2514_v55, 1 }
0x2b82   :  { %v2502_v7 = vpop.permute.xlu0 %2501 }
0x2b83   :  { %v2504_v8 = vadd.f32 %v2502_v7, %v2494_v19 }
0x2b85   :  { %5369 = vtanh.f32 %v2504_v8  ;;  %v2517_v27 = vsel %vm2515_vm9, %v2504_v8, %v2433_v45  ;;  %v2736_v8 = vld [vmem:[#allocation3 + $0x20] sm:$0xff]  }
0x2b8f   :  { %v5370_v37 = vpop.eup %5369 }
0x2b90   :  { %2507 = vrot.lane.b32.xlu0 %v5370_v37, %s5539_s6  ;;  %v2737_v37 = vunpack.c.l.bf16 %v2736_v8 }
0x2c02   :  { %v2508_v52 = vpop.permute.xlu0 %2507 }
0x2c03   :  { %v2510_v35 = vmul.f32 %v5368_v49, %v2508_v52 }
0x2c05   :  { %v2516_v47 = vsel %vm2515_vm9, %v2510_v35, %v2432_v50 }
0x2c06   :  { %v2518_v53 = vpack.c.bf16 %v2516_v47, %v2516_v47 }
0x2c08   :  { %2520 = vrot.lane.b32.xlu1 %v2518_v53, %s5540_s27 }
0x2c7a   :  { %v2521_v20 = vpop.permute.xlu1 %2520 }
0x2c7b   :  { %4996 = vmatmul.mubr.msk.bf16.vlgmr.msra.gmra.mrb[64].mxu1 %vm117_vm0, %v2521_v20  ;;  %v4671_v20 = vld [vmem:[%s7395_s23 + $0x80] sm:$0xff] }
0x2c7c   :  { %5008 = vmatpush3.bf16.msra.mxu1 %v6393_v38  ;;  %5011 = vmatprep.mubr.msk.bf16.mxu1 %vm5542_vm11, %v5541_v54  ;;  %vm2734_vm15 = vcmp.gt.f32.partialorder %v4671_v20, 0.5  ;;  %v2931_v20 = vld [vmem:[%s7372_s2 + $0x38] sm:$0xff] }
0x2c7d   :  { %5009 = vmatprep.subr.bf16.mxu1 %v5541_v54 }
0x2c80   :  { %5010 = vmatpush3.bf16.msra.mxu1 %v6403_v15 }
0x2c81   :  { %5023 = vmatprep.subr.bf16.mxu1 %v5541_v54 }
0x2d4e   :  { %v2559_v60 = vpop.f32.mrb[64].mxu1 }
0x2d4f   :  { %v2570_v0 = vadd.f32 %v2569_v48, %v2559_v60  ;;  %v4997_v21 = vpop.f32.mrb[65].mxu1  ;;  %v2763_v48 = vsel %vm2734_vm15, 1, %v5538_v1 }
0x2d50   :  { %v2562_v24 = vpop.f32.mrb[66].mxu1 }
0x2d51   :  { %5371 = vtanh.f32 %v2570_v0  ;;  %v4998_v30 = vpop.f32.mrb[67].mxu1  ;;  %v4666_v36 = vmul.f32 -1.442695, %v2570_v0 }
0x2d53   :  { %5373 = vpow2.f32 %v4666_v36 }
0x2d5b   :  { %v5372_v32 = vpop.eup %5371 }
0x2d5c   :  { %2580 = vrot.lane.b32.xlu0 %v5372_v32, %s5539_s6 }
0x2d5d   :  { %v5374_v12 = vpop.eup %5373 }
0x2d5e   :  { %v2574_v6 = vadd.f32 1.0, %v5374_v12 }
0x2d60   :  { %2597 = vperm.xlu0 %5129, %v2595_v2   ;;  %5375 = vrcp.f32 %v2574_v6 }
0x2d6a   :  { %v5376_v42 = vpop.eup %5375 }
0x2d6b   :  { %v2578_v51 = vmul.f32 %v5376_v42, %v2517_v27 }
0x2dce   :  { %v2581_v28 = vpop.permute.xlu0 %2580 }
0x2dcf   :  { %v2583_v13 = vmul.f32 %v5376_v42, %v2581_v28 }
0x2dd1   :  { %2585 = vrot.lane.b32.xlu1 %v2583_v13, %s5540_s27 }
0x2ddf   :  { %v2598_v14 = vpop.permute.xlu0 %2597 }
0x2de0   :  { %vm2599_vm12 = vcmp.eq.s32.totalorder %v2598_v14, 1 }
0x2e43   :  { %v2586_v16 = vpop.permute.xlu1 %2585 }
0x2e44   :  { %v2588_v18 = vadd.f32 %v2586_v16, %v2578_v51 }
0x2e46   :  { %5377 = vtanh.f32 %v2588_v18  ;;  %v2601_v29 = vsel %vm2599_vm12, %v2588_v18, %v2517_v27  ;;  %v2821_v18 = vunpack.c.h.bf16 %v2736_v8 }
0x2e50   :  { %v5378_v3 = vpop.eup %5377 }
0x2e51   :  { %2591 = vrot.lane.b32.xlu1 %v5378_v3, %s5539_s6 }
0x2ec3   :  { %v2592_v10 = vpop.permute.xlu1 %2591 }
0x2ec4   :  { %v2594_v33 = vmul.f32 %v5376_v42, %v2592_v10 }
0x2ec6   :  { %v2600_v44 = vsel %vm2599_vm12, %v2594_v33, %v2516_v47 }
0x2ec7   :  { %v2602_v9 = vpack.c.bf16 %v2600_v44, %v2600_v44 }
0x2ec9   :  { %2604 = vrot.lane.b32.xlu0 %v2602_v9, %s5540_s27  ;;  %v4674_v9 = vld [vmem:[%s7395_s23 + $0x90] sm:$0xff] }
0x2eca   :  { %vm2818_vm2 = vcmp.gt.f32.partialorder %v4674_v9, 0.5 }
0x2f3b   :  { %v2605_v26 = vpop.permute.xlu0 %2604 }
0x2f3c   :  { %5004 = vmatmul.mubr.msk.bf16.vlgmr.msra.gmra.mrb[60].mxu0 %vm117_vm0, %v2605_v26 }
0x2f3d   :  { %5016 = vmatpush3.bf16.msra.mxu0 %v6393_v38  ;;  %5019 = vmatprep.mubr.msk.bf16.mxu0 %vm5542_vm11, %v5541_v54 }
0x2f3e   :  { %5017 = vmatprep.subr.bf16.mxu0 %v5541_v54 }
0x2f41   :  { %5018 = vmatpush3.bf16.msra.mxu0 %v6403_v15 }
0x300f   :  { %v2643_v34 = vpop.f32.mrb[60].mxu0 }
0x3010   :  { %v2654_v39 = vadd.f32 %v2653_v17, %v2643_v34  ;;  %v5005_v50 = vpop.f32.mrb[61].mxu0  ;;  %v2847_v17 = vsel %vm2818_vm2, 1, %v5538_v1 }
0x3011   :  { %v2646_v40 = vpop.f32.mrb[62].mxu0 }
0x3012   :  { %5379 = vtanh.f32 %v2654_v39  ;;  %v5006_v23 = vpop.f32.mrb[63].mxu0  ;;  %v4669_v11 = vmul.f32 -1.442695, %v2654_v39 }
0x3014   :  { %5381 = vpow2.f32 %v4669_v11 }
0x301c   :  { %v5380_v38 = vpop.eup %5379 }
0x301d   :  { %2664 = vrot.lane.b32.xlu1 %v5380_v38, %s5539_s6 }
0x301e   :  { %v5382_v15 = vpop.eup %5381 }
0x301f   :  { %v2658_v46 = vadd.f32 1.0, %v5382_v15 }
0x3021   :  { %2681 = vperm.xlu1 %5130, %v2679_v41   ;;  %5383 = vrcp.f32 %v2658_v46  ;;  %v5149_v46 = vld [vmem:[%s7370_s11] sm:$0xff]  }
0x302b   :  { %v5384_v57 = vpop.eup %5383 }
0x302c   :  { %v2662_v63 = vmul.f32 %v5384_v57, %v2601_v29 }
0x308f   :  { %v2665_v56 = vpop.permute.xlu1 %2664 }
0x3090   :  { %v2667_v22 = vmul.f32 %v5384_v57, %v2665_v56 }
0x3092   :  { %2669 = vrot.lane.b32.xlu0 %v2667_v22, %s5540_s27  ;;  %v5151_v22 = vld [vmem:[%s7371_s13] sm:$0xff]  }
0x3093   :  { %5031 = vmatprep.subr.bf16.mxu0 %v5151_v22 }
0x30a0   :  { %v2682_v49 = vpop.permute.xlu1 %2681 }
0x30a1   :  { %vm2683_vm14 = vcmp.eq.s32.totalorder %v2682_v49, 1  ;;  %v2927_v49 = vld [vmem:[%s7372_s2 + $0x18] sm:$0xff] }
0x3104   :  { %v2670_v25 = vpop.permute.xlu0 %2669 }
0x3105   :  { %v2672_v61 = vadd.f32 %v2670_v25, %v2662_v63  ;;  %v2924_v63 = vld [vmem:[%s7372_s2] sm:$0xff]  ;;  %v2925_v25 = vld [vmem:[%s7372_s2 + $0x8] sm:$0xff] }
0x3107   :  { %5385 = vtanh.f32 %v2672_v61  ;;  %v2685_v32 = vsel %vm2683_vm14, %v2672_v61, %v2601_v29  ;;  %v5152_v29 = vld [vmem:[%s7371_s13 + $0x8] sm:$0xff]   ;;  %v2926_v61 = vld [vmem:[%s7372_s2 + $0x10] sm:$0xff]  ;;  %s5543_s13 = smov 96  }
0x3111   :  { %v5386_v31 = vpop.eup %5385 }
0x3112   :  { %2675 = vrot.lane.b32.xlu0 %v5386_v31, %s5539_s6  ;;  %v2932_v31 = vpack.c.bf16 %v2925_v25, %v2924_v63 }
0x3184   :  { %v2676_v43 = vpop.permute.xlu0 %2675 }
0x3185   :  { %v2678_v58 = vmul.f32 %v5384_v57, %v2676_v43  ;;  %v5150_v57 = vld [vmem:[%s7370_s11 + $0x8] sm:$0xff]  }
0x3186   :  { %v6705_v43 = vld [vmem:[%s7373_s17 + $0x4] ss:$8 sps:$4 sm:$0xff]  }
0x3187   :  { %v2684_v45 = vsel %vm2683_vm14, %v2678_v58, %v2600_v44 }
0x3188   :  { %v2686_v19 = vpack.c.bf16 %v2684_v45, %v2684_v45 }
0x318a   :  { %2688 = vrot.lane.b32.xlu1 %v2686_v19, %s5540_s27  ;;  %v2933_v19 = vpack.c.bf16 %v2927_v49, %v2926_v61 }
0x31fc   :  { %v2689_v7 = vpop.permute.xlu1 %2688 }
0x31fd   :  { %5012 = vmatmul.mubr.msk.bf16.vlgmr.msra.gmra.mrb[68].mxu1 %vm117_vm0, %v2689_v7 }
0x31fe   :  { %5027 = vmatprep.mubr.msk.bf16.mxu1 %vm5542_vm11, %v5541_v54  ;;  %5024 = vmatpush3.bf16.msra.mxu1 %v5149_v46 }
0x31ff   :  { %5025 = vmatprep.subr.bf16.mxu1 %v5541_v54 }
0x3202   :  { %5026 = vmatpush3.bf16.msra.mxu1 %v5150_v57 }
0x3203   :  { %3091 = vmatprep.subr.bf16.mxu1 %v6705_v43 }
0x32d0   :  { %v2727_v55 = vpop.f32.mrb[68].mxu1 }
0x32d1   :  { %v2738_v52 = vadd.f32 %v2737_v37, %v2727_v55  ;;  %v5013_v35 = vpop.f32.mrb[69].mxu1  ;;  %v6714_v37 = vld [vmem:[%s7373_s17] ss:$8 sps:$4 sm:$0xff]  }
0x32d2   :  { %v2730_v47 = vpop.f32.mrb[70].mxu1  ;;  %v2928_v35 = vld [vmem:[%s7372_s2 + $0x20] sm:$0xff] }
0x32d3   :  { %5387 = vtanh.f32 %v2738_v52  ;;  %v5014_v53 = vpop.f32.mrb[71].mxu1  ;;  %v4672_v60 = vmul.f32 -1.442695, %v2738_v52 }
0x32d4   :  { %v2930_v53 = vld [vmem:[%s7372_s2 + $0x30] sm:$0xff] }
0x32d5   :  { %5389 = vpow2.f32 %v4672_v60  ;;  %v6746_v60 = vld [vmem:[%s7373_s17 + $0x10] ss:$8 sps:$4 sm:$0xff]  }
0x32dd   :  { %v5388_v4 = vpop.eup %5387 }
0x32de   :  { %2748 = vrot.lane.b32.xlu0 %v5388_v4, %s5539_s6  ;;  %v2935_v4 = vpack.c.bf16 %v2931_v20, %v2930_v53  ;;  %v6823_v53 = vld [vmem:[%s7378_s16] ss:$0 sm:$0xff] }
0x32df   :  { %v5390_v0 = vpop.eup %5389 }
0x32e0   :  { %v2742_v21 = vadd.f32 1.0, %v5390_v0  ;;  %v6757_v0 = vld [vmem:[%s7374_s14] ss:$0 sm:$0xff] }
0x32e2   :  { %2765 = vperm.xlu0 %5129, %v2763_v48   ;;  %5391 = vrcp.f32 %v2742_v21  ;;  %v6741_v48 = vld [vmem:[%s7373_s17 + $0x14] ss:$8 sps:$4 sm:$0xff]  }
0x32ec   :  { %v5392_v24 = vpop.eup %5391 }
0x32ed   :  { %v2746_v2 = vmul.f32 %v5392_v24, %v2685_v32 }
0x3350   :  { %v2749_v30 = vpop.permute.xlu0 %2748 }
0x3351   :  { %v2751_v59 = vmul.f32 %v5392_v24, %v2749_v30 }
0x3353   :  { %2753 = vrot.lane.b32.xlu1 %v2751_v59, %s5540_s27 }
0x3361   :  { %v2766_v42 = vpop.permute.xlu0 %2765 }
0x3362   :  { %vm2767_vm1 = vcmp.eq.s32.totalorder %v2766_v42, 1 }
0x33c5   :  { %v2754_v36 = vpop.permute.xlu1 %2753 }
0x33c6   :  { %v2756_v12 = vadd.f32 %v2754_v36, %v2746_v2 }
0x33c8   :  { %5393 = vtanh.f32 %v2756_v12  ;;  %v2769_v38 = vsel %vm2767_vm1, %v2756_v12, %v2685_v32 }
0x33d2   :  { %v5394_v6 = vpop.eup %5393 }
0x33d3   :  { %2759 = vrot.lane.b32.xlu1 %v5394_v6, %s5539_s6 }
0x3445   :  { %v2760_v28 = vpop.permute.xlu1 %2759 }
0x3446   :  { %v2762_v13 = vmul.f32 %v5392_v24, %v2760_v28  ;;  %v4676_v28 = vld [vmem:[%s7375_s12] ss:$0 sm:$0xff] }
0x3448   :  { %v6663_v27 = vsel %vm2767_vm1, %v2762_v13, %v2684_v45 }
0x3449   :  { %v2770_v51 = vpack.c.bf16 %v6663_v27, %v6663_v27 }
0x344b   :  { %2772 = vrot.lane.b32.xlu0 %v2770_v51, %s5540_s27 }
0x34bd   :  { %v2773_v16 = vpop.permute.xlu0 %2772 }
0x34be   :  { %5020 = vmatmul.mubr.msk.bf16.vlgmr.msra.gmra.mrb[64].mxu0 %vm117_vm0, %v2773_v16 }
0x34bf   :  { %5032 = vmatpush3.bf16.msra.mxu0 %v5151_v22  ;;  %5035 = vmatprep.mubr.msk.bf16.mxu0 %vm117_vm0, %v2932_v31 }
0x34c0   :  { %5033 = vmatprep.subr.bf16.mxu0 %v5152_v29 }
0x34c3   :  { %5034 = vmatpush3.bf16.msra.mxu0 %v5152_v29 }
0x34c4   :  { %3275 = vmatprep.subr.bf16.mxu0 %v6705_v43 }
0x34c6   :  { %5036 = vmatmul.mubr.msk.bf16.vlgmr.msra.gmra.mrb[68].mxu0 %vm117_vm0, %v2933_v19 }
0x34c7   :  { %3276 = vmatpush1.bf16.msra.mxu0 %v6714_v37 }
0x34c8   :  { %3277 = vmatprep.subr.bf16.mxu0 %v6741_v48 }
0x34cb   :  { %3278 = vmatpush1.bf16.msra.mxu0 %v6746_v60 }
0x34cc   :  { %3441 = vmatprep.subr.bf16.mxu0 %v6705_v43 }
0x3591   :  { %v2811_v3 = vpop.f32.mrb[64].mxu0 }
0x3592   :  { %v2822_v14 = vadd.f32 %v2821_v18, %v2811_v3  ;;  %v5021_v10 = vpop.f32.mrb[65].mxu0 }
0x3593   :  { %v2814_v33 = vpop.f32.mrb[66].mxu0 }
0x3594   :  { %5395 = vtanh.f32 %v2822_v14  ;;  %v5022_v44 = vpop.f32.mrb[67].mxu0  ;;  %v4675_v34 = vmul.f32 -1.442695, %v2822_v14 }
0x3596   :  { %5397 = vpow2.f32 %v4675_v34 }
0x3599   :  { %v5037_v21 = vpop.f32.mrb[68].mxu0 }
0x359a   :  { %v3014_v24 = vadd.f32 %v5037_v21, %v6757_v0  ;;  %v3005_v30 = vpop.f32.mrb[69].mxu0 }
0x359b   :  { %v3006_v59 = vadd.f32 %v6757_v0, %v3005_v30  ;;  %v5038_v32 = vpop.f32.mrb[70].mxu0 }
0x359c   :  { %v3017_v2 = vadd.f32 %v5038_v32, %v6757_v0  ;;  %v3008_v36 = vpop.f32.mrb[71].mxu0 }
0x359d   :  { %v3009_v12 = vadd.f32 %v6757_v0, %v3008_v36 }
0x359e   :  { %v5396_v26 = vpop.eup %5395  ;;  %v4783_v6 = vpack.c.bf16 %v3017_v2, %v3014_v24 }
0x359f   :  { %2832 = vrot.lane.b32.xlu1 %v5396_v26, %s5539_s6  ;;  %v4778_v42 = vpack.c.bf16 %v3009_v12, %v3006_v59 }
0x35a0   :  { %v5398_v39 = vpop.eup %5397  ;;  %4799 = vst [vmem:[#allocation3 + $0x8] sm:$0xff] %v4783_v6  }
0x35a1   :  { %v2826_v50 = vadd.f32 1.0, %v5398_v39  ;;  %4779 = vst [vmem:[#allocation3] sm:$0xff] %v4778_v42  }
0x35a3   :  { %2849 = vperm.xlu1 %5130, %v2847_v17   ;;  %5399 = vrcp.f32 %v2826_v50 }
0x35a8   :  { %v3134_v39 = vld [vmem:[#allocation3] sm:$0xf] }
0x35a9   :  { %v3135_v50 = vunpack.c.l.bf16 %v3134_v39 }
0x35ad   :  { %v5400_v40 = vpop.eup %5399 }
0x35ae   :  { %v2830_v41 = vmul.f32 %v5400_v40, %v2769_v38 }
0x3611   :  { %v2833_v23 = vpop.permute.xlu1 %2832 }
0x3612   :  { %v2835_v62 = vmul.f32 %v5400_v40, %v2833_v23 }
0x3614   :  { %2837 = vrot.lane.b32.xlu0 %v2835_v62, %s5540_s27 }
0x3622   :  { %v2850_v58 = vpop.permute.xlu1 %2849 }
0x3623   :  { %vm2851_vm3 = vcmp.eq.s32.totalorder %v2850_v58, 1  ;;  %v6791_v58 = vld [vmem:[%s7377_s15] sm:$0xff]  }
0x3686   :  { %v2838_v11 = vpop.permute.xlu0 %2837 }
0x3687   :  { %v2840_v15 = vadd.f32 %v2838_v11, %v2830_v41  ;;  %v3132_v11 = vld [vmem:[%s7376_s3] sm:$0xff] }
0x3688   :  { %vm3133_vm4 = vcmp.gt.f32.partialorder %v3132_v11, 0.5 }
0x3689   :  { %5401 = vtanh.f32 %v2840_v15  ;;  %v3161_v46 = vsel %vm3133_vm4, 1, %v5538_v1 }
0x3693   :  { %v5402_v56 = vpop.eup %5401 }
0x3694   :  { %2843 = vrot.lane.b32.xlu0 %v5402_v56, %s5539_s6 }
0x3706   :  { %v2844_v45 = vpop.permute.xlu0 %2843 }
0x3707   :  { %v2846_v7 = vmul.f32 %v5400_v40, %v2844_v45  ;;  %v6797_v45 = vld [vmem:[%s7377_s15 + $0x8] sm:$0xff]  }
0x3709   :  { %v2852_v8 = vsel %vm2851_vm3, %v2846_v7, %v6663_v27 }
0x370a   :  { %v2853_v55 = vpack.c.bf16 %v2852_v8, %v6485_v5  ;;  %v2929_v5 = vld [vmem:[%s7372_s2 + $0x28] sm:$0xff] }
0x370b   :  { %v2934_v47 = vpack.c.bf16 %v2929_v5, %v2928_v35 }
0x370c   :  { %2866 = vrot.lane.b32.xlu1 %v2853_v55, %s5540_s27 }
0x370d   :  { %5039 = vmatprep.mubr.msk.bf16.mxu0 %vm117_vm0, %v2934_v47 }
0x370e   :  { %5040 = vmatmul.mubr.msk.bf16.gmra.mrb[72].mxu0 %vm117_vm0, %v2935_v4 }
0x370f   :  { %3307 = vmatprep.mubr.bf16.mxu0 %v5538_v1 }
0x377e   :  { %v2867_v52 = vpop.permute.xlu1 %2866 }
0x377f   :  { %5028 = vmatmul.mubr.msk.bf16.vlgmr.msra.gmra.mrb[72].mxu1 %vm117_vm0, %v2867_v52 }
0x3780   :  { %3092 = vmatpush1.bf16.msra.mxu1 %v6714_v37  ;;  %3123 = vmatprep.mubr.bf16.mxu1 %v5538_v1 }
0x3781   :  { %3093 = vmatprep.subr.bf16.mxu1 %v6741_v48 }
0x3784   :  { %3094 = vmatpush1.bf16.msra.mxu1 %v6746_v60 }
0x3785   :  { %5043 = vmatprep.subr.bf16.mxu1 %v5541_v54 }
0x37e1   :  { %v6772_v10 = vpop.f32.mrb[72].mxu0 }
0x37e2   :  { %v3021_v33 = vpop.f32.mrb[73].mxu0 }
0x37e3   :  { %v6774_v44 = vpop.f32.mrb[74].mxu0  ;;  %v3022_v26 = vadd.f32 %v6757_v0, %v3021_v33 }
0x37e4   :  { %v3024_v9 = vpop.f32.mrb[75].mxu0 }
0x37e5   :  { %v3025_v17 = vadd.f32 %v6757_v0, %v3024_v9 }
0x37e7   :  { %v4788_v34 = vpack.c.bf16 %v3025_v17, %v3022_v26 }
0x37e9   :  { %4800 = vst [vmem:[#allocation3 + $0x10] sm:$0xff] %v4788_v34  }
0x3852   :  { %v2917_v13 = vpop.f32.mrb[72].mxu1 }
0x3853   :  { %v5029_v27 = vpop.f32.mrb[73].mxu1  ;;  %v2918_v16 = vadd.f32 %v4676_v28, %v2917_v13 }
0x3854   :  { %v2920_v51 = vpop.f32.mrb[74].mxu1 }
0x3855   :  { %v6766_v18 = vadd.f32 %v4676_v28, %v2920_v51  ;;  %v5030_v3 = vpop.f32.mrb[75].mxu1 }
0x3856   :  { %v3030_v3 = vadd.f32 %v6772_v10, %v6757_v0 }
0x3857   :  { %v3067_v14 = vpack.c.bf16 %v6766_v18, %v2918_v16 }
0x3859   :  { %4692 = vmatmul.mubr.msk.bf16.vlgmr.msra.gmra.mrb[76].mxu1 %vm117_vm0, %v3067_v14  ;;  %v3033_v14 = vadd.f32 %v6774_v44, %v6757_v0  ;;  %v6854_v0 = vld [vmem:[#allocation3 + $0x4] sm:$0xff]  }
0x385a   :  { %5047 = vmatprep.mubr.msk.bf16.mxu1 %vm5542_vm11, %v5541_v54  ;;  %5044 = vmatpush3.bf16.msra.mxu1 %v6791_v58  ;;  %v3320_v44 = vunpack.c.l.bf16 %v6854_v0 }
0x385b   :  { %5045 = vmatprep.subr.bf16.mxu1 %v5541_v54  ;;  %v4793_v33 = vpack.c.bf16 %v3033_v14, %v3030_v3 }
0x385d   :  { %4801 = vst [vmem:[#allocation3 + $0x18] sm:$0xff] %v4793_v33  }
0x385e   :  { %5046 = vmatpush3.bf16.msra.mxu1 %v6797_v45 }
0x385f   :  { %5051 = vmatprep.subr.bf16.mxu1 %v5541_v54 }
0x392c   :  { %v3125_v40 = vpop.f32.mrb[76].mxu1 }
0x392d   :  { %v3136_v23 = vadd.f32 %v3135_v50, %v3125_v40  ;;  %v3127_v62 = vpop.f32.mrb[77].mxu1 }
0x392e   :  { %v3128_v38 = vpop.f32.mrb[78].mxu1 }
0x392f   :  { %5403 = vtanh.f32 %v3136_v23  ;;  %v3129_v41 = vpop.f32.mrb[79].mxu1  ;;  %v4693_v57 = vmul.f32 -1.442695, %v3136_v23  ;;  %v4699_v38 = vld [vmem:[%s7376_s3 + $0x8] sm:$0xff] }
0x3930   :  { %vm3318_vm6 = vcmp.gt.f32.partialorder %v4699_v38, 0.5 }
0x3931   :  { %5405 = vpow2.f32 %v4693_v57  ;;  %v3346_v11 = vsel %vm3318_vm6, 1, %v5538_v1 }
0x3939   :  { %v5404_v15 = vpop.eup %5403 }
0x393a   :  { %3146 = vrot.lane.b32.xlu0 %v5404_v15, %s5539_s6 }
0x393b   :  { %v5406_v56 = vpop.eup %5405 }
0x393c   :  { %v3140_v22 = vadd.f32 1.0, %v5406_v56 }
0x393e   :  { %3163 = vperm.xlu0 %5129, %v3161_v46   ;;  %5407 = vrcp.f32 %v3140_v22 }
0x3942   :  { %3167 = vrot.lane.b32.xlu0 %v2918_v16, %s5543_s13 }
0x3948   :  { %v5408_v29 = vpop.eup %5407 }
0x3949   :  { %v3144_v61 = vmul.f32 0.0, %v5408_v29 }
0x39ac   :  { %v3147_v63 = vpop.permute.xlu0 %3146 }
0x39ad   :  { %v3149_v25 = vmul.f32 %v5408_v29, %v3147_v63 }
0x39af   :  { %3151 = vrot.lane.b32.xlu1 %v3149_v25, %s5540_s27 }
0x39bd   :  { %v6803_v7 = vpop.permute.xlu0 %3163 }
0x39be   :  { %vm3165_vm5 = vcmp.eq.s32.totalorder %v6803_v7, 1 }
0x39c1   :  { %v3168_v52 = vpop.permute.xlu0 %3167 }
0x3a21   :  { %v3152_v31 = vpop.permute.xlu1 %3151 }
0x3a22   :  { %v6785_v49 = vadd.f32 %v3152_v31, %v3144_v61 }
0x3a24   :  { %5409 = vtanh.f32 %v6785_v49  ;;  %v6866_v63 = vsel %vm3165_vm5, %v6785_v49, 0.0 }
0x3a2e   :  { %v5410_v19 = vpop.eup %5409 }
0x3a2f   :  { %3157 = vrot.lane.b32.xlu1 %v5410_v19, %s5539_s6 }
0x3aa1   :  { %v3158_v8 = vpop.permute.xlu1 %3157 }
0x3aa2   :  { %v3160_v55 = vmul.f32 %v5408_v29, %v3158_v8 }
0x3aa4   :  { %v6808_v35 = vsel %vm3165_vm5, %v3160_v55, %v3168_v52 }
0x3aa5   :  { %v3172_v5 = vpack.c.bf16 %v6808_v35, %v6808_v35 }
0x3aa7   :  { %3174 = vrot.lane.b32.xlu1 %v3172_v5, %s5540_s27 }
0x3b19   :  { %v3175_v47 = vpop.permute.xlu1 %3174 }
0x3b1a   :  { %5048 = vmatmul.mubr.msk.bf16.vlgmr.msra.gmra.mrb[80].mxu1 %vm117_vm0, %v3175_v47 }
0x3b1b   :  { %5052 = vmatpush3.bf16.msra.mxu1 %v6791_v58  ;;  %5055 = vmatprep.mubr.msk.bf16.mxu1 %vm5542_vm11, %v5541_v54 }
0x3b1c   :  { %5053 = vmatprep.subr.bf16.mxu1 %v5541_v54 }
0x3b1f   :  { %5054 = vmatpush3.bf16.msra.mxu1 %v6797_v45 }
0x3b20   :  { %5059 = vmatprep.subr.bf16.mxu1 %v5541_v54 }
0x3bed   :  { %v3225_v20 = vpop.f32.mrb[80].mxu1 }
0x3bee   :  { %v3226_v4 = vadd.f32 %v6823_v53, %v3225_v20  ;;  %v5049_v21 = vpop.f32.mrb[81].mxu1 }
0x3bef   :  { %v3228_v24 = vpop.f32.mrb[82].mxu1 }
0x3bf0   :  { %v3231_v30 = vadd.f32 %v3226_v4, %v3129_v41  ;;  %v5050_v59 = vpop.f32.mrb[83].mxu1 }
0x3bf2   :  { %5411 = vtanh.f32 %v3231_v30  ;;  %v4697_v2 = vmul.f32 -1.442695, %v3231_v30 }
0x3bf4   :  { %5413 = vpow2.f32 %v4697_v2 }
0x3bfc   :  { %v5412_v32 = vpop.eup %5411 }
0x3bfd   :  { %3241 = vrot.lane.b32.xlu0 %v5412_v32, %s5539_s6 }
0x3bfe   :  { %v5414_v36 = vpop.eup %5413 }
0x3bff   :  { %v3235_v12 = vadd.f32 1.0, %v5414_v36 }
0x3c01   :  { %5415 = vrcp.f32 %v3235_v12 }
0x3c0b   :  { %v5416_v6 = vpop.eup %5415 }
0x3c0c   :  { %v3239_v13 = vmul.f32 0.0, %v5416_v6 }
0x3c6f   :  { %v3242_v42 = vpop.permute.xlu0 %3241 }
0x3c70   :  { %v3244_v28 = vmul.f32 %v5416_v6, %v3242_v42 }
0x3c72   :  { %3246 = vrot.lane.b32.xlu1 %v3244_v28, %s5540_s27 }
0x3c76   :  { %3257 = vrot.lane.b32.xlu1 %v6766_v18, %s5543_s13 }
0x3ce4   :  { %v3247_v27 = vpop.permute.xlu1 %3246 }
0x3ce5   :  { %v6830_v51 = vadd.f32 %v3247_v27, %v3239_v13 }
0x3ce7   :  { %5417 = vtanh.f32 %v6830_v51  ;;  %v6897_v28 = vsel %vm3165_vm5, %v6830_v51, 0.0 }
0x3ce8   :  { %v3258_v18 = vpop.permute.xlu1 %3257 }
0x3cf1   :  { %v5418_v16 = vpop.eup %5417 }
0x3cf2   :  { %3252 = vrot.lane.b32.xlu0 %v5418_v16, %s5539_s6 }
0x3d64   :  { %v3253_v9 = vpop.permute.xlu0 %3252 }
0x3d65   :  { %v6838_v26 = vmul.f32 %v5416_v6, %v3253_v9 }
0x3d67   :  { %v6843_v17 = vsel %vm3165_vm5, %v6838_v26, %v3258_v18 }
0x3d68   :  { %v3268_v34 = vpack.c.bf16 %v6843_v17, %v6808_v35 }
0x3d6a   :  { %3270 = vrot.lane.b32.xlu0 %v3268_v34, %s5540_s27 }
0x3ddc   :  { %v3271_v10 = vpop.permute.xlu0 %3270 }
0x3ddd   :  { %4698 = vmatmul.mubr.msk.bf16.vlgmr.msra.gmra.mrb[76].mxu0 %vm117_vm0, %v3271_v10 }
0x3dde   :  { %3442 = vmatpush1.bf16.msra.mxu0 %v6714_v37  ;;  %3473 = vmatprep.mubr.bf16.mxu0 %v5538_v1 }
0x3ddf   :  { %3443 = vmatprep.subr.bf16.mxu0 %v6741_v48 }
0x3de2   :  { %3444 = vmatpush1.bf16.msra.mxu0 %v6746_v60 }
0x3de3   :  { %3607 = vmatprep.subr.bf16.mxu0 %v6705_v43 }
0x3eb0   :  { %v3309_v39 = vpop.f32.mrb[76].mxu0 }
0x3eb1   :  { %v3321_v50 = vadd.f32 %v3320_v44, %v3309_v39  ;;  %v3311_v40 = vpop.f32.mrb[77].mxu0 }
0x3eb2   :  { %v3312_v23 = vpop.f32.mrb[78].mxu0  ;;  %v4704_v40 = vld [vmem:[%s7376_s3 + $0x10] sm:$0xff] }
0x3eb3   :  { %5419 = vtanh.f32 %v3321_v50  ;;  %v3313_v62 = vpop.f32.mrb[79].mxu0  ;;  %v4700_v15 = vmul.f32 -1.442695, %v3321_v50  ;;  %vm3484_vm8 = vcmp.gt.f32.partialorder %v4704_v40, 0.5 }
0x3eb5   :  { %5421 = vpow2.f32 %v4700_v15 }
0x3ebd   :  { %v5420_v41 = vpop.eup %5419 }
0x3ebe   :  { %3331 = vrot.lane.b32.xlu1 %v5420_v41, %s5539_s6 }
0x3ebf   :  { %v5422_v46 = vpop.eup %5421 }
0x3ec0   :  { %v3325_v57 = vadd.f32 1.0, %v5422_v46 }
0x3ec2   :  { %3348 = vperm.xlu1 %5130, %v3346_v11   ;;  %5423 = vrcp.f32 %v3325_v57 }
0x3ecc   :  { %v5424_v56 = vpop.eup %5423 }
0x3ecd   :  { %v3329_v25 = vmul.f32 %v5424_v56, %v6866_v63 }
0x3f30   :  { %v3332_v22 = vpop.permute.xlu1 %3331 }
0x3f31   :  { %v3334_v29 = vmul.f32 %v5424_v56, %v3332_v22 }
0x3f33   :  { %3336 = vrot.lane.b32.xlu0 %v3334_v29, %s5540_s27 }
0x3f41   :  { %v6873_v8 = vpop.permute.xlu1 %3348 }
0x3f42   :  { %vm3350_vm7 = vcmp.eq.s32.totalorder %v6873_v8, 1 }
0x3fa5   :  { %v3337_v61 = vpop.permute.xlu0 %3336 }
0x3fa6   :  { %v6869_v31 = vadd.f32 %v3337_v61, %v3329_v25 }
0x3fa8   :  { %5425 = vtanh.f32 %v6869_v31  ;;  %v6932_v57 = vsel %vm3350_vm7, %v6869_v31, %v6866_v63 }
0x3fb2   :  { %v5426_v19 = vpop.eup %5425 }
0x3fb3   :  { %3342 = vrot.lane.b32.xlu0 %v5426_v19, %s5539_s6 }
0x4025   :  { %v3343_v55 = vpop.permute.xlu0 %3342 }
0x4026   :  { %v3345_v52 = vmul.f32 %v5424_v56, %v3343_v55 }
0x4028   :  { %v6879_v49 = vsel %vm3350_vm7, %v3345_v52, %v6808_v35 }
0x4029   :  { %v3353_v5 = vpack.c.bf16 %v6879_v49, %v6879_v49 }
0x402b   :  { %3355 = vrot.lane.b32.xlu1 %v3353_v5, %s5540_s27 }
0x409d   :  { %v3356_v47 = vpop.permute.xlu1 %3355 }
0x409e   :  { %5056 = vmatmul.mubr.msk.bf16.vlgmr.msra.gmra.mrb[84].mxu1 %vm117_vm0, %v3356_v47 }
0x409f   :  { %5060 = vmatpush3.bf16.msra.mxu1 %v6791_v58  ;;  %5063 = vmatprep.mubr.msk.bf16.mxu1 %vm5542_vm11, %v5541_v54 }
0x40a0   :  { %5061 = vmatprep.subr.bf16.mxu1 %v5541_v54 }
0x40a3   :  { %5062 = vmatpush3.bf16.msra.mxu1 %v6797_v45 }
0x40a4   :  { %5067 = vmatprep.subr.bf16.mxu1 %v5541_v54 }
0x4171   :  { %v3394_v35 = vpop.f32.mrb[84].mxu1 }
0x4172   :  { %v3395_v20 = vadd.f32 %v6823_v53, %v3394_v35  ;;  %v5057_v4 = vpop.f32.mrb[85].mxu1 }
0x4173   :  { %v3397_v21 = vpop.f32.mrb[86].mxu1 }
0x4174   :  { %v3400_v24 = vadd.f32 %v3395_v20, %v3313_v62  ;;  %v5058_v30 = vpop.f32.mrb[87].mxu1  ;;  %v3512_v62 = vsel %vm3484_vm8, 1, %v5538_v1 }
0x4176   :  { %5427 = vtanh.f32 %v3400_v24  ;;  %v4702_v32 = vmul.f32 -1.442695, %v3400_v24 }
0x4178   :  { %5429 = vpow2.f32 %v4702_v32 }
0x4180   :  { %v5428_v59 = vpop.eup %5427 }
0x4181   :  { %3410 = vrot.lane.b32.xlu0 %v5428_v59, %s5539_s6 }
0x4182   :  { %v5430_v2 = vpop.eup %5429 }
0x4183   :  { %v3404_v36 = vadd.f32 1.0, %v5430_v2 }
0x4185   :  { %5431 = vrcp.f32 %v3404_v36 }
0x418f   :  { %v5432_v12 = vpop.eup %5431 }
0x4190   :  { %v3408_v13 = vmul.f32 %v5432_v12, %v6897_v28 }
0x41f3   :  { %v3411_v6 = vpop.permute.xlu0 %3410 }
0x41f4   :  { %v3413_v42 = vmul.f32 %v5432_v12, %v3411_v6 }
0x41f6   :  { %3415 = vrot.lane.b32.xlu1 %v3413_v42, %s5540_s27 }
0x4268   :  { %v3416_v27 = vpop.permute.xlu1 %3415 }
0x4269   :  { %v6900_v16 = vadd.f32 %v3416_v27, %v3408_v13 }
0x426b   :  { %5433 = vtanh.f32 %v6900_v16 }
0x4275   :  { %v5434_v3 = vpop.eup %5433 }
0x4276   :  { %3421 = vrot.lane.b32.xlu0 %v5434_v3, %s5539_s6 }
0x42e8   :  { %v3422_v14 = vpop.permute.xlu0 %3421 }
0x42e9   :  { %v6904_v33 = vmul.f32 %v5432_v12, %v3422_v14  ;;  %v6964_v12 = vsel %vm3350_vm7, %v6900_v16, %v6897_v28 }
0x42eb   :  { %v6910_v9 = vsel %vm3350_vm7, %v6904_v33, %v6843_v17  ;;  %v3486_v17 = vunpack.c.h.bf16 %v6854_v0 }
0x42ec   :  { %v3434_v51 = vpack.c.bf16 %v6910_v9, %v6879_v49 }
0x42ee   :  { %3436 = vrot.lane.b32.xlu1 %v3434_v51, %s5540_s27 }
0x4360   :  { %v3437_v18 = vpop.permute.xlu1 %3436 }
0x4361   :  { %4703 = vmatmul.mubr.msk.bf16.vlgmr.msra.gmra.mrb[80].mxu0 %vm117_vm0, %v3437_v18 }
0x4362   :  { %3608 = vmatpush1.bf16.msra.mxu0 %v6714_v37  ;;  %3639 = vmatprep.mubr.bf16.mxu0 %v5538_v1 }
0x4363   :  { %3609 = vmatprep.subr.bf16.mxu0 %v6741_v48 }
0x4366   :  { %3610 = vmatpush1.bf16.msra.mxu0 %v6746_v60 }
0x4367   :  { %3773 = vmatprep.subr.bf16.mxu0 %v6705_v43 }
0x4434   :  { %v3475_v34 = vpop.f32.mrb[80].mxu0 }
0x4435   :  { %v3487_v10 = vadd.f32 %v3486_v17, %v3475_v34  ;;  %v3477_v44 = vpop.f32.mrb[81].mxu0 }
0x4436   :  { %v3478_v39 = vpop.f32.mrb[82].mxu0 }
0x4437   :  { %5435 = vtanh.f32 %v3487_v10  ;;  %v3479_v50 = vpop.f32.mrb[83].mxu0  ;;  %v4705_v38 = vmul.f32 -1.442695, %v3487_v10 }
0x4439   :  { %5437 = vpow2.f32 %v4705_v38 }
0x4441   :  { %v5436_v23 = vpop.eup %5435 }
0x4442   :  { %3497 = vrot.lane.b32.xlu0 %v5436_v23, %s5539_s6 }
0x4443   :  { %v5438_v0 = vpop.eup %5437 }
0x4444   :  { %v3491_v41 = vadd.f32 1.0, %v5438_v0 }
0x4446   :  { %3514 = vperm.xlu0 %5129, %v3512_v62   ;;  %5439 = vrcp.f32 %v3491_v41 }
0x4450   :  { %v5440_v11 = vpop.eup %5439 }
0x4451   :  { %v3495_v56 = vmul.f32 %v5440_v11, %v6932_v57 }
0x44b4   :  { %v3498_v15 = vpop.permute.xlu0 %3497 }
0x44b5   :  { %v3500_v46 = vmul.f32 %v5440_v11, %v3498_v15 }
0x44b7   :  { %3502 = vrot.lane.b32.xlu1 %v3500_v46, %s5540_s27 }
0x44c5   :  { %v6939_v61 = vpop.permute.xlu0 %3514 }
0x44c6   :  { %vm3516_vm9 = vcmp.eq.s32.totalorder %v6939_v61, 1 }
0x4529   :  { %v3503_v22 = vpop.permute.xlu1 %3502 }
0x452a   :  { %v6935_v29 = vadd.f32 %v3503_v22, %v3495_v56 }
0x452c   :  { %5441 = vtanh.f32 %v6935_v29  ;;  %v7001_v46 = vsel %vm3516_vm9, %v6935_v29, %v6932_v57 }
0x4536   :  { %v5442_v25 = vpop.eup %5441 }
0x4537   :  { %3508 = vrot.lane.b32.xlu1 %v5442_v25, %s5539_s6 }
0x45a9   :  { %v3509_v19 = vpop.permute.xlu1 %3508 }
0x45aa   :  { %v3511_v55 = vmul.f32 %v5440_v11, %v3509_v19 }
0x45ac   :  { %v6945_v63 = vsel %vm3516_vm9, %v3511_v55, %v6879_v49 }
0x45ad   :  { %v3519_v31 = vpack.c.bf16 %v6945_v63, %v6945_v63 }
0x45af   :  { %3521 = vrot.lane.b32.xlu0 %v3519_v31, %s5540_s27 }
0x4621   :  { %v3522_v52 = vpop.permute.xlu0 %3521 }
0x4622   :  { %5064 = vmatmul.mubr.msk.bf16.vlgmr.msra.gmra.mrb[88].mxu1 %vm117_vm0, %v3522_v52 }
0x4623   :  { %5068 = vmatpush3.bf16.msra.mxu1 %v6791_v58  ;;  %5071 = vmatprep.mubr.msk.bf16.mxu1 %vm5542_vm11, %v5541_v54 }
0x4624   :  { %5069 = vmatprep.subr.bf16.mxu1 %v5541_v54 }
0x4627   :  { %5070 = vmatpush3.bf16.msra.mxu1 %v6797_v45 }
0x4628   :  { %5075 = vmatprep.subr.bf16.mxu1 %v5541_v54 }
0x46f5   :  { %v3560_v49 = vpop.f32.mrb[88].mxu1 }
0x46f6   :  { %v3561_v5 = vadd.f32 %v6823_v53, %v3560_v49  ;;  %v5065_v47 = vpop.f32.mrb[89].mxu1 }
0x46f7   :  { %v3563_v35 = vpop.f32.mrb[90].mxu1 }
0x46f8   :  { %v3566_v20 = vadd.f32 %v3561_v5, %v3479_v50  ;;  %v5066_v4 = vpop.f32.mrb[91].mxu1  ;;  %v4709_v50 = vld [vmem:[%s7376_s3 + $0x18] sm:$0xff] }
0x46f9   :  { %vm3650_vm10 = vcmp.gt.f32.partialorder %v4709_v50, 0.5 }
0x46fa   :  { %5443 = vtanh.f32 %v3566_v20  ;;  %v4707_v24 = vmul.f32 -1.442695, %v3566_v20  ;;  %v3678_v23 = vsel %vm3650_vm10, 1, %v5538_v1 }
0x46fc   :  { %5445 = vpow2.f32 %v4707_v24 }
0x4704   :  { %v5444_v21 = vpop.eup %5443 }
0x4705   :  { %3576 = vrot.lane.b32.xlu1 %v5444_v21, %s5539_s6 }
0x4706   :  { %v5446_v30 = vpop.eup %5445 }
0x4707   :  { %v3570_v59 = vadd.f32 1.0, %v5446_v30 }
0x4709   :  { %5447 = vrcp.f32 %v3570_v59 }
0x4713   :  { %v5448_v32 = vpop.eup %5447 }
0x4714   :  { %v3574_v6 = vmul.f32 %v5448_v32, %v6964_v12 }
0x4777   :  { %v3577_v2 = vpop.permute.xlu1 %3576 }
0x4778   :  { %v3579_v36 = vmul.f32 %v5448_v32, %v3577_v2 }
0x477a   :  { %3581 = vrot.lane.b32.xlu0 %v3579_v36, %s5540_s27 }
0x47ec   :  { %v3582_v42 = vpop.permute.xlu0 %3581 }
0x47ed   :  { %v6967_v13 = vadd.f32 %v3582_v42, %v3574_v6 }
0x47ef   :  { %5449 = vtanh.f32 %v6967_v13  ;;  %v7033_v6 = vsel %vm3516_vm9, %v6967_v13, %v6964_v12 }
0x47f9   :  { %v5450_v27 = vpop.eup %5449 }
0x47fa   :  { %3587 = vrot.lane.b32.xlu1 %v5450_v27, %s5539_s6 }
0x486c   :  { %v3588_v3 = vpop.permute.xlu1 %3587 }
0x486d   :  { %v6971_v14 = vmul.f32 %v5448_v32, %v3588_v3 }
0x486f   :  { %v6977_v51 = vsel %vm3516_vm9, %v6971_v14, %v6910_v9  ;;  %v6988_v9 = vld [vmem:[#allocation3 + $0xc] sm:$0xff]  }
0x4870   :  { %v3600_v28 = vpack.c.bf16 %v6977_v51, %v6945_v63  ;;  %v3652_v18 = vunpack.c.l.bf16 %v6988_v9 }
0x4872   :  { %3602 = vrot.lane.b32.xlu0 %v3600_v28, %s5540_s27 }
0x48e4   :  { %v3603_v16 = vpop.permute.xlu0 %3602 }
0x48e5   :  { %4708 = vmatmul.mubr.msk.bf16.vlgmr.msra.gmra.mrb[84].mxu0 %vm117_vm0, %v3603_v16 }
0x48e6   :  { %3774 = vmatpush1.bf16.msra.mxu0 %v6714_v37  ;;  %3805 = vmatprep.mubr.bf16.mxu0 %v5538_v1 }
0x48e7   :  { %3775 = vmatprep.subr.bf16.mxu0 %v6741_v48 }
0x48ea   :  { %3776 = vmatpush1.bf16.msra.mxu0 %v6746_v60 }
0x48eb   :  { %3939 = vmatprep.subr.bf16.mxu0 %v6705_v43 }
0x49b8   :  { %v3641_v17 = vpop.f32.mrb[84].mxu0 }
0x49b9   :  { %v3653_v34 = vadd.f32 %v3652_v18, %v3641_v17  ;;  %v3643_v10 = vpop.f32.mrb[85].mxu0 }
0x49ba   :  { %v3644_v44 = vpop.f32.mrb[86].mxu0 }
0x49bb   :  { %5451 = vtanh.f32 %v3653_v34  ;;  %v3645_v39 = vpop.f32.mrb[87].mxu0  ;;  %v4710_v62 = vmul.f32 -1.442695, %v3653_v34 }
0x49bd   :  { %5453 = vpow2.f32 %v4710_v62 }
0x49c5   :  { %v5452_v40 = vpop.eup %5451 }
0x49c6   :  { %3663 = vrot.lane.b32.xlu1 %v5452_v40, %s5539_s6  ;;  %v4714_v40 = vld [vmem:[%s7376_s3 + $0x20] sm:$0xff] }
0x49c7   :  { %v5454_v38 = vpop.eup %5453  ;;  %vm3816_vm13 = vcmp.gt.f32.partialorder %v4714_v40, 0.5 }
0x49c8   :  { %v3657_v0 = vadd.f32 1.0, %v5454_v38  ;;  %v3844_v62 = vsel %vm3816_vm13, 1, %v5538_v1 }
0x49ca   :  { %3680 = vperm.xlu1 %5130, %v3678_v23   ;;  %5455 = vrcp.f32 %v3657_v0 }
0x49d4   :  { %v5456_v41 = vpop.eup %5455 }
0x49d5   :  { %v3661_v56 = vmul.f32 %v5456_v41, %v7001_v46 }
0x4a38   :  { %v3664_v11 = vpop.permute.xlu1 %3663 }
0x4a39   :  { %v3666_v15 = vmul.f32 %v5456_v41, %v3664_v11 }
0x4a3b   :  { %3668 = vrot.lane.b32.xlu0 %v3666_v15, %s5540_s27 }
0x4a49   :  { %v7008_v55 = vpop.permute.xlu1 %3680 }
0x4a4a   :  { %vm3682_vm12 = vcmp.eq.s32.totalorder %v7008_v55, 1 }
0x4aad   :  { %v3669_v22 = vpop.permute.xlu0 %3668 }
0x4aae   :  { %v7004_v25 = vadd.f32 %v3669_v22, %v3661_v56 }
0x4ab0   :  { %5457 = vtanh.f32 %v7004_v25  ;;  %v7068_v56 = vsel %vm3682_vm12, %v7004_v25, %v7001_v46 }
0x4aba   :  { %v5458_v19 = vpop.eup %5457 }
0x4abb   :  { %3674 = vrot.lane.b32.xlu0 %v5458_v19, %s5539_s6 }
0x4b2d   :  { %v3675_v31 = vpop.permute.xlu0 %3674 }
0x4b2e   :  { %v3677_v52 = vmul.f32 %v5456_v41, %v3675_v31 }
0x4b30   :  { %v7014_v57 = vsel %vm3682_vm12, %v3677_v52, %v6945_v63 }
0x4b31   :  { %v3685_v29 = vpack.c.bf16 %v7014_v57, %v7014_v57 }
0x4b33   :  { %3687 = vrot.lane.b32.xlu1 %v3685_v29, %s5540_s27 }
0x4ba5   :  { %v3688_v49 = vpop.permute.xlu1 %3687 }
0x4ba6   :  { %5072 = vmatmul.mubr.msk.bf16.vlgmr.msra.gmra.mrb[92].mxu1 %vm117_vm0, %v3688_v49 }
0x4ba7   :  { %5076 = vmatpush3.bf16.msra.mxu1 %v6791_v58  ;;  %5079 = vmatprep.mubr.msk.bf16.mxu1 %vm5542_vm11, %v5541_v54 }
0x4ba8   :  { %5077 = vmatprep.subr.bf16.mxu1 %v5541_v54 }
0x4bab   :  { %5078 = vmatpush3.bf16.msra.mxu1 %v6797_v45 }
0x4bac   :  { %5083 = vmatprep.subr.bf16.mxu1 %v5541_v54 }
0x4c79   :  { %v3726_v63 = vpop.f32.mrb[92].mxu1 }
0x4c7a   :  { %v3727_v5 = vadd.f32 %v6823_v53, %v3726_v63  ;;  %v5073_v47 = vpop.f32.mrb[93].mxu1 }
0x4c7b   :  { %v3729_v35 = vpop.f32.mrb[94].mxu1 }
0x4c7c   :  { %v3732_v20 = vadd.f32 %v3727_v5, %v3645_v39  ;;  %v5074_v4 = vpop.f32.mrb[95].mxu1 }
0x4c7e   :  { %5459 = vtanh.f32 %v3732_v20  ;;  %v4712_v24 = vmul.f32 -1.442695, %v3732_v20 }
0x4c80   :  { %5461 = vpow2.f32 %v4712_v24 }
0x4c88   :  { %v5460_v21 = vpop.eup %5459 }
0x4c89   :  { %3742 = vrot.lane.b32.xlu0 %v5460_v21, %s5539_s6 }
0x4c8a   :  { %v5462_v30 = vpop.eup %5461 }
0x4c8b   :  { %v3736_v59 = vadd.f32 1.0, %v5462_v30 }
0x4c8d   :  { %5463 = vrcp.f32 %v3736_v59 }
0x4c97   :  { %v5464_v32 = vpop.eup %5463 }
0x4c98   :  { %v3740_v42 = vmul.f32 %v5464_v32, %v7033_v6 }
0x4cfb   :  { %v3743_v2 = vpop.permute.xlu0 %3742 }
0x4cfc   :  { %v3745_v36 = vmul.f32 %v5464_v32, %v3743_v2 }
0x4cfe   :  { %3747 = vrot.lane.b32.xlu1 %v3745_v36, %s5540_s27 }
0x4d70   :  { %v3748_v27 = vpop.permute.xlu1 %3747 }
0x4d71   :  { %v7036_v3 = vadd.f32 %v3748_v27, %v3740_v42 }
0x4d73   :  { %5465 = vtanh.f32 %v7036_v3  ;;  %v7100_v27 = vsel %vm3682_vm12, %v7036_v3, %v7033_v6 }
0x4d7d   :  { %v5466_v28 = vpop.eup %5465 }
0x4d7e   :  { %3753 = vrot.lane.b32.xlu0 %v5466_v28, %s5539_s6 }
0x4df0   :  { %v3754_v16 = vpop.permute.xlu0 %3753 }
0x4df1   :  { %v7040_v18 = vmul.f32 %v5464_v32, %v3754_v16 }
0x4df3   :  { %v7046_v17 = vsel %vm3682_vm12, %v7040_v18, %v6977_v51  ;;  %v3818_v51 = vunpack.c.h.bf16 %v6988_v9 }
0x4df4   :  { %v3766_v12 = vpack.c.bf16 %v7046_v17, %v7014_v57 }
0x4df6   :  { %3768 = vrot.lane.b32.xlu1 %v3766_v12, %s5540_s27 }
0x4e68   :  { %v3769_v13 = vpop.permute.xlu1 %3768 }
0x4e69   :  { %4713 = vmatmul.mubr.msk.bf16.vlgmr.msra.gmra.mrb[88].mxu0 %vm117_vm0, %v3769_v13 }
0x4e6a   :  { %3940 = vmatpush1.bf16.msra.mxu0 %v6714_v37  ;;  %3971 = vmatprep.mubr.bf16.mxu0 %v5538_v1 }
0x4e6b   :  { %3941 = vmatprep.subr.bf16.mxu0 %v6741_v48 }
0x4e6e   :  { %3942 = vmatpush1.bf16.msra.mxu0 %v6746_v60 }
0x4e6f   :  { %4105 = vmatprep.subr.bf16.mxu0 %v6705_v43 }
0x4f3c   :  { %v3807_v34 = vpop.f32.mrb[88].mxu0 }
0x4f3d   :  { %v3819_v10 = vadd.f32 %v3818_v51, %v3807_v34  ;;  %v3809_v44 = vpop.f32.mrb[89].mxu0 }
0x4f3e   :  { %v3810_v39 = vpop.f32.mrb[90].mxu0 }
0x4f3f   :  { %5467 = vtanh.f32 %v3819_v10  ;;  %v3811_v50 = vpop.f32.mrb[91].mxu0  ;;  %v4715_v38 = vmul.f32 -1.442695, %v3819_v10 }
0x4f41   :  { %5469 = vpow2.f32 %v4715_v38 }
0x4f49   :  { %v5468_v23 = vpop.eup %5467 }
0x4f4a   :  { %3829 = vrot.lane.b32.xlu0 %v5468_v23, %s5539_s6 }
0x4f4b   :  { %v5470_v9 = vpop.eup %5469 }
0x4f4c   :  { %v3823_v0 = vadd.f32 1.0, %v5470_v9 }
0x4f4e   :  { %3846 = vperm.xlu0 %5129, %v3844_v62   ;;  %5471 = vrcp.f32 %v3823_v0 }
0x4f58   :  { %v5472_v41 = vpop.eup %5471 }
0x4f59   :  { %v3827_v22 = vmul.f32 %v5472_v41, %v7068_v56 }
0x4fbc   :  { %v3830_v11 = vpop.permute.xlu0 %3829 }
0x4fbd   :  { %v3832_v15 = vmul.f32 %v5472_v41, %v3830_v11 }
0x4fbf   :  { %3834 = vrot.lane.b32.xlu1 %v3832_v15, %s5540_s27 }
0x4fcd   :  { %v7075_v29 = vpop.permute.xlu0 %3846 }
0x4fce   :  { %vm3848_vm14 = vcmp.eq.s32.totalorder %v7075_v29, 1 }
0x5031   :  { %v3835_v19 = vpop.permute.xlu1 %3834 }
0x5032   :  { %v7071_v31 = vadd.f32 %v3835_v19, %v3827_v22 }
0x5034   :  { %5473 = vtanh.f32 %v7071_v31  ;;  %v7137_v15 = vsel %vm3848_vm14, %v7071_v31, %v7068_v56 }
0x503e   :  { %v5474_v52 = vpop.eup %5473 }
0x503f   :  { %3840 = vrot.lane.b32.xlu1 %v5474_v52, %s5539_s6 }
0x50b1   :  { %v3841_v49 = vpop.permute.xlu1 %3840 }
0x50b2   :  { %v3843_v63 = vmul.f32 %v5472_v41, %v3841_v49 }
0x50b4   :  { %v7081_v46 = vsel %vm3848_vm14, %v3843_v63, %v7014_v57 }
0x50b5   :  { %v3851_v25 = vpack.c.bf16 %v7081_v46, %v7081_v46 }
0x50b7   :  { %3853 = vrot.lane.b32.xlu0 %v3851_v25, %s5540_s27 }
0x5129   :  { %v3854_v5 = vpop.permute.xlu0 %3853 }
0x512a   :  { %5080 = vmatmul.mubr.msk.bf16.vlgmr.msra.gmra.mrb[96].mxu1 %vm117_vm0, %v3854_v5 }
0x512b   :  { %5084 = vmatpush3.bf16.msra.mxu1 %v6791_v58  ;;  %5087 = vmatprep.mubr.msk.bf16.mxu1 %vm5542_vm11, %v5541_v54 }
0x512c   :  { %5085 = vmatprep.subr.bf16.mxu1 %v5541_v54 }
0x512f   :  { %5086 = vmatpush3.bf16.msra.mxu1 %v6797_v45 }
0x5130   :  { %5091 = vmatprep.subr.bf16.mxu1 %v5541_v54 }
0x51fd   :  { %v3892_v57 = vpop.f32.mrb[96].mxu1 }
0x51fe   :  { %v3893_v47 = vadd.f32 %v6823_v53, %v3892_v57  ;;  %v5081_v35 = vpop.f32.mrb[97].mxu1 }
0x51ff   :  { %v3895_v20 = vpop.f32.mrb[98].mxu1 }
0x5200   :  { %v3898_v4 = vadd.f32 %v3893_v47, %v3811_v50  ;;  %v5082_v21 = vpop.f32.mrb[99].mxu1 }
0x5202   :  { %5475 = vtanh.f32 %v3898_v4  ;;  %v4717_v30 = vmul.f32 -1.442695, %v3898_v4 }
0x5204   :  { %5477 = vpow2.f32 %v4717_v30 }
0x520c   :  { %v5476_v24 = vpop.eup %5475 }
0x520d   :  { %3908 = vrot.lane.b32.xlu1 %v5476_v24, %s5539_s6 }
0x520e   :  { %v5478_v59 = vpop.eup %5477 }
0x520f   :  { %v3902_v32 = vadd.f32 1.0, %v5478_v59 }
0x5211   :  { %5479 = vrcp.f32 %v3902_v32 }
0x521b   :  { %v5480_v2 = vpop.eup %5479 }
0x521c   :  { %v3906_v28 = vmul.f32 %v5480_v2, %v7100_v27 }
0x527f   :  { %v3909_v36 = vpop.permute.xlu1 %3908 }
0x5280   :  { %v3911_v42 = vmul.f32 %v5480_v2, %v3909_v36 }
0x5282   :  { %3913 = vrot.lane.b32.xlu0 %v3911_v42, %s5540_s27 }
0x52f4   :  { %v3914_v16 = vpop.permute.xlu0 %3913 }
0x52f5   :  { %v7103_v12 = vadd.f32 %v3914_v16, %v3906_v28 }
0x52f7   :  { %5481 = vtanh.f32 %v7103_v12  ;;  %v7169_v28 = vsel %vm3848_vm14, %v7103_v12, %v7100_v27 }
0x5301   :  { %v5482_v13 = vpop.eup %5481 }
0x5302   :  { %3919 = vrot.lane.b32.xlu1 %v5482_v13, %s5539_s6 }
0x5374   :  { %v3920_v51 = vpop.permute.xlu1 %3919 }
0x5375   :  { %v7107_v34 = vmul.f32 %v5480_v2, %v3920_v51 }
0x5377   :  { %v7113_v10 = vsel %vm3848_vm14, %v7107_v34, %v7046_v17  ;;  %v7124_v17 = vld [vmem:[#allocation3 + $0x14] sm:$0xff]  }
0x5378   :  { %v3932_v6 = vpack.c.bf16 %v7113_v10, %v7081_v46  ;;  %v3984_v44 = vunpack.c.l.bf16 %v7124_v17 }
0x537a   :  { %3934 = vrot.lane.b32.xlu0 %v3932_v6, %s5540_s27 }
0x53ec   :  { %v3935_v3 = vpop.permute.xlu0 %3934 }
0x53ed   :  { %4718 = vmatmul.mubr.msk.bf16.vlgmr.msra.gmra.mrb[92].mxu0 %vm117_vm0, %v3935_v3 }
0x53ee   :  { %4106 = vmatpush1.bf16.msra.mxu0 %v6714_v37  ;;  %4137 = vmatprep.mubr.bf16.mxu0 %v5538_v1  ;;  %v4719_v37 = vld [vmem:[%s7376_s3 + $0x28] sm:$0xff] }
0x53ef   :  { %4107 = vmatprep.subr.bf16.mxu0 %v6741_v48  ;;  %vm3982_vm15 = vcmp.gt.f32.partialorder %v4719_v37, 0.5 }
0x53f2   :  { %4108 = vmatpush1.bf16.msra.mxu0 %v6746_v60 }
0x53f3   :  { %4271 = vmatprep.subr.bf16.mxu0 %v6705_v43  ;;  %v4010_v43 = vsel %vm3982_vm15, 1, %v5538_v1 }
0x54c0   :  { %v3973_v39 = vpop.f32.mrb[92].mxu0 }
0x54c1   :  { %v3985_v50 = vadd.f32 %v3984_v44, %v3973_v39  ;;  %v3975_v40 = vpop.f32.mrb[93].mxu0 }
0x54c2   :  { %v3976_v23 = vpop.f32.mrb[94].mxu0  ;;  %v5536_v40 = vld [vmem:[%s7373_s17 + $0x10] ss:$8 sps:$4 sm:$0xff]  }
0x54c3   :  { %5483 = vtanh.f32 %v3985_v50  ;;  %v3977_v62 = vpop.f32.mrb[95].mxu0  ;;  %v4720_v60 = vmul.f32 -1.442695, %v3985_v50  ;;  %v5534_v50 = vld [vmem:[%s7373_s17] ss:$8 sps:$4 sm:$0xff]   ;;  %v4150_v23 = vunpack.c.h.bf16 %v7124_v17 }
0x54c5   :  { %5485 = vpow2.f32 %v4720_v60 }
0x54cd   :  { %v5484_v48 = vpop.eup %5483 }
0x54ce   :  { %3995 = vrot.lane.b32.xlu1 %v5484_v48, %s5539_s6 }
0x54cf   :  { %v5486_v38 = vpop.eup %5485 }
0x54d0   :  { %v3989_v9 = vadd.f32 1.0, %v5486_v38  ;;  %v4724_v38 = vld [vmem:[%s7376_s3 + $0x30] sm:$0xff] }
0x54d1   :  { %vm4148_vm2 = vcmp.gt.f32.partialorder %v4724_v38, 0.5  ;;  %v4729_v38 = vld [vmem:[%s7376_s3 + $0x38] sm:$0xff] }
0x54d2   :  { %4012 = vperm.xlu1 %5130, %v4010_v43   ;;  %5487 = vrcp.f32 %v3989_v9 }
0x54dc   :  { %v5488_v0 = vpop.eup %5487 }
0x54dd   :  { %v3993_v22 = vmul.f32 %v5488_v0, %v7137_v15 }
0x5540   :  { %v3996_v41 = vpop.permute.xlu1 %3995 }
0x5541   :  { %v3998_v11 = vmul.f32 %v5488_v0, %v3996_v41 }
0x5543   :  { %4000 = vrot.lane.b32.xlu0 %v3998_v11, %s5540_s27 }
0x5551   :  { %v7144_v63 = vpop.permute.xlu1 %4012 }
0x5552   :  { %vm4014_vm1 = vcmp.eq.s32.totalorder %v7144_v63, 1 }
0x55b5   :  { %v4001_v19 = vpop.permute.xlu0 %4000 }
0x55b6   :  { %v7140_v52 = vadd.f32 %v4001_v19, %v3993_v22 }
0x55b8   :  { %5489 = vtanh.f32 %v7140_v52 }
0x55c2   :  { %v5490_v49 = vpop.eup %5489 }
0x55c3   :  { %4006 = vrot.lane.b32.xlu0 %v5490_v49, %s5539_s6 }
0x5635   :  { %v4007_v25 = vpop.permute.xlu0 %4006 }
0x5636   :  { %v4009_v5 = vmul.f32 %v5488_v0, %v4007_v25  ;;  %v4176_v0 = vsel %vm4148_vm2, 1, %v5538_v1  ;;  %v7209_v25 = vsel %vm4014_vm1, %v7140_v52, %v7137_v15 }
0x5638   :  { %v7150_v56 = vsel %vm4014_vm1, %v4009_v5, %v7081_v46 }
0x5639   :  { %v4017_v31 = vpack.c.bf16 %v7150_v56, %v7150_v56 }
0x563b   :  { %4019 = vrot.lane.b32.xlu1 %v4017_v31, %s5540_s27 }
0x56ad   :  { %v4020_v57 = vpop.permute.xlu1 %4019 }
0x56ae   :  { %5088 = vmatmul.mubr.msk.bf16.vlgmr.msra.gmra.mrb[100].mxu1 %vm117_vm0, %v4020_v57 }
0x56af   :  { %5092 = vmatpush3.bf16.msra.mxu1 %v6791_v58  ;;  %5095 = vmatprep.mubr.msk.bf16.mxu1 %vm5542_vm11, %v5541_v54 }
0x56b0   :  { %5093 = vmatprep.subr.bf16.mxu1 %v5541_v54 }
0x56b3   :  { %5094 = vmatpush3.bf16.msra.mxu1 %v6797_v45 }
0x56b4   :  { %5099 = vmatprep.subr.bf16.mxu1 %v5541_v54 }
0x5781   :  { %v4058_v46 = vpop.f32.mrb[100].mxu1 }
0x5782   :  { %v4059_v47 = vadd.f32 %v6823_v53, %v4058_v46  ;;  %v5089_v35 = vpop.f32.mrb[101].mxu1 }
0x5783   :  { %v4061_v20 = vpop.f32.mrb[102].mxu1 }
0x5784   :  { %v4064_v4 = vadd.f32 %v4059_v47, %v3977_v62  ;;  %v5090_v21 = vpop.f32.mrb[103].mxu1 }
0x5786   :  { %5491 = vtanh.f32 %v4064_v4  ;;  %v4722_v30 = vmul.f32 -1.442695, %v4064_v4 }
0x5788   :  { %5493 = vpow2.f32 %v4722_v30 }
0x5790   :  { %v5492_v24 = vpop.eup %5491 }
0x5791   :  { %4074 = vrot.lane.b32.xlu0 %v5492_v24, %s5539_s6 }
0x5792   :  { %v5494_v59 = vpop.eup %5493 }
0x5793   :  { %v4068_v32 = vadd.f32 1.0, %v5494_v59 }
0x5795   :  { %5495 = vrcp.f32 %v4068_v32 }
0x579f   :  { %v5496_v2 = vpop.eup %5495 }
0x57a0   :  { %v4072_v16 = vmul.f32 %v5496_v2, %v7169_v28 }
0x5803   :  { %v4075_v36 = vpop.permute.xlu0 %4074 }
0x5804   :  { %v4077_v42 = vmul.f32 %v5496_v2, %v4075_v36 }
0x5806   :  { %4079 = vrot.lane.b32.xlu1 %v4077_v42, %s5540_s27 }
0x5878   :  { %v4080_v13 = vpop.permute.xlu1 %4079 }
0x5879   :  { %v7172_v51 = vadd.f32 %v4080_v13, %v4072_v16 }
0x587b   :  { %5497 = vtanh.f32 %v7172_v51 }
0x5885   :  { %v5498_v6 = vpop.eup %5497 }
0x5886   :  { %4085 = vrot.lane.b32.xlu0 %v5498_v6, %s5539_s6 }
0x58f8   :  { %v4086_v3 = vpop.permute.xlu0 %4085 }
0x58f9   :  { %v7176_v44 = vmul.f32 %v5496_v2, %v4086_v3 }
0x58fb   :  { %v7182_v39 = vsel %vm4014_vm1, %v7176_v44, %v7113_v10  ;;  %v5535_v10 = vld [vmem:[%s7373_s17 + $0x14] ss:$8 sps:$4 sm:$0xff]  }
0x58fc   :  { %v4098_v27 = vpack.c.bf16 %v7182_v39, %v7150_v56 }
0x58fe   :  { %4100 = vrot.lane.b32.xlu1 %v4098_v27, %s5540_s27 }
0x5970   :  { %v4101_v12 = vpop.permute.xlu1 %4100 }
0x5971   :  { %4723 = vmatmul.mubr.msk.bf16.vlgmr.msra.gmra.mrb[96].mxu0 %vm117_vm0, %v4101_v12 }
0x5972   :  { %4272 = vmatpush1.bf16.msra.mxu0 %v5534_v50  ;;  %4303 = vmatprep.mubr.bf16.mxu0 %v5538_v1 }
0x5973   :  { %4273 = vmatprep.subr.bf16.mxu0 %v5535_v10 }
0x5976   :  { %4274 = vmatpush1.bf16.msra.mxu0 %v5536_v40  ;;  %v4315_v40 = vld [vmem:[#allocation3 + $0x1c] sm:$0xf] }
0x5a44   :  { %v4139_v62 = vpop.f32.mrb[96].mxu0 }
0x5a45   :  { %v4151_v37 = vadd.f32 %v4150_v23, %v4139_v62  ;;  %v4141_v48 = vpop.f32.mrb[97].mxu0  ;;  %v4316_v23 = vunpack.c.l.bf16 %v4315_v40  ;;  %v4091_v40 = vsel %vm4014_vm1, %v7176_v44, 0.0 }
0x5a46   :  { %v4142_v43 = vpop.f32.mrb[98].mxu0 }
0x5a47   :  { %5499 = vtanh.f32 %v4151_v37  ;;  %v4143_v60 = vpop.f32.mrb[99].mxu0  ;;  %v4725_v41 = vmul.f32 -1.442695, %v4151_v37 }
0x5a49   :  { %5501 = vpow2.f32 %v4725_v41 }
0x5a51   :  { %v5500_v9 = vpop.eup %5499 }
0x5a52   :  { %4161 = vrot.lane.b32.xlu0 %v5500_v9, %s5539_s6 }
0x5a53   :  { %v5502_v17 = vpop.eup %5501 }
0x5a54   :  { %v4155_v11 = vadd.f32 1.0, %v5502_v17 }
0x5a56   :  { %4178 = vperm.xlu0 %5129, %v4176_v0   ;;  %5503 = vrcp.f32 %v4155_v11 }
0x5a60   :  { %v5504_v22 = vpop.eup %5503 }
0x5a61   :  { %v4159_v5 = vmul.f32 %v5504_v22, %v7209_v25 }
0x5ac4   :  { %v4162_v19 = vpop.permute.xlu0 %4161 }
0x5ac5   :  { %v4164_v49 = vmul.f32 %v5504_v22, %v4162_v19 }
0x5ac7   :  { %4166 = vrot.lane.b32.xlu1 %v4164_v49, %s5540_s27 }
0x5ad5   :  { %v7216_v47 = vpop.permute.xlu0 %4178 }
0x5ad6   :  { %vm4180_vm3 = vcmp.eq.s32.totalorder %v7216_v47, 1  ;;  %v5162_v47 = vld [vmem:[%s7379_s18 + $0x8] sm:$0xff]  }
0x5b39   :  { %v4167_v31 = vpop.permute.xlu1 %4166 }
0x5b3a   :  { %v7212_v57 = vadd.f32 %v4167_v31, %v4159_v5 }
0x5b3c   :  { %5505 = vtanh.f32 %v7212_v57  ;;  %v4182_v49 = vsel %vm4180_vm3, %v7212_v57, %v7209_v25 }
0x5b46   :  { %v5506_v46 = vpop.eup %5505 }
0x5b47   :  { %4172 = vrot.lane.b32.xlu1 %v5506_v46, %s5539_s6 }
0x5bb9   :  { %v4173_v35 = vpop.permute.xlu1 %4172 }
0x5bba   :  { %v4175_v20 = vmul.f32 %v5504_v22, %v4173_v35 }
0x5bbc   :  { %v7222_v15 = vsel %vm4180_vm3, %v4175_v20, %v7150_v56 }
0x5bbd   :  { %v4183_v52 = vpack.c.bf16 %v7222_v15, %v7222_v15 }
0x5bbf   :  { %4185 = vrot.lane.b32.xlu0 %v4183_v52, %s5540_s27 }
0x5c31   :  { %v4186_v4 = vpop.permute.xlu0 %4185 }
0x5c32   :  { %5096 = vmatmul.mubr.msk.bf16.vlgmr.msra.gmra.mrb[104].mxu1 %vm117_vm0, %v4186_v4 }
0x5c33   :  { %5100 = vmatpush3.bf16.msra.mxu1 %v6791_v58  ;;  %5103 = vmatprep.mubr.msk.bf16.mxu1 %vm5542_vm11, %v5541_v54  ;;  %vm4314_vm11 = vcmp.gt.f32.partialorder %v4729_v38, 0.5 }
0x5c34   :  { %5101 = vmatprep.subr.bf16.mxu1 %v5541_v54  ;;  %v4342_v9 = vsel %vm4314_vm11, 1, %v5538_v1 }
0x5c37   :  { %5102 = vmatpush3.bf16.msra.mxu1 %v6797_v45  ;;  %v7240_v45 = vsel %vm4014_vm1, %v7172_v51, %v7169_v28 }
0x5d05   :  { %v4224_v21 = vpop.f32.mrb[104].mxu1 }
0x5d06   :  { %v4225_v56 = vadd.f32 %v6823_v53, %v4224_v21  ;;  %v5097_v24 = vpop.f32.mrb[105].mxu1 }
0x5d07   :  { %v4227_v30 = vpop.f32.mrb[106].mxu1 }
0x5d08   :  { %v4230_v59 = vadd.f32 %v4225_v56, %v4143_v60  ;;  %v5098_v32 = vpop.f32.mrb[107].mxu1  ;;  %v5537_v56 = vld [vmem:[%s7378_s16] ss:$0 sm:$0xff] }
0x5d0a   :  { %5507 = vtanh.f32 %v4230_v59  ;;  %v4727_v36 = vmul.f32 -1.442695, %v4230_v59 }
0x5d0c   :  { %5509 = vpow2.f32 %v4727_v36 }
0x5d14   :  { %v5508_v2 = vpop.eup %5507 }
0x5d15   :  { %4240 = vrot.lane.b32.xlu1 %v5508_v2, %s5539_s6 }
0x5d16   :  { %v5510_v58 = vpop.eup %5509 }
0x5d17   :  { %v4234_v42 = vadd.f32 1.0, %v5510_v58 }
0x5d19   :  { %5511 = vrcp.f32 %v4234_v42 }
0x5d23   :  { %v5512_v16 = vpop.eup %5511 }
0x5d24   :  { %v4238_v53 = vmul.f32 %v5512_v16, %v7240_v45 }
0x5d87   :  { %v4241_v54 = vpop.permute.xlu1 %4240 }
0x5d88   :  { %v4243_v13 = vmul.f32 %v5512_v16, %v4241_v54 }
0x5d8a   :  { %4245 = vrot.lane.b32.xlu0 %v4243_v13, %s5540_s27 }
0x5dfc   :  { %v4246_v6 = vpop.permute.xlu0 %4245 }
0x5dfd   :  { %v7243_v3 = vadd.f32 %v4246_v6, %v4238_v53  ;;  %v3262_v53 = vsel %vm3165_vm5, %v6838_v26, 0.0  ;;  %v3593_v6 = vsel %vm3516_vm9, %v6971_v14, 0.0 }
0x5dff   :  { %5513 = vtanh.f32 %v7243_v3  ;;  %v4256_v7 = vsel %vm4180_vm3, %v7243_v3, %v7240_v45  ;;  %v3427_v3 = vsel %vm3350_vm7, %v6904_v33, 0.0 }
0x5e09   :  { %v5514_v27 = vpop.eup %5513 }
0x5e0a   :  { %4251 = vrot.lane.b32.xlu1 %v5514_v27, %s5539_s6  ;;  %v3925_v27 = vsel %vm3848_vm14, %v7107_v34, 0.0  ;;  %v5161_v34 = vld [vmem:[%s7379_s18] sm:$0xff]  }
0x5e0b   :  { %5107 = vmatprep.subr.bf16.mxu0 %v5161_v34 }
0x5e7c   :  { %v4252_v12 = vpop.permute.xlu1 %4251 }
0x5e7d   :  { %v7247_v50 = vmul.f32 %v5512_v16, %v4252_v12 }
0x5e7f   :  { %v4255_v10 = vsel %vm4180_vm3, %v7247_v50, %v7182_v39  ;;  %v4257_v12 = vsel %vm4180_vm3, %v7247_v50, 0.0 }
0x5e80   :  { %v4264_v28 = vpack.c.bf16 %v4255_v10, %v7222_v15 }
0x5e82   :  { %4266 = vrot.lane.b32.xlu0 %v4264_v28, %s5540_s27 }
0x5ef4   :  { %v4267_v51 = vpop.permute.xlu0 %4266 }
0x5ef5   :  { %4728 = vmatmul.mubr.msk.bf16.vlgmr.msra.gmra.mrb[100].mxu0 %vm117_vm0, %v4267_v51  ;;  %v3759_v51 = vsel %vm3682_vm12, %v7040_v18, 0.0 }
0x5ef6   :  { %5108 = vmatpush3.bf16.msra.mxu0 %v5161_v34 }
0x5ef7   :  { %5109 = vmatprep.subr.bf16.mxu0 %v5162_v47 }
0x5efa   :  { %5110 = vmatpush3.bf16.msra.mxu0 %v5162_v47 }
0x5fc8   :  { %v4305_v62 = vpop.f32.mrb[100].mxu0 }
0x5fc9   :  { %v4317_v37 = vadd.f32 %v4316_v23, %v4305_v62  ;;  %v4307_v48 = vpop.f32.mrb[101].mxu0 }
0x5fca   :  { %v4308_v43 = vpop.f32.mrb[102].mxu0 }
0x5fcb   :  { %5515 = vtanh.f32 %v4317_v37  ;;  %v4309_v60 = vpop.f32.mrb[103].mxu0  ;;  %v4730_v0 = vmul.f32 -1.442695, %v4317_v37 }
0x5fcd   :  { %5517 = vpow2.f32 %v4730_v0 }
0x5fd5   :  { %v5516_v39 = vpop.eup %5515 }
0x5fd6   :  { %4327 = vrot.lane.b32.xlu1 %v5516_v39, %s5539_s6 }
0x5fd7   :  { %v5518_v41 = vpop.eup %5517 }
0x5fd8   :  { %v4321_v17 = vadd.f32 1.0, %v5518_v41 }
0x5fda   :  { %4344 = vperm.xlu1 %5130, %v4342_v9   ;;  %5519 = vrcp.f32 %v4321_v17 }
0x5fe4   :  { %v5520_v11 = vpop.eup %5519 }
0x5fe5   :  { %v4325_v5 = vmul.f32 %v5520_v11, %v4182_v49 }
0x6048   :  { %v4328_v22 = vpop.permute.xlu1 %4327 }
0x6049   :  { %v4330_v19 = vmul.f32 %v5520_v11, %v4328_v22  ;;  %v4733_v22 = vld [vmem:[%s7380_s19] ss:$0 sm:$0xff] }
0x604b   :  { %4332 = vrot.lane.b32.xlu0 %v4330_v19, %s5540_s27 }
0x6059   :  { %v7267_v35 = vpop.permute.xlu1 %4344 }
0x605a   :  { %vm4346_vm4 = vcmp.eq.s32.totalorder %v7267_v35, 1 }
0x60bd   :  { %v4333_v31 = vpop.permute.xlu0 %4332 }
0x60be   :  { %v4335_v46 = vadd.f32 %v4333_v31, %v4325_v5 }
0x60c0   :  { %5521 = vtanh.f32 %v4335_v46 }
0x60ca   :  { %v5522_v1 = vpop.eup %5521 }
0x60cb   :  { %4338 = vrot.lane.b32.xlu0 %v5522_v1, %s5539_s6 }
0x613d   :  { %v4339_v20 = vpop.permute.xlu0 %4338 }
0x613e   :  { %v4341_v52 = vmul.f32 %v5520_v11, %v4339_v20 }
0x6140   :  { %v4347_v4 = vsel %vm4346_vm4, %v4341_v52, %v7222_v15 }
0x6141   :  { %v4348_v21 = vpack.c.bf16 %v4347_v4, %v4347_v4 }
0x6143   :  { %4350 = vrot.lane.b32.xlu1 %v4348_v21, %s5540_s27 }
0x61b5   :  { %v4351_v25 = vpop.permute.xlu1 %4350 }
0x61b6   :  { %5104 = vmatmul.mubr.msk.bf16.vlgmr.msra.gmra.mrb[108].mxu1 %vm117_vm0, %v4351_v25 }
0x6289   :  { %v4389_v57 = vpop.f32.mrb[108].mxu1 }
0x628a   :  { %v4390_v24 = vadd.f32 %v5537_v56, %v4389_v57  ;;  %v5105_v30 = vpop.f32.mrb[109].mxu1 }
0x628b   :  { %v4392_v59 = vpop.f32.mrb[110].mxu1 }
0x628c   :  { %v4395_v32 = vadd.f32 %v4390_v24, %v4309_v60  ;;  %v5106_v2 = vpop.f32.mrb[111].mxu1 }
0x628e   :  { %5523 = vtanh.f32 %v4395_v32  ;;  %v4732_v15 = vmul.f32 -1.442695, %v4395_v32 }
0x6290   :  { %5525 = vpow2.f32 %v4732_v15 }
0x6298   :  { %v5524_v36 = vpop.eup %5523 }
0x6299   :  { %4405 = vrot.lane.b32.xlu0 %v5524_v36, %s5539_s6 }
0x629a   :  { %v5526_v58 = vpop.eup %5525 }
0x629b   :  { %v4399_v42 = vadd.f32 1.0, %v5526_v58 }
0x629d   :  { %5527 = vrcp.f32 %v4399_v42 }
0x62a7   :  { %v5528_v16 = vpop.eup %5527 }
0x62a8   :  { %v4403_v26 = vmul.f32 %v5528_v16, %v4256_v7 }
0x630b   :  { %v4406_v54 = vpop.permute.xlu0 %4405 }
0x630c   :  { %v4408_v13 = vmul.f32 %v5528_v16, %v4406_v54 }
0x630e   :  { %4410 = vrot.lane.b32.xlu1 %v4408_v13, %s5540_s27 }
0x6312   :  { %3264 = vrot.lane.b32.xlu1 %v3262_v53, %s5540_s27 }
0x6316   :  { %3595 = vrot.lane.b32.xlu1 %v3593_v6, %s5540_s27 }
0x631a   :  { %3927 = vrot.lane.b32.xlu1 %v3925_v27, %s5540_s27 }
0x631e   :  { %4259 = vrot.lane.b32.xlu1 %v4257_v12, %s5540_s27 }
0x6380   :  { %v4411_v61 = vpop.permute.xlu1 %4410 }
0x6381   :  { %v4413_v14 = vadd.f32 %v4411_v61, %v4403_v26 }
0x6383   :  { %5529 = vtanh.f32 %v4413_v14 }
0x6384   :  { %v3265_v10 = vpop.permute.xlu1 %3264 }
0x6385   :  { %3267 = vst.msk [vmem:[#allocation6] sm:$0xff] %vm117_vm0, %v3265_v10 }
0x6388   :  { %v3596_v29 = vpop.permute.xlu1 %3595 }
0x6389   :  { %3599 = vst.msk [vmem:[#allocation6 + $0x10] sm:$0xff] %vm117_vm0, %v3596_v29 }
0x638c   :  { %v3928_v50 = vpop.permute.xlu1 %3927  ;;  %v4427_v37 = vld [vmem:[#allocation6] sm:$0xff] }
0x638d   :  { %v5530_v28 = vpop.eup %5529  ;;  %3931 = vst.msk [vmem:[#allocation6 + $0x20] sm:$0xff] %vm117_vm0, %v3928_v50 }
0x638e   :  { %4416 = vrot.lane.b32.xlu0 %v5530_v28, %s5539_s6 }
0x6390   :  { %v4260_v45 = vpop.permute.xlu1 %4259  ;;  %v4429_v44 = vld [vmem:[#allocation6 + $0x10] sm:$0xff] }
0x6391   :  { %4263 = vst.msk [vmem:[#allocation6 + $0x30] sm:$0xff] %vm117_vm0, %v4260_v45 }
0x6392   :  { %3429 = vrot.lane.b32.xlu0 %v3427_v3, %s5540_s27 }
0x6394   :  { %v4431_v38 = vld [vmem:[#allocation6 + $0x20] sm:$0xff] }
0x6396   :  { %3761 = vrot.lane.b32.xlu0 %v3759_v51, %s5540_s27 }
0x6398   :  { %v4433_v41 = vld [vmem:[#allocation6 + $0x30] sm:$0xff] }
0x639a   :  { %4093 = vrot.lane.b32.xlu0 %v4091_v40, %s5540_s27 }
0x6400   :  { %v4417_v23 = vpop.permute.xlu0 %4416 }
0x6401   :  { %v4419_v8 = vmul.f32 %v5528_v16, %v4417_v23 }
0x6403   :  { %v4420_v33 = vsel %vm4346_vm4, %v4419_v8, 0.0 }
0x6404   :  { %4422 = vrot.lane.b32.xlu0 %v4420_v33, %s5540_s27  ;;  %v3430_v62 = vpop.permute.xlu0 %3429 }
0x6405   :  { %3433 = vst.msk [vmem:[#allocation6 + $0x8] sm:$0xff] %vm117_vm0, %v3430_v62 }
0x6408   :  { %v3762_v55 = vpop.permute.xlu0 %3761 }
0x6409   :  { %3765 = vst.msk [vmem:[#allocation6 + $0x18] sm:$0xff] %vm117_vm0, %v3762_v55 }
0x640c   :  { %v4094_v18 = vpop.permute.xlu0 %4093  ;;  %v4428_v48 = vld [vmem:[#allocation6 + $0x8] sm:$0xff] }
0x640d   :  { %4097 = vst.msk [vmem:[#allocation6 + $0x28] sm:$0xff] %vm117_vm0, %v4094_v18  ;;  %v4435_v63 = vpack.c.bf16 %v4428_v48, %v4427_v37 }
0x640f   :  { %5111 = vmatprep.mubr.msk.bf16.mxu0 %vm117_vm0, %v4435_v63 }
0x6410   :  { %v4430_v43 = vld [vmem:[#allocation6 + $0x18] sm:$0xff] }
0x6411   :  { %v4436_v60 = vpack.c.bf16 %v4430_v43, %v4429_v44 }
0x6413   :  { %5112 = vmatmul.mubr.msk.bf16.vlgmr.msra.gmra.mrb[104].mxu0 %vm117_vm0, %v4436_v60 }
0x6414   :  { %v4432_v39 = vld [vmem:[#allocation6 + $0x28] sm:$0xff] }
0x6415   :  { %v4437_v9 = vpack.c.bf16 %v4432_v39, %v4431_v38 }
0x6417   :  { %5115 = vmatprep.mubr.msk.bf16.mxu0 %vm117_vm0, %v4437_v9 }
0x6476   :  { %v4423_v0 = vpop.permute.xlu0 %4422 }
0x6477   :  { %4426 = vst.msk [vmem:[#allocation6 + $0x38] sm:$0xff] %vm117_vm0, %v4423_v0 }
0x647e   :  { %v4434_v17 = vld [vmem:[#allocation6 + $0x38] sm:$0xff] }
0x647f   :  { %v4438_v11 = vpack.c.bf16 %v4434_v17, %v4433_v41 }
0x6481   :  { %5116 = vmatmul.mubr.msk.bf16.gmra.mrb[108].mxu0 %vm117_vm0, %v4438_v11 }
0x64e6   :  { %v5113_v19 = vpop.f32.mrb[104].mxu0 }
0x64e7   :  { %v4517_v49 = vadd.f32 %v5113_v19, %v4733_v22  ;;  %v4508_v5 = vpop.f32.mrb[105].mxu0 }
0x64e8   :  { %v4509_v31 = vadd.f32 %v4733_v22, %v4508_v5  ;;  %v5114_v46 = vpop.f32.mrb[106].mxu0 }
0x64e9   :  { %4541 = vst [vmem:[%s7381_s20 + $0x10] sm:$0xff] %v4517_v49  ;;  %v4520_v1 = vadd.f32 %v5114_v46, %v4733_v22  ;;  %v4511_v35 = vpop.f32.mrb[107].mxu0 }
0x64ea   :  { %4539 = vst [vmem:[%s7381_s20] sm:$0xff] %v4509_v31  ;;  %v4512_v20 = vadd.f32 %v4733_v22, %v4511_v35 }
0x64eb   :  { %4542 = vst [vmem:[%s7381_s20 + $0x18] sm:$0xff] %v4520_v1 }
0x64ec   :  { %4540 = vst [vmem:[%s7381_s20 + $0x8] sm:$0xff] %v4512_v20 }
0x6554   :  { %v5117_v52 = vpop.f32.mrb[108].mxu0 }
0x6555   :  { %v4533_v4 = vadd.f32 %v5117_v52, %v4733_v22  ;;  %v4524_v21 = vpop.f32.mrb[109].mxu0 }
0x6556   :  { %v4525_v25 = vadd.f32 %v4733_v22, %v4524_v21  ;;  %v5118_v57 = vpop.f32.mrb[110].mxu0 }
0x6557   :  { %4545 = vst [vmem:[%s7381_s20 + $0x30] sm:$0xff] %v4533_v4  ;;  %v4536_v56 = vadd.f32 %v5118_v57, %v4733_v22  ;;  %v4527_v24 = vpop.f32.mrb[111].mxu0 }
0x6558   :  { %4543 = vst [vmem:[%s7381_s20 + $0x20] sm:$0xff] %v4525_v25  ;;  %v4528_v30 = vadd.f32 %v4733_v22, %v4527_v24 }
0x6559   :  { %4546 = vst [vmem:[%s7381_s20 + $0x38] sm:$0xff] %v4536_v56 }
0x655a   :  { %4544 = vst [vmem:[%s7381_s20 + $0x28] sm:$0xff] %v4528_v30 }

</bundles_post_ra>
